<compile_context>
chip_gen: v6e
topology: v6e:2x2x1
jax: 0.10.0
libtpu: 0.0.40
codegen_flags: <defaults>
</compile_context>

<pallas_src>
import functools
import math

import jax
import jax.numpy as jnp
from jax.experimental import pallas as pl
from jax.experimental.pallas import tpu as pltpu

_BN_EPS = 1e-5
_INV_SQRT2 = 1.0 / math.sqrt(2.0)


# ---------------------------------------------------------------------------
# Generation-dependent tiling / VMEM budget
# ---------------------------------------------------------------------------
@functools.lru_cache(maxsize=None)
def _hw_budget():
    """(max lanes per M tile, scoped-VMEM limit bytes), chosen per TPU generation."""
    try:
        vmem = int(pltpu.get_tpu_info().vmem_capacity_bytes)
    except Exception:
        vmem = 0
    if vmem >= 100 * 1024 * 1024:          # v5e / v6e: 128 MiB VMEM per core
        return 8192, 96 * 1024 * 1024
    return 4096, 48 * 1024 * 1024          # v7x (64 MiB per core) or unknown


def _cparams(semantics):
    return pltpu.CompilerParams(dimension_semantics=semantics,
                                vmem_limit_bytes=_hw_budget()[1])


def _col_spec(c, tm):
    """All channels (sublanes) x one M tile (lanes)."""
    return pl.BlockSpec((c, tm), lambda mi: (0, mi))


def _rep_spec(shape):
    """Full-array block, constant index map (kept VMEM-resident across tiles)."""
    return pl.BlockSpec(shape, lambda mi: (0,) * len(shape))


def _stat_spec(c):
    """One (1, c, 1) partial-statistics block per grid step."""
    return pl.BlockSpec((1, c, 1), lambda mi: (mi, 0, 0))


# ---------------------------------------------------------------------------
# In-kernel helpers
# ---------------------------------------------------------------------------
def _normalize(y, ssum, ssq, inv_m):
    mean = ssum * inv_m
    var = jnp.maximum(ssq * inv_m - mean * mean, 0.0)
    return (y - mean) * jax.lax.rsqrt(var + _BN_EPS)


def _mask_pad_cols(h, mi, m_real):
    col = mi * h.shape[1] + jax.lax.broadcasted_iota(jnp.int32, h.shape, 1)
    return jnp.where(col < m_real, h, 0.0)


def _partial_stats(y, ssum_ref, ssq_ref):
    # Per-tile partial sums (f32); cross-tile reduction is tiny XLA glue outside.
    ssum_ref[...] = jnp.sum(y, axis=1, keepdims=True)[None]
    ssq_ref[...] = jnp.sum(y * y, axis=1, keepdims=True)[None]


# ---------------------------------------------------------------------------
# Pallas kernels
# ---------------------------------------------------------------------------
def _conv_stats_kernel(w_ref, x_ref, y_ref, ssum_ref, ssq_ref):
    # Y(C_out, TM) = W(C_out, K) @ X(K, TM); bf16 operands, f32 accumulation.
    # Padded input columns are exactly zero, so they contribute zero to the stats.
    y = jnp.dot(w_ref[...], x_ref[...], preferred_element_type=jnp.float32)
    y_ref[...] = y.astype(y_ref.dtype)                 # bf16 intermediate to HBM
    _partial_stats(y, ssum_ref, ssq_ref)


def _bnrelu_conv_stats_kernel(w_ref, yp_ref, psum_ref, psq_ref,
                              y_ref, ssum_ref, ssq_ref, *, inv_m, m_real, last_tile):
    # BN+ReLU of the previous conv's raw output fused into this conv's prologue.
    mi = pl.program_id(0)
    h = _normalize(yp_ref[...].astype(jnp.float32), psum_ref[...], psq_ref[...], inv_m)
    h = jnp.maximum(h, 0.0)
    if last_tile is not None:
        # Only the last tile has padded lanes; zero them so they don't pollute
        # this conv's partial BN statistics.
        h = jnp.where(mi == last_tile, _mask_pad_cols(h, mi, m_real), h)
    y = jnp.dot(w_ref[...], h.astype(jnp.bfloat16), preferred_element_type=jnp.float32)
    y_ref[...] = y.astype(y_ref.dtype)
    _partial_stats(y, ssum_ref, ssq_ref)


def _bn_act_kernel(y_ref, ssum_ref, ssq_ref, o_ref, *, inv_m, m_real, act, last_tile):
    mi = pl.program_id(0)
    h = _normalize(y_ref[...].astype(jnp.float32), ssum_ref[...], ssq_ref[...], inv_m)
    if act == "relu":
        h = jnp.maximum(h, 0.0)
    elif act == "gelu":                     # exact (erf) GELU, nn.GELU() default
        h = 0.5 * h * (1.0 + jax.lax.erf(h * _INV_SQRT2))
    o_ref[...] = h.astype(o_ref.dtype)
    if last_tile is not None:               # mask padded lanes on the last tile only
        @pl.when(mi == last_tile)
        def _():
            o_ref[...] = _mask_pad_cols(h, mi, m_real).astype(o_ref.dtype)


def _bn_add_relu_kernel(y_ref, ssum_ref, ssq_ref, r_ref, o_ref,
                        *, inv_m, m_real, last_tile):
    # norm3 + residual add + ReLU (stride-1 bottleneck tail).
    mi = pl.program_id(0)
    h = _normalize(y_ref[...].astype(jnp.float32), ssum_ref[...], ssq_ref[...], inv_m)
    h = jnp.maximum(h + r_ref[...].astype(jnp.float32), 0.0)
    o_ref[...] = h.astype(o_ref.dtype)
    if last_tile is not None:
        @pl.when(mi == last_tile)
        def _():
            o_ref[...] = _mask_pad_cols(h, mi, m_real).astype(o_ref.dtype)


def _bn2_add_relu_kernel(ya_ref, asum_ref, asq_ref, yb_ref, bsum_ref, bsq_ref,
                         o_ref, *, inv_m, m_real, last_tile):
    # norm3(main) + norm4(downsample) + add + ReLU (strided bottleneck tail).
    mi = pl.program_id(0)
    ha = _normalize(ya_ref[...].astype(jnp.float32), asum_ref[...], asq_ref[...], inv_m)
    hb = _normalize(yb_ref[...].astype(jnp.float32), bsum_ref[...], bsq_ref[...], inv_m)
    h = jnp.maximum(ha + hb, 0.0)
    o_ref[...] = h.astype(o_ref.dtype)
    if last_tile is not None:
        @pl.when(mi == last_tile)
        def _():
            o_ref[...] = _mask_pad_cols(h, mi, m_real).astype(o_ref.dtype)


def _matmul_bias_kernel(w_ref, x_ref, b_ref, o_ref):
    # Final 1x1 conv: no norm, bias kept, f32 output.
    o_ref[...] = (jnp.dot(w_ref[...], x_ref[...], preferred_element_type=jnp.float32)
                  + b_ref[...])


# ---------------------------------------------------------------------------
# pallas_call wrappers
# ---------------------------------------------------------------------------
def _last_tile(m_pad, m_real, tm):
    return (m_real - 1) // tm if m_pad > m_real else None


def conv_stats(w, x_slab):
    """Fused conv matmul + per-tile BN-stat emission. x_slab: (K, M_pad) bf16."""
    c_out, k = w.shape
    _, m_pad = x_slab.shape
    tm = min(_hw_budget()[0], m_pad)
    nt = m_pad // tm
    y, ps, pq = pl.pallas_call(
        _conv_stats_kernel,
        grid=(nt,),
        in_specs=[_rep_spec((c_out, k)), _col_spec(k, tm)],
        out_specs=(_col_spec(c_out, tm), _stat_spec(c_out), _stat_spec(c_out)),
        out_shape=(jax.ShapeDtypeStruct((c_out, m_pad), jnp.bfloat16),
                   jax.ShapeDtypeStruct((nt, c_out, 1), jnp.float32),
                   jax.ShapeDtypeStruct((nt, c_out, 1), jnp.float32)),
        compiler_params=_cparams(("parallel",)),
    )(w, x_slab)
    return y, jnp.sum(ps, axis=0), jnp.sum(pq, axis=0)


def bnrelu_conv_stats(w, y_prev, psum, psq, m_real):
    """conv3: BN+ReLU of y_prev fused into the matmul prologue, + own partial stats."""
    c_out, c_in = w.shape
    _, m_pad = y_prev.shape
    tm = min(_hw_budget()[0], m_pad)
    nt = m_pad // tm
    kern = functools.partial(_bnrelu_conv_stats_kernel, inv_m=1.0 / m_real,
                             m_real=m_real, last_tile=_last_tile(m_pad, m_real, tm))
    y, ps, pq = pl.pallas_call(
        kern,
        grid=(nt,),
        in_specs=[_rep_spec((c_out, c_in)), _col_spec(c_in, tm),
                  _rep_spec((c_in, 1)), _rep_spec((c_in, 1))],
        out_specs=(_col_spec(c_out, tm), _stat_spec(c_out), _stat_spec(c_out)),
        out_shape=(jax.ShapeDtypeStruct((c_out, m_pad), jnp.bfloat16),
                   jax.ShapeDtypeStruct((nt, c_out, 1), jnp.float32),
                   jax.ShapeDtypeStruct((nt, c_out, 1), jnp.float32)),
        compiler_params=_cparams(("parallel",)),
    )(w, y_prev, psum, psq)
    return y, jnp.sum(ps, axis=0), jnp.sum(pq, axis=0)


def bn_act(y, ssum, ssq, m_real, act):
    c, m_pad = y.shape
    tm = min(_hw_budget()[0], m_pad)
    kern = functools.partial(_bn_act_kernel, inv_m=1.0 / m_real, m_real=m_real,
                             act=act, last_tile=_last_tile(m_pad, m_real, tm))
    return pl.pallas_call(
        kern,
        grid=(m_pad // tm,),
        in_specs=[_col_spec(c, tm), _rep_spec((c, 1)), _rep_spec((c, 1))],
        out_specs=_col_spec(c, tm),
        out_shape=jax.ShapeDtypeStruct((c, m_pad), jnp.bfloat16),
        compiler_params=_cparams(("parallel",)),
    )(y, ssum, ssq)


def bn_add_relu(y, ssum, ssq, residual, m_real):
    c, m_pad = y.shape
    tm = min(_hw_budget()[0], m_pad)
    kern = functools.partial(_bn_add_relu_kernel, inv_m=1.0 / m_real, m_real=m_real,
                             last_tile=_last_tile(m_pad, m_real, tm))
    return pl.pallas_call(
        kern,
        grid=(m_pad // tm,),
        in_specs=[_col_spec(c, tm), _rep_spec((c, 1)), _rep_spec((c, 1)),
                  _col_spec(c, tm)],
        out_specs=_col_spec(c, tm),
        out_shape=jax.ShapeDtypeStruct((c, m_pad), jnp.bfloat16),
        compiler_params=_cparams(("parallel",)),
    )(y, ssum, ssq, residual)


def bn2_add_relu(ya, asum, asq, yb, bsum, bsq, m_real):
    c, m_pad = ya.shape
    tm = min(_hw_budget()[0], m_pad)
    kern = functools.partial(_bn2_add_relu_kernel, inv_m=1.0 / m_real, m_real=m_real,
                             last_tile=_last_tile(m_pad, m_real, tm))
    return pl.pallas_call(
        kern,
        grid=(m_pad // tm,),
        in_specs=[_col_spec(c, tm), _rep_spec((c, 1)), _rep_spec((c, 1)),
                  _col_spec(c, tm), _rep_spec((c, 1)), _rep_spec((c, 1))],
        out_specs=_col_spec(c, tm),
        out_shape=jax.ShapeDtypeStruct((c, m_pad), jnp.bfloat16),
        compiler_params=_cparams(("parallel",)),
    )(ya, asum, asq, yb, bsum, bsq)


def matmul_bias(w, x_slab, b):
    c_out, k = w.shape
    _, m_pad = x_slab.shape
    tm = min(_hw_budget()[0], m_pad)
    return pl.pallas_call(
        _matmul_bias_kernel,
        grid=(m_pad // tm,),
        in_specs=[_rep_spec((c_out, k)), _col_spec(k, tm), _rep_spec((c_out, 1))],
        out_specs=_col_spec(c_out, tm),
        out_shape=jax.ShapeDtypeStruct((c_out, m_pad), jnp.float32),
        compiler_params=_cparams(("parallel",)),
    )(w, x_slab, b)


# ---------------------------------------------------------------------------
# XLA glue (layout plumbing only)
# ---------------------------------------------------------------------------
def _m_tiling(m_real):
    m128 = -(-m_real // 128) * 128
    tm = min(_hw_budget()[0], m128)
    return -(-m128 // tm) * tm              # M padded to a multiple of the tile


def _pad_cols(x2d, m_pad):
    m = x2d.shape[1]
    if m == m_pad:
        return x2d
    return jnp.pad(x2d, ((0, 0), (0, m_pad - m)))


def _im2col(x_cnhw, kh, kw, stride, pad):
    """Channel-major im2col: (C,N,H,W) -> (kh*kw*C, N*Ho*Wo), bf16 throughout."""
    # TODO(synk): the KxK convs (7x7 stem, 3x3 bottleneck) still build their patch
    # tensor with XLA glue; in-kernel tap accumulation (shifted-window DMA per tap)
    # would remove this 9x/49x expansion and is the remaining big HBM-traffic win.
    c, n, h, w = x_cnhw.shape
    xp = jnp.pad(x_cnhw, ((0, 0), (0, 0), (pad, pad), (pad, pad)))
    ho = (h + 2 * pad - kh) // stride + 1
    wo = (w + 2 * pad - kw) // stride + 1
    rows = []
    for i in range(kh):
        for j in range(kw):
            rows.append(xp[:, :, i:i + stride * ho:stride, j:j + stride * wo:stride])
    patches = jnp.concatenate(rows, axis=0).reshape(kh * kw * c, n * ho * wo)
    return patches, ho, wo


# ---------------------------------------------------------------------------
# Parameter init (deterministic, kaiming-normal fan_out like the module)
# ---------------------------------------------------------------------------
def make_conv(key, kh, kw, cin, cout, bias=False):
    k1, k2 = jax.random.split(key)
    fan_out = cout * kh * kw
    std = math.sqrt(2.0 / fan_out)
    w = std * jax.random.normal(k1, (kh, kw, cin, cout), jnp.float32)
    w = w.reshape(kh * kw * cin, cout).T          # (cout, K) lane-dense matmul layout
    p = {"w": w.astype(jnp.bfloat16)}
    if bias:                                      # only for convs NOT followed by BN
        bound = 1.0 / math.sqrt(cin * kh * kw)
        p["b"] = jax.random.uniform(k2, (cout, 1), jnp.float32, -bound, bound)
    return p


def init_params(key, output_dim=128):
    keys = iter(jax.random.split(key, 64))

    def make_block(cin, planes, stride):
        blk = {
            "conv1": make_conv(next(keys), 1, 1, cin, planes // 4),
            "conv2": make_conv(next(keys), 3, 3, planes // 4, planes // 4),
            "conv3": make_conv(next(keys), 1, 1, planes // 4, planes),
            "stride": stride,
        }
        if stride != 1:
            blk["down"] = make_conv(next(keys), 1, 1, cin, planes)
        return blk

    params = {"conv1": make_conv(next(keys), 7, 7, 3, 32)}
    params["layer1"] = [make_block(32, 32, 1), make_block(32, 32, 1)]
    params["layer2"] = [make_block(32, 64, 2), make_block(64, 64, 1)]
    params["layer3"] = [make_block(64, 96, 2), make_block(96, 96, 1)]
    params["conv2"] = make_conv(next(keys), 1, 1, 96, output_dim, bias=True)
    return params


# ---------------------------------------------------------------------------
# Forward pass
# ---------------------------------------------------------------------------
def bottleneck(cur, blk):
    stride = blk["stride"]
    n, h, w = cur["n"], cur["h"], cur["w"]
    m_in = n * h * w
    x_slab = cur["slab"]                                       # (C_in, m_pad_in) bf16

    # conv1 (1x1) + norm1 + ReLU
    y1, s1, q1 = conv_stats(blk["conv1"]["w"], x_slab)
    h1 = bn_act(y1, s1, q1, m_in, "relu")

    # conv2 (3x3, stride) + norm2 partial stats (im2col is XLA glue)
    c_mid = h1.shape[0]
    h1_sp = h1[:, :m_in].reshape(c_mid, n, h, w)
    p2, ho, wo = _im2col(h1_sp, 3, 3, stride, 1)
    m_out = n * ho * wo
    m_pad_out = _m_tiling(m_out)
    y2, s2, q2 = conv_stats(blk["conv2"]["w"], _pad_cols(p2, m_pad_out))

    # conv3 (1x1): norm2+ReLU fused into its prologue, norm3 stats fused into its pass
    y3, s3, q3 = bnrelu_conv_stats(blk["conv3"]["w"], y2, s2, q2, m_out)

    if stride == 1:
        out = bn_add_relu(y3, s3, q3, x_slab, m_out)           # norm3 + residual + ReLU
    else:
        # downsample: 1x1 stride-s conv (spatial subsample is cheap glue) + norm4
        c_in = x_slab.shape[0]
        x_sp = x_slab[:, :m_in].reshape(c_in, n, h, w)[:, :, ::stride, ::stride]
        xd = _pad_cols(x_sp.reshape(c_in, m_out), m_pad_out)
        y4, s4, q4 = conv_stats(blk["down"]["w"], xd)
        out = bn2_add_relu(y3, s3, q3, y4, s4, q4, m_out)      # norm3 + norm4 + add + ReLU

    return {"slab": out, "n": n, "h": ho, "w": wo}


def small_encoder(x_nchw, params):
    # TODO(synk): tuple/list input concat-then-split path is not implemented
    # (single-tensor path only).
    n = x_nchw.shape[0]
    x_cnhw = jnp.transpose(x_nchw, (1, 0, 2, 3)).astype(jnp.bfloat16)  # NCHW -> CNHW, bf16

    # stem: 7x7 stride-2 conv + norm1 (batch stats) + GELU
    p1, ho, wo = _im2col(x_cnhw, 7, 7, 2, 3)
    m = n * ho * wo
    p1 = _pad_cols(p1, _m_tiling(m))
    y, s, q = conv_stats(params["conv1"]["w"], p1)
    cur = {"slab": bn_act(y, s, q, m, "gelu"), "n": n, "h": ho, "w": wo}

    for blk in params["layer1"] + params["layer2"] + params["layer3"]:
        cur = bottleneck(cur, blk)

    # final 1x1 conv (bias kept, no norm/activation)
    m = cur["n"] * cur["h"] * cur["w"]
    out = matmul_bias(params["conv2"]["w"], cur["slab"], params["conv2"]["b"])
    out = out[:, :m].reshape(-1, cur["n"], cur["h"], cur["w"])
    return jnp.transpose(out, (1, 0, 2, 3))                    # (C,N,H,W) -> NCHW


if __name__ == "__main__":
    key = jax.random.PRNGKey(0)
    kx, kp = jax.random.split(key)
    x = jax.random.normal(kx, (2, 3, 16, 16), jnp.float32)
    params = init_params(kp, output_dim=128)

    fwd = jax.jit(lambda inp: small_encoder(inp, params))
    out = fwd(x)
    jax.block_until_ready(out)

    assert out.shape == (2, 128, 2, 2), out.shape
    assert bool(jnp.all(jnp.isfinite(out)))
    print("KERNEL_OK")
</pallas_src>

<mosaic_0001>
module attributes {stable_mosaic.version = 11 : i64} {
  func.func @_conv_stats_kernel(%arg0: i32, %arg1: memref<32x147xbf16, #tpu.memory_space<vmem>>, %arg2: memref<147x128xbf16, #tpu.memory_space<vmem>>, %arg3: memref<32x128xbf16, #tpu.memory_space<vmem>>, %arg4: memref<1x32x1xf32, #tpu.memory_space<vmem>>, %arg5: memref<1x32x1xf32, #tpu.memory_space<vmem>>) attributes {dimension_semantics = [#tpu.dimension_semantics<parallel>], iteration_bounds = array<i64: 1>, scalar_prefetch = 0 : i64, scratch_operands = 0 : i64, tpu.core_type = #tpu.core_type<tc>, window_params = [{pipeline_mode = #tpu.pipeline_mode<synchronous>, transform_indices = @transform_0, window_bounds = array<i64: 32, 147>}, {transform_indices = @transform_1, window_bounds = array<i64: 147, 128>}, {transform_indices = @transform_2, window_bounds = array<i64: 32, 128>}, {transform_indices = @transform_3, window_bounds = array<i64: 1, 32, 1>}, {transform_indices = @transform_4, window_bounds = array<i64: 1, 32, 1>}]} {
    %c0 = arith.constant 0 : index
    %c0_0 = arith.constant 0 : index
    %0 = vector.load %arg1[%c0, %c0_0] : memref<32x147xbf16, #tpu.memory_space<vmem>>, vector<32x147xbf16>
    %c0_1 = arith.constant 0 : index
    %c0_2 = arith.constant 0 : index
    %1 = vector.load %arg2[%c0_1, %c0_2] : memref<147x128xbf16, #tpu.memory_space<vmem>>, vector<147x128xbf16>
    %cst = arith.constant dense<0.000000e+00> : vector<32x128xf32>
    %2 = tpu.matmul %0, %1, %cst {dimension_numbers = #tpu.dot_dimension_numbers<[1], [0], [0], [1], [0, 0, 1, 1], [], []>} : vector<32x147xbf16>, vector<147x128xbf16>, vector<32x128xf32> -> vector<32x128xf32>
    %3 = arith.truncf %2 : vector<32x128xf32> to vector<32x128xbf16>
    %c0_3 = arith.constant 0 : index
    %c0_4 = arith.constant 0 : index
    %4 = vector.load %arg3[%c0_3, %c0_4] : memref<32x128xbf16, #tpu.memory_space<vmem>>, vector<32x128xbf16>
    tpu.vector_store %arg3[%c0_3, %c0_4], %3 {strides = array<i32>} : memref<32x128xbf16, #tpu.memory_space<vmem>>, vector<32x128xbf16>,
    %cst_5 = arith.constant dense<0.000000e+00> : vector<32xf32>
    %5 = vector.multi_reduction <add>, %2, %cst_5 [1] : vector<32x128xf32> to vector<32xf32>
    %6 = vector.shape_cast %5 : vector<32xf32> to vector<32x1xf32>
    %7 = vector.shape_cast %6 : vector<32x1xf32> to vector<1x32x1xf32>
    %c0_6 = arith.constant 0 : index
    %c0_7 = arith.constant 0 : index
    %c0_8 = arith.constant 0 : index
    %8 = vector.load %arg4[%c0_6, %c0_7, %c0_8] : memref<1x32x1xf32, #tpu.memory_space<vmem>>, vector<1x32x1xf32>
    tpu.vector_store %arg4[%c0_6, %c0_7, %c0_8], %7 {strides = array<i32>} : memref<1x32x1xf32, #tpu.memory_space<vmem>>, vector<1x32x1xf32>,
    %9 = arith.mulf %2, %2 : vector<32x128xf32>
    %cst_9 = arith.constant dense<0.000000e+00> : vector<32xf32>
    %10 = vector.multi_reduction <add>, %9, %cst_9 [1] : vector<32x128xf32> to vector<32xf32>
    %11 = vector.shape_cast %10 : vector<32xf32> to vector<32x1xf32>
    %12 = vector.shape_cast %11 : vector<32x1xf32> to vector<1x32x1xf32>
    %c0_10 = arith.constant 0 : index
    %c0_11 = arith.constant 0 : index
    %c0_12 = arith.constant 0 : index
    %13 = vector.load %arg5[%c0_10, %c0_11, %c0_12] : memref<1x32x1xf32, #tpu.memory_space<vmem>>, vector<1x32x1xf32>
    tpu.vector_store %arg5[%c0_10, %c0_11, %c0_12], %12 {strides = array<i32>} : memref<1x32x1xf32, #tpu.memory_space<vmem>>, vector<1x32x1xf32>,
    return
  }
  func.func @transform_0(%arg0: i32) -> (i32, i32) {
    %c0_i32 = arith.constant 0 : i32
    %c0_i32_0 = arith.constant 0 : i32
    %c0_i32_1 = arith.constant 0 : i32
    return %c0_i32, %c0_i32_0 : i32, i32
  }
  func.func @transform_1(%arg0: i32) -> (i32, i32) {
    %c0_i32 = arith.constant 0 : i32
    %c0_i32_0 = arith.constant 0 : i32
    return %c0_i32, %arg0 : i32, i32
  }
  func.func @transform_2(%arg0: i32) -> (i32, i32) {
    %c0_i32 = arith.constant 0 : i32
    %c0_i32_0 = arith.constant 0 : i32
    return %c0_i32, %arg0 : i32, i32
  }
  func.func @transform_3(%arg0: i32) -> (i32, i32, i32) {
    %c0_i32 = arith.constant 0 : i32
    %c0_i32_0 = arith.constant 0 : i32
    %c0_i32_1 = arith.constant 0 : i32
    return %arg0, %c0_i32, %c0_i32_0 : i32, i32, i32
  }
  func.func @transform_4(%arg0: i32) -> (i32, i32, i32) {
    %c0_i32 = arith.constant 0 : i32
    %c0_i32_0 = arith.constant 0 : i32
    %c0_i32_1 = arith.constant 0 : i32
    return %arg0, %c0_i32, %c0_i32_0 : i32, i32, i32
  }
}

module attributes {stable_mosaic.version = 11 : i64} {
  func.func @_bn_act_kernel(%arg0: i32, %arg1: memref<32x128xbf16, #tpu.memory_space<vmem>>, %arg2: memref<32x1xf32, #tpu.memory_space<vmem>>, %arg3: memref<32x1xf32, #tpu.memory_space<vmem>>, %arg4: memref<32x128xbf16, #tpu.memory_space<vmem>>) attributes {dimension_semantics = [#tpu.dimension_semantics<parallel>], iteration_bounds = array<i64: 1>, scalar_prefetch = 0 : i64, scratch_operands = 0 : i64, tpu.core_type = #tpu.core_type<tc>, window_params = [{transform_indices = @transform_0, window_bounds = array<i64: 32, 128>}, {pipeline_mode = #tpu.pipeline_mode<synchronous>, transform_indices = @transform_1, window_bounds = array<i64: 32, 1>}, {pipeline_mode = #tpu.pipeline_mode<synchronous>, transform_indices = @transform_2, window_bounds = array<i64: 32, 1>}, {transform_indices = @transform_3, window_bounds = array<i64: 32, 128>}]} {
    %c0 = arith.constant 0 : index
    %c0_0 = arith.constant 0 : index
    %0 = vector.load %arg1[%c0, %c0_0] : memref<32x128xbf16, #tpu.memory_space<vmem>>, vector<32x128xbf16>
    %1 = arith.extf %0 : vector<32x128xbf16> to vector<32x128xf32>
    %c0_1 = arith.constant 0 : index
    %c0_2 = arith.constant 0 : index
    %2 = vector.load %arg2[%c0_1, %c0_2] : memref<32x1xf32, #tpu.memory_space<vmem>>, vector<32x1xf32>
    %c0_3 = arith.constant 0 : index
    %c0_4 = arith.constant 0 : index
    %3 = vector.load %arg3[%c0_3, %c0_4] : memref<32x1xf32, #tpu.memory_space<vmem>>, vector<32x1xf32>
    %cst = arith.constant 7.812500e-03 : f32
    %4 = vector.broadcast %cst : f32 to vector<32x1xf32>
    %5 = arith.mulf %2, %4 : vector<32x1xf32>
    %cst_5 = arith.constant 7.812500e-03 : f32
    %6 = vector.broadcast %cst_5 : f32 to vector<32x1xf32>
    %7 = arith.mulf %3, %6 : vector<32x1xf32>
    %8 = arith.mulf %5, %5 : vector<32x1xf32>
    %9 = arith.subf %7, %8 : vector<32x1xf32>
    %cst_6 = arith.constant 0.000000e+00 : f32
    %10 = vector.broadcast %cst_6 : f32 to vector<32x1xf32>
    %11 = arith.maximumf %9, %10 : vector<32x1xf32>
    %12 = vector.broadcast %5 : vector<32x1xf32> to vector<32x128xf32>
    %13 = arith.subf %1, %12 : vector<32x128xf32>
    %cst_7 = arith.constant 9.99999974E-6 : f32
    %14 = vector.broadcast %cst_7 : f32 to vector<32x1xf32>
    %15 = arith.addf %11, %14 : vector<32x1xf32>
    %16 = math.rsqrt %15 : vector<32x1xf32>
    %17 = vector.broadcast %16 : vector<32x1xf32> to vector<32x128xf32>
    %18 = arith.mulf %13, %17 : vector<32x128xf32>
    %cst_8 = arith.constant 5.000000e-01 : f32
    %19 = vector.broadcast %cst_8 : f32 to vector<32x128xf32>
    %20 = arith.mulf %19, %18 : vector<32x128xf32>
    %cst_9 = arith.constant 0.707106769 : f32
    %21 = vector.broadcast %cst_9 : f32 to vector<32x128xf32>
    %22 = arith.mulf %18, %21 : vector<32x128xf32>
    %23 = math.erf %22 : vector<32x128xf32>
    %cst_10 = arith.constant 1.000000e+00 : f32
    %24 = vector.broadcast %cst_10 : f32 to vector<32x128xf32>
    %25 = arith.addf %24, %23 : vector<32x128xf32>
    %26 = arith.mulf %20, %25 : vector<32x128xf32>
    %27 = arith.truncf %26 : vector<32x128xf32> to vector<32x128xbf16>
    %c0_11 = arith.constant 0 : index
    %c0_12 = arith.constant 0 : index
    %28 = vector.load %arg4[%c0_11, %c0_12] : memref<32x128xbf16, #tpu.memory_space<vmem>>, vector<32x128xbf16>
    tpu.vector_store %arg4[%c0_11, %c0_12], %27 {strides = array<i32>} : memref<32x128xbf16, #tpu.memory_space<vmem>>, vector<32x128xbf16>,
    return
  }
  func.func @transform_0(%arg0: i32) -> (i32, i32) {
    %c0_i32 = arith.constant 0 : i32
    %c0_i32_0 = arith.constant 0 : i32
    return %c0_i32, %arg0 : i32, i32
  }
  func.func @transform_1(%arg0: i32) -> (i32, i32) {
    %c0_i32 = arith.constant 0 : i32
    %c0_i32_0 = arith.constant 0 : i32
    %c0_i32_1 = arith.constant 0 : i32
    return %c0_i32, %c0_i32_0 : i32, i32
  }
  func.func @transform_2(%arg0: i32) -> (i32, i32) {
    %c0_i32 = arith.constant 0 : i32
    %c0_i32_0 = arith.constant 0 : i32
    %c0_i32_1 = arith.constant 0 : i32
    return %c0_i32, %c0_i32_0 : i32, i32
  }
  func.func @transform_3(%arg0: i32) -> (i32, i32) {
    %c0_i32 = arith.constant 0 : i32
    %c0_i32_0 = arith.constant 0 : i32
    return %c0_i32, %arg0 : i32, i32
  }
}

module attributes {stable_mosaic.version = 11 : i64} {
  func.func @_conv_stats_kernel(%arg0: i32, %arg1: memref<8x32xbf16, #tpu.memory_space<vmem>>, %arg2: memref<32x128xbf16, #tpu.memory_space<vmem>>, %arg3: memref<8x128xbf16, #tpu.memory_space<vmem>>, %arg4: memref<1x8x1xf32, #tpu.memory_space<vmem>>, %arg5: memref<1x8x1xf32, #tpu.memory_space<vmem>>) attributes {dimension_semantics = [#tpu.dimension_semantics<parallel>], iteration_bounds = array<i64: 1>, scalar_prefetch = 0 : i64, scratch_operands = 0 : i64, tpu.core_type = #tpu.core_type<tc>, window_params = [{pipeline_mode = #tpu.pipeline_mode<synchronous>, transform_indices = @transform_0, window_bounds = array<i64: 8, 32>}, {transform_indices = @transform_1, window_bounds = array<i64: 32, 128>}, {transform_indices = @transform_2, window_bounds = array<i64: 8, 128>}, {transform_indices = @transform_3, window_bounds = array<i64: 1, 8, 1>}, {transform_indices = @transform_4, window_bounds = array<i64: 1, 8, 1>}]} {
    %c0 = arith.constant 0 : index
    %c0_0 = arith.constant 0 : index
    %0 = vector.load %arg1[%c0, %c0_0] : memref<8x32xbf16, #tpu.memory_space<vmem>>, vector<8x32xbf16>
    %c0_1 = arith.constant 0 : index
    %c0_2 = arith.constant 0 : index
    %1 = vector.load %arg2[%c0_1, %c0_2] : memref<32x128xbf16, #tpu.memory_space<vmem>>, vector<32x128xbf16>
    %cst = arith.constant dense<0.000000e+00> : vector<8x128xf32>
    %2 = tpu.matmul %0, %1, %cst {dimension_numbers = #tpu.dot_dimension_numbers<[1], [0], [0], [1], [0, 0, 1, 1], [], []>} : vector<8x32xbf16>, vector<32x128xbf16>, vector<8x128xf32> -> vector<8x128xf32>
    %3 = arith.truncf %2 : vector<8x128xf32> to vector<8x128xbf16>
    %c0_3 = arith.constant 0 : index
    %c0_4 = arith.constant 0 : index
    %4 = vector.load %arg3[%c0_3, %c0_4] : memref<8x128xbf16, #tpu.memory_space<vmem>>, vector<8x128xbf16>
    tpu.vector_store %arg3[%c0_3, %c0_4], %3 {strides = array<i32>} : memref<8x128xbf16, #tpu.memory_space<vmem>>, vector<8x128xbf16>,
    %cst_5 = arith.constant dense<0.000000e+00> : vector<8xf32>
    %5 = vector.multi_reduction <add>, %2, %cst_5 [1] : vector<8x128xf32> to vector<8xf32>
    %6 = vector.shape_cast %5 : vector<8xf32> to vector<8x1xf32>
    %7 = vector.shape_cast %6 : vector<8x1xf32> to vector<1x8x1xf32>
    %c0_6 = arith.constant 0 : index
    %c0_7 = arith.constant 0 : index
    %c0_8 = arith.constant 0 : index
    %8 = vector.load %arg4[%c0_6, %c0_7, %c0_8] : memref<1x8x1xf32, #tpu.memory_space<vmem>>, vector<1x8x1xf32>
    tpu.vector_store %arg4[%c0_6, %c0_7, %c0_8], %7 {strides = array<i32>} : memref<1x8x1xf32, #tpu.memory_space<vmem>>, vector<1x8x1xf32>,
    %9 = arith.mulf %2, %2 : vector<8x128xf32>
    %cst_9 = arith.constant dense<0.000000e+00> : vector<8xf32>
    %10 = vector.multi_reduction <add>, %9, %cst_9 [1] : vector<8x128xf32> to vector<8xf32>
    %11 = vector.shape_cast %10 : vector<8xf32> to vector<8x1xf32>
    %12 = vector.shape_cast %11 : vector<8x1xf32> to vector<1x8x1xf32>
    %c0_10 = arith.constant 0 : index
    %c0_11 = arith.constant 0 : index
    %c0_12 = arith.constant 0 : index
    %13 = vector.load %arg5[%c0_10, %c0_11, %c0_12] : memref<1x8x1xf32, #tpu.memory_space<vmem>>, vector<1x8x1xf32>
    tpu.vector_store %arg5[%c0_10, %c0_11, %c0_12], %12 {strides = array<i32>} : memref<1x8x1xf32, #tpu.memory_space<vmem>>, vector<1x8x1xf32>,
    return
  }
  func.func @transform_0(%arg0: i32) -> (i32, i32) {
    %c0_i32 = arith.constant 0 : i32
    %c0_i32_0 = arith.constant 0 : i32
    %c0_i32_1 = arith.constant 0 : i32
    return %c0_i32, %c0_i32_0 : i32, i32
  }
  func.func @transform_1(%arg0: i32) -> (i32, i32) {
    %c0_i32 = arith.constant 0 : i32
    %c0_i32_0 = arith.constant 0 : i32
    return %c0_i32, %arg0 : i32, i32
  }
  func.func @transform_2(%arg0: i32) -> (i32, i32) {
    %c0_i32 = arith.constant 0 : i32
    %c0_i32_0 = arith.constant 0 : i32
    return %c0_i32, %arg0 : i32, i32
  }
  func.func @transform_3(%arg0: i32) -> (i32, i32, i32) {
    %c0_i32 = arith.constant 0 : i32
    %c0_i32_0 = arith.constant 0 : i32
    %c0_i32_1 = arith.constant 0 : i32
    return %arg0, %c0_i32, %c0_i32_0 : i32, i32, i32
  }
  func.func @transform_4(%arg0: i32) -> (i32, i32, i32) {
    %c0_i32 = arith.constant 0 : i32
    %c0_i32_0 = arith.constant 0 : i32
    %c0_i32_1 = arith.constant 0 : i32
    return %arg0, %c0_i32, %c0_i32_0 : i32, i32, i32
  }
}

module attributes {stable_mosaic.version = 11 : i64} {
  func.func @_bn_act_kernel(%arg0: i32, %arg1: memref<8x128xbf16, #tpu.memory_space<vmem>>, %arg2: memref<8x1xf32, #tpu.memory_space<vmem>>, %arg3: memref<8x1xf32, #tpu.memory_space<vmem>>, %arg4: memref<8x128xbf16, #tpu.memory_space<vmem>>) attributes {dimension_semantics = [#tpu.dimension_semantics<parallel>], iteration_bounds = array<i64: 1>, scalar_prefetch = 0 : i64, scratch_operands = 0 : i64, tpu.core_type = #tpu.core_type<tc>, window_params = [{transform_indices = @transform_0, window_bounds = array<i64: 8, 128>}, {pipeline_mode = #tpu.pipeline_mode<synchronous>, transform_indices = @transform_1, window_bounds = array<i64: 8, 1>}, {pipeline_mode = #tpu.pipeline_mode<synchronous>, transform_indices = @transform_2, window_bounds = array<i64: 8, 1>}, {transform_indices = @transform_3, window_bounds = array<i64: 8, 128>}]} {
    %c0 = arith.constant 0 : index
    %c0_0 = arith.constant 0 : index
    %0 = vector.load %arg1[%c0, %c0_0] : memref<8x128xbf16, #tpu.memory_space<vmem>>, vector<8x128xbf16>
    %1 = arith.extf %0 : vector<8x128xbf16> to vector<8x128xf32>
    %c0_1 = arith.constant 0 : index
    %c0_2 = arith.constant 0 : index
    %2 = vector.load %arg2[%c0_1, %c0_2] : memref<8x1xf32, #tpu.memory_space<vmem>>, vector<8x1xf32>
    %c0_3 = arith.constant 0 : index
    %c0_4 = arith.constant 0 : index
    %3 = vector.load %arg3[%c0_3, %c0_4] : memref<8x1xf32, #tpu.memory_space<vmem>>, vector<8x1xf32>
    %cst = arith.constant 7.812500e-03 : f32
    %4 = vector.broadcast %cst : f32 to vector<8x1xf32>
    %5 = arith.mulf %2, %4 : vector<8x1xf32>
    %cst_5 = arith.constant 7.812500e-03 : f32
    %6 = vector.broadcast %cst_5 : f32 to vector<8x1xf32>
    %7 = arith.mulf %3, %6 : vector<8x1xf32>
    %8 = arith.mulf %5, %5 : vector<8x1xf32>
    %9 = arith.subf %7, %8 : vector<8x1xf32>
    %cst_6 = arith.constant 0.000000e+00 : f32
    %10 = vector.broadcast %cst_6 : f32 to vector<8x1xf32>
    %11 = arith.maximumf %9, %10 : vector<8x1xf32>
    %12 = vector.broadcast %5 : vector<8x1xf32> to vector<8x128xf32>
    %13 = arith.subf %1, %12 : vector<8x128xf32>
    %cst_7 = arith.constant 9.99999974E-6 : f32
    %14 = vector.broadcast %cst_7 : f32 to vector<8x1xf32>
    %15 = arith.addf %11, %14 : vector<8x1xf32>
    %16 = math.rsqrt %15 : vector<8x1xf32>
    %17 = vector.broadcast %16 : vector<8x1xf32> to vector<8x128xf32>
    %18 = arith.mulf %13, %17 : vector<8x128xf32>
    %cst_8 = arith.constant 0.000000e+00 : f32
    %19 = vector.broadcast %cst_8 : f32 to vector<8x128xf32>
    %20 = arith.maximumf %18, %19 : vector<8x128xf32>
    %21 = arith.truncf %20 : vector<8x128xf32> to vector<8x128xbf16>
    %c0_9 = arith.constant 0 : index
    %c0_10 = arith.constant 0 : index
    %22 = vector.load %arg4[%c0_9, %c0_10] : memref<8x128xbf16, #tpu.memory_space<vmem>>, vector<8x128xbf16>
    tpu.vector_store %arg4[%c0_9, %c0_10], %21 {strides = array<i32>} : memref<8x128xbf16, #tpu.memory_space<vmem>>, vector<8x128xbf16>,
    return
  }
  func.func @transform_0(%arg0: i32) -> (i32, i32) {
    %c0_i32 = arith.constant 0 : i32
    %c0_i32_0 = arith.constant 0 : i32
    return %c0_i32, %arg0 : i32, i32
  }
  func.func @transform_1(%arg0: i32) -> (i32, i32) {
    %c0_i32 = arith.constant 0 : i32
    %c0_i32_0 = arith.constant 0 : i32
    %c0_i32_1 = arith.constant 0 : i32
    return %c0_i32, %c0_i32_0 : i32, i32
  }
  func.func @transform_2(%arg0: i32) -> (i32, i32) {
    %c0_i32 = arith.constant 0 : i32
    %c0_i32_0 = arith.constant 0 : i32
    %c0_i32_1 = arith.constant 0 : i32
    return %c0_i32, %c0_i32_0 : i32, i32
  }
  func.func @transform_3(%arg0: i32) -> (i32, i32) {
    %c0_i32 = arith.constant 0 : i32
    %c0_i32_0 = arith.constant 0 : i32
    return %c0_i32, %arg0 : i32, i32
  }
}

module attributes {stable_mosaic.version = 11 : i64} {
  func.func @_bn_add_relu_kernel(%arg0: i32, %arg1: memref<32x128xbf16, #tpu.memory_space<vmem>>, %arg2: memref<32x1xf32, #tpu.memory_space<vmem>>, %arg3: memref<32x1xf32, #tpu.memory_space<vmem>>, %arg4: memref<32x128xbf16, #tpu.memory_space<vmem>>, %arg5: memref<32x128xbf16, #tpu.memory_space<vmem>>) attributes {dimension_semantics = [#tpu.dimension_semantics<parallel>], iteration_bounds = array<i64: 1>, scalar_prefetch = 0 : i64, scratch_operands = 0 : i64, tpu.core_type = #tpu.core_type<tc>, window_params = [{transform_indices = @transform_0, window_bounds = array<i64: 32, 128>}, {pipeline_mode = #tpu.pipeline_mode<synchronous>, transform_indices = @transform_1, window_bounds = array<i64: 32, 1>}, {pipeline_mode = #tpu.pipeline_mode<synchronous>, transform_indices = @transform_2, window_bounds = array<i64: 32, 1>}, {transform_indices = @transform_3, window_bounds = array<i64: 32, 128>}, {transform_indices = @transform_4, window_bounds = array<i64: 32, 128>}]} {
    %c0 = arith.constant 0 : index
    %c0_0 = arith.constant 0 : index
    %0 = vector.load %arg1[%c0, %c0_0] : memref<32x128xbf16, #tpu.memory_space<vmem>>, vector<32x128xbf16>
    %1 = arith.extf %0 : vector<32x128xbf16> to vector<32x128xf32>
    %c0_1 = arith.constant 0 : index
    %c0_2 = arith.constant 0 : index
    %2 = vector.load %arg2[%c0_1, %c0_2] : memref<32x1xf32, #tpu.memory_space<vmem>>, vector<32x1xf32>
    %c0_3 = arith.constant 0 : index
    %c0_4 = arith.constant 0 : index
    %3 = vector.load %arg3[%c0_3, %c0_4] : memref<32x1xf32, #tpu.memory_space<vmem>>, vector<32x1xf32>
    %cst = arith.constant 7.812500e-03 : f32
    %4 = vector.broadcast %cst : f32 to vector<32x1xf32>
    %5 = arith.mulf %2, %4 : vector<32x1xf32>
    %cst_5 = arith.constant 7.812500e-03 : f32
    %6 = vector.broadcast %cst_5 : f32 to vector<32x1xf32>
    %7 = arith.mulf %3, %6 : vector<32x1xf32>
    %8 = arith.mulf %5, %5 : vector<32x1xf32>
    %9 = arith.subf %7, %8 : vector<32x1xf32>
    %cst_6 = arith.constant 0.000000e+00 : f32
    %10 = vector.broadcast %cst_6 : f32 to vector<32x1xf32>
    %11 = arith.maximumf %9, %10 : vector<32x1xf32>
    %12 = vector.broadcast %5 : vector<32x1xf32> to vector<32x128xf32>
    %13 = arith.subf %1, %12 : vector<32x128xf32>
    %cst_7 = arith.constant 9.99999974E-6 : f32
    %14 = vector.broadcast %cst_7 : f32 to vector<32x1xf32>
    %15 = arith.addf %11, %14 : vector<32x1xf32>
    %16 = math.rsqrt %15 : vector<32x1xf32>
    %17 = vector.broadcast %16 : vector<32x1xf32> to vector<32x128xf32>
    %18 = arith.mulf %13, %17 : vector<32x128xf32>
    %c0_8 = arith.constant 0 : index
    %c0_9 = arith.constant 0 : index
    %19 = vector.load %arg4[%c0_8, %c0_9] : memref<32x128xbf16, #tpu.memory_space<vmem>>, vector<32x128xbf16>
    %20 = arith.extf %19 : vector<32x128xbf16> to vector<32x128xf32>
    %21 = arith.addf %18, %20 : vector<32x128xf32>
    %cst_10 = arith.constant 0.000000e+00 : f32
    %22 = vector.broadcast %cst_10 : f32 to vector<32x128xf32>
    %23 = arith.maximumf %21, %22 : vector<32x128xf32>
    %24 = arith.truncf %23 : vector<32x128xf32> to vector<32x128xbf16>
    %c0_11 = arith.constant 0 : index
    %c0_12 = arith.constant 0 : index
    %25 = vector.load %arg5[%c0_11, %c0_12] : memref<32x128xbf16, #tpu.memory_space<vmem>>, vector<32x128xbf16>
    tpu.vector_store %arg5[%c0_11, %c0_12], %24 {strides = array<i32>} : memref<32x128xbf16, #tpu.memory_space<vmem>>, vector<32x128xbf16>,
    return
  }
  func.func @transform_0(%arg0: i32) -> (i32, i32) {
    %c0_i32 = arith.constant 0 : i32
    %c0_i32_0 = arith.constant 0 : i32
    return %c0_i32, %arg0 : i32, i32
  }
  func.func @transform_1(%arg0: i32) -> (i32, i32) {
    %c0_i32 = arith.constant 0 : i32
    %c0_i32_0 = arith.constant 0 : i32
    %c0_i32_1 = arith.constant 0 : i32
    return %c0_i32, %c0_i32_0 : i32, i32
  }
  func.func @transform_2(%arg0: i32) -> (i32, i32) {
    %c0_i32 = arith.constant 0 : i32
    %c0_i32_0 = arith.constant 0 : i32
    %c0_i32_1 = arith.constant 0 : i32
    return %c0_i32, %c0_i32_0 : i32, i32
  }
  func.func @transform_3(%arg0: i32) -> (i32, i32) {
    %c0_i32 = arith.constant 0 : i32
    %c0_i32_0 = arith.constant 0 : i32
    return %c0_i32, %arg0 : i32, i32
  }
  func.func @transform_4(%arg0: i32) -> (i32, i32) {
    %c0_i32 = arith.constant 0 : i32
    %c0_i32_0 = arith.constant 0 : i32
    return %c0_i32, %arg0 : i32, i32
  }
}

module attributes {stable_mosaic.version = 11 : i64} {
  func.func @_conv_stats_kernel(%arg0: i32, %arg1: memref<8x72xbf16, #tpu.memory_space<vmem>>, %arg2: memref<72x128xbf16, #tpu.memory_space<vmem>>, %arg3: memref<8x128xbf16, #tpu.memory_space<vmem>>, %arg4: memref<1x8x1xf32, #tpu.memory_space<vmem>>, %arg5: memref<1x8x1xf32, #tpu.memory_space<vmem>>) attributes {dimension_semantics = [#tpu.dimension_semantics<parallel>], iteration_bounds = array<i64: 1>, scalar_prefetch = 0 : i64, scratch_operands = 0 : i64, tpu.core_type = #tpu.core_type<tc>, window_params = [{pipeline_mode = #tpu.pipeline_mode<synchronous>, transform_indices = @transform_0, window_bounds = array<i64: 8, 72>}, {transform_indices = @transform_1, window_bounds = array<i64: 72, 128>}, {transform_indices = @transform_2, window_bounds = array<i64: 8, 128>}, {transform_indices = @transform_3, window_bounds = array<i64: 1, 8, 1>}, {transform_indices = @transform_4, window_bounds = array<i64: 1, 8, 1>}]} {
    %c0 = arith.constant 0 : index
    %c0_0 = arith.constant 0 : index
    %0 = vector.load %arg1[%c0, %c0_0] : memref<8x72xbf16, #tpu.memory_space<vmem>>, vector<8x72xbf16>
    %c0_1 = arith.constant 0 : index
    %c0_2 = arith.constant 0 : index
    %1 = vector.load %arg2[%c0_1, %c0_2] : memref<72x128xbf16, #tpu.memory_space<vmem>>, vector<72x128xbf16>
    %cst = arith.constant dense<0.000000e+00> : vector<8x128xf32>
    %2 = tpu.matmul %0, %1, %cst {dimension_numbers = #tpu.dot_dimension_numbers<[1], [0], [0], [1], [0, 0, 1, 1], [], []>} : vector<8x72xbf16>, vector<72x128xbf16>, vector<8x128xf32> -> vector<8x128xf32>
    %3 = arith.truncf %2 : vector<8x128xf32> to vector<8x128xbf16>
    %c0_3 = arith.constant 0 : index
    %c0_4 = arith.constant 0 : index
    %4 = vector.load %arg3[%c0_3, %c0_4] : memref<8x128xbf16, #tpu.memory_space<vmem>>, vector<8x128xbf16>
    tpu.vector_store %arg3[%c0_3, %c0_4], %3 {strides = array<i32>} : memref<8x128xbf16, #tpu.memory_space<vmem>>, vector<8x128xbf16>,
    %cst_5 = arith.constant dense<0.000000e+00> : vector<8xf32>
    %5 = vector.multi_reduction <add>, %2, %cst_5 [1] : vector<8x128xf32> to vector<8xf32>
    %6 = vector.shape_cast %5 : vector<8xf32> to vector<8x1xf32>
    %7 = vector.shape_cast %6 : vector<8x1xf32> to vector<1x8x1xf32>
    %c0_6 = arith.constant 0 : index
    %c0_7 = arith.constant 0 : index
    %c0_8 = arith.constant 0 : index
    %8 = vector.load %arg4[%c0_6, %c0_7, %c0_8] : memref<1x8x1xf32, #tpu.memory_space<vmem>>, vector<1x8x1xf32>
    tpu.vector_store %arg4[%c0_6, %c0_7, %c0_8], %7 {strides = array<i32>} : memref<1x8x1xf32, #tpu.memory_space<vmem>>, vector<1x8x1xf32>,
    %9 = arith.mulf %2, %2 : vector<8x128xf32>
    %cst_9 = arith.constant dense<0.000000e+00> : vector<8xf32>
    %10 = vector.multi_reduction <add>, %9, %cst_9 [1] : vector<8x128xf32> to vector<8xf32>
    %11 = vector.shape_cast %10 : vector<8xf32> to vector<8x1xf32>
    %12 = vector.shape_cast %11 : vector<8x1xf32> to vector<1x8x1xf32>
    %c0_10 = arith.constant 0 : index
    %c0_11 = arith.constant 0 : index
    %c0_12 = arith.constant 0 : index
    %13 = vector.load %arg5[%c0_10, %c0_11, %c0_12] : memref<1x8x1xf32, #tpu.memory_space<vmem>>, vector<1x8x1xf32>
    tpu.vector_store %arg5[%c0_10, %c0_11, %c0_12], %12 {strides = array<i32>} : memref<1x8x1xf32, #tpu.memory_space<vmem>>, vector<1x8x1xf32>,
    return
  }
  func.func @transform_0(%arg0: i32) -> (i32, i32) {
    %c0_i32 = arith.constant 0 : i32
    %c0_i32_0 = arith.constant 0 : i32
    %c0_i32_1 = arith.constant 0 : i32
    return %c0_i32, %c0_i32_0 : i32, i32
  }
  func.func @transform_1(%arg0: i32) -> (i32, i32) {
    %c0_i32 = arith.constant 0 : i32
    %c0_i32_0 = arith.constant 0 : i32
    return %c0_i32, %arg0 : i32, i32
  }
  func.func @transform_2(%arg0: i32) -> (i32, i32) {
    %c0_i32 = arith.constant 0 : i32
    %c0_i32_0 = arith.constant 0 : i32
    return %c0_i32, %arg0 : i32, i32
  }
  func.func @transform_3(%arg0: i32) -> (i32, i32, i32) {
    %c0_i32 = arith.constant 0 : i32
    %c0_i32_0 = arith.constant 0 : i32
    %c0_i32_1 = arith.constant 0 : i32
    return %arg0, %c0_i32, %c0_i32_0 : i32, i32, i32
  }
  func.func @transform_4(%arg0: i32) -> (i32, i32, i32) {
    %c0_i32 = arith.constant 0 : i32
    %c0_i32_0 = arith.constant 0 : i32
    %c0_i32_1 = arith.constant 0 : i32
    return %arg0, %c0_i32, %c0_i32_0 : i32, i32, i32
  }
}

module attributes {stable_mosaic.version = 11 : i64} {
  func.func @_bnrelu_conv_stats_kernel(%arg0: i32, %arg1: memref<32x8xbf16, #tpu.memory_space<vmem>>, %arg2: memref<8x128xbf16, #tpu.memory_space<vmem>>, %arg3: memref<8x1xf32, #tpu.memory_space<vmem>>, %arg4: memref<8x1xf32, #tpu.memory_space<vmem>>, %arg5: memref<32x128xbf16, #tpu.memory_space<vmem>>, %arg6: memref<1x32x1xf32, #tpu.memory_space<vmem>>, %arg7: memref<1x32x1xf32, #tpu.memory_space<vmem>>) attributes {dimension_semantics = [#tpu.dimension_semantics<parallel>], iteration_bounds = array<i64: 1>, scalar_prefetch = 0 : i64, scratch_operands = 0 : i64, tpu.core_type = #tpu.core_type<tc>, window_params = [{pipeline_mode = #tpu.pipeline_mode<synchronous>, transform_indices = @transform_0, window_bounds = array<i64: 32, 8>}, {transform_indices = @transform_1, window_bounds = array<i64: 8, 128>}, {pipeline_mode = #tpu.pipeline_mode<synchronous>, transform_indices = @transform_2, window_bounds = array<i64: 8, 1>}, {pipeline_mode = #tpu.pipeline_mode<synchronous>, transform_indices = @transform_3, window_bounds = array<i64: 8, 1>}, {transform_indices = @transform_4, window_bounds = array<i64: 32, 128>}, {transform_indices = @transform_5, window_bounds = array<i64: 1, 32, 1>}, {transform_indices = @transform_6, window_bounds = array<i64: 1, 32, 1>}]} {
    %c0 = arith.constant 0 : index
    %c0_0 = arith.constant 0 : index
    %0 = vector.load %arg2[%c0, %c0_0] : memref<8x128xbf16, #tpu.memory_space<vmem>>, vector<8x128xbf16>
    %1 = arith.extf %0 : vector<8x128xbf16> to vector<8x128xf32>
    %c0_1 = arith.constant 0 : index
    %c0_2 = arith.constant 0 : index
    %2 = vector.load %arg3[%c0_1, %c0_2] : memref<8x1xf32, #tpu.memory_space<vmem>>, vector<8x1xf32>
    %c0_3 = arith.constant 0 : index
    %c0_4 = arith.constant 0 : index
    %3 = vector.load %arg4[%c0_3, %c0_4] : memref<8x1xf32, #tpu.memory_space<vmem>>, vector<8x1xf32>
    %cst = arith.constant 7.812500e-03 : f32
    %4 = vector.broadcast %cst : f32 to vector<8x1xf32>
    %5 = arith.mulf %2, %4 : vector<8x1xf32>
    %cst_5 = arith.constant 7.812500e-03 : f32
    %6 = vector.broadcast %cst_5 : f32 to vector<8x1xf32>
    %7 = arith.mulf %3, %6 : vector<8x1xf32>
    %8 = arith.mulf %5, %5 : vector<8x1xf32>
    %9 = arith.subf %7, %8 : vector<8x1xf32>
    %cst_6 = arith.constant 0.000000e+00 : f32
    %10 = vector.broadcast %cst_6 : f32 to vector<8x1xf32>
    %11 = arith.maximumf %9, %10 : vector<8x1xf32>
    %12 = vector.broadcast %5 : vector<8x1xf32> to vector<8x128xf32>
    %13 = arith.subf %1, %12 : vector<8x128xf32>
    %cst_7 = arith.constant 9.99999974E-6 : f32
    %14 = vector.broadcast %cst_7 : f32 to vector<8x1xf32>
    %15 = arith.addf %11, %14 : vector<8x1xf32>
    %16 = math.rsqrt %15 : vector<8x1xf32>
    %17 = vector.broadcast %16 : vector<8x1xf32> to vector<8x128xf32>
    %18 = arith.mulf %13, %17 : vector<8x128xf32>
    %cst_8 = arith.constant 0.000000e+00 : f32
    %19 = vector.broadcast %cst_8 : f32 to vector<8x128xf32>
    %20 = arith.maximumf %18, %19 : vector<8x128xf32>
    %c0_9 = arith.constant 0 : index
    %c0_10 = arith.constant 0 : index
    %21 = vector.load %arg1[%c0_9, %c0_10] : memref<32x8xbf16, #tpu.memory_space<vmem>>, vector<32x8xbf16>
    %22 = arith.truncf %20 : vector<8x128xf32> to vector<8x128xbf16>
    %cst_11 = arith.constant dense<0.000000e+00> : vector<32x128xf32>
    %23 = tpu.matmul %21, %22, %cst_11 {dimension_numbers = #tpu.dot_dimension_numbers<[1], [0], [0], [1], [0, 0, 1, 1], [], []>} : vector<32x8xbf16>, vector<8x128xbf16>, vector<32x128xf32> -> vector<32x128xf32>
    %24 = arith.truncf %23 : vector<32x128xf32> to vector<32x128xbf16>
    %c0_12 = arith.constant 0 : index
    %c0_13 = arith.constant 0 : index
    %25 = vector.load %arg5[%c0_12, %c0_13] : memref<32x128xbf16, #tpu.memory_space<vmem>>, vector<32x128xbf16>
    tpu.vector_store %arg5[%c0_12, %c0_13], %24 {strides = array<i32>} : memref<32x128xbf16, #tpu.memory_space<vmem>>, vector<32x128xbf16>,
    %cst_14 = arith.constant dense<0.000000e+00> : vector<32xf32>
    %26 = vector.multi_reduction <add>, %23, %cst_14 [1] : vector<32x128xf32> to vector<32xf32>
    %27 = vector.shape_cast %26 : vector<32xf32> to vector<32x1xf32>
    %28 = vector.shape_cast %27 : vector<32x1xf32> to vector<1x32x1xf32>
    %c0_15 = arith.constant 0 : index
    %c0_16 = arith.constant 0 : index
    %c0_17 = arith.constant 0 : index
    %29 = vector.load %arg6[%c0_15, %c0_16, %c0_17] : memref<1x32x1xf32, #tpu.memory_space<vmem>>, vector<1x32x1xf32>
    tpu.vector_store %arg6[%c0_15, %c0_16, %c0_17], %28 {strides = array<i32>} : memref<1x32x1xf32, #tpu.memory_space<vmem>>, vector<1x32x1xf32>,
    %30 = arith.mulf %23, %23 : vector<32x128xf32>
    %cst_18 = arith.constant dense<0.000000e+00> : vector<32xf32>
    %31 = vector.multi_reduction <add>, %30, %cst_18 [1] : vector<32x128xf32> to vector<32xf32>
    %32 = vector.shape_cast %31 : vector<32xf32> to vector<32x1xf32>
    %33 = vector.shape_cast %32 : vector<32x1xf32> to vector<1x32x1xf32>
    %c0_19 = arith.constant 0 : index
    %c0_20 = arith.constant 0 : index
    %c0_21 = arith.constant 0 : index
    %34 = vector.load %arg7[%c0_19, %c0_20, %c0_21] : memref<1x32x1xf32, #tpu.memory_space<vmem>>, vector<1x32x1xf32>
    tpu.vector_store %arg7[%c0_19, %c0_20, %c0_21], %33 {strides = array<i32>} : memref<1x32x1xf32, #tpu.memory_space<vmem>>, vector<1x32x1xf32>,
    return
  }
  func.func @transform_0(%arg0: i32) -> (i32, i32) {
    %c0_i32 = arith.constant 0 : i32
    %c0_i32_0 = arith.constant 0 : i32
    %c0_i32_1 = arith.constant 0 : i32
    return %c0_i32, %c0_i32_0 : i32, i32
  }
  func.func @transform_1(%arg0: i32) -> (i32, i32) {
    %c0_i32 = arith.constant 0 : i32
    %c0_i32_0 = arith.constant 0 : i32
    return %c0_i32, %arg0 : i32, i32
  }
  func.func @transform_2(%arg0: i32) -> (i32, i32) {
    %c0_i32 = arith.constant 0 : i32
    %c0_i32_0 = arith.constant 0 : i32
    %c0_i32_1 = arith.constant 0 : i32
    return %c0_i32, %c0_i32_0 : i32, i32
  }
  func.func @transform_3(%arg0: i32) -> (i32, i32) {
    %c0_i32 = arith.constant 0 : i32
    %c0_i32_0 = arith.constant 0 : i32
    %c0_i32_1 = arith.constant 0 : i32
    return %c0_i32, %c0_i32_0 : i32, i32
  }
  func.func @transform_4(%arg0: i32) -> (i32, i32) {
    %c0_i32 = arith.constant 0 : i32
    %c0_i32_0 = arith.constant 0 : i32
    return %c0_i32, %arg0 : i32, i32
  }
  func.func @transform_5(%arg0: i32) -> (i32, i32, i32) {
    %c0_i32 = arith.constant 0 : i32
    %c0_i32_0 = arith.constant 0 : i32
    %c0_i32_1 = arith.constant 0 : i32
    return %arg0, %c0_i32, %c0_i32_0 : i32, i32, i32
  }
  func.func @transform_6(%arg0: i32) -> (i32, i32, i32) {
    %c0_i32 = arith.constant 0 : i32
    %c0_i32_0 = arith.constant 0 : i32
    %c0_i32_1 = arith.constant 0 : i32
    return %arg0, %c0_i32, %c0_i32_0 : i32, i32, i32
  }
}

module attributes {stable_mosaic.version = 11 : i64} {
  func.func @_conv_stats_kernel(%arg0: i32, %arg1: memref<16x32xbf16, #tpu.memory_space<vmem>>, %arg2: memref<32x128xbf16, #tpu.memory_space<vmem>>, %arg3: memref<16x128xbf16, #tpu.memory_space<vmem>>, %arg4: memref<1x16x1xf32, #tpu.memory_space<vmem>>, %arg5: memref<1x16x1xf32, #tpu.memory_space<vmem>>) attributes {dimension_semantics = [#tpu.dimension_semantics<parallel>], iteration_bounds = array<i64: 1>, scalar_prefetch = 0 : i64, scratch_operands = 0 : i64, tpu.core_type = #tpu.core_type<tc>, window_params = [{pipeline_mode = #tpu.pipeline_mode<synchronous>, transform_indices = @transform_0, window_bounds = array<i64: 16, 32>}, {transform_indices = @transform_1, window_bounds = array<i64: 32, 128>}, {transform_indices = @transform_2, window_bounds = array<i64: 16, 128>}, {transform_indices = @transform_3, window_bounds = array<i64: 1, 16, 1>}, {transform_indices = @transform_4, window_bounds = array<i64: 1, 16, 1>}]} {
    %c0 = arith.constant 0 : index
    %c0_0 = arith.constant 0 : index
    %0 = vector.load %arg1[%c0, %c0_0] : memref<16x32xbf16, #tpu.memory_space<vmem>>, vector<16x32xbf16>
    %c0_1 = arith.constant 0 : index
    %c0_2 = arith.constant 0 : index
    %1 = vector.load %arg2[%c0_1, %c0_2] : memref<32x128xbf16, #tpu.memory_space<vmem>>, vector<32x128xbf16>
    %cst = arith.constant dense<0.000000e+00> : vector<16x128xf32>
    %2 = tpu.matmul %0, %1, %cst {dimension_numbers = #tpu.dot_dimension_numbers<[1], [0], [0], [1], [0, 0, 1, 1], [], []>} : vector<16x32xbf16>, vector<32x128xbf16>, vector<16x128xf32> -> vector<16x128xf32>
    %3 = arith.truncf %2 : vector<16x128xf32> to vector<16x128xbf16>
    %c0_3 = arith.constant 0 : index
    %c0_4 = arith.constant 0 : index
    %4 = vector.load %arg3[%c0_3, %c0_4] : memref<16x128xbf16, #tpu.memory_space<vmem>>, vector<16x128xbf16>
    tpu.vector_store %arg3[%c0_3, %c0_4], %3 {strides = array<i32>} : memref<16x128xbf16, #tpu.memory_space<vmem>>, vector<16x128xbf16>,
    %cst_5 = arith.constant dense<0.000000e+00> : vector<16xf32>
    %5 = vector.multi_reduction <add>, %2, %cst_5 [1] : vector<16x128xf32> to vector<16xf32>
    %6 = vector.shape_cast %5 : vector<16xf32> to vector<16x1xf32>
    %7 = vector.shape_cast %6 : vector<16x1xf32> to vector<1x16x1xf32>
    %c0_6 = arith.constant 0 : index
    %c0_7 = arith.constant 0 : index
    %c0_8 = arith.constant 0 : index
    %8 = vector.load %arg4[%c0_6, %c0_7, %c0_8] : memref<1x16x1xf32, #tpu.memory_space<vmem>>, vector<1x16x1xf32>
    tpu.vector_store %arg4[%c0_6, %c0_7, %c0_8], %7 {strides = array<i32>} : memref<1x16x1xf32, #tpu.memory_space<vmem>>, vector<1x16x1xf32>,
    %9 = arith.mulf %2, %2 : vector<16x128xf32>
    %cst_9 = arith.constant dense<0.000000e+00> : vector<16xf32>
    %10 = vector.multi_reduction <add>, %9, %cst_9 [1] : vector<16x128xf32> to vector<16xf32>
    %11 = vector.shape_cast %10 : vector<16xf32> to vector<16x1xf32>
    %12 = vector.shape_cast %11 : vector<16x1xf32> to vector<1x16x1xf32>
    %c0_10 = arith.constant 0 : index
    %c0_11 = arith.constant 0 : index
    %c0_12 = arith.constant 0 : index
    %13 = vector.load %arg5[%c0_10, %c0_11, %c0_12] : memref<1x16x1xf32, #tpu.memory_space<vmem>>, vector<1x16x1xf32>
    tpu.vector_store %arg5[%c0_10, %c0_11, %c0_12], %12 {strides = array<i32>} : memref<1x16x1xf32, #tpu.memory_space<vmem>>, vector<1x16x1xf32>,
    return
  }
  func.func @transform_0(%arg0: i32) -> (i32, i32) {
    %c0_i32 = arith.constant 0 : i32
    %c0_i32_0 = arith.constant 0 : i32
    %c0_i32_1 = arith.constant 0 : i32
    return %c0_i32, %c0_i32_0 : i32, i32
  }
  func.func @transform_1(%arg0: i32) -> (i32, i32) {
    %c0_i32 = arith.constant 0 : i32
    %c0_i32_0 = arith.constant 0 : i32
    return %c0_i32, %arg0 : i32, i32
  }
  func.func @transform_2(%arg0: i32) -> (i32, i32) {
    %c0_i32 = arith.constant 0 : i32
    %c0_i32_0 = arith.constant 0 : i32
    return %c0_i32, %arg0 : i32, i32
  }
  func.func @transform_3(%arg0: i32) -> (i32, i32, i32) {
    %c0_i32 = arith.constant 0 : i32
    %c0_i32_0 = arith.constant 0 : i32
    %c0_i32_1 = arith.constant 0 : i32
    return %arg0, %c0_i32, %c0_i32_0 : i32, i32, i32
  }
  func.func @transform_4(%arg0: i32) -> (i32, i32, i32) {
    %c0_i32 = arith.constant 0 : i32
    %c0_i32_0 = arith.constant 0 : i32
    %c0_i32_1 = arith.constant 0 : i32
    return %arg0, %c0_i32, %c0_i32_0 : i32, i32, i32
  }
}

module attributes {stable_mosaic.version = 11 : i64} {
  func.func @_bn_act_kernel(%arg0: i32, %arg1: memref<16x128xbf16, #tpu.memory_space<vmem>>, %arg2: memref<16x1xf32, #tpu.memory_space<vmem>>, %arg3: memref<16x1xf32, #tpu.memory_space<vmem>>, %arg4: memref<16x128xbf16, #tpu.memory_space<vmem>>) attributes {dimension_semantics = [#tpu.dimension_semantics<parallel>], iteration_bounds = array<i64: 1>, scalar_prefetch = 0 : i64, scratch_operands = 0 : i64, tpu.core_type = #tpu.core_type<tc>, window_params = [{transform_indices = @transform_0, window_bounds = array<i64: 16, 128>}, {pipeline_mode = #tpu.pipeline_mode<synchronous>, transform_indices = @transform_1, window_bounds = array<i64: 16, 1>}, {pipeline_mode = #tpu.pipeline_mode<synchronous>, transform_indices = @transform_2, window_bounds = array<i64: 16, 1>}, {transform_indices = @transform_3, window_bounds = array<i64: 16, 128>}]} {
    %c0 = arith.constant 0 : index
    %c0_0 = arith.constant 0 : index
    %0 = vector.load %arg1[%c0, %c0_0] : memref<16x128xbf16, #tpu.memory_space<vmem>>, vector<16x128xbf16>
    %1 = arith.extf %0 : vector<16x128xbf16> to vector<16x128xf32>
    %c0_1 = arith.constant 0 : index
    %c0_2 = arith.constant 0 : index
    %2 = vector.load %arg2[%c0_1, %c0_2] : memref<16x1xf32, #tpu.memory_space<vmem>>, vector<16x1xf32>
    %c0_3 = arith.constant 0 : index
    %c0_4 = arith.constant 0 : index
    %3 = vector.load %arg3[%c0_3, %c0_4] : memref<16x1xf32, #tpu.memory_space<vmem>>, vector<16x1xf32>
    %cst = arith.constant 7.812500e-03 : f32
    %4 = vector.broadcast %cst : f32 to vector<16x1xf32>
    %5 = arith.mulf %2, %4 : vector<16x1xf32>
    %cst_5 = arith.constant 7.812500e-03 : f32
    %6 = vector.broadcast %cst_5 : f32 to vector<16x1xf32>
    %7 = arith.mulf %3, %6 : vector<16x1xf32>
    %8 = arith.mulf %5, %5 : vector<16x1xf32>
    %9 = arith.subf %7, %8 : vector<16x1xf32>
    %cst_6 = arith.constant 0.000000e+00 : f32
    %10 = vector.broadcast %cst_6 : f32 to vector<16x1xf32>
    %11 = arith.maximumf %9, %10 : vector<16x1xf32>
    %12 = vector.broadcast %5 : vector<16x1xf32> to vector<16x128xf32>
    %13 = arith.subf %1, %12 : vector<16x128xf32>
    %cst_7 = arith.constant 9.99999974E-6 : f32
    %14 = vector.broadcast %cst_7 : f32 to vector<16x1xf32>
    %15 = arith.addf %11, %14 : vector<16x1xf32>
    %16 = math.rsqrt %15 : vector<16x1xf32>
    %17 = vector.broadcast %16 : vector<16x1xf32> to vector<16x128xf32>
    %18 = arith.mulf %13, %17 : vector<16x128xf32>
    %cst_8 = arith.constant 0.000000e+00 : f32
    %19 = vector.broadcast %cst_8 : f32 to vector<16x128xf32>
    %20 = arith.maximumf %18, %19 : vector<16x128xf32>
    %21 = arith.truncf %20 : vector<16x128xf32> to vector<16x128xbf16>
    %c0_9 = arith.constant 0 : index
    %c0_10 = arith.constant 0 : index
    %22 = vector.load %arg4[%c0_9, %c0_10] : memref<16x128xbf16, #tpu.memory_space<vmem>>, vector<16x128xbf16>
    tpu.vector_store %arg4[%c0_9, %c0_10], %21 {strides = array<i32>} : memref<16x128xbf16, #tpu.memory_space<vmem>>, vector<16x128xbf16>,
    return
  }
  func.func @transform_0(%arg0: i32) -> (i32, i32) {
    %c0_i32 = arith.constant 0 : i32
    %c0_i32_0 = arith.constant 0 : i32
    return %c0_i32, %arg0 : i32, i32
  }
  func.func @transform_1(%arg0: i32) -> (i32, i32) {
    %c0_i32 = arith.constant 0 : i32
    %c0_i32_0 = arith.constant 0 : i32
    %c0_i32_1 = arith.constant 0 : i32
    return %c0_i32, %c0_i32_0 : i32, i32
  }
  func.func @transform_2(%arg0: i32) -> (i32, i32) {
    %c0_i32 = arith.constant 0 : i32
    %c0_i32_0 = arith.constant 0 : i32
    %c0_i32_1 = arith.constant 0 : i32
    return %c0_i32, %c0_i32_0 : i32, i32
  }
  func.func @transform_3(%arg0: i32) -> (i32, i32) {
    %c0_i32 = arith.constant 0 : i32
    %c0_i32_0 = arith.constant 0 : i32
    return %c0_i32, %arg0 : i32, i32
  }
}

module attributes {stable_mosaic.version = 11 : i64} {
  func.func @_conv_stats_kernel(%arg0: i32, %arg1: memref<64x32xbf16, #tpu.memory_space<vmem>>, %arg2: memref<32x128xbf16, #tpu.memory_space<vmem>>, %arg3: memref<64x128xbf16, #tpu.memory_space<vmem>>, %arg4: memref<1x64x1xf32, #tpu.memory_space<vmem>>, %arg5: memref<1x64x1xf32, #tpu.memory_space<vmem>>) attributes {dimension_semantics = [#tpu.dimension_semantics<parallel>], iteration_bounds = array<i64: 1>, scalar_prefetch = 0 : i64, scratch_operands = 0 : i64, tpu.core_type = #tpu.core_type<tc>, window_params = [{pipeline_mode = #tpu.pipeline_mode<synchronous>, transform_indices = @transform_0, window_bounds = array<i64: 64, 32>}, {transform_indices = @transform_1, window_bounds = array<i64: 32, 128>}, {transform_indices = @transform_2, window_bounds = array<i64: 64, 128>}, {transform_indices = @transform_3, window_bounds = array<i64: 1, 64, 1>}, {transform_indices = @transform_4, window_bounds = array<i64: 1, 64, 1>}]} {
    %c0 = arith.constant 0 : index
    %c0_0 = arith.constant 0 : index
    %0 = vector.load %arg1[%c0, %c0_0] : memref<64x32xbf16, #tpu.memory_space<vmem>>, vector<64x32xbf16>
    %c0_1 = arith.constant 0 : index
    %c0_2 = arith.constant 0 : index
    %1 = vector.load %arg2[%c0_1, %c0_2] : memref<32x128xbf16, #tpu.memory_space<vmem>>, vector<32x128xbf16>
    %cst = arith.constant dense<0.000000e+00> : vector<64x128xf32>
    %2 = tpu.matmul %0, %1, %cst {dimension_numbers = #tpu.dot_dimension_numbers<[1], [0], [0], [1], [0, 0, 1, 1], [], []>} : vector<64x32xbf16>, vector<32x128xbf16>, vector<64x128xf32> -> vector<64x128xf32>
    %3 = arith.truncf %2 : vector<64x128xf32> to vector<64x128xbf16>
    %c0_3 = arith.constant 0 : index
    %c0_4 = arith.constant 0 : index
    %4 = vector.load %arg3[%c0_3, %c0_4] : memref<64x128xbf16, #tpu.memory_space<vmem>>, vector<64x128xbf16>
    tpu.vector_store %arg3[%c0_3, %c0_4], %3 {strides = array<i32>} : memref<64x128xbf16, #tpu.memory_space<vmem>>, vector<64x128xbf16>,
    %cst_5 = arith.constant dense<0.000000e+00> : vector<64xf32>
    %5 = vector.multi_reduction <add>, %2, %cst_5 [1] : vector<64x128xf32> to vector<64xf32>
    %6 = vector.shape_cast %5 : vector<64xf32> to vector<64x1xf32>
    %7 = vector.shape_cast %6 : vector<64x1xf32> to vector<1x64x1xf32>
    %c0_6 = arith.constant 0 : index
    %c0_7 = arith.constant 0 : index
    %c0_8 = arith.constant 0 : index
    %8 = vector.load %arg4[%c0_6, %c0_7, %c0_8] : memref<1x64x1xf32, #tpu.memory_space<vmem>>, vector<1x64x1xf32>
    tpu.vector_store %arg4[%c0_6, %c0_7, %c0_8], %7 {strides = array<i32>} : memref<1x64x1xf32, #tpu.memory_space<vmem>>, vector<1x64x1xf32>,
    %9 = arith.mulf %2, %2 : vector<64x128xf32>
    %cst_9 = arith.constant dense<0.000000e+00> : vector<64xf32>
    %10 = vector.multi_reduction <add>, %9, %cst_9 [1] : vector<64x128xf32> to vector<64xf32>
    %11 = vector.shape_cast %10 : vector<64xf32> to vector<64x1xf32>
    %12 = vector.shape_cast %11 : vector<64x1xf32> to vector<1x64x1xf32>
    %c0_10 = arith.constant 0 : index
    %c0_11 = arith.constant 0 : index
    %c0_12 = arith.constant 0 : index
    %13 = vector.load %arg5[%c0_10, %c0_11, %c0_12] : memref<1x64x1xf32, #tpu.memory_space<vmem>>, vector<1x64x1xf32>
    tpu.vector_store %arg5[%c0_10, %c0_11, %c0_12], %12 {strides = array<i32>} : memref<1x64x1xf32, #tpu.memory_space<vmem>>, vector<1x64x1xf32>,
    return
  }
  func.func @transform_0(%arg0: i32) -> (i32, i32) {
    %c0_i32 = arith.constant 0 : i32
    %c0_i32_0 = arith.constant 0 : i32
    %c0_i32_1 = arith.constant 0 : i32
    return %c0_i32, %c0_i32_0 : i32, i32
  }
  func.func @transform_1(%arg0: i32) -> (i32, i32) {
    %c0_i32 = arith.constant 0 : i32
    %c0_i32_0 = arith.constant 0 : i32
    return %c0_i32, %arg0 : i32, i32
  }
  func.func @transform_2(%arg0: i32) -> (i32, i32) {
    %c0_i32 = arith.constant 0 : i32
    %c0_i32_0 = arith.constant 0 : i32
    return %c0_i32, %arg0 : i32, i32
  }
  func.func @transform_3(%arg0: i32) -> (i32, i32, i32) {
    %c0_i32 = arith.constant 0 : i32
    %c0_i32_0 = arith.constant 0 : i32
    %c0_i32_1 = arith.constant 0 : i32
    return %arg0, %c0_i32, %c0_i32_0 : i32, i32, i32
  }
  func.func @transform_4(%arg0: i32) -> (i32, i32, i32) {
    %c0_i32 = arith.constant 0 : i32
    %c0_i32_0 = arith.constant 0 : i32
    %c0_i32_1 = arith.constant 0 : i32
    return %arg0, %c0_i32, %c0_i32_0 : i32, i32, i32
  }
}

module attributes {stable_mosaic.version = 11 : i64} {
  func.func @_conv_stats_kernel(%arg0: i32, %arg1: memref<16x144xbf16, #tpu.memory_space<vmem>>, %arg2: memref<144x128xbf16, #tpu.memory_space<vmem>>, %arg3: memref<16x128xbf16, #tpu.memory_space<vmem>>, %arg4: memref<1x16x1xf32, #tpu.memory_space<vmem>>, %arg5: memref<1x16x1xf32, #tpu.memory_space<vmem>>) attributes {dimension_semantics = [#tpu.dimension_semantics<parallel>], iteration_bounds = array<i64: 1>, scalar_prefetch = 0 : i64, scratch_operands = 0 : i64, tpu.core_type = #tpu.core_type<tc>, window_params = [{pipeline_mode = #tpu.pipeline_mode<synchronous>, transform_indices = @transform_0, window_bounds = array<i64: 16, 144>}, {transform_indices = @transform_1, window_bounds = array<i64: 144, 128>}, {transform_indices = @transform_2, window_bounds = array<i64: 16, 128>}, {transform_indices = @transform_3, window_bounds = array<i64: 1, 16, 1>}, {transform_indices = @transform_4, window_bounds = array<i64: 1, 16, 1>}]} {
    %c0 = arith.constant 0 : index
    %c0_0 = arith.constant 0 : index
    %0 = vector.load %arg1[%c0, %c0_0] : memref<16x144xbf16, #tpu.memory_space<vmem>>, vector<16x144xbf16>
    %c0_1 = arith.constant 0 : index
    %c0_2 = arith.constant 0 : index
    %1 = vector.load %arg2[%c0_1, %c0_2] : memref<144x128xbf16, #tpu.memory_space<vmem>>, vector<144x128xbf16>
    %cst = arith.constant dense<0.000000e+00> : vector<16x128xf32>
    %2 = tpu.matmul %0, %1, %cst {dimension_numbers = #tpu.dot_dimension_numbers<[1], [0], [0], [1], [0, 0, 1, 1], [], []>} : vector<16x144xbf16>, vector<144x128xbf16>, vector<16x128xf32> -> vector<16x128xf32>
    %3 = arith.truncf %2 : vector<16x128xf32> to vector<16x128xbf16>
    %c0_3 = arith.constant 0 : index
    %c0_4 = arith.constant 0 : index
    %4 = vector.load %arg3[%c0_3, %c0_4] : memref<16x128xbf16, #tpu.memory_space<vmem>>, vector<16x128xbf16>
    tpu.vector_store %arg3[%c0_3, %c0_4], %3 {strides = array<i32>} : memref<16x128xbf16, #tpu.memory_space<vmem>>, vector<16x128xbf16>,
    %cst_5 = arith.constant dense<0.000000e+00> : vector<16xf32>
    %5 = vector.multi_reduction <add>, %2, %cst_5 [1] : vector<16x128xf32> to vector<16xf32>
    %6 = vector.shape_cast %5 : vector<16xf32> to vector<16x1xf32>
    %7 = vector.shape_cast %6 : vector<16x1xf32> to vector<1x16x1xf32>
    %c0_6 = arith.constant 0 : index
    %c0_7 = arith.constant 0 : index
    %c0_8 = arith.constant 0 : index
    %8 = vector.load %arg4[%c0_6, %c0_7, %c0_8] : memref<1x16x1xf32, #tpu.memory_space<vmem>>, vector<1x16x1xf32>
    tpu.vector_store %arg4[%c0_6, %c0_7, %c0_8], %7 {strides = array<i32>} : memref<1x16x1xf32, #tpu.memory_space<vmem>>, vector<1x16x1xf32>,
    %9 = arith.mulf %2, %2 : vector<16x128xf32>
    %cst_9 = arith.constant dense<0.000000e+00> : vector<16xf32>
    %10 = vector.multi_reduction <add>, %9, %cst_9 [1] : vector<16x128xf32> to vector<16xf32>
    %11 = vector.shape_cast %10 : vector<16xf32> to vector<16x1xf32>
    %12 = vector.shape_cast %11 : vector<16x1xf32> to vector<1x16x1xf32>
    %c0_10 = arith.constant 0 : index
    %c0_11 = arith.constant 0 : index
    %c0_12 = arith.constant 0 : index
    %13 = vector.load %arg5[%c0_10, %c0_11, %c0_12] : memref<1x16x1xf32, #tpu.memory_space<vmem>>, vector<1x16x1xf32>
    tpu.vector_store %arg5[%c0_10, %c0_11, %c0_12], %12 {strides = array<i32>} : memref<1x16x1xf32, #tpu.memory_space<vmem>>, vector<1x16x1xf32>,
    return
  }
  func.func @transform_0(%arg0: i32) -> (i32, i32) {
    %c0_i32 = arith.constant 0 : i32
    %c0_i32_0 = arith.constant 0 : i32
    %c0_i32_1 = arith.constant 0 : i32
    return %c0_i32, %c0_i32_0 : i32, i32
  }
  func.func @transform_1(%arg0: i32) -> (i32, i32) {
    %c0_i32 = arith.constant 0 : i32
    %c0_i32_0 = arith.constant 0 : i32
    return %c0_i32, %arg0 : i32, i32
  }
  func.func @transform_2(%arg0: i32) -> (i32, i32) {
    %c0_i32 = arith.constant 0 : i32
    %c0_i32_0 = arith.constant 0 : i32
    return %c0_i32, %arg0 : i32, i32
  }
  func.func @transform_3(%arg0: i32) -> (i32, i32, i32) {
    %c0_i32 = arith.constant 0 : i32
    %c0_i32_0 = arith.constant 0 : i32
    %c0_i32_1 = arith.constant 0 : i32
    return %arg0, %c0_i32, %c0_i32_0 : i32, i32, i32
  }
  func.func @transform_4(%arg0: i32) -> (i32, i32, i32) {
    %c0_i32 = arith.constant 0 : i32
    %c0_i32_0 = arith.constant 0 : i32
    %c0_i32_1 = arith.constant 0 : i32
    return %arg0, %c0_i32, %c0_i32_0 : i32, i32, i32
  }
}

module attributes {stable_mosaic.version = 11 : i64} {
  func.func @_bnrelu_conv_stats_kernel(%arg0: i32, %arg1: memref<64x16xbf16, #tpu.memory_space<vmem>>, %arg2: memref<16x128xbf16, #tpu.memory_space<vmem>>, %arg3: memref<16x1xf32, #tpu.memory_space<vmem>>, %arg4: memref<16x1xf32, #tpu.memory_space<vmem>>, %arg5: memref<64x128xbf16, #tpu.memory_space<vmem>>, %arg6: memref<1x64x1xf32, #tpu.memory_space<vmem>>, %arg7: memref<1x64x1xf32, #tpu.memory_space<vmem>>) attributes {dimension_semantics = [#tpu.dimension_semantics<parallel>], iteration_bounds = array<i64: 1>, scalar_prefetch = 0 : i64, scratch_operands = 0 : i64, tpu.core_type = #tpu.core_type<tc>, window_params = [{pipeline_mode = #tpu.pipeline_mode<synchronous>, transform_indices = @transform_0, window_bounds = array<i64: 64, 16>}, {transform_indices = @transform_1, window_bounds = array<i64: 16, 128>}, {pipeline_mode = #tpu.pipeline_mode<synchronous>, transform_indices = @transform_2, window_bounds = array<i64: 16, 1>}, {pipeline_mode = #tpu.pipeline_mode<synchronous>, transform_indices = @transform_3, window_bounds = array<i64: 16, 1>}, {transform_indices = @transform_4, window_bounds = array<i64: 64, 128>}, {transform_indices = @transform_5, window_bounds = array<i64: 1, 64, 1>}, {transform_indices = @transform_6, window_bounds = array<i64: 1, 64, 1>}]} {
    %c0 = arith.constant 0 : index
    %c0_0 = arith.constant 0 : index
    %0 = vector.load %arg2[%c0, %c0_0] : memref<16x128xbf16, #tpu.memory_space<vmem>>, vector<16x128xbf16>
    %1 = arith.extf %0 : vector<16x128xbf16> to vector<16x128xf32>
    %c0_1 = arith.constant 0 : index
    %c0_2 = arith.constant 0 : index
    %2 = vector.load %arg3[%c0_1, %c0_2] : memref<16x1xf32, #tpu.memory_space<vmem>>, vector<16x1xf32>
    %c0_3 = arith.constant 0 : index
    %c0_4 = arith.constant 0 : index
    %3 = vector.load %arg4[%c0_3, %c0_4] : memref<16x1xf32, #tpu.memory_space<vmem>>, vector<16x1xf32>
    %cst = arith.constant 3.125000e-02 : f32
    %4 = vector.broadcast %cst : f32 to vector<16x1xf32>
    %5 = arith.mulf %2, %4 : vector<16x1xf32>
    %cst_5 = arith.constant 3.125000e-02 : f32
    %6 = vector.broadcast %cst_5 : f32 to vector<16x1xf32>
    %7 = arith.mulf %3, %6 : vector<16x1xf32>
    %8 = arith.mulf %5, %5 : vector<16x1xf32>
    %9 = arith.subf %7, %8 : vector<16x1xf32>
    %cst_6 = arith.constant 0.000000e+00 : f32
    %10 = vector.broadcast %cst_6 : f32 to vector<16x1xf32>
    %11 = arith.maximumf %9, %10 : vector<16x1xf32>
    %12 = vector.broadcast %5 : vector<16x1xf32> to vector<16x128xf32>
    %13 = arith.subf %1, %12 : vector<16x128xf32>
    %cst_7 = arith.constant 9.99999974E-6 : f32
    %14 = vector.broadcast %cst_7 : f32 to vector<16x1xf32>
    %15 = arith.addf %11, %14 : vector<16x1xf32>
    %16 = math.rsqrt %15 : vector<16x1xf32>
    %17 = vector.broadcast %16 : vector<16x1xf32> to vector<16x128xf32>
    %18 = arith.mulf %13, %17 : vector<16x128xf32>
    %cst_8 = arith.constant 0.000000e+00 : f32
    %19 = vector.broadcast %cst_8 : f32 to vector<16x128xf32>
    %20 = arith.maximumf %18, %19 : vector<16x128xf32>
    %c0_i32 = arith.constant 0 : i32
    %21 = arith.cmpi eq, %arg0, %c0_i32 : i32
    %c128_i32 = arith.constant 128 : i32
    %22 = arith.muli %arg0, %c128_i32 : i32
    %23 = tpu.iota {dimensions = array<i32: 1>} : vector<16x128xi32>
    %24 = vector.broadcast %22 : i32 to vector<16x128xi32>
    %25 = arith.addi %24, %23 : vector<16x128xi32>
    %c32_i32 = arith.constant 32 : i32
    %26 = vector.broadcast %c32_i32 : i32 to vector<16x128xi32>
    %27 = arith.cmpi slt, %25, %26 : vector<16x128xi32>
    %cst_9 = arith.constant 0.000000e+00 : f32
    %28 = vector.broadcast %cst_9 : f32 to vector<16x128xf32>
    %29 = arith.select %27, %20, %28 : vector<16x128xi1>, vector<16x128xf32>
    %30 = arith.select %21, %29, %20 : vector<16x128xf32>
    %c0_10 = arith.constant 0 : index
    %c0_11 = arith.constant 0 : index
    %31 = vector.load %arg1[%c0_10, %c0_11] : memref<64x16xbf16, #tpu.memory_space<vmem>>, vector<64x16xbf16>
    %32 = arith.truncf %30 : vector<16x128xf32> to vector<16x128xbf16>
    %cst_12 = arith.constant dense<0.000000e+00> : vector<64x128xf32>
    %33 = tpu.matmul %31, %32, %cst_12 {dimension_numbers = #tpu.dot_dimension_numbers<[1], [0], [0], [1], [0, 0, 1, 1], [], []>} : vector<64x16xbf16>, vector<16x128xbf16>, vector<64x128xf32> -> vector<64x128xf32>
    %34 = arith.truncf %33 : vector<64x128xf32> to vector<64x128xbf16>
    %c0_13 = arith.constant 0 : index
    %c0_14 = arith.constant 0 : index
    %35 = vector.load %arg5[%c0_13, %c0_14] : memref<64x128xbf16, #tpu.memory_space<vmem>>, vector<64x128xbf16>
    tpu.vector_store %arg5[%c0_13, %c0_14], %34 {strides = array<i32>} : memref<64x128xbf16, #tpu.memory_space<vmem>>, vector<64x128xbf16>,
    %cst_15 = arith.constant dense<0.000000e+00> : vector<64xf32>
    %36 = vector.multi_reduction <add>, %33, %cst_15 [1] : vector<64x128xf32> to vector<64xf32>
    %37 = vector.shape_cast %36 : vector<64xf32> to vector<64x1xf32>
    %38 = vector.shape_cast %37 : vector<64x1xf32> to vector<1x64x1xf32>
    %c0_16 = arith.constant 0 : index
    %c0_17 = arith.constant 0 : index
    %c0_18 = arith.constant 0 : index
    %39 = vector.load %arg6[%c0_16, %c0_17, %c0_18] : memref<1x64x1xf32, #tpu.memory_space<vmem>>, vector<1x64x1xf32>
    tpu.vector_store %arg6[%c0_16, %c0_17, %c0_18], %38 {strides = array<i32>} : memref<1x64x1xf32, #tpu.memory_space<vmem>>, vector<1x64x1xf32>,
    %40 = arith.mulf %33, %33 : vector<64x128xf32>
    %cst_19 = arith.constant dense<0.000000e+00> : vector<64xf32>
    %41 = vector.multi_reduction <add>, %40, %cst_19 [1] : vector<64x128xf32> to vector<64xf32>
    %42 = vector.shape_cast %41 : vector<64xf32> to vector<64x1xf32>
    %43 = vector.shape_cast %42 : vector<64x1xf32> to vector<1x64x1xf32>
    %c0_20 = arith.constant 0 : index
    %c0_21 = arith.constant 0 : index
    %c0_22 = arith.constant 0 : index
    %44 = vector.load %arg7[%c0_20, %c0_21, %c0_22] : memref<1x64x1xf32, #tpu.memory_space<vmem>>, vector<1x64x1xf32>
    tpu.vector_store %arg7[%c0_20, %c0_21, %c0_22], %43 {strides = array<i32>} : memref<1x64x1xf32, #tpu.memory_space<vmem>>, vector<1x64x1xf32>,
    return
  }
  func.func @transform_0(%arg0: i32) -> (i32, i32) {
    %c0_i32 = arith.constant 0 : i32
    %c0_i32_0 = arith.constant 0 : i32
    %c0_i32_1 = arith.constant 0 : i32
    return %c0_i32, %c0_i32_0 : i32, i32
  }
  func.func @transform_1(%arg0: i32) -> (i32, i32) {
    %c0_i32 = arith.constant 0 : i32
    %c0_i32_0 = arith.constant 0 : i32
    return %c0_i32, %arg0 : i32, i32
  }
  func.func @transform_2(%arg0: i32) -> (i32, i32) {
    %c0_i32 = arith.constant 0 : i32
    %c0_i32_0 = arith.constant 0 : i32
    %c0_i32_1 = arith.constant 0 : i32
    return %c0_i32, %c0_i32_0 : i32, i32
  }
  func.func @transform_3(%arg0: i32) -> (i32, i32) {
    %c0_i32 = arith.constant 0 : i32
    %c0_i32_0 = arith.constant 0 : i32
    %c0_i32_1 = arith.constant 0 : i32
    return %c0_i32, %c0_i32_0 : i32, i32
  }
  func.func @transform_4(%arg0: i32) -> (i32, i32) {
    %c0_i32 = arith.constant 0 : i32
    %c0_i32_0 = arith.constant 0 : i32
    return %c0_i32, %arg0 : i32, i32
  }
  func.func @transform_5(%arg0: i32) -> (i32, i32, i32) {
    %c0_i32 = arith.constant 0 : i32
    %c0_i32_0 = arith.constant 0 : i32
    %c0_i32_1 = arith.constant 0 : i32
    return %arg0, %c0_i32, %c0_i32_0 : i32, i32, i32
  }
  func.func @transform_6(%arg0: i32) -> (i32, i32, i32) {
    %c0_i32 = arith.constant 0 : i32
    %c0_i32_0 = arith.constant 0 : i32
    %c0_i32_1 = arith.constant 0 : i32
    return %arg0, %c0_i32, %c0_i32_0 : i32, i32, i32
  }
}

module attributes {stable_mosaic.version = 11 : i64} {
  func.func @_bn2_add_relu_kernel(%arg0: i32, %arg1: memref<64x128xbf16, #tpu.memory_space<vmem>>, %arg2: memref<64x1xf32, #tpu.memory_space<vmem>>, %arg3: memref<64x1xf32, #tpu.memory_space<vmem>>, %arg4: memref<64x128xbf16, #tpu.memory_space<vmem>>, %arg5: memref<64x1xf32, #tpu.memory_space<vmem>>, %arg6: memref<64x1xf32, #tpu.memory_space<vmem>>, %arg7: memref<64x128xbf16, #tpu.memory_space<vmem>>) attributes {dimension_semantics = [#tpu.dimension_semantics<parallel>], iteration_bounds = array<i64: 1>, scalar_prefetch = 0 : i64, scratch_operands = 0 : i64, tpu.core_type = #tpu.core_type<tc>, window_params = [{transform_indices = @transform_0, window_bounds = array<i64: 64, 128>}, {pipeline_mode = #tpu.pipeline_mode<synchronous>, transform_indices = @transform_1, window_bounds = array<i64: 64, 1>}, {pipeline_mode = #tpu.pipeline_mode<synchronous>, transform_indices = @transform_2, window_bounds = array<i64: 64, 1>}, {transform_indices = @transform_3, window_bounds = array<i64: 64, 128>}, {pipeline_mode = #tpu.pipeline_mode<synchronous>, transform_indices = @transform_4, window_bounds = array<i64: 64, 1>}, {pipeline_mode = #tpu.pipeline_mode<synchronous>, transform_indices = @transform_5, window_bounds = array<i64: 64, 1>}, {transform_indices = @transform_6, window_bounds = array<i64: 64, 128>}]} {
    %c0 = arith.constant 0 : index
    %c0_0 = arith.constant 0 : index
    %0 = vector.load %arg1[%c0, %c0_0] : memref<64x128xbf16, #tpu.memory_space<vmem>>, vector<64x128xbf16>
    %1 = arith.extf %0 : vector<64x128xbf16> to vector<64x128xf32>
    %c0_1 = arith.constant 0 : index
    %c0_2 = arith.constant 0 : index
    %2 = vector.load %arg2[%c0_1, %c0_2] : memref<64x1xf32, #tpu.memory_space<vmem>>, vector<64x1xf32>
    %c0_3 = arith.constant 0 : index
    %c0_4 = arith.constant 0 : index
    %3 = vector.load %arg3[%c0_3, %c0_4] : memref<64x1xf32, #tpu.memory_space<vmem>>, vector<64x1xf32>
    %cst = arith.constant 3.125000e-02 : f32
    %4 = vector.broadcast %cst : f32 to vector<64x1xf32>
    %5 = arith.mulf %2, %4 : vector<64x1xf32>
    %cst_5 = arith.constant 3.125000e-02 : f32
    %6 = vector.broadcast %cst_5 : f32 to vector<64x1xf32>
    %7 = arith.mulf %3, %6 : vector<64x1xf32>
    %8 = arith.mulf %5, %5 : vector<64x1xf32>
    %9 = arith.subf %7, %8 : vector<64x1xf32>
    %cst_6 = arith.constant 0.000000e+00 : f32
    %10 = vector.broadcast %cst_6 : f32 to vector<64x1xf32>
    %11 = arith.maximumf %9, %10 : vector<64x1xf32>
    %12 = vector.broadcast %5 : vector<64x1xf32> to vector<64x128xf32>
    %13 = arith.subf %1, %12 : vector<64x128xf32>
    %cst_7 = arith.constant 9.99999974E-6 : f32
    %14 = vector.broadcast %cst_7 : f32 to vector<64x1xf32>
    %15 = arith.addf %11, %14 : vector<64x1xf32>
    %16 = math.rsqrt %15 : vector<64x1xf32>
    %17 = vector.broadcast %16 : vector<64x1xf32> to vector<64x128xf32>
    %18 = arith.mulf %13, %17 : vector<64x128xf32>
    %c0_8 = arith.constant 0 : index
    %c0_9 = arith.constant 0 : index
    %19 = vector.load %arg4[%c0_8, %c0_9] : memref<64x128xbf16, #tpu.memory_space<vmem>>, vector<64x128xbf16>
    %20 = arith.extf %19 : vector<64x128xbf16> to vector<64x128xf32>
    %c0_10 = arith.constant 0 : index
    %c0_11 = arith.constant 0 : index
    %21 = vector.load %arg5[%c0_10, %c0_11] : memref<64x1xf32, #tpu.memory_space<vmem>>, vector<64x1xf32>
    %c0_12 = arith.constant 0 : index
    %c0_13 = arith.constant 0 : index
    %22 = vector.load %arg6[%c0_12, %c0_13] : memref<64x1xf32, #tpu.memory_space<vmem>>, vector<64x1xf32>
    %cst_14 = arith.constant 3.125000e-02 : f32
    %23 = vector.broadcast %cst_14 : f32 to vector<64x1xf32>
    %24 = arith.mulf %21, %23 : vector<64x1xf32>
    %cst_15 = arith.constant 3.125000e-02 : f32
    %25 = vector.broadcast %cst_15 : f32 to vector<64x1xf32>
    %26 = arith.mulf %22, %25 : vector<64x1xf32>
    %27 = arith.mulf %24, %24 : vector<64x1xf32>
    %28 = arith.subf %26, %27 : vector<64x1xf32>
    %cst_16 = arith.constant 0.000000e+00 : f32
    %29 = vector.broadcast %cst_16 : f32 to vector<64x1xf32>
    %30 = arith.maximumf %28, %29 : vector<64x1xf32>
    %31 = vector.broadcast %24 : vector<64x1xf32> to vector<64x128xf32>
    %32 = arith.subf %20, %31 : vector<64x128xf32>
    %cst_17 = arith.constant 9.99999974E-6 : f32
    %33 = vector.broadcast %cst_17 : f32 to vector<64x1xf32>
    %34 = arith.addf %30, %33 : vector<64x1xf32>
    %35 = math.rsqrt %34 : vector<64x1xf32>
    %36 = vector.broadcast %35 : vector<64x1xf32> to vector<64x128xf32>
    %37 = arith.mulf %32, %36 : vector<64x128xf32>
    %38 = arith.addf %18, %37 : vector<64x128xf32>
    %cst_18 = arith.constant 0.000000e+00 : f32
    %39 = vector.broadcast %cst_18 : f32 to vector<64x128xf32>
    %40 = arith.maximumf %38, %39 : vector<64x128xf32>
    %41 = arith.truncf %40 : vector<64x128xf32> to vector<64x128xbf16>
    %c0_19 = arith.constant 0 : index
    %c0_20 = arith.constant 0 : index
    %42 = vector.load %arg7[%c0_19, %c0_20] : memref<64x128xbf16, #tpu.memory_space<vmem>>, vector<64x128xbf16>
    tpu.vector_store %arg7[%c0_19, %c0_20], %41 {strides = array<i32>} : memref<64x128xbf16, #tpu.memory_space<vmem>>, vector<64x128xbf16>,
    %c0_i32 = arith.constant 0 : i32
    %43 = arith.cmpi eq, %arg0, %c0_i32 : i32
    %44 = arith.extui %43 : i1 to i32
    %c0_i32_21 = arith.constant 0 : i32
    %45 = arith.cmpi ne, %44, %c0_i32_21 : i32
    scf.if %45 {
      %c128_i32 = arith.constant 128 : i32
      %46 = arith.muli %arg0, %c128_i32 : i32
      %47 = tpu.iota {dimensions = array<i32: 1>} : vector<64x128xi32>
      %48 = vector.broadcast %46 : i32 to vector<64x128xi32>
      %49 = arith.addi %48, %47 : vector<64x128xi32>
      %c32_i32 = arith.constant 32 : i32
      %50 = vector.broadcast %c32_i32 : i32 to vector<64x128xi32>
      %51 = arith.cmpi slt, %49, %50 : vector<64x128xi32>
      %cst_22 = arith.constant 0.000000e+00 : f32
      %52 = vector.broadcast %cst_22 : f32 to vector<64x128xf32>
      %53 = arith.select %51, %40, %52 : vector<64x128xi1>, vector<64x128xf32>
      %54 = arith.truncf %53 : vector<64x128xf32> to vector<64x128xbf16>
      %c0_23 = arith.constant 0 : index
      %c0_24 = arith.constant 0 : index
      %55 = vector.load %arg7[%c0_23, %c0_24] : memref<64x128xbf16, #tpu.memory_space<vmem>>, vector<64x128xbf16>
      tpu.vector_store %arg7[%c0_23, %c0_24], %54 {strides = array<i32>} : memref<64x128xbf16, #tpu.memory_space<vmem>>, vector<64x128xbf16>,
    } else {
    }
    return
  }
  func.func @transform_0(%arg0: i32) -> (i32, i32) {
    %c0_i32 = arith.constant 0 : i32
    %c0_i32_0 = arith.constant 0 : i32
    return %c0_i32, %arg0 : i32, i32
  }
  func.func @transform_1(%arg0: i32) -> (i32, i32) {
    %c0_i32 = arith.constant 0 : i32
    %c0_i32_0 = arith.constant 0 : i32
    %c0_i32_1 = arith.constant 0 : i32
    return %c0_i32, %c0_i32_0 : i32, i32
  }
  func.func @transform_2(%arg0: i32) -> (i32, i32) {
    %c0_i32 = arith.constant 0 : i32
    %c0_i32_0 = arith.constant 0 : i32
    %c0_i32_1 = arith.constant 0 : i32
    return %c0_i32, %c0_i32_0 : i32, i32
  }
  func.func @transform_3(%arg0: i32) -> (i32, i32) {
    %c0_i32 = arith.constant 0 : i32
    %c0_i32_0 = arith.constant 0 : i32
    return %c0_i32, %arg0 : i32, i32
  }
  func.func @transform_4(%arg0: i32) -> (i32, i32) {
    %c0_i32 = arith.constant 0 : i32
    %c0_i32_0 = arith.constant 0 : i32
    %c0_i32_1 = arith.constant 0 : i32
    return %c0_i32, %c0_i32_0 : i32, i32
  }
  func.func @transform_5(%arg0: i32) -> (i32, i32) {
    %c0_i32 = arith.constant 0 : i32
    %c0_i32_0 = arith.constant 0 : i32
    %c0_i32_1 = arith.constant 0 : i32
    return %c0_i32, %c0_i32_0 : i32, i32
  }
  func.func @transform_6(%arg0: i32) -> (i32, i32) {
    %c0_i32 = arith.constant 0 : i32
    %c0_i32_0 = arith.constant 0 : i32
    return %c0_i32, %arg0 : i32, i32
  }
}

module attributes {stable_mosaic.version = 11 : i64} {
  func.func @_conv_stats_kernel(%arg0: i32, %arg1: memref<16x64xbf16, #tpu.memory_space<vmem>>, %arg2: memref<64x128xbf16, #tpu.memory_space<vmem>>, %arg3: memref<16x128xbf16, #tpu.memory_space<vmem>>, %arg4: memref<1x16x1xf32, #tpu.memory_space<vmem>>, %arg5: memref<1x16x1xf32, #tpu.memory_space<vmem>>) attributes {dimension_semantics = [#tpu.dimension_semantics<parallel>], iteration_bounds = array<i64: 1>, scalar_prefetch = 0 : i64, scratch_operands = 0 : i64, tpu.core_type = #tpu.core_type<tc>, window_params = [{pipeline_mode = #tpu.pipeline_mode<synchronous>, transform_indices = @transform_0, window_bounds = array<i64: 16, 64>}, {transform_indices = @transform_1, window_bounds = array<i64: 64, 128>}, {transform_indices = @transform_2, window_bounds = array<i64: 16, 128>}, {transform_indices = @transform_3, window_bounds = array<i64: 1, 16, 1>}, {transform_indices = @transform_4, window_bounds = array<i64: 1, 16, 1>}]} {
    %c0 = arith.constant 0 : index
    %c0_0 = arith.constant 0 : index
    %0 = vector.load %arg1[%c0, %c0_0] : memref<16x64xbf16, #tpu.memory_space<vmem>>, vector<16x64xbf16>
    %c0_1 = arith.constant 0 : index
    %c0_2 = arith.constant 0 : index
    %1 = vector.load %arg2[%c0_1, %c0_2] : memref<64x128xbf16, #tpu.memory_space<vmem>>, vector<64x128xbf16>
    %cst = arith.constant dense<0.000000e+00> : vector<16x128xf32>
    %2 = tpu.matmul %0, %1, %cst {dimension_numbers = #tpu.dot_dimension_numbers<[1], [0], [0], [1], [0, 0, 1, 1], [], []>} : vector<16x64xbf16>, vector<64x128xbf16>, vector<16x128xf32> -> vector<16x128xf32>
    %3 = arith.truncf %2 : vector<16x128xf32> to vector<16x128xbf16>
    %c0_3 = arith.constant 0 : index
    %c0_4 = arith.constant 0 : index
    %4 = vector.load %arg3[%c0_3, %c0_4] : memref<16x128xbf16, #tpu.memory_space<vmem>>, vector<16x128xbf16>
    tpu.vector_store %arg3[%c0_3, %c0_4], %3 {strides = array<i32>} : memref<16x128xbf16, #tpu.memory_space<vmem>>, vector<16x128xbf16>,
    %cst_5 = arith.constant dense<0.000000e+00> : vector<16xf32>
    %5 = vector.multi_reduction <add>, %2, %cst_5 [1] : vector<16x128xf32> to vector<16xf32>
    %6 = vector.shape_cast %5 : vector<16xf32> to vector<16x1xf32>
    %7 = vector.shape_cast %6 : vector<16x1xf32> to vector<1x16x1xf32>
    %c0_6 = arith.constant 0 : index
    %c0_7 = arith.constant 0 : index
    %c0_8 = arith.constant 0 : index
    %8 = vector.load %arg4[%c0_6, %c0_7, %c0_8] : memref<1x16x1xf32, #tpu.memory_space<vmem>>, vector<1x16x1xf32>
    tpu.vector_store %arg4[%c0_6, %c0_7, %c0_8], %7 {strides = array<i32>} : memref<1x16x1xf32, #tpu.memory_space<vmem>>, vector<1x16x1xf32>,
    %9 = arith.mulf %2, %2 : vector<16x128xf32>
    %cst_9 = arith.constant dense<0.000000e+00> : vector<16xf32>
    %10 = vector.multi_reduction <add>, %9, %cst_9 [1] : vector<16x128xf32> to vector<16xf32>
    %11 = vector.shape_cast %10 : vector<16xf32> to vector<16x1xf32>
    %12 = vector.shape_cast %11 : vector<16x1xf32> to vector<1x16x1xf32>
    %c0_10 = arith.constant 0 : index
    %c0_11 = arith.constant 0 : index
    %c0_12 = arith.constant 0 : index
    %13 = vector.load %arg5[%c0_10, %c0_11, %c0_12] : memref<1x16x1xf32, #tpu.memory_space<vmem>>, vector<1x16x1xf32>
    tpu.vector_store %arg5[%c0_10, %c0_11, %c0_12], %12 {strides = array<i32>} : memref<1x16x1xf32, #tpu.memory_space<vmem>>, vector<1x16x1xf32>,
    return
  }
  func.func @transform_0(%arg0: i32) -> (i32, i32) {
    %c0_i32 = arith.constant 0 : i32
    %c0_i32_0 = arith.constant 0 : i32
    %c0_i32_1 = arith.constant 0 : i32
    return %c0_i32, %c0_i32_0 : i32, i32
  }
  func.func @transform_1(%arg0: i32) -> (i32, i32) {
    %c0_i32 = arith.constant 0 : i32
    %c0_i32_0 = arith.constant 0 : i32
    return %c0_i32, %arg0 : i32, i32
  }
  func.func @transform_2(%arg0: i32) -> (i32, i32) {
    %c0_i32 = arith.constant 0 : i32
    %c0_i32_0 = arith.constant 0 : i32
    return %c0_i32, %arg0 : i32, i32
  }
  func.func @transform_3(%arg0: i32) -> (i32, i32, i32) {
    %c0_i32 = arith.constant 0 : i32
    %c0_i32_0 = arith.constant 0 : i32
    %c0_i32_1 = arith.constant 0 : i32
    return %arg0, %c0_i32, %c0_i32_0 : i32, i32, i32
  }
  func.func @transform_4(%arg0: i32) -> (i32, i32, i32) {
    %c0_i32 = arith.constant 0 : i32
    %c0_i32_0 = arith.constant 0 : i32
    %c0_i32_1 = arith.constant 0 : i32
    return %arg0, %c0_i32, %c0_i32_0 : i32, i32, i32
  }
}

module attributes {stable_mosaic.version = 11 : i64} {
  func.func @_bn_act_kernel(%arg0: i32, %arg1: memref<16x128xbf16, #tpu.memory_space<vmem>>, %arg2: memref<16x1xf32, #tpu.memory_space<vmem>>, %arg3: memref<16x1xf32, #tpu.memory_space<vmem>>, %arg4: memref<16x128xbf16, #tpu.memory_space<vmem>>) attributes {dimension_semantics = [#tpu.dimension_semantics<parallel>], iteration_bounds = array<i64: 1>, scalar_prefetch = 0 : i64, scratch_operands = 0 : i64, tpu.core_type = #tpu.core_type<tc>, window_params = [{transform_indices = @transform_0, window_bounds = array<i64: 16, 128>}, {pipeline_mode = #tpu.pipeline_mode<synchronous>, transform_indices = @transform_1, window_bounds = array<i64: 16, 1>}, {pipeline_mode = #tpu.pipeline_mode<synchronous>, transform_indices = @transform_2, window_bounds = array<i64: 16, 1>}, {transform_indices = @transform_3, window_bounds = array<i64: 16, 128>}]} {
    %c0 = arith.constant 0 : index
    %c0_0 = arith.constant 0 : index
    %0 = vector.load %arg1[%c0, %c0_0] : memref<16x128xbf16, #tpu.memory_space<vmem>>, vector<16x128xbf16>
    %1 = arith.extf %0 : vector<16x128xbf16> to vector<16x128xf32>
    %c0_1 = arith.constant 0 : index
    %c0_2 = arith.constant 0 : index
    %2 = vector.load %arg2[%c0_1, %c0_2] : memref<16x1xf32, #tpu.memory_space<vmem>>, vector<16x1xf32>
    %c0_3 = arith.constant 0 : index
    %c0_4 = arith.constant 0 : index
    %3 = vector.load %arg3[%c0_3, %c0_4] : memref<16x1xf32, #tpu.memory_space<vmem>>, vector<16x1xf32>
    %cst = arith.constant 3.125000e-02 : f32
    %4 = vector.broadcast %cst : f32 to vector<16x1xf32>
    %5 = arith.mulf %2, %4 : vector<16x1xf32>
    %cst_5 = arith.constant 3.125000e-02 : f32
    %6 = vector.broadcast %cst_5 : f32 to vector<16x1xf32>
    %7 = arith.mulf %3, %6 : vector<16x1xf32>
    %8 = arith.mulf %5, %5 : vector<16x1xf32>
    %9 = arith.subf %7, %8 : vector<16x1xf32>
    %cst_6 = arith.constant 0.000000e+00 : f32
    %10 = vector.broadcast %cst_6 : f32 to vector<16x1xf32>
    %11 = arith.maximumf %9, %10 : vector<16x1xf32>
    %12 = vector.broadcast %5 : vector<16x1xf32> to vector<16x128xf32>
    %13 = arith.subf %1, %12 : vector<16x128xf32>
    %cst_7 = arith.constant 9.99999974E-6 : f32
    %14 = vector.broadcast %cst_7 : f32 to vector<16x1xf32>
    %15 = arith.addf %11, %14 : vector<16x1xf32>
    %16 = math.rsqrt %15 : vector<16x1xf32>
    %17 = vector.broadcast %16 : vector<16x1xf32> to vector<16x128xf32>
    %18 = arith.mulf %13, %17 : vector<16x128xf32>
    %cst_8 = arith.constant 0.000000e+00 : f32
    %19 = vector.broadcast %cst_8 : f32 to vector<16x128xf32>
    %20 = arith.maximumf %18, %19 : vector<16x128xf32>
    %21 = arith.truncf %20 : vector<16x128xf32> to vector<16x128xbf16>
    %c0_9 = arith.constant 0 : index
    %c0_10 = arith.constant 0 : index
    %22 = vector.load %arg4[%c0_9, %c0_10] : memref<16x128xbf16, #tpu.memory_space<vmem>>, vector<16x128xbf16>
    tpu.vector_store %arg4[%c0_9, %c0_10], %21 {strides = array<i32>} : memref<16x128xbf16, #tpu.memory_space<vmem>>, vector<16x128xbf16>,
    %c0_i32 = arith.constant 0 : i32
    %23 = arith.cmpi eq, %arg0, %c0_i32 : i32
    %24 = arith.extui %23 : i1 to i32
    %c0_i32_11 = arith.constant 0 : i32
    %25 = arith.cmpi ne, %24, %c0_i32_11 : i32
    scf.if %25 {
      %c128_i32 = arith.constant 128 : i32
      %26 = arith.muli %arg0, %c128_i32 : i32
      %27 = tpu.iota {dimensions = array<i32: 1>} : vector<16x128xi32>
      %28 = vector.broadcast %26 : i32 to vector<16x128xi32>
      %29 = arith.addi %28, %27 : vector<16x128xi32>
      %c32_i32 = arith.constant 32 : i32
      %30 = vector.broadcast %c32_i32 : i32 to vector<16x128xi32>
      %31 = arith.cmpi slt, %29, %30 : vector<16x128xi32>
      %cst_12 = arith.constant 0.000000e+00 : f32
      %32 = vector.broadcast %cst_12 : f32 to vector<16x128xf32>
      %33 = arith.select %31, %20, %32 : vector<16x128xi1>, vector<16x128xf32>
      %34 = arith.truncf %33 : vector<16x128xf32> to vector<16x128xbf16>
      %c0_13 = arith.constant 0 : index
      %c0_14 = arith.constant 0 : index
      %35 = vector.load %arg4[%c0_13, %c0_14] : memref<16x128xbf16, #tpu.memory_space<vmem>>, vector<16x128xbf16>
      tpu.vector_store %arg4[%c0_13, %c0_14], %34 {strides = array<i32>} : memref<16x128xbf16, #tpu.memory_space<vmem>>, vector<16x128xbf16>,
    } else {
    }
    return
  }
  func.func @transform_0(%arg0: i32) -> (i32, i32) {
    %c0_i32 = arith.constant 0 : i32
    %c0_i32_0 = arith.constant 0 : i32
    return %c0_i32, %arg0 : i32, i32
  }
  func.func @transform_1(%arg0: i32) -> (i32, i32) {
    %c0_i32 = arith.constant 0 : i32
    %c0_i32_0 = arith.constant 0 : i32
    %c0_i32_1 = arith.constant 0 : i32
    return %c0_i32, %c0_i32_0 : i32, i32
  }
  func.func @transform_2(%arg0: i32) -> (i32, i32) {
    %c0_i32 = arith.constant 0 : i32
    %c0_i32_0 = arith.constant 0 : i32
    %c0_i32_1 = arith.constant 0 : i32
    return %c0_i32, %c0_i32_0 : i32, i32
  }
  func.func @transform_3(%arg0: i32) -> (i32, i32) {
    %c0_i32 = arith.constant 0 : i32
    %c0_i32_0 = arith.constant 0 : i32
    return %c0_i32, %arg0 : i32, i32
  }
}

module attributes {stable_mosaic.version = 11 : i64} {
  func.func @_bn_add_relu_kernel(%arg0: i32, %arg1: memref<64x128xbf16, #tpu.memory_space<vmem>>, %arg2: memref<64x1xf32, #tpu.memory_space<vmem>>, %arg3: memref<64x1xf32, #tpu.memory_space<vmem>>, %arg4: memref<64x128xbf16, #tpu.memory_space<vmem>>, %arg5: memref<64x128xbf16, #tpu.memory_space<vmem>>) attributes {dimension_semantics = [#tpu.dimension_semantics<parallel>], iteration_bounds = array<i64: 1>, scalar_prefetch = 0 : i64, scratch_operands = 0 : i64, tpu.core_type = #tpu.core_type<tc>, window_params = [{transform_indices = @transform_0, window_bounds = array<i64: 64, 128>}, {pipeline_mode = #tpu.pipeline_mode<synchronous>, transform_indices = @transform_1, window_bounds = array<i64: 64, 1>}, {pipeline_mode = #tpu.pipeline_mode<synchronous>, transform_indices = @transform_2, window_bounds = array<i64: 64, 1>}, {transform_indices = @transform_3, window_bounds = array<i64: 64, 128>}, {transform_indices = @transform_4, window_bounds = array<i64: 64, 128>}]} {
    %c0 = arith.constant 0 : index
    %c0_0 = arith.constant 0 : index
    %0 = vector.load %arg1[%c0, %c0_0] : memref<64x128xbf16, #tpu.memory_space<vmem>>, vector<64x128xbf16>
    %1 = arith.extf %0 : vector<64x128xbf16> to vector<64x128xf32>
    %c0_1 = arith.constant 0 : index
    %c0_2 = arith.constant 0 : index
    %2 = vector.load %arg2[%c0_1, %c0_2] : memref<64x1xf32, #tpu.memory_space<vmem>>, vector<64x1xf32>
    %c0_3 = arith.constant 0 : index
    %c0_4 = arith.constant 0 : index
    %3 = vector.load %arg3[%c0_3, %c0_4] : memref<64x1xf32, #tpu.memory_space<vmem>>, vector<64x1xf32>
    %cst = arith.constant 3.125000e-02 : f32
    %4 = vector.broadcast %cst : f32 to vector<64x1xf32>
    %5 = arith.mulf %2, %4 : vector<64x1xf32>
    %cst_5 = arith.constant 3.125000e-02 : f32
    %6 = vector.broadcast %cst_5 : f32 to vector<64x1xf32>
    %7 = arith.mulf %3, %6 : vector<64x1xf32>
    %8 = arith.mulf %5, %5 : vector<64x1xf32>
    %9 = arith.subf %7, %8 : vector<64x1xf32>
    %cst_6 = arith.constant 0.000000e+00 : f32
    %10 = vector.broadcast %cst_6 : f32 to vector<64x1xf32>
    %11 = arith.maximumf %9, %10 : vector<64x1xf32>
    %12 = vector.broadcast %5 : vector<64x1xf32> to vector<64x128xf32>
    %13 = arith.subf %1, %12 : vector<64x128xf32>
    %cst_7 = arith.constant 9.99999974E-6 : f32
    %14 = vector.broadcast %cst_7 : f32 to vector<64x1xf32>
    %15 = arith.addf %11, %14 : vector<64x1xf32>
    %16 = math.rsqrt %15 : vector<64x1xf32>
    %17 = vector.broadcast %16 : vector<64x1xf32> to vector<64x128xf32>
    %18 = arith.mulf %13, %17 : vector<64x128xf32>
    %c0_8 = arith.constant 0 : index
    %c0_9 = arith.constant 0 : index
    %19 = vector.load %arg4[%c0_8, %c0_9] : memref<64x128xbf16, #tpu.memory_space<vmem>>, vector<64x128xbf16>
    %20 = arith.extf %19 : vector<64x128xbf16> to vector<64x128xf32>
    %21 = arith.addf %18, %20 : vector<64x128xf32>
    %cst_10 = arith.constant 0.000000e+00 : f32
    %22 = vector.broadcast %cst_10 : f32 to vector<64x128xf32>
    %23 = arith.maximumf %21, %22 : vector<64x128xf32>
    %24 = arith.truncf %23 : vector<64x128xf32> to vector<64x128xbf16>
    %c0_11 = arith.constant 0 : index
    %c0_12 = arith.constant 0 : index
    %25 = vector.load %arg5[%c0_11, %c0_12] : memref<64x128xbf16, #tpu.memory_space<vmem>>, vector<64x128xbf16>
    tpu.vector_store %arg5[%c0_11, %c0_12], %24 {strides = array<i32>} : memref<64x128xbf16, #tpu.memory_space<vmem>>, vector<64x128xbf16>,
    %c0_i32 = arith.constant 0 : i32
    %26 = arith.cmpi eq, %arg0, %c0_i32 : i32
    %27 = arith.extui %26 : i1 to i32
    %c0_i32_13 = arith.constant 0 : i32
    %28 = arith.cmpi ne, %27, %c0_i32_13 : i32
    scf.if %28 {
      %c128_i32 = arith.constant 128 : i32
      %29 = arith.muli %arg0, %c128_i32 : i32
      %30 = tpu.iota {dimensions = array<i32: 1>} : vector<64x128xi32>
      %31 = vector.broadcast %29 : i32 to vector<64x128xi32>
      %32 = arith.addi %31, %30 : vector<64x128xi32>
      %c32_i32 = arith.constant 32 : i32
      %33 = vector.broadcast %c32_i32 : i32 to vector<64x128xi32>
      %34 = arith.cmpi slt, %32, %33 : vector<64x128xi32>
      %cst_14 = arith.constant 0.000000e+00 : f32
      %35 = vector.broadcast %cst_14 : f32 to vector<64x128xf32>
      %36 = arith.select %34, %23, %35 : vector<64x128xi1>, vector<64x128xf32>
      %37 = arith.truncf %36 : vector<64x128xf32> to vector<64x128xbf16>
      %c0_15 = arith.constant 0 : index
      %c0_16 = arith.constant 0 : index
      %38 = vector.load %arg5[%c0_15, %c0_16] : memref<64x128xbf16, #tpu.memory_space<vmem>>, vector<64x128xbf16>
      tpu.vector_store %arg5[%c0_15, %c0_16], %37 {strides = array<i32>} : memref<64x128xbf16, #tpu.memory_space<vmem>>, vector<64x128xbf16>,
    } else {
    }
    return
  }
  func.func @transform_0(%arg0: i32) -> (i32, i32) {
    %c0_i32 = arith.constant 0 : i32
    %c0_i32_0 = arith.constant 0 : i32
    return %c0_i32, %arg0 : i32, i32
  }
  func.func @transform_1(%arg0: i32) -> (i32, i32) {
    %c0_i32 = arith.constant 0 : i32
    %c0_i32_0 = arith.constant 0 : i32
    %c0_i32_1 = arith.constant 0 : i32
    return %c0_i32, %c0_i32_0 : i32, i32
  }
  func.func @transform_2(%arg0: i32) -> (i32, i32) {
    %c0_i32 = arith.constant 0 : i32
    %c0_i32_0 = arith.constant 0 : i32
    %c0_i32_1 = arith.constant 0 : i32
    return %c0_i32, %c0_i32_0 : i32, i32
  }
  func.func @transform_3(%arg0: i32) -> (i32, i32) {
    %c0_i32 = arith.constant 0 : i32
    %c0_i32_0 = arith.constant 0 : i32
    return %c0_i32, %arg0 : i32, i32
  }
  func.func @transform_4(%arg0: i32) -> (i32, i32) {
    %c0_i32 = arith.constant 0 : i32
    %c0_i32_0 = arith.constant 0 : i32
    return %c0_i32, %arg0 : i32, i32
  }
}

module attributes {stable_mosaic.version = 11 : i64} {
  func.func @_conv_stats_kernel(%arg0: i32, %arg1: memref<24x64xbf16, #tpu.memory_space<vmem>>, %arg2: memref<64x128xbf16, #tpu.memory_space<vmem>>, %arg3: memref<24x128xbf16, #tpu.memory_space<vmem>>, %arg4: memref<1x24x1xf32, #tpu.memory_space<vmem>>, %arg5: memref<1x24x1xf32, #tpu.memory_space<vmem>>) attributes {dimension_semantics = [#tpu.dimension_semantics<parallel>], iteration_bounds = array<i64: 1>, scalar_prefetch = 0 : i64, scratch_operands = 0 : i64, tpu.core_type = #tpu.core_type<tc>, window_params = [{pipeline_mode = #tpu.pipeline_mode<synchronous>, transform_indices = @transform_0, window_bounds = array<i64: 24, 64>}, {transform_indices = @transform_1, window_bounds = array<i64: 64, 128>}, {transform_indices = @transform_2, window_bounds = array<i64: 24, 128>}, {transform_indices = @transform_3, window_bounds = array<i64: 1, 24, 1>}, {transform_indices = @transform_4, window_bounds = array<i64: 1, 24, 1>}]} {
    %c0 = arith.constant 0 : index
    %c0_0 = arith.constant 0 : index
    %0 = vector.load %arg1[%c0, %c0_0] : memref<24x64xbf16, #tpu.memory_space<vmem>>, vector<24x64xbf16>
    %c0_1 = arith.constant 0 : index
    %c0_2 = arith.constant 0 : index
    %1 = vector.load %arg2[%c0_1, %c0_2] : memref<64x128xbf16, #tpu.memory_space<vmem>>, vector<64x128xbf16>
    %cst = arith.constant dense<0.000000e+00> : vector<24x128xf32>
    %2 = tpu.matmul %0, %1, %cst {dimension_numbers = #tpu.dot_dimension_numbers<[1], [0], [0], [1], [0, 0, 1, 1], [], []>} : vector<24x64xbf16>, vector<64x128xbf16>, vector<24x128xf32> -> vector<24x128xf32>
    %3 = arith.truncf %2 : vector<24x128xf32> to vector<24x128xbf16>
    %c0_3 = arith.constant 0 : index
    %c0_4 = arith.constant 0 : index
    %4 = vector.load %arg3[%c0_3, %c0_4] : memref<24x128xbf16, #tpu.memory_space<vmem>>, vector<24x128xbf16>
    tpu.vector_store %arg3[%c0_3, %c0_4], %3 {strides = array<i32>} : memref<24x128xbf16, #tpu.memory_space<vmem>>, vector<24x128xbf16>,
    %cst_5 = arith.constant dense<0.000000e+00> : vector<24xf32>
    %5 = vector.multi_reduction <add>, %2, %cst_5 [1] : vector<24x128xf32> to vector<24xf32>
    %6 = vector.shape_cast %5 : vector<24xf32> to vector<24x1xf32>
    %7 = vector.shape_cast %6 : vector<24x1xf32> to vector<1x24x1xf32>
    %c0_6 = arith.constant 0 : index
    %c0_7 = arith.constant 0 : index
    %c0_8 = arith.constant 0 : index
    %8 = vector.load %arg4[%c0_6, %c0_7, %c0_8] : memref<1x24x1xf32, #tpu.memory_space<vmem>>, vector<1x24x1xf32>
    tpu.vector_store %arg4[%c0_6, %c0_7, %c0_8], %7 {strides = array<i32>} : memref<1x24x1xf32, #tpu.memory_space<vmem>>, vector<1x24x1xf32>,
    %9 = arith.mulf %2, %2 : vector<24x128xf32>
    %cst_9 = arith.constant dense<0.000000e+00> : vector<24xf32>
    %10 = vector.multi_reduction <add>, %9, %cst_9 [1] : vector<24x128xf32> to vector<24xf32>
    %11 = vector.shape_cast %10 : vector<24xf32> to vector<24x1xf32>
    %12 = vector.shape_cast %11 : vector<24x1xf32> to vector<1x24x1xf32>
    %c0_10 = arith.constant 0 : index
    %c0_11 = arith.constant 0 : index
    %c0_12 = arith.constant 0 : index
    %13 = vector.load %arg5[%c0_10, %c0_11, %c0_12] : memref<1x24x1xf32, #tpu.memory_space<vmem>>, vector<1x24x1xf32>
    tpu.vector_store %arg5[%c0_10, %c0_11, %c0_12], %12 {strides = array<i32>} : memref<1x24x1xf32, #tpu.memory_space<vmem>>, vector<1x24x1xf32>,
    return
  }
  func.func @transform_0(%arg0: i32) -> (i32, i32) {
    %c0_i32 = arith.constant 0 : i32
    %c0_i32_0 = arith.constant 0 : i32
    %c0_i32_1 = arith.constant 0 : i32
    return %c0_i32, %c0_i32_0 : i32, i32
  }
  func.func @transform_1(%arg0: i32) -> (i32, i32) {
    %c0_i32 = arith.constant 0 : i32
    %c0_i32_0 = arith.constant 0 : i32
    return %c0_i32, %arg0 : i32, i32
  }
  func.func @transform_2(%arg0: i32) -> (i32, i32) {
    %c0_i32 = arith.constant 0 : i32
    %c0_i32_0 = arith.constant 0 : i32
    return %c0_i32, %arg0 : i32, i32
  }
  func.func @transform_3(%arg0: i32) -> (i32, i32, i32) {
    %c0_i32 = arith.constant 0 : i32
    %c0_i32_0 = arith.constant 0 : i32
    %c0_i32_1 = arith.constant 0 : i32
    return %arg0, %c0_i32, %c0_i32_0 : i32, i32, i32
  }
  func.func @transform_4(%arg0: i32) -> (i32, i32, i32) {
    %c0_i32 = arith.constant 0 : i32
    %c0_i32_0 = arith.constant 0 : i32
    %c0_i32_1 = arith.constant 0 : i32
    return %arg0, %c0_i32, %c0_i32_0 : i32, i32, i32
  }
}

module attributes {stable_mosaic.version = 11 : i64} {
  func.func @_bn_act_kernel(%arg0: i32, %arg1: memref<24x128xbf16, #tpu.memory_space<vmem>>, %arg2: memref<24x1xf32, #tpu.memory_space<vmem>>, %arg3: memref<24x1xf32, #tpu.memory_space<vmem>>, %arg4: memref<24x128xbf16, #tpu.memory_space<vmem>>) attributes {dimension_semantics = [#tpu.dimension_semantics<parallel>], iteration_bounds = array<i64: 1>, scalar_prefetch = 0 : i64, scratch_operands = 0 : i64, tpu.core_type = #tpu.core_type<tc>, window_params = [{transform_indices = @transform_0, window_bounds = array<i64: 24, 128>}, {pipeline_mode = #tpu.pipeline_mode<synchronous>, transform_indices = @transform_1, window_bounds = array<i64: 24, 1>}, {pipeline_mode = #tpu.pipeline_mode<synchronous>, transform_indices = @transform_2, window_bounds = array<i64: 24, 1>}, {transform_indices = @transform_3, window_bounds = array<i64: 24, 128>}]} {
    %c0 = arith.constant 0 : index
    %c0_0 = arith.constant 0 : index
    %0 = vector.load %arg1[%c0, %c0_0] : memref<24x128xbf16, #tpu.memory_space<vmem>>, vector<24x128xbf16>
    %1 = arith.extf %0 : vector<24x128xbf16> to vector<24x128xf32>
    %c0_1 = arith.constant 0 : index
    %c0_2 = arith.constant 0 : index
    %2 = vector.load %arg2[%c0_1, %c0_2] : memref<24x1xf32, #tpu.memory_space<vmem>>, vector<24x1xf32>
    %c0_3 = arith.constant 0 : index
    %c0_4 = arith.constant 0 : index
    %3 = vector.load %arg3[%c0_3, %c0_4] : memref<24x1xf32, #tpu.memory_space<vmem>>, vector<24x1xf32>
    %cst = arith.constant 3.125000e-02 : f32
    %4 = vector.broadcast %cst : f32 to vector<24x1xf32>
    %5 = arith.mulf %2, %4 : vector<24x1xf32>
    %cst_5 = arith.constant 3.125000e-02 : f32
    %6 = vector.broadcast %cst_5 : f32 to vector<24x1xf32>
    %7 = arith.mulf %3, %6 : vector<24x1xf32>
    %8 = arith.mulf %5, %5 : vector<24x1xf32>
    %9 = arith.subf %7, %8 : vector<24x1xf32>
    %cst_6 = arith.constant 0.000000e+00 : f32
    %10 = vector.broadcast %cst_6 : f32 to vector<24x1xf32>
    %11 = arith.maximumf %9, %10 : vector<24x1xf32>
    %12 = vector.broadcast %5 : vector<24x1xf32> to vector<24x128xf32>
    %13 = arith.subf %1, %12 : vector<24x128xf32>
    %cst_7 = arith.constant 9.99999974E-6 : f32
    %14 = vector.broadcast %cst_7 : f32 to vector<24x1xf32>
    %15 = arith.addf %11, %14 : vector<24x1xf32>
    %16 = math.rsqrt %15 : vector<24x1xf32>
    %17 = vector.broadcast %16 : vector<24x1xf32> to vector<24x128xf32>
    %18 = arith.mulf %13, %17 : vector<24x128xf32>
    %cst_8 = arith.constant 0.000000e+00 : f32
    %19 = vector.broadcast %cst_8 : f32 to vector<24x128xf32>
    %20 = arith.maximumf %18, %19 : vector<24x128xf32>
    %21 = arith.truncf %20 : vector<24x128xf32> to vector<24x128xbf16>
    %c0_9 = arith.constant 0 : index
    %c0_10 = arith.constant 0 : index
    %22 = vector.load %arg4[%c0_9, %c0_10] : memref<24x128xbf16, #tpu.memory_space<vmem>>, vector<24x128xbf16>
    tpu.vector_store %arg4[%c0_9, %c0_10], %21 {strides = array<i32>} : memref<24x128xbf16, #tpu.memory_space<vmem>>, vector<24x128xbf16>,
    %c0_i32 = arith.constant 0 : i32
    %23 = arith.cmpi eq, %arg0, %c0_i32 : i32
    %24 = arith.extui %23 : i1 to i32
    %c0_i32_11 = arith.constant 0 : i32
    %25 = arith.cmpi ne, %24, %c0_i32_11 : i32
    scf.if %25 {
      %c128_i32 = arith.constant 128 : i32
      %26 = arith.muli %arg0, %c128_i32 : i32
      %27 = tpu.iota {dimensions = array<i32: 1>} : vector<24x128xi32>
      %28 = vector.broadcast %26 : i32 to vector<24x128xi32>
      %29 = arith.addi %28, %27 : vector<24x128xi32>
      %c32_i32 = arith.constant 32 : i32
      %30 = vector.broadcast %c32_i32 : i32 to vector<24x128xi32>
      %31 = arith.cmpi slt, %29, %30 : vector<24x128xi32>
      %cst_12 = arith.constant 0.000000e+00 : f32
      %32 = vector.broadcast %cst_12 : f32 to vector<24x128xf32>
      %33 = arith.select %31, %20, %32 : vector<24x128xi1>, vector<24x128xf32>
      %34 = arith.truncf %33 : vector<24x128xf32> to vector<24x128xbf16>
      %c0_13 = arith.constant 0 : index
      %c0_14 = arith.constant 0 : index
      %35 = vector.load %arg4[%c0_13, %c0_14] : memref<24x128xbf16, #tpu.memory_space<vmem>>, vector<24x128xbf16>
      tpu.vector_store %arg4[%c0_13, %c0_14], %34 {strides = array<i32>} : memref<24x128xbf16, #tpu.memory_space<vmem>>, vector<24x128xbf16>,
    } else {
    }
    return
  }
  func.func @transform_0(%arg0: i32) -> (i32, i32) {
    %c0_i32 = arith.constant 0 : i32
    %c0_i32_0 = arith.constant 0 : i32
    return %c0_i32, %arg0 : i32, i32
  }
  func.func @transform_1(%arg0: i32) -> (i32, i32) {
    %c0_i32 = arith.constant 0 : i32
    %c0_i32_0 = arith.constant 0 : i32
    %c0_i32_1 = arith.constant 0 : i32
    return %c0_i32, %c0_i32_0 : i32, i32
  }
  func.func @transform_2(%arg0: i32) -> (i32, i32) {
    %c0_i32 = arith.constant 0 : i32
    %c0_i32_0 = arith.constant 0 : i32
    %c0_i32_1 = arith.constant 0 : i32
    return %c0_i32, %c0_i32_0 : i32, i32
  }
  func.func @transform_3(%arg0: i32) -> (i32, i32) {
    %c0_i32 = arith.constant 0 : i32
    %c0_i32_0 = arith.constant 0 : i32
    return %c0_i32, %arg0 : i32, i32
  }
}

module attributes {stable_mosaic.version = 11 : i64} {
  func.func @_bnrelu_conv_stats_kernel(%arg0: i32, %arg1: memref<96x24xbf16, #tpu.memory_space<vmem>>, %arg2: memref<24x128xbf16, #tpu.memory_space<vmem>>, %arg3: memref<24x1xf32, #tpu.memory_space<vmem>>, %arg4: memref<24x1xf32, #tpu.memory_space<vmem>>, %arg5: memref<96x128xbf16, #tpu.memory_space<vmem>>, %arg6: memref<1x96x1xf32, #tpu.memory_space<vmem>>, %arg7: memref<1x96x1xf32, #tpu.memory_space<vmem>>) attributes {dimension_semantics = [#tpu.dimension_semantics<parallel>], iteration_bounds = array<i64: 1>, scalar_prefetch = 0 : i64, scratch_operands = 0 : i64, tpu.core_type = #tpu.core_type<tc>, window_params = [{pipeline_mode = #tpu.pipeline_mode<synchronous>, transform_indices = @transform_0, window_bounds = array<i64: 96, 24>}, {transform_indices = @transform_1, window_bounds = array<i64: 24, 128>}, {pipeline_mode = #tpu.pipeline_mode<synchronous>, transform_indices = @transform_2, window_bounds = array<i64: 24, 1>}, {pipeline_mode = #tpu.pipeline_mode<synchronous>, transform_indices = @transform_3, window_bounds = array<i64: 24, 1>}, {transform_indices = @transform_4, window_bounds = array<i64: 96, 128>}, {transform_indices = @transform_5, window_bounds = array<i64: 1, 96, 1>}, {transform_indices = @transform_6, window_bounds = array<i64: 1, 96, 1>}]} {
    %c0 = arith.constant 0 : index
    %c0_0 = arith.constant 0 : index
    %0 = vector.load %arg2[%c0, %c0_0] : memref<24x128xbf16, #tpu.memory_space<vmem>>, vector<24x128xbf16>
    %1 = arith.extf %0 : vector<24x128xbf16> to vector<24x128xf32>
    %c0_1 = arith.constant 0 : index
    %c0_2 = arith.constant 0 : index
    %2 = vector.load %arg3[%c0_1, %c0_2] : memref<24x1xf32, #tpu.memory_space<vmem>>, vector<24x1xf32>
    %c0_3 = arith.constant 0 : index
    %c0_4 = arith.constant 0 : index
    %3 = vector.load %arg4[%c0_3, %c0_4] : memref<24x1xf32, #tpu.memory_space<vmem>>, vector<24x1xf32>
    %cst = arith.constant 1.250000e-01 : f32
    %4 = vector.broadcast %cst : f32 to vector<24x1xf32>
    %5 = arith.mulf %2, %4 : vector<24x1xf32>
    %cst_5 = arith.constant 1.250000e-01 : f32
    %6 = vector.broadcast %cst_5 : f32 to vector<24x1xf32>
    %7 = arith.mulf %3, %6 : vector<24x1xf32>
    %8 = arith.mulf %5, %5 : vector<24x1xf32>
    %9 = arith.subf %7, %8 : vector<24x1xf32>
    %cst_6 = arith.constant 0.000000e+00 : f32
    %10 = vector.broadcast %cst_6 : f32 to vector<24x1xf32>
    %11 = arith.maximumf %9, %10 : vector<24x1xf32>
    %12 = vector.broadcast %5 : vector<24x1xf32> to vector<24x128xf32>
    %13 = arith.subf %1, %12 : vector<24x128xf32>
    %cst_7 = arith.constant 9.99999974E-6 : f32
    %14 = vector.broadcast %cst_7 : f32 to vector<24x1xf32>
    %15 = arith.addf %11, %14 : vector<24x1xf32>
    %16 = math.rsqrt %15 : vector<24x1xf32>
    %17 = vector.broadcast %16 : vector<24x1xf32> to vector<24x128xf32>
    %18 = arith.mulf %13, %17 : vector<24x128xf32>
    %cst_8 = arith.constant 0.000000e+00 : f32
    %19 = vector.broadcast %cst_8 : f32 to vector<24x128xf32>
    %20 = arith.maximumf %18, %19 : vector<24x128xf32>
    %c0_i32 = arith.constant 0 : i32
    %21 = arith.cmpi eq, %arg0, %c0_i32 : i32
    %c128_i32 = arith.constant 128 : i32
    %22 = arith.muli %arg0, %c128_i32 : i32
    %23 = tpu.iota {dimensions = array<i32: 1>} : vector<24x128xi32>
    %24 = vector.broadcast %22 : i32 to vector<24x128xi32>
    %25 = arith.addi %24, %23 : vector<24x128xi32>
    %c8_i32 = arith.constant 8 : i32
    %26 = vector.broadcast %c8_i32 : i32 to vector<24x128xi32>
    %27 = arith.cmpi slt, %25, %26 : vector<24x128xi32>
    %cst_9 = arith.constant 0.000000e+00 : f32
    %28 = vector.broadcast %cst_9 : f32 to vector<24x128xf32>
    %29 = arith.select %27, %20, %28 : vector<24x128xi1>, vector<24x128xf32>
    %30 = arith.select %21, %29, %20 : vector<24x128xf32>
    %c0_10 = arith.constant 0 : index
    %c0_11 = arith.constant 0 : index
    %31 = vector.load %arg1[%c0_10, %c0_11] : memref<96x24xbf16, #tpu.memory_space<vmem>>, vector<96x24xbf16>
    %32 = arith.truncf %30 : vector<24x128xf32> to vector<24x128xbf16>
    %cst_12 = arith.constant dense<0.000000e+00> : vector<96x128xf32>
    %33 = tpu.matmul %31, %32, %cst_12 {dimension_numbers = #tpu.dot_dimension_numbers<[1], [0], [0], [1], [0, 0, 1, 1], [], []>} : vector<96x24xbf16>, vector<24x128xbf16>, vector<96x128xf32> -> vector<96x128xf32>
    %34 = arith.truncf %33 : vector<96x128xf32> to vector<96x128xbf16>
    %c0_13 = arith.constant 0 : index
    %c0_14 = arith.constant 0 : index
    %35 = vector.load %arg5[%c0_13, %c0_14] : memref<96x128xbf16, #tpu.memory_space<vmem>>, vector<96x128xbf16>
    tpu.vector_store %arg5[%c0_13, %c0_14], %34 {strides = array<i32>} : memref<96x128xbf16, #tpu.memory_space<vmem>>, vector<96x128xbf16>,
    %cst_15 = arith.constant dense<0.000000e+00> : vector<96xf32>
    %36 = vector.multi_reduction <add>, %33, %cst_15 [1] : vector<96x128xf32> to vector<96xf32>
    %37 = vector.shape_cast %36 : vector<96xf32> to vector<96x1xf32>
    %38 = vector.shape_cast %37 : vector<96x1xf32> to vector<1x96x1xf32>
    %c0_16 = arith.constant 0 : index
    %c0_17 = arith.constant 0 : index
    %c0_18 = arith.constant 0 : index
    %39 = vector.load %arg6[%c0_16, %c0_17, %c0_18] : memref<1x96x1xf32, #tpu.memory_space<vmem>>, vector<1x96x1xf32>
    tpu.vector_store %arg6[%c0_16, %c0_17, %c0_18], %38 {strides = array<i32>} : memref<1x96x1xf32, #tpu.memory_space<vmem>>, vector<1x96x1xf32>,
    %40 = arith.mulf %33, %33 : vector<96x128xf32>
    %cst_19 = arith.constant dense<0.000000e+00> : vector<96xf32>
    %41 = vector.multi_reduction <add>, %40, %cst_19 [1] : vector<96x128xf32> to vector<96xf32>
    %42 = vector.shape_cast %41 : vector<96xf32> to vector<96x1xf32>
    %43 = vector.shape_cast %42 : vector<96x1xf32> to vector<1x96x1xf32>
    %c0_20 = arith.constant 0 : index
    %c0_21 = arith.constant 0 : index
    %c0_22 = arith.constant 0 : index
    %44 = vector.load %arg7[%c0_20, %c0_21, %c0_22] : memref<1x96x1xf32, #tpu.memory_space<vmem>>, vector<1x96x1xf32>
    tpu.vector_store %arg7[%c0_20, %c0_21, %c0_22], %43 {strides = array<i32>} : memref<1x96x1xf32, #tpu.memory_space<vmem>>, vector<1x96x1xf32>,
    return
  }
  func.func @transform_0(%arg0: i32) -> (i32, i32) {
    %c0_i32 = arith.constant 0 : i32
    %c0_i32_0 = arith.constant 0 : i32
    %c0_i32_1 = arith.constant 0 : i32
    return %c0_i32, %c0_i32_0 : i32, i32
  }
  func.func @transform_1(%arg0: i32) -> (i32, i32) {
    %c0_i32 = arith.constant 0 : i32
    %c0_i32_0 = arith.constant 0 : i32
    return %c0_i32, %arg0 : i32, i32
  }
  func.func @transform_2(%arg0: i32) -> (i32, i32) {
    %c0_i32 = arith.constant 0 : i32
    %c0_i32_0 = arith.constant 0 : i32
    %c0_i32_1 = arith.constant 0 : i32
    return %c0_i32, %c0_i32_0 : i32, i32
  }
  func.func @transform_3(%arg0: i32) -> (i32, i32) {
    %c0_i32 = arith.constant 0 : i32
    %c0_i32_0 = arith.constant 0 : i32
    %c0_i32_1 = arith.constant 0 : i32
    return %c0_i32, %c0_i32_0 : i32, i32
  }
  func.func @transform_4(%arg0: i32) -> (i32, i32) {
    %c0_i32 = arith.constant 0 : i32
    %c0_i32_0 = arith.constant 0 : i32
    return %c0_i32, %arg0 : i32, i32
  }
  func.func @transform_5(%arg0: i32) -> (i32, i32, i32) {
    %c0_i32 = arith.constant 0 : i32
    %c0_i32_0 = arith.constant 0 : i32
    %c0_i32_1 = arith.constant 0 : i32
    return %arg0, %c0_i32, %c0_i32_0 : i32, i32, i32
  }
  func.func @transform_6(%arg0: i32) -> (i32, i32, i32) {
    %c0_i32 = arith.constant 0 : i32
    %c0_i32_0 = arith.constant 0 : i32
    %c0_i32_1 = arith.constant 0 : i32
    return %arg0, %c0_i32, %c0_i32_0 : i32, i32, i32
  }
}

module attributes {stable_mosaic.version = 11 : i64} {
  func.func @_conv_stats_kernel(%arg0: i32, %arg1: memref<96x64xbf16, #tpu.memory_space<vmem>>, %arg2: memref<64x128xbf16, #tpu.memory_space<vmem>>, %arg3: memref<96x128xbf16, #tpu.memory_space<vmem>>, %arg4: memref<1x96x1xf32, #tpu.memory_space<vmem>>, %arg5: memref<1x96x1xf32, #tpu.memory_space<vmem>>) attributes {dimension_semantics = [#tpu.dimension_semantics<parallel>], iteration_bounds = array<i64: 1>, scalar_prefetch = 0 : i64, scratch_operands = 0 : i64, tpu.core_type = #tpu.core_type<tc>, window_params = [{pipeline_mode = #tpu.pipeline_mode<synchronous>, transform_indices = @transform_0, window_bounds = array<i64: 96, 64>}, {transform_indices = @transform_1, window_bounds = array<i64: 64, 128>}, {transform_indices = @transform_2, window_bounds = array<i64: 96, 128>}, {transform_indices = @transform_3, window_bounds = array<i64: 1, 96, 1>}, {transform_indices = @transform_4, window_bounds = array<i64: 1, 96, 1>}]} {
    %c0 = arith.constant 0 : index
    %c0_0 = arith.constant 0 : index
    %0 = vector.load %arg1[%c0, %c0_0] : memref<96x64xbf16, #tpu.memory_space<vmem>>, vector<96x64xbf16>
    %c0_1 = arith.constant 0 : index
    %c0_2 = arith.constant 0 : index
    %1 = vector.load %arg2[%c0_1, %c0_2] : memref<64x128xbf16, #tpu.memory_space<vmem>>, vector<64x128xbf16>
    %cst = arith.constant dense<0.000000e+00> : vector<96x128xf32>
    %2 = tpu.matmul %0, %1, %cst {dimension_numbers = #tpu.dot_dimension_numbers<[1], [0], [0], [1], [0, 0, 1, 1], [], []>} : vector<96x64xbf16>, vector<64x128xbf16>, vector<96x128xf32> -> vector<96x128xf32>
    %3 = arith.truncf %2 : vector<96x128xf32> to vector<96x128xbf16>
    %c0_3 = arith.constant 0 : index
    %c0_4 = arith.constant 0 : index
    %4 = vector.load %arg3[%c0_3, %c0_4] : memref<96x128xbf16, #tpu.memory_space<vmem>>, vector<96x128xbf16>
    tpu.vector_store %arg3[%c0_3, %c0_4], %3 {strides = array<i32>} : memref<96x128xbf16, #tpu.memory_space<vmem>>, vector<96x128xbf16>,
    %cst_5 = arith.constant dense<0.000000e+00> : vector<96xf32>
    %5 = vector.multi_reduction <add>, %2, %cst_5 [1] : vector<96x128xf32> to vector<96xf32>
    %6 = vector.shape_cast %5 : vector<96xf32> to vector<96x1xf32>
    %7 = vector.shape_cast %6 : vector<96x1xf32> to vector<1x96x1xf32>
    %c0_6 = arith.constant 0 : index
    %c0_7 = arith.constant 0 : index
    %c0_8 = arith.constant 0 : index
    %8 = vector.load %arg4[%c0_6, %c0_7, %c0_8] : memref<1x96x1xf32, #tpu.memory_space<vmem>>, vector<1x96x1xf32>
    tpu.vector_store %arg4[%c0_6, %c0_7, %c0_8], %7 {strides = array<i32>} : memref<1x96x1xf32, #tpu.memory_space<vmem>>, vector<1x96x1xf32>,
    %9 = arith.mulf %2, %2 : vector<96x128xf32>
    %cst_9 = arith.constant dense<0.000000e+00> : vector<96xf32>
    %10 = vector.multi_reduction <add>, %9, %cst_9 [1] : vector<96x128xf32> to vector<96xf32>
    %11 = vector.shape_cast %10 : vector<96xf32> to vector<96x1xf32>
    %12 = vector.shape_cast %11 : vector<96x1xf32> to vector<1x96x1xf32>
    %c0_10 = arith.constant 0 : index
    %c0_11 = arith.constant 0 : index
    %c0_12 = arith.constant 0 : index
    %13 = vector.load %arg5[%c0_10, %c0_11, %c0_12] : memref<1x96x1xf32, #tpu.memory_space<vmem>>, vector<1x96x1xf32>
    tpu.vector_store %arg5[%c0_10, %c0_11, %c0_12], %12 {strides = array<i32>} : memref<1x96x1xf32, #tpu.memory_space<vmem>>, vector<1x96x1xf32>,
    return
  }
  func.func @transform_0(%arg0: i32) -> (i32, i32) {
    %c0_i32 = arith.constant 0 : i32
    %c0_i32_0 = arith.constant 0 : i32
    %c0_i32_1 = arith.constant 0 : i32
    return %c0_i32, %c0_i32_0 : i32, i32
  }
  func.func @transform_1(%arg0: i32) -> (i32, i32) {
    %c0_i32 = arith.constant 0 : i32
    %c0_i32_0 = arith.constant 0 : i32
    return %c0_i32, %arg0 : i32, i32
  }
  func.func @transform_2(%arg0: i32) -> (i32, i32) {
    %c0_i32 = arith.constant 0 : i32
    %c0_i32_0 = arith.constant 0 : i32
    return %c0_i32, %arg0 : i32, i32
  }
  func.func @transform_3(%arg0: i32) -> (i32, i32, i32) {
    %c0_i32 = arith.constant 0 : i32
    %c0_i32_0 = arith.constant 0 : i32
    %c0_i32_1 = arith.constant 0 : i32
    return %arg0, %c0_i32, %c0_i32_0 : i32, i32, i32
  }
  func.func @transform_4(%arg0: i32) -> (i32, i32, i32) {
    %c0_i32 = arith.constant 0 : i32
    %c0_i32_0 = arith.constant 0 : i32
    %c0_i32_1 = arith.constant 0 : i32
    return %arg0, %c0_i32, %c0_i32_0 : i32, i32, i32
  }
}

module attributes {stable_mosaic.version = 11 : i64} {
  func.func @_conv_stats_kernel(%arg0: i32, %arg1: memref<24x216xbf16, #tpu.memory_space<vmem>>, %arg2: memref<216x128xbf16, #tpu.memory_space<vmem>>, %arg3: memref<24x128xbf16, #tpu.memory_space<vmem>>, %arg4: memref<1x24x1xf32, #tpu.memory_space<vmem>>, %arg5: memref<1x24x1xf32, #tpu.memory_space<vmem>>) attributes {dimension_semantics = [#tpu.dimension_semantics<parallel>], iteration_bounds = array<i64: 1>, scalar_prefetch = 0 : i64, scratch_operands = 0 : i64, tpu.core_type = #tpu.core_type<tc>, window_params = [{pipeline_mode = #tpu.pipeline_mode<synchronous>, transform_indices = @transform_0, window_bounds = array<i64: 24, 216>}, {transform_indices = @transform_1, window_bounds = array<i64: 216, 128>}, {transform_indices = @transform_2, window_bounds = array<i64: 24, 128>}, {transform_indices = @transform_3, window_bounds = array<i64: 1, 24, 1>}, {transform_indices = @transform_4, window_bounds = array<i64: 1, 24, 1>}]} {
    %c0 = arith.constant 0 : index
    %c0_0 = arith.constant 0 : index
    %0 = vector.load %arg1[%c0, %c0_0] : memref<24x216xbf16, #tpu.memory_space<vmem>>, vector<24x216xbf16>
    %c0_1 = arith.constant 0 : index
    %c0_2 = arith.constant 0 : index
    %1 = vector.load %arg2[%c0_1, %c0_2] : memref<216x128xbf16, #tpu.memory_space<vmem>>, vector<216x128xbf16>
    %cst = arith.constant dense<0.000000e+00> : vector<24x128xf32>
    %2 = tpu.matmul %0, %1, %cst {dimension_numbers = #tpu.dot_dimension_numbers<[1], [0], [0], [1], [0, 0, 1, 1], [], []>} : vector<24x216xbf16>, vector<216x128xbf16>, vector<24x128xf32> -> vector<24x128xf32>
    %3 = arith.truncf %2 : vector<24x128xf32> to vector<24x128xbf16>
    %c0_3 = arith.constant 0 : index
    %c0_4 = arith.constant 0 : index
    %4 = vector.load %arg3[%c0_3, %c0_4] : memref<24x128xbf16, #tpu.memory_space<vmem>>, vector<24x128xbf16>
    tpu.vector_store %arg3[%c0_3, %c0_4], %3 {strides = array<i32>} : memref<24x128xbf16, #tpu.memory_space<vmem>>, vector<24x128xbf16>,
    %cst_5 = arith.constant dense<0.000000e+00> : vector<24xf32>
    %5 = vector.multi_reduction <add>, %2, %cst_5 [1] : vector<24x128xf32> to vector<24xf32>
    %6 = vector.shape_cast %5 : vector<24xf32> to vector<24x1xf32>
    %7 = vector.shape_cast %6 : vector<24x1xf32> to vector<1x24x1xf32>
    %c0_6 = arith.constant 0 : index
    %c0_7 = arith.constant 0 : index
    %c0_8 = arith.constant 0 : index
    %8 = vector.load %arg4[%c0_6, %c0_7, %c0_8] : memref<1x24x1xf32, #tpu.memory_space<vmem>>, vector<1x24x1xf32>
    tpu.vector_store %arg4[%c0_6, %c0_7, %c0_8], %7 {strides = array<i32>} : memref<1x24x1xf32, #tpu.memory_space<vmem>>, vector<1x24x1xf32>,
    %9 = arith.mulf %2, %2 : vector<24x128xf32>
    %cst_9 = arith.constant dense<0.000000e+00> : vector<24xf32>
    %10 = vector.multi_reduction <add>, %9, %cst_9 [1] : vector<24x128xf32> to vector<24xf32>
    %11 = vector.shape_cast %10 : vector<24xf32> to vector<24x1xf32>
    %12 = vector.shape_cast %11 : vector<24x1xf32> to vector<1x24x1xf32>
    %c0_10 = arith.constant 0 : index
    %c0_11 = arith.constant 0 : index
    %c0_12 = arith.constant 0 : index
    %13 = vector.load %arg5[%c0_10, %c0_11, %c0_12] : memref<1x24x1xf32, #tpu.memory_space<vmem>>, vector<1x24x1xf32>
    tpu.vector_store %arg5[%c0_10, %c0_11, %c0_12], %12 {strides = array<i32>} : memref<1x24x1xf32, #tpu.memory_space<vmem>>, vector<1x24x1xf32>,
    return
  }
  func.func @transform_0(%arg0: i32) -> (i32, i32) {
    %c0_i32 = arith.constant 0 : i32
    %c0_i32_0 = arith.constant 0 : i32
    %c0_i32_1 = arith.constant 0 : i32
    return %c0_i32, %c0_i32_0 : i32, i32
  }
  func.func @transform_1(%arg0: i32) -> (i32, i32) {
    %c0_i32 = arith.constant 0 : i32
    %c0_i32_0 = arith.constant 0 : i32
    return %c0_i32, %arg0 : i32, i32
  }
  func.func @transform_2(%arg0: i32) -> (i32, i32) {
    %c0_i32 = arith.constant 0 : i32
    %c0_i32_0 = arith.constant 0 : i32
    return %c0_i32, %arg0 : i32, i32
  }
  func.func @transform_3(%arg0: i32) -> (i32, i32, i32) {
    %c0_i32 = arith.constant 0 : i32
    %c0_i32_0 = arith.constant 0 : i32
    %c0_i32_1 = arith.constant 0 : i32
    return %arg0, %c0_i32, %c0_i32_0 : i32, i32, i32
  }
  func.func @transform_4(%arg0: i32) -> (i32, i32, i32) {
    %c0_i32 = arith.constant 0 : i32
    %c0_i32_0 = arith.constant 0 : i32
    %c0_i32_1 = arith.constant 0 : i32
    return %arg0, %c0_i32, %c0_i32_0 : i32, i32, i32
  }
}

module attributes {stable_mosaic.version = 11 : i64} {
  func.func @_bn2_add_relu_kernel(%arg0: i32, %arg1: memref<96x128xbf16, #tpu.memory_space<vmem>>, %arg2: memref<96x1xf32, #tpu.memory_space<vmem>>, %arg3: memref<96x1xf32, #tpu.memory_space<vmem>>, %arg4: memref<96x128xbf16, #tpu.memory_space<vmem>>, %arg5: memref<96x1xf32, #tpu.memory_space<vmem>>, %arg6: memref<96x1xf32, #tpu.memory_space<vmem>>, %arg7: memref<96x128xbf16, #tpu.memory_space<vmem>>) attributes {dimension_semantics = [#tpu.dimension_semantics<parallel>], iteration_bounds = array<i64: 1>, scalar_prefetch = 0 : i64, scratch_operands = 0 : i64, tpu.core_type = #tpu.core_type<tc>, window_params = [{transform_indices = @transform_0, window_bounds = array<i64: 96, 128>}, {pipeline_mode = #tpu.pipeline_mode<synchronous>, transform_indices = @transform_1, window_bounds = array<i64: 96, 1>}, {pipeline_mode = #tpu.pipeline_mode<synchronous>, transform_indices = @transform_2, window_bounds = array<i64: 96, 1>}, {transform_indices = @transform_3, window_bounds = array<i64: 96, 128>}, {pipeline_mode = #tpu.pipeline_mode<synchronous>, transform_indices = @transform_4, window_bounds = array<i64: 96, 1>}, {pipeline_mode = #tpu.pipeline_mode<synchronous>, transform_indices = @transform_5, window_bounds = array<i64: 96, 1>}, {transform_indices = @transform_6, window_bounds = array<i64: 96, 128>}]} {
    %c0 = arith.constant 0 : index
    %c0_0 = arith.constant 0 : index
    %0 = vector.load %arg1[%c0, %c0_0] : memref<96x128xbf16, #tpu.memory_space<vmem>>, vector<96x128xbf16>
    %1 = arith.extf %0 : vector<96x128xbf16> to vector<96x128xf32>
    %c0_1 = arith.constant 0 : index
    %c0_2 = arith.constant 0 : index
    %2 = vector.load %arg2[%c0_1, %c0_2] : memref<96x1xf32, #tpu.memory_space<vmem>>, vector<96x1xf32>
    %c0_3 = arith.constant 0 : index
    %c0_4 = arith.constant 0 : index
    %3 = vector.load %arg3[%c0_3, %c0_4] : memref<96x1xf32, #tpu.memory_space<vmem>>, vector<96x1xf32>
    %cst = arith.constant 1.250000e-01 : f32
    %4 = vector.broadcast %cst : f32 to vector<96x1xf32>
    %5 = arith.mulf %2, %4 : vector<96x1xf32>
    %cst_5 = arith.constant 1.250000e-01 : f32
    %6 = vector.broadcast %cst_5 : f32 to vector<96x1xf32>
    %7 = arith.mulf %3, %6 : vector<96x1xf32>
    %8 = arith.mulf %5, %5 : vector<96x1xf32>
    %9 = arith.subf %7, %8 : vector<96x1xf32>
    %cst_6 = arith.constant 0.000000e+00 : f32
    %10 = vector.broadcast %cst_6 : f32 to vector<96x1xf32>
    %11 = arith.maximumf %9, %10 : vector<96x1xf32>
    %12 = vector.broadcast %5 : vector<96x1xf32> to vector<96x128xf32>
    %13 = arith.subf %1, %12 : vector<96x128xf32>
    %cst_7 = arith.constant 9.99999974E-6 : f32
    %14 = vector.broadcast %cst_7 : f32 to vector<96x1xf32>
    %15 = arith.addf %11, %14 : vector<96x1xf32>
    %16 = math.rsqrt %15 : vector<96x1xf32>
    %17 = vector.broadcast %16 : vector<96x1xf32> to vector<96x128xf32>
    %18 = arith.mulf %13, %17 : vector<96x128xf32>
    %c0_8 = arith.constant 0 : index
    %c0_9 = arith.constant 0 : index
    %19 = vector.load %arg4[%c0_8, %c0_9] : memref<96x128xbf16, #tpu.memory_space<vmem>>, vector<96x128xbf16>
    %20 = arith.extf %19 : vector<96x128xbf16> to vector<96x128xf32>
    %c0_10 = arith.constant 0 : index
    %c0_11 = arith.constant 0 : index
    %21 = vector.load %arg5[%c0_10, %c0_11] : memref<96x1xf32, #tpu.memory_space<vmem>>, vector<96x1xf32>
    %c0_12 = arith.constant 0 : index
    %c0_13 = arith.constant 0 : index
    %22 = vector.load %arg6[%c0_12, %c0_13] : memref<96x1xf32, #tpu.memory_space<vmem>>, vector<96x1xf32>
    %cst_14 = arith.constant 1.250000e-01 : f32
    %23 = vector.broadcast %cst_14 : f32 to vector<96x1xf32>
    %24 = arith.mulf %21, %23 : vector<96x1xf32>
    %cst_15 = arith.constant 1.250000e-01 : f32
    %25 = vector.broadcast %cst_15 : f32 to vector<96x1xf32>
    %26 = arith.mulf %22, %25 : vector<96x1xf32>
    %27 = arith.mulf %24, %24 : vector<96x1xf32>
    %28 = arith.subf %26, %27 : vector<96x1xf32>
    %cst_16 = arith.constant 0.000000e+00 : f32
    %29 = vector.broadcast %cst_16 : f32 to vector<96x1xf32>
    %30 = arith.maximumf %28, %29 : vector<96x1xf32>
    %31 = vector.broadcast %24 : vector<96x1xf32> to vector<96x128xf32>
    %32 = arith.subf %20, %31 : vector<96x128xf32>
    %cst_17 = arith.constant 9.99999974E-6 : f32
    %33 = vector.broadcast %cst_17 : f32 to vector<96x1xf32>
    %34 = arith.addf %30, %33 : vector<96x1xf32>
    %35 = math.rsqrt %34 : vector<96x1xf32>
    %36 = vector.broadcast %35 : vector<96x1xf32> to vector<96x128xf32>
    %37 = arith.mulf %32, %36 : vector<96x128xf32>
    %38 = arith.addf %18, %37 : vector<96x128xf32>
    %cst_18 = arith.constant 0.000000e+00 : f32
    %39 = vector.broadcast %cst_18 : f32 to vector<96x128xf32>
    %40 = arith.maximumf %38, %39 : vector<96x128xf32>
    %41 = arith.truncf %40 : vector<96x128xf32> to vector<96x128xbf16>
    %c0_19 = arith.constant 0 : index
    %c0_20 = arith.constant 0 : index
    %42 = vector.load %arg7[%c0_19, %c0_20] : memref<96x128xbf16, #tpu.memory_space<vmem>>, vector<96x128xbf16>
    tpu.vector_store %arg7[%c0_19, %c0_20], %41 {strides = array<i32>} : memref<96x128xbf16, #tpu.memory_space<vmem>>, vector<96x128xbf16>,
    %c0_i32 = arith.constant 0 : i32
    %43 = arith.cmpi eq, %arg0, %c0_i32 : i32
    %44 = arith.extui %43 : i1 to i32
    %c0_i32_21 = arith.constant 0 : i32
    %45 = arith.cmpi ne, %44, %c0_i32_21 : i32
    scf.if %45 {
      %c128_i32 = arith.constant 128 : i32
      %46 = arith.muli %arg0, %c128_i32 : i32
      %47 = tpu.iota {dimensions = array<i32: 1>} : vector<96x128xi32>
      %48 = vector.broadcast %46 : i32 to vector<96x128xi32>
      %49 = arith.addi %48, %47 : vector<96x128xi32>
      %c8_i32 = arith.constant 8 : i32
      %50 = vector.broadcast %c8_i32 : i32 to vector<96x128xi32>
      %51 = arith.cmpi slt, %49, %50 : vector<96x128xi32>
      %cst_22 = arith.constant 0.000000e+00 : f32
      %52 = vector.broadcast %cst_22 : f32 to vector<96x128xf32>
      %53 = arith.select %51, %40, %52 : vector<96x128xi1>, vector<96x128xf32>
      %54 = arith.truncf %53 : vector<96x128xf32> to vector<96x128xbf16>
      %c0_23 = arith.constant 0 : index
      %c0_24 = arith.constant 0 : index
      %55 = vector.load %arg7[%c0_23, %c0_24] : memref<96x128xbf16, #tpu.memory_space<vmem>>, vector<96x128xbf16>
      tpu.vector_store %arg7[%c0_23, %c0_24], %54 {strides = array<i32>} : memref<96x128xbf16, #tpu.memory_space<vmem>>, vector<96x128xbf16>,
    } else {
    }
    return
  }
  func.func @transform_0(%arg0: i32) -> (i32, i32) {
    %c0_i32 = arith.constant 0 : i32
    %c0_i32_0 = arith.constant 0 : i32
    return %c0_i32, %arg0 : i32, i32
  }
  func.func @transform_1(%arg0: i32) -> (i32, i32) {
    %c0_i32 = arith.constant 0 : i32
    %c0_i32_0 = arith.constant 0 : i32
    %c0_i32_1 = arith.constant 0 : i32
    return %c0_i32, %c0_i32_0 : i32, i32
  }
  func.func @transform_2(%arg0: i32) -> (i32, i32) {
    %c0_i32 = arith.constant 0 : i32
    %c0_i32_0 = arith.constant 0 : i32
    %c0_i32_1 = arith.constant 0 : i32
    return %c0_i32, %c0_i32_0 : i32, i32
  }
  func.func @transform_3(%arg0: i32) -> (i32, i32) {
    %c0_i32 = arith.constant 0 : i32
    %c0_i32_0 = arith.constant 0 : i32
    return %c0_i32, %arg0 : i32, i32
  }
  func.func @transform_4(%arg0: i32) -> (i32, i32) {
    %c0_i32 = arith.constant 0 : i32
    %c0_i32_0 = arith.constant 0 : i32
    %c0_i32_1 = arith.constant 0 : i32
    return %c0_i32, %c0_i32_0 : i32, i32
  }
  func.func @transform_5(%arg0: i32) -> (i32, i32) {
    %c0_i32 = arith.constant 0 : i32
    %c0_i32_0 = arith.constant 0 : i32
    %c0_i32_1 = arith.constant 0 : i32
    return %c0_i32, %c0_i32_0 : i32, i32
  }
  func.func @transform_6(%arg0: i32) -> (i32, i32) {
    %c0_i32 = arith.constant 0 : i32
    %c0_i32_0 = arith.constant 0 : i32
    return %c0_i32, %arg0 : i32, i32
  }
}

module attributes {stable_mosaic.version = 11 : i64} {
  func.func @_conv_stats_kernel(%arg0: i32, %arg1: memref<24x96xbf16, #tpu.memory_space<vmem>>, %arg2: memref<96x128xbf16, #tpu.memory_space<vmem>>, %arg3: memref<24x128xbf16, #tpu.memory_space<vmem>>, %arg4: memref<1x24x1xf32, #tpu.memory_space<vmem>>, %arg5: memref<1x24x1xf32, #tpu.memory_space<vmem>>) attributes {dimension_semantics = [#tpu.dimension_semantics<parallel>], iteration_bounds = array<i64: 1>, scalar_prefetch = 0 : i64, scratch_operands = 0 : i64, tpu.core_type = #tpu.core_type<tc>, window_params = [{pipeline_mode = #tpu.pipeline_mode<synchronous>, transform_indices = @transform_0, window_bounds = array<i64: 24, 96>}, {transform_indices = @transform_1, window_bounds = array<i64: 96, 128>}, {transform_indices = @transform_2, window_bounds = array<i64: 24, 128>}, {transform_indices = @transform_3, window_bounds = array<i64: 1, 24, 1>}, {transform_indices = @transform_4, window_bounds = array<i64: 1, 24, 1>}]} {
    %c0 = arith.constant 0 : index
    %c0_0 = arith.constant 0 : index
    %0 = vector.load %arg1[%c0, %c0_0] : memref<24x96xbf16, #tpu.memory_space<vmem>>, vector<24x96xbf16>
    %c0_1 = arith.constant 0 : index
    %c0_2 = arith.constant 0 : index
    %1 = vector.load %arg2[%c0_1, %c0_2] : memref<96x128xbf16, #tpu.memory_space<vmem>>, vector<96x128xbf16>
    %cst = arith.constant dense<0.000000e+00> : vector<24x128xf32>
    %2 = tpu.matmul %0, %1, %cst {dimension_numbers = #tpu.dot_dimension_numbers<[1], [0], [0], [1], [0, 0, 1, 1], [], []>} : vector<24x96xbf16>, vector<96x128xbf16>, vector<24x128xf32> -> vector<24x128xf32>
    %3 = arith.truncf %2 : vector<24x128xf32> to vector<24x128xbf16>
    %c0_3 = arith.constant 0 : index
    %c0_4 = arith.constant 0 : index
    %4 = vector.load %arg3[%c0_3, %c0_4] : memref<24x128xbf16, #tpu.memory_space<vmem>>, vector<24x128xbf16>
    tpu.vector_store %arg3[%c0_3, %c0_4], %3 {strides = array<i32>} : memref<24x128xbf16, #tpu.memory_space<vmem>>, vector<24x128xbf16>,
    %cst_5 = arith.constant dense<0.000000e+00> : vector<24xf32>
    %5 = vector.multi_reduction <add>, %2, %cst_5 [1] : vector<24x128xf32> to vector<24xf32>
    %6 = vector.shape_cast %5 : vector<24xf32> to vector<24x1xf32>
    %7 = vector.shape_cast %6 : vector<24x1xf32> to vector<1x24x1xf32>
    %c0_6 = arith.constant 0 : index
    %c0_7 = arith.constant 0 : index
    %c0_8 = arith.constant 0 : index
    %8 = vector.load %arg4[%c0_6, %c0_7, %c0_8] : memref<1x24x1xf32, #tpu.memory_space<vmem>>, vector<1x24x1xf32>
    tpu.vector_store %arg4[%c0_6, %c0_7, %c0_8], %7 {strides = array<i32>} : memref<1x24x1xf32, #tpu.memory_space<vmem>>, vector<1x24x1xf32>,
    %9 = arith.mulf %2, %2 : vector<24x128xf32>
    %cst_9 = arith.constant dense<0.000000e+00> : vector<24xf32>
    %10 = vector.multi_reduction <add>, %9, %cst_9 [1] : vector<24x128xf32> to vector<24xf32>
    %11 = vector.shape_cast %10 : vector<24xf32> to vector<24x1xf32>
    %12 = vector.shape_cast %11 : vector<24x1xf32> to vector<1x24x1xf32>
    %c0_10 = arith.constant 0 : index
    %c0_11 = arith.constant 0 : index
    %c0_12 = arith.constant 0 : index
    %13 = vector.load %arg5[%c0_10, %c0_11, %c0_12] : memref<1x24x1xf32, #tpu.memory_space<vmem>>, vector<1x24x1xf32>
    tpu.vector_store %arg5[%c0_10, %c0_11, %c0_12], %12 {strides = array<i32>} : memref<1x24x1xf32, #tpu.memory_space<vmem>>, vector<1x24x1xf32>,
    return
  }
  func.func @transform_0(%arg0: i32) -> (i32, i32) {
    %c0_i32 = arith.constant 0 : i32
    %c0_i32_0 = arith.constant 0 : i32
    %c0_i32_1 = arith.constant 0 : i32
    return %c0_i32, %c0_i32_0 : i32, i32
  }
  func.func @transform_1(%arg0: i32) -> (i32, i32) {
    %c0_i32 = arith.constant 0 : i32
    %c0_i32_0 = arith.constant 0 : i32
    return %c0_i32, %arg0 : i32, i32
  }
  func.func @transform_2(%arg0: i32) -> (i32, i32) {
    %c0_i32 = arith.constant 0 : i32
    %c0_i32_0 = arith.constant 0 : i32
    return %c0_i32, %arg0 : i32, i32
  }
  func.func @transform_3(%arg0: i32) -> (i32, i32, i32) {
    %c0_i32 = arith.constant 0 : i32
    %c0_i32_0 = arith.constant 0 : i32
    %c0_i32_1 = arith.constant 0 : i32
    return %arg0, %c0_i32, %c0_i32_0 : i32, i32, i32
  }
  func.func @transform_4(%arg0: i32) -> (i32, i32, i32) {
    %c0_i32 = arith.constant 0 : i32
    %c0_i32_0 = arith.constant 0 : i32
    %c0_i32_1 = arith.constant 0 : i32
    return %arg0, %c0_i32, %c0_i32_0 : i32, i32, i32
  }
}

module attributes {stable_mosaic.version = 11 : i64} {
  func.func @_bn_act_kernel(%arg0: i32, %arg1: memref<24x128xbf16, #tpu.memory_space<vmem>>, %arg2: memref<24x1xf32, #tpu.memory_space<vmem>>, %arg3: memref<24x1xf32, #tpu.memory_space<vmem>>, %arg4: memref<24x128xbf16, #tpu.memory_space<vmem>>) attributes {dimension_semantics = [#tpu.dimension_semantics<parallel>], iteration_bounds = array<i64: 1>, scalar_prefetch = 0 : i64, scratch_operands = 0 : i64, tpu.core_type = #tpu.core_type<tc>, window_params = [{transform_indices = @transform_0, window_bounds = array<i64: 24, 128>}, {pipeline_mode = #tpu.pipeline_mode<synchronous>, transform_indices = @transform_1, window_bounds = array<i64: 24, 1>}, {pipeline_mode = #tpu.pipeline_mode<synchronous>, transform_indices = @transform_2, window_bounds = array<i64: 24, 1>}, {transform_indices = @transform_3, window_bounds = array<i64: 24, 128>}]} {
    %c0 = arith.constant 0 : index
    %c0_0 = arith.constant 0 : index
    %0 = vector.load %arg1[%c0, %c0_0] : memref<24x128xbf16, #tpu.memory_space<vmem>>, vector<24x128xbf16>
    %1 = arith.extf %0 : vector<24x128xbf16> to vector<24x128xf32>
    %c0_1 = arith.constant 0 : index
    %c0_2 = arith.constant 0 : index
    %2 = vector.load %arg2[%c0_1, %c0_2] : memref<24x1xf32, #tpu.memory_space<vmem>>, vector<24x1xf32>
    %c0_3 = arith.constant 0 : index
    %c0_4 = arith.constant 0 : index
    %3 = vector.load %arg3[%c0_3, %c0_4] : memref<24x1xf32, #tpu.memory_space<vmem>>, vector<24x1xf32>
    %cst = arith.constant 1.250000e-01 : f32
    %4 = vector.broadcast %cst : f32 to vector<24x1xf32>
    %5 = arith.mulf %2, %4 : vector<24x1xf32>
    %cst_5 = arith.constant 1.250000e-01 : f32
    %6 = vector.broadcast %cst_5 : f32 to vector<24x1xf32>
    %7 = arith.mulf %3, %6 : vector<24x1xf32>
    %8 = arith.mulf %5, %5 : vector<24x1xf32>
    %9 = arith.subf %7, %8 : vector<24x1xf32>
    %cst_6 = arith.constant 0.000000e+00 : f32
    %10 = vector.broadcast %cst_6 : f32 to vector<24x1xf32>
    %11 = arith.maximumf %9, %10 : vector<24x1xf32>
    %12 = vector.broadcast %5 : vector<24x1xf32> to vector<24x128xf32>
    %13 = arith.subf %1, %12 : vector<24x128xf32>
    %cst_7 = arith.constant 9.99999974E-6 : f32
    %14 = vector.broadcast %cst_7 : f32 to vector<24x1xf32>
    %15 = arith.addf %11, %14 : vector<24x1xf32>
    %16 = math.rsqrt %15 : vector<24x1xf32>
    %17 = vector.broadcast %16 : vector<24x1xf32> to vector<24x128xf32>
    %18 = arith.mulf %13, %17 : vector<24x128xf32>
    %cst_8 = arith.constant 0.000000e+00 : f32
    %19 = vector.broadcast %cst_8 : f32 to vector<24x128xf32>
    %20 = arith.maximumf %18, %19 : vector<24x128xf32>
    %21 = arith.truncf %20 : vector<24x128xf32> to vector<24x128xbf16>
    %c0_9 = arith.constant 0 : index
    %c0_10 = arith.constant 0 : index
    %22 = vector.load %arg4[%c0_9, %c0_10] : memref<24x128xbf16, #tpu.memory_space<vmem>>, vector<24x128xbf16>
    tpu.vector_store %arg4[%c0_9, %c0_10], %21 {strides = array<i32>} : memref<24x128xbf16, #tpu.memory_space<vmem>>, vector<24x128xbf16>,
    %c0_i32 = arith.constant 0 : i32
    %23 = arith.cmpi eq, %arg0, %c0_i32 : i32
    %24 = arith.extui %23 : i1 to i32
    %c0_i32_11 = arith.constant 0 : i32
    %25 = arith.cmpi ne, %24, %c0_i32_11 : i32
    scf.if %25 {
      %c128_i32 = arith.constant 128 : i32
      %26 = arith.muli %arg0, %c128_i32 : i32
      %27 = tpu.iota {dimensions = array<i32: 1>} : vector<24x128xi32>
      %28 = vector.broadcast %26 : i32 to vector<24x128xi32>
      %29 = arith.addi %28, %27 : vector<24x128xi32>
      %c8_i32 = arith.constant 8 : i32
      %30 = vector.broadcast %c8_i32 : i32 to vector<24x128xi32>
      %31 = arith.cmpi slt, %29, %30 : vector<24x128xi32>
      %cst_12 = arith.constant 0.000000e+00 : f32
      %32 = vector.broadcast %cst_12 : f32 to vector<24x128xf32>
      %33 = arith.select %31, %20, %32 : vector<24x128xi1>, vector<24x128xf32>
      %34 = arith.truncf %33 : vector<24x128xf32> to vector<24x128xbf16>
      %c0_13 = arith.constant 0 : index
      %c0_14 = arith.constant 0 : index
      %35 = vector.load %arg4[%c0_13, %c0_14] : memref<24x128xbf16, #tpu.memory_space<vmem>>, vector<24x128xbf16>
      tpu.vector_store %arg4[%c0_13, %c0_14], %34 {strides = array<i32>} : memref<24x128xbf16, #tpu.memory_space<vmem>>, vector<24x128xbf16>,
    } else {
    }
    return
  }
  func.func @transform_0(%arg0: i32) -> (i32, i32) {
    %c0_i32 = arith.constant 0 : i32
    %c0_i32_0 = arith.constant 0 : i32
    return %c0_i32, %arg0 : i32, i32
  }
  func.func @transform_1(%arg0: i32) -> (i32, i32) {
    %c0_i32 = arith.constant 0 : i32
    %c0_i32_0 = arith.constant 0 : i32
    %c0_i32_1 = arith.constant 0 : i32
    return %c0_i32, %c0_i32_0 : i32, i32
  }
  func.func @transform_2(%arg0: i32) -> (i32, i32) {
    %c0_i32 = arith.constant 0 : i32
    %c0_i32_0 = arith.constant 0 : i32
    %c0_i32_1 = arith.constant 0 : i32
    return %c0_i32, %c0_i32_0 : i32, i32
  }
  func.func @transform_3(%arg0: i32) -> (i32, i32) {
    %c0_i32 = arith.constant 0 : i32
    %c0_i32_0 = arith.constant 0 : i32
    return %c0_i32, %arg0 : i32, i32
  }
}

module attributes {stable_mosaic.version = 11 : i64} {
  func.func @_bn_add_relu_kernel(%arg0: i32, %arg1: memref<96x128xbf16, #tpu.memory_space<vmem>>, %arg2: memref<96x1xf32, #tpu.memory_space<vmem>>, %arg3: memref<96x1xf32, #tpu.memory_space<vmem>>, %arg4: memref<96x128xbf16, #tpu.memory_space<vmem>>, %arg5: memref<96x128xbf16, #tpu.memory_space<vmem>>) attributes {dimension_semantics = [#tpu.dimension_semantics<parallel>], iteration_bounds = array<i64: 1>, scalar_prefetch = 0 : i64, scratch_operands = 0 : i64, tpu.core_type = #tpu.core_type<tc>, window_params = [{transform_indices = @transform_0, window_bounds = array<i64: 96, 128>}, {pipeline_mode = #tpu.pipeline_mode<synchronous>, transform_indices = @transform_1, window_bounds = array<i64: 96, 1>}, {pipeline_mode = #tpu.pipeline_mode<synchronous>, transform_indices = @transform_2, window_bounds = array<i64: 96, 1>}, {transform_indices = @transform_3, window_bounds = array<i64: 96, 128>}, {transform_indices = @transform_4, window_bounds = array<i64: 96, 128>}]} {
    %c0 = arith.constant 0 : index
    %c0_0 = arith.constant 0 : index
    %0 = vector.load %arg1[%c0, %c0_0] : memref<96x128xbf16, #tpu.memory_space<vmem>>, vector<96x128xbf16>
    %1 = arith.extf %0 : vector<96x128xbf16> to vector<96x128xf32>
    %c0_1 = arith.constant 0 : index
    %c0_2 = arith.constant 0 : index
    %2 = vector.load %arg2[%c0_1, %c0_2] : memref<96x1xf32, #tpu.memory_space<vmem>>, vector<96x1xf32>
    %c0_3 = arith.constant 0 : index
    %c0_4 = arith.constant 0 : index
    %3 = vector.load %arg3[%c0_3, %c0_4] : memref<96x1xf32, #tpu.memory_space<vmem>>, vector<96x1xf32>
    %cst = arith.constant 1.250000e-01 : f32
    %4 = vector.broadcast %cst : f32 to vector<96x1xf32>
    %5 = arith.mulf %2, %4 : vector<96x1xf32>
    %cst_5 = arith.constant 1.250000e-01 : f32
    %6 = vector.broadcast %cst_5 : f32 to vector<96x1xf32>
    %7 = arith.mulf %3, %6 : vector<96x1xf32>
    %8 = arith.mulf %5, %5 : vector<96x1xf32>
    %9 = arith.subf %7, %8 : vector<96x1xf32>
    %cst_6 = arith.constant 0.000000e+00 : f32
    %10 = vector.broadcast %cst_6 : f32 to vector<96x1xf32>
    %11 = arith.maximumf %9, %10 : vector<96x1xf32>
    %12 = vector.broadcast %5 : vector<96x1xf32> to vector<96x128xf32>
    %13 = arith.subf %1, %12 : vector<96x128xf32>
    %cst_7 = arith.constant 9.99999974E-6 : f32
    %14 = vector.broadcast %cst_7 : f32 to vector<96x1xf32>
    %15 = arith.addf %11, %14 : vector<96x1xf32>
    %16 = math.rsqrt %15 : vector<96x1xf32>
    %17 = vector.broadcast %16 : vector<96x1xf32> to vector<96x128xf32>
    %18 = arith.mulf %13, %17 : vector<96x128xf32>
    %c0_8 = arith.constant 0 : index
    %c0_9 = arith.constant 0 : index
    %19 = vector.load %arg4[%c0_8, %c0_9] : memref<96x128xbf16, #tpu.memory_space<vmem>>, vector<96x128xbf16>
    %20 = arith.extf %19 : vector<96x128xbf16> to vector<96x128xf32>
    %21 = arith.addf %18, %20 : vector<96x128xf32>
    %cst_10 = arith.constant 0.000000e+00 : f32
    %22 = vector.broadcast %cst_10 : f32 to vector<96x128xf32>
    %23 = arith.maximumf %21, %22 : vector<96x128xf32>
    %24 = arith.truncf %23 : vector<96x128xf32> to vector<96x128xbf16>
    %c0_11 = arith.constant 0 : index
    %c0_12 = arith.constant 0 : index
    %25 = vector.load %arg5[%c0_11, %c0_12] : memref<96x128xbf16, #tpu.memory_space<vmem>>, vector<96x128xbf16>
    tpu.vector_store %arg5[%c0_11, %c0_12], %24 {strides = array<i32>} : memref<96x128xbf16, #tpu.memory_space<vmem>>, vector<96x128xbf16>,
    %c0_i32 = arith.constant 0 : i32
    %26 = arith.cmpi eq, %arg0, %c0_i32 : i32
    %27 = arith.extui %26 : i1 to i32
    %c0_i32_13 = arith.constant 0 : i32
    %28 = arith.cmpi ne, %27, %c0_i32_13 : i32
    scf.if %28 {
      %c128_i32 = arith.constant 128 : i32
      %29 = arith.muli %arg0, %c128_i32 : i32
      %30 = tpu.iota {dimensions = array<i32: 1>} : vector<96x128xi32>
      %31 = vector.broadcast %29 : i32 to vector<96x128xi32>
      %32 = arith.addi %31, %30 : vector<96x128xi32>
      %c8_i32 = arith.constant 8 : i32
      %33 = vector.broadcast %c8_i32 : i32 to vector<96x128xi32>
      %34 = arith.cmpi slt, %32, %33 : vector<96x128xi32>
      %cst_14 = arith.constant 0.000000e+00 : f32
      %35 = vector.broadcast %cst_14 : f32 to vector<96x128xf32>
      %36 = arith.select %34, %23, %35 : vector<96x128xi1>, vector<96x128xf32>
      %37 = arith.truncf %36 : vector<96x128xf32> to vector<96x128xbf16>
      %c0_15 = arith.constant 0 : index
      %c0_16 = arith.constant 0 : index
      %38 = vector.load %arg5[%c0_15, %c0_16] : memref<96x128xbf16, #tpu.memory_space<vmem>>, vector<96x128xbf16>
      tpu.vector_store %arg5[%c0_15, %c0_16], %37 {strides = array<i32>} : memref<96x128xbf16, #tpu.memory_space<vmem>>, vector<96x128xbf16>,
    } else {
    }
    return
  }
  func.func @transform_0(%arg0: i32) -> (i32, i32) {
    %c0_i32 = arith.constant 0 : i32
    %c0_i32_0 = arith.constant 0 : i32
    return %c0_i32, %arg0 : i32, i32
  }
  func.func @transform_1(%arg0: i32) -> (i32, i32) {
    %c0_i32 = arith.constant 0 : i32
    %c0_i32_0 = arith.constant 0 : i32
    %c0_i32_1 = arith.constant 0 : i32
    return %c0_i32, %c0_i32_0 : i32, i32
  }
  func.func @transform_2(%arg0: i32) -> (i32, i32) {
    %c0_i32 = arith.constant 0 : i32
    %c0_i32_0 = arith.constant 0 : i32
    %c0_i32_1 = arith.constant 0 : i32
    return %c0_i32, %c0_i32_0 : i32, i32
  }
  func.func @transform_3(%arg0: i32) -> (i32, i32) {
    %c0_i32 = arith.constant 0 : i32
    %c0_i32_0 = arith.constant 0 : i32
    return %c0_i32, %arg0 : i32, i32
  }
  func.func @transform_4(%arg0: i32) -> (i32, i32) {
    %c0_i32 = arith.constant 0 : i32
    %c0_i32_0 = arith.constant 0 : i32
    return %c0_i32, %arg0 : i32, i32
  }
}

module attributes {stable_mosaic.version = 11 : i64} {
  func.func @_matmul_bias_kernel(%arg0: i32, %arg1: memref<128x96xbf16, #tpu.memory_space<vmem>>, %arg2: memref<96x128xbf16, #tpu.memory_space<vmem>>, %arg3: memref<128x1xf32, #tpu.memory_space<vmem>>, %arg4: memref<128x128xf32, #tpu.memory_space<vmem>>) attributes {dimension_semantics = [#tpu.dimension_semantics<parallel>], iteration_bounds = array<i64: 1>, scalar_prefetch = 0 : i64, scratch_operands = 0 : i64, tpu.core_type = #tpu.core_type<tc>, window_params = [{pipeline_mode = #tpu.pipeline_mode<synchronous>, transform_indices = @transform_0, window_bounds = array<i64: 128, 96>}, {transform_indices = @transform_1, window_bounds = array<i64: 96, 128>}, {pipeline_mode = #tpu.pipeline_mode<synchronous>, transform_indices = @transform_2, window_bounds = array<i64: 128, 1>}, {transform_indices = @transform_3, window_bounds = array<i64: 128, 128>}]} {
    %c0 = arith.constant 0 : index
    %c0_0 = arith.constant 0 : index
    %0 = vector.load %arg1[%c0, %c0_0] : memref<128x96xbf16, #tpu.memory_space<vmem>>, vector<128x96xbf16>
    %c0_1 = arith.constant 0 : index
    %c0_2 = arith.constant 0 : index
    %1 = vector.load %arg2[%c0_1, %c0_2] : memref<96x128xbf16, #tpu.memory_space<vmem>>, vector<96x128xbf16>
    %cst = arith.constant dense<0.000000e+00> : vector<128x128xf32>
    %2 = tpu.matmul %0, %1, %cst {dimension_numbers = #tpu.dot_dimension_numbers<[1], [0], [0], [1], [0, 0, 1, 1], [], []>} : vector<128x96xbf16>, vector<96x128xbf16>, vector<128x128xf32> -> vector<128x128xf32>
    %c0_3 = arith.constant 0 : index
    %c0_4 = arith.constant 0 : index
    %3 = vector.load %arg3[%c0_3, %c0_4] : memref<128x1xf32, #tpu.memory_space<vmem>>, vector<128x1xf32>
    %4 = vector.broadcast %3 : vector<128x1xf32> to vector<128x128xf32>
    %5 = arith.addf %2, %4 : vector<128x128xf32>
    %c0_5 = arith.constant 0 : index
    %c0_6 = arith.constant 0 : index
    %6 = vector.load %arg4[%c0_5, %c0_6] : memref<128x128xf32, #tpu.memory_space<vmem>>, vector<128x128xf32>
    tpu.vector_store %arg4[%c0_5, %c0_6], %5 {strides = array<i32>} : memref<128x128xf32, #tpu.memory_space<vmem>>, vector<128x128xf32>,
    return
  }
  func.func @transform_0(%arg0: i32) -> (i32, i32) {
    %c0_i32 = arith.constant 0 : i32
    %c0_i32_0 = arith.constant 0 : i32
    %c0_i32_1 = arith.constant 0 : i32
    return %c0_i32, %c0_i32_0 : i32, i32
  }
  func.func @transform_1(%arg0: i32) -> (i32, i32) {
    %c0_i32 = arith.constant 0 : i32
    %c0_i32_0 = arith.constant 0 : i32
    return %c0_i32, %arg0 : i32, i32
  }
  func.func @transform_2(%arg0: i32) -> (i32, i32) {
    %c0_i32 = arith.constant 0 : i32
    %c0_i32_0 = arith.constant 0 : i32
    %c0_i32_1 = arith.constant 0 : i32
    return %c0_i32, %c0_i32_0 : i32, i32
  }
  func.func @transform_3(%arg0: i32) -> (i32, i32) {
    %c0_i32 = arith.constant 0 : i32
    %c0_i32_0 = arith.constant 0 : i32
    return %c0_i32, %arg0 : i32, i32
  }
}

</mosaic_0001>

<bundles_post_ra>
// kernel: _lambda_.36
= control target key start
LH: loop header
LB: loop body
LE: loop exit
PB: predicated region body
PF: predicated region fallthrough
CT: control target
= control target key end

     0   :  { %v197_v0 = vmov 0   ;;  %s254_s1 = inlined_call_operand.vmem [shape: f32[32,1], index: 1, kind: input, shape index: {}]   ;;  %s255_s2 = inlined_call_operand.vmem [shape: f32[32,1], index: 2, kind: input, shape index: {}]   ;;  %s256_s0 = inlined_call_operand.vmem [shape: bf16[32,128], index: 0, kind: input, shape index: {}]   ;;  %s257_s3 = inlined_call_operand.vmem [shape: bf16[32,128], index: 3, kind: output, shape index: {}]  }
   0x1   :  { %180 = vset.pattern.permute.xlu1 %v197_v0  ;;  %179 = vset.pattern.permute.xlu0 %v197_v0  ;;  %v24_v1 = vld [vmem:[%s254_s1 + $0x10] sm:$0xff]  ;;  %v22_v3 = vld [vmem:[%s254_s1] sm:$0xff]  ;;  %v25_v8 = vld [vmem:[%s254_s1 + $0x18] sm:$0xff] }
   0x2   :  { %v28_v2 = vld [vmem:[%s255_s2 + $0x10] sm:$0xff]  ;;  %v32_v4 = vmul.f32 0.0078125, %v24_v1  ;;  %v26_v6 = vld [vmem:[%s255_s2] sm:$0xff]  ;;  %v30_v7 = vmul.f32 0.0078125, %v22_v3  ;;  %v29_v9 = vld [vmem:[%s255_s2 + $0x18] sm:$0xff]  ;;  %v33_v11 = vmul.f32 0.0078125, %v25_v8 }
   0x3   :  { %v36_v5 = vmul.f32 0.0078125, %v28_v2  ;;  %v34_v10 = vmul.f32 0.0078125, %v26_v6  ;;  %v37_v12 = vmul.f32 0.0078125, %v29_v9  ;;  %v23_v13 = vld [vmem:[%s254_s1 + $0x8] sm:$0xff]  ;;  %v159_v39 = vld [vmem:[%s256_s0] sm:$0xff]  }
   0x4   :  { %v27_v14 = vld [vmem:[%s255_s2 + $0x8] sm:$0xff]  ;;  %62 = vperm.xlu1 %180, %v32_v4   ;;  %v40_v15 = vmul.f32 %v32_v4, %v32_v4  ;;  %52 = vperm.xlu0 %179, %v30_v7   ;;  %v38_v16 = vmul.f32 %v30_v7, %v30_v7  ;;  %v31_v17 = vmul.f32 0.0078125, %v23_v13  ;;  %v41_v19 = vmul.f32 %v33_v11, %v33_v11 }
   0x5   :  { %v35_v18 = vmul.f32 0.0078125, %v27_v14  ;;  %v160_v40 = vunpack.c.l.bf16 %v159_v39  ;;  %v176_v41 = vld [vmem:[%s256_s0 + $0x8] sm:$0xff]   ;;  %v161_v43 = vunpack.c.h.bf16 %v159_v39 }
   0x6   :  { %v44_v20 = vsub.f32 %v36_v5, %v40_v15  ;;  %v42_v21 = vsub.f32 %v34_v10, %v38_v16  ;;  %v39_v22 = vmul.f32 %v31_v17, %v31_v17  ;;  %v45_v23 = vsub.f32 %v37_v12, %v41_v19 }
   0x7   :  { %v164_v45 = vunpack.c.l.bf16 %v176_v41  ;;  %v165_v48 = vunpack.c.h.bf16 %v176_v41 }
   0x8   :  { %v48_v24 = vmax.f32 %v44_v20, 0.0  ;;  %v46_v25 = vmax.f32 %v42_v21, 0.0  ;;  %67 = vperm.xlu1 %180, %v33_v11   ;;  %v43_v26 = vsub.f32 %v35_v18, %v39_v22  ;;  %57 = vperm.xlu0 %179, %v31_v17   ;;  %v49_v27 = vmax.f32 %v45_v23, 0.0 }
   0xa   :  { %v76_v28 = vadd.f32 1e-05, %v48_v24  ;;  %v74_v29 = vadd.f32 1e-05, %v46_v25  ;;  %v47_v30 = vmax.f32 %v43_v26, 0.0 }
   0xb   :  { %v77_v32 = vadd.f32 1e-05, %v49_v27 }
   0xc   :  { %v75_v31 = vadd.f32 1e-05, %v47_v30  ;;  %181 = vrsqrt.f32 %v74_v29 }
   0xd   :  { %183 = vrsqrt.f32 %v76_v28 }
   0xe   :  { %185 = vrsqrt.f32 %v75_v31 }
   0xf   :  { %187 = vrsqrt.f32 %v77_v32 }
  0x19   :  { %v182_v33 = vpop.eup %181 }
  0x1a   :  { %v184_v34 = vpop.eup %183  ;;  %84 = vperm.xlu0 %179, %v182_v33  }
  0x1b   :  { %v186_v35 = vpop.eup %185 }
  0x1c   :  { %89 = vperm.xlu1 %180, %v186_v35   ;;  %v188_v36 = vpop.eup %187 }
  0x1e   :  { %94 = vperm.xlu0 %179, %v184_v34  }
  0x20   :  { %99 = vperm.xlu1 %180, %v188_v36  }
  0x7f   :  { %v53_v37 = vpop.permute.xlu0 %52  ;;  %v63_v38 = vpop.permute.xlu1 %62 }
  0x80   :  { %v70_v46 = vsub.f32 %v160_v40, %v53_v37  ;;  %v72_v52 = vsub.f32 %v164_v45, %v63_v38 }
  0x83   :  { %v58_v42 = vpop.permute.xlu0 %57  ;;  %v68_v44 = vpop.permute.xlu1 %67 }
  0x84   :  { %v71_v49 = vsub.f32 %v161_v43, %v58_v42  ;;  %v73_v56 = vsub.f32 %v165_v48, %v68_v44 }
  0x95   :  { %v85_v47 = vpop.permute.xlu0 %84 }
  0x96   :  { %v102_v50 = vmul.f32 %v85_v47, %v70_v46 }
  0x97   :  { %v90_v51 = vpop.permute.xlu1 %89 }
  0x98   :  { %v103_v53 = vmul.f32 %v90_v51, %v71_v49  ;;  %v110_v54 = vmul.f32 0.70710677, %v102_v50  ;;  %v106_v0 = vmul.f32 0.5, %v102_v50 }
  0x99   :  { %v95_v55 = vpop.permute.xlu0 %94 }
  0x9a   :  { %v111_v57 = vmul.f32 0.70710677, %v103_v53  ;;  %189 = verf.f32 %v110_v54  ;;  %v104_v58 = vmul.f32 %v95_v55, %v72_v52  ;;  %v107_v3 = vmul.f32 0.5, %v103_v53 }
  0x9b   :  { %v100_v59 = vpop.permute.xlu1 %99 }
  0x9c   :  { %191 = verf.f32 %v111_v57  ;;  %v105_v60 = vmul.f32 %v100_v59, %v73_v56  ;;  %v112_v61 = vmul.f32 0.70710677, %v104_v58  ;;  %v108_v8 = vmul.f32 0.5, %v104_v58 }
  0x9e   :  { %v113_v62 = vmul.f32 0.70710677, %v105_v60  ;;  %193 = verf.f32 %v112_v61  ;;  %v109_v12 = vmul.f32 0.5, %v105_v60 }
  0xa0   :  { %195 = verf.f32 %v113_v62 }
  0xa7   :  { %v190_v63 = vpop.eup %189 }
  0xa8   :  { %v118_v1 = vadd.f32 1.0, %v190_v63 }
  0xa9   :  { %v192_v2 = vpop.eup %191 }
  0xaa   :  { %v119_v4 = vadd.f32 1.0, %v192_v2  ;;  %v122_v5 = vmul.f32 %v118_v1, %v106_v0 }
  0xab   :  { %v194_v6 = vpop.eup %193 }
  0xac   :  { %v123_v7 = vmul.f32 %v119_v4, %v107_v3  ;;  %v120_v9 = vadd.f32 1.0, %v194_v6 }
  0xad   :  { %v196_v10 = vpop.eup %195 }
  0xae   :  { %v169_v11 = vpack.c.bf16 %v123_v7, %v122_v5  ;;  %v121_v13 = vadd.f32 1.0, %v196_v10  ;;  %v124_v14 = vmul.f32 %v120_v9, %v108_v8 }
  0xb0   :  { %170 = vst [vmem:[%s257_s3] sm:$0xff] %v169_v11   ;;  %v125_v15 = vmul.f32 %v121_v13, %v109_v12 }
  0xb2   :  { %v174_v16 = vpack.c.bf16 %v125_v15, %v124_v14 }
  0xb4   :  { %177 = vst [vmem:[%s257_s3 + $0x8] sm:$0xff] %v174_v16  }

// kernel: _lambda_.38
= control target key start
LH: loop header
LB: loop body
LE: loop exit
PB: predicated region body
PF: predicated region fallthrough
CT: control target
= control target key end

     0   :  { %v48_v0 = vmov 0   ;;  %s81_s1 = inlined_call_operand.vmem [shape: f32[8,1], index: 1, kind: input, shape index: {}]   ;;  %s82_s2 = inlined_call_operand.vmem [shape: f32[8,1], index: 2, kind: input, shape index: {}]   ;;  %s83_s0 = inlined_call_operand.vmem [shape: bf16[8,128], index: 0, kind: input, shape index: {}]   ;;  %s84_s3 = inlined_call_operand.vmem [shape: bf16[8,128], index: 3, kind: output, shape index: {}]  }
   0x1   :  { %45 = vset.pattern.permute.xlu0 %v48_v0  ;;  %v16_v1 = vld [vmem:[%s81_s1] sm:$0xff] }
   0x2   :  { %v17_v2 = vld [vmem:[%s82_s2] sm:$0xff]  ;;  %v18_v3 = vmul.f32 0.0078125, %v16_v1 }
   0x3   :  { %v19_v4 = vmul.f32 0.0078125, %v17_v2  ;;  %v14_v10 = vld [vmem:[%s83_s0] sm:$0xf] }
   0x4   :  { %25 = vperm.xlu0 %45, %v18_v3   ;;  %v20_v5 = vmul.f32 %v18_v3, %v18_v3  ;;  %v15_v12 = vunpack.c.l.bf16 %v14_v10 }
   0x6   :  { %v21_v6 = vsub.f32 %v19_v4, %v20_v5 }
   0x8   :  { %v22_v7 = vmax.f32 %v21_v6, 0.0 }
   0xa   :  { %v29_v8 = vadd.f32 1e-05, %v22_v7 }
   0xc   :  { %46 = vrsqrt.f32 %v29_v8 }
  0x19   :  { %v47_v9 = vpop.eup %46 }
  0x1a   :  { %33 = vperm.xlu0 %45, %v47_v9  }
  0x7f   :  { %v26_v11 = vpop.permute.xlu0 %25 }
  0x80   :  { %v28_v13 = vsub.f32 %v15_v12, %v26_v11 }
  0x95   :  { %v34_v14 = vpop.permute.xlu0 %33 }
  0x96   :  { %v36_v15 = vmul.f32 %v34_v14, %v28_v13 }
  0x98   :  { %v37_v16 = vmax.f32 %v36_v15, 0.0 }
  0x9a   :  { %v38_v17 = vpack.c.bf16 %v37_v16, %v37_v16 }
  0x9c   :  { %39 = vst [vmem:[%s84_s3] sm:$0xf] %v38_v17 }

// kernel: _lambda_.37
= control target key start
LH: loop header
LB: loop body
LE: loop exit
PB: predicated region body
PF: predicated region fallthrough
CT: control target
= control target key end

     0   :  { %v116_v0 = vmov 0.0   ;;  %vm117_vm0 = vmmov 0   ;;  %vm32_vm1 = vcmask 261120   ;;  %vm80_vm2 = vcmask 7168   ;;  %s161_s1 = inlined_call_operand.vmem [shape: bf16[32,128], index: 1, kind: input, shape index: {}]   ;;  %s162_s0 = inlined_call_operand.vmem [shape: bf16[8,32], index: 0, kind: input, shape index: {}]   ;;  %s163_s2 = inlined_call_operand.vmem [shape: bf16[8,128], index: 2, kind: output, shape index: {0}]   ;;  %s164_s3 = inlined_call_operand.vmem [shape: f32[1,8,1], index: 3, kind: output, shape index: {1}]   ;;  %s165_s4 = inlined_call_operand.vmem [shape: f32[1,8,1], index: 4, kind: output, shape index: {2}]  }
   0x1   :  { %104 = vmatprep.subr.bf16.mxu0 %v116_v0  ;;  %v114_v1 = vld [vmem:[%s161_s1 + $0x8] sm:$0xff]   ;;  %108 = vmatprep.mubr.msk.bf16.mxu0 %vm117_vm0, %v116_v0  ;;  %v115_v2 = vld [vmem:[%s161_s1] sm:$0xff]  }
   0x2   :  { %105 = vmatpush3.bf16.msra.mxu0 %v114_v1  ;;  %v15_v3 = vld [vmem:[%s162_s0] sm:$0xf] }
   0x3   :  { %106 = vmatprep.subr.bf16.mxu0 %v116_v0 }
   0x6   :  { %107 = vmatpush3.bf16.msra.mxu0 %v115_v2 }
   0x9   :  { %109 = vmatmul.mubr.msk.bf16.vlgmr.msra.gmra.mxu0 %vm32_vm1, %v15_v3 }
  0xc9   :  { %v70_v4 = vpop.f32.mrf.mxu0 }
  0xca   :  { %v76_v5 = vpack.c.bf16 %v70_v4, %v70_v4  ;;  %78 = vadd.xlane.f32.xlu0 %v70_v4  ;;  %v82_v7 = vmul.f32 %v70_v4, %v70_v4 }
  0xcb   :  { %v110_v6 = vpop.f32.mrf.mxu0 }
  0xcc   :  { %77 = vst [vmem:[%s163_s2] sm:$0xf] %v76_v5 }
  0xcd   :  { %v73_v8 = vpop.f32.mrf.mxu0 }
  0xce   :  { %83 = vadd.xlane.f32.xlu0 %v82_v7 }
  0xcf   :  { %v111_v9 = vpop.f32.mrf.mxu0 }
 0x153   :  { %v79_v10 = vpop.xlane.xlu0 %78 }
 0x154   :  { %81 = vst.msk [vmem:[%s164_s3] sm:$0xff] %vm80_vm2, %v79_v10 }
 0x157   :  { %v84_v11 = vpop.xlane.xlu0 %83 }
 0x158   :  { %85 = vst.msk [vmem:[%s165_s4] sm:$0xff] %vm80_vm2, %v84_v11 }

// kernel: _lambda_.35
= control target key start
LH: loop header
LB: loop body
LE: loop exit
PB: predicated region body
PF: predicated region fallthrough
CT: control target
= control target key end

     0   :  { %v310_v0 = vmov 0   ;;  %vm113_vm0 = vcmask 154624   ;;  %vm120_vm1 = vcmask 1040384   ;;  %vm121_vm2 = vcmask 1041408   ;;  %s417_s1 = inlined_call_operand.vmem [shape: bf16[147,128], index: 1, kind: input, shape index: {}]   ;;  %s418_s0 = inlined_call_operand.vmem [shape: bf16[32,147], index: 0, kind: input, shape index: {}]   ;;  %s419_s2 = inlined_call_operand.vmem [shape: bf16[32,128], index: 2, kind: output, shape index: {0}]   ;;  %s420_s3 = inlined_call_operand.vmem [shape: f32[1,32,1], index: 3, kind: output, shape index: {1}]   ;;  %s421_s4 = inlined_call_operand.vmem [shape: f32[1,32,1], index: 4, kind: output, shape index: {2}]  }
   0x1   :  { %127 = vmatprep.subr.bf16.mxu0 %v310_v0  ;;  %272 = vmatprep.subr.bf16.mxu1 %v310_v0  ;;  %v294_v1 = vld [vmem:[%s417_s1 + $0x38] sm:$0xff]   ;;  %v295_v2 = vld [vmem:[%s417_s1 + $0x30] sm:$0xff]   ;;  %v296_v3 = vld [vmem:[%s417_s1 + $0x28] sm:$0xff]   ;;  %v311_v10 = vmov 65535   ;;  %vm204_vm3 = vcmask 7168  }
   0x2   :  { %128 = vmatpush1.bf16.msra.mxu0 %v294_v1  ;;  %282 = vmatpush1.bf16.msra.mxu1 %v294_v1  ;;  %v297_v4 = vld [vmem:[%s417_s1 + $0x20] sm:$0xff]   ;;  %v309_v6 = vld [vmem:[%s418_s0 + $0x14] ss:$8 sps:$4 sm:$0xff]   ;;  %v300_v9 = vld [vmem:[%s417_s1 + $0x8] sm:$0xff]   ;;  %v122_v11 = vsel %vm120_vm1, 4294967295, %v311_v10 }
   0x3   :  { %129 = vmatprep.subr.bf16.mxu0 %v310_v0  ;;  %273 = vmatprep.subr.bf16.mxu1 %v310_v0  ;;  %v306_v5 = vld [vmem:[%s418_s0 + $0x4] ss:$8 sps:$4 sm:$0xff]   ;;  %v298_v7 = vld [vmem:[%s417_s1 + $0x18] sm:$0xff]   ;;  %v299_v8 = vld [vmem:[%s417_s1 + $0x10] sm:$0xff]   ;;  %v123_v14 = vsel %vm121_vm2, %v122_v11, 0 }
   0x4   :  { %251 = vmatprep.mubr.msk.bf16.mxu0 %vm113_vm0, %v306_v5  ;;  %252 = vmatprep.mubr.msk.bf16.mxu1 %vm113_vm0, %v309_v6  ;;  %v301_v12 = vld [vmem:[%s417_s1] sm:$0xff]   ;;  %v302_v13 = vld [vmem:[%s417_s1 + $0x48] ss:$0 sps:$4 sm:$0x33]   ;;  %v307_v18 = vld [vmem:[%s418_s0 + $0x10] ss:$8 sps:$4 sm:$0xff]  }
   0x5   :  { %v125_v15 = vand.u32 %v302_v13, %v123_v14  ;;  %v303_v16 = vld [vmem:[%s417_s1 + $0x40] sm:$0xff]  }
   0x6   :  { %130 = vmatpush1.bf16.msra.mxu0 %v295_v2  ;;  %283 = vmatpush1.bf16.msra.mxu1 %v295_v2  ;;  %v304_v17 = vld [vmem:[%s418_s0] ss:$8 sps:$4 sm:$0xff]  }
   0x7   :  { %131 = vmatprep.subr.bf16.mxu0 %v310_v0  ;;  %274 = vmatprep.subr.bf16.mxu1 %v310_v0 }
   0xa   :  { %132 = vmatpush1.bf16.msra.mxu0 %v296_v3  ;;  %284 = vmatpush1.bf16.msra.mxu1 %v296_v3 }
   0xb   :  { %133 = vmatprep.subr.bf16.mxu0 %v310_v0  ;;  %275 = vmatprep.subr.bf16.mxu1 %v310_v0 }
   0xe   :  { %134 = vmatpush1.bf16.msra.mxu0 %v297_v4  ;;  %285 = vmatpush1.bf16.msra.mxu1 %v297_v4 }
   0xf   :  { %135 = vmatprep.subr.bf16.mxu0 %v310_v0  ;;  %276 = vmatprep.subr.bf16.mxu1 %v310_v0 }
  0x12   :  { %136 = vmatpush1.bf16.msra.mxu0 %v298_v7  ;;  %286 = vmatpush1.bf16.msra.mxu1 %v298_v7 }
  0x13   :  { %137 = vmatprep.subr.bf16.mxu0 %v310_v0  ;;  %277 = vmatprep.subr.bf16.mxu1 %v310_v0 }
  0x16   :  { %138 = vmatpush1.bf16.msra.mxu0 %v299_v8  ;;  %287 = vmatpush1.bf16.msra.mxu1 %v299_v8 }
  0x17   :  { %139 = vmatprep.subr.bf16.mxu0 %v310_v0  ;;  %278 = vmatprep.subr.bf16.mxu1 %v310_v0 }
  0x1a   :  { %140 = vmatpush1.bf16.msra.mxu0 %v300_v9  ;;  %288 = vmatpush1.bf16.msra.mxu1 %v300_v9 }
  0x1b   :  { %141 = vmatprep.subr.bf16.mxu0 %v310_v0  ;;  %279 = vmatprep.subr.bf16.mxu1 %v310_v0 }
  0x1e   :  { %142 = vmatpush1.bf16.msra.mxu0 %v301_v12  ;;  %289 = vmatpush1.bf16.msra.mxu1 %v301_v12 }
  0x1f   :  { %155 = vmatprep.subr.bf16.mxu0 %v310_v0  ;;  %280 = vmatprep.subr.bf16.mxu1 %v310_v0 }
  0x22   :  { %156 = vmatpush2.bf16.msra.mxu0 %v125_v15  ;;  %290 = vmatpush2.bf16.msra.mxu1 %v125_v15 }
  0x23   :  { %157 = vmatprep.subr.bf16.mxu0 %v310_v0  ;;  %281 = vmatprep.subr.bf16.mxu1 %v310_v0 }
  0x26   :  { %158 = vmatpush2.bf16.msra.mxu0 %v303_v16  ;;  %291 = vmatpush2.bf16.msra.mxu1 %v303_v16 }
  0x29   :  { %160 = vmatmul.mubr.bf16.vlgmr.msra.gmra.mxu0 %v304_v17  ;;  %168 = vmatmul.mubr.bf16.vlgmr.msra.gmra.mxu1 %v307_v18 }
  0xe9   :  { %v161_v19 = vpop.f32.mrf.mxu0  ;;  %v169_v20 = vpop.f32.mrf.mxu1 }
  0xea   :  { %200 = vadd.xlane.f32.xlu1 %v169_v20  ;;  %196 = vadd.xlane.f32.xlu0 %v161_v19  ;;  %v209_v23 = vmul.f32 %v161_v19, %v161_v19  ;;  %v211_v31 = vmul.f32 %v169_v20, %v169_v20 }
  0xeb   :  { %v163_v21 = vpop.f32.mrf.mxu0  ;;  %v171_v22 = vpop.f32.mrf.mxu1 }
  0xed   :  { %v164_v24 = vpop.f32.mrf.mxu0  ;;  %v172_v25 = vpop.f32.mrf.mxu1 }
  0xee   :  { %v264_v26 = vpack.c.bf16 %v164_v24, %v161_v19  ;;  %v269_v27 = vpack.c.bf16 %v172_v25, %v169_v20  ;;  %202 = vadd.xlane.f32.xlu1 %v172_v25  ;;  %213 = vadd.xlane.f32.xlu0 %v209_v23  ;;  %v210_v30 = vmul.f32 %v164_v24, %v164_v24 }
  0xef   :  { %v166_v28 = vpop.f32.mrf.mxu0  ;;  %v174_v29 = vpop.f32.mrf.mxu1  ;;  %v212_v32 = vmul.f32 %v172_v25, %v172_v25 }
  0xf0   :  { %265 = vst [vmem:[%s419_s2] sm:$0xff] %v264_v26   ;;  %271 = vst [vmem:[%s419_s2 + $0x8] sm:$0xff] %v269_v27  }
  0xf2   :  { %198 = vadd.xlane.f32.xlu0 %v164_v24  ;;  %215 = vadd.xlane.f32.xlu1 %v210_v30 }
  0xf6   :  { %217 = vadd.xlane.f32.xlu0 %v211_v31  ;;  %219 = vadd.xlane.f32.xlu1 %v212_v32 }
 0x173   :  { %v201_v33 = vpop.xlane.xlu1 %200  ;;  %v197_v34 = vpop.xlane.xlu0 %196 }
 0x174   :  { %207 = vst.msk [vmem:[%s420_s3 + $0x10] sm:$0xff] %vm204_vm3, %v201_v33  ;;  %205 = vst.msk [vmem:[%s420_s3] sm:$0xff] %vm204_vm3, %v197_v34 }
 0x177   :  { %v203_v35 = vpop.xlane.xlu1 %202  ;;  %v214_v36 = vpop.xlane.xlu0 %213 }
 0x178   :  { %208 = vst.msk [vmem:[%s420_s3 + $0x18] sm:$0xff] %vm204_vm3, %v203_v35  ;;  %221 = vst.msk [vmem:[%s421_s4] sm:$0xff] %vm204_vm3, %v214_v36 }
 0x17b   :  { %v199_v37 = vpop.xlane.xlu0 %198  ;;  %v216_v38 = vpop.xlane.xlu1 %215 }
 0x17c   :  { %206 = vst.msk [vmem:[%s420_s3 + $0x8] sm:$0xff] %vm204_vm3, %v199_v37  ;;  %222 = vst.msk [vmem:[%s421_s4 + $0x8] sm:$0xff] %vm204_vm3, %v216_v38 }
 0x17f   :  { %v218_v39 = vpop.xlane.xlu0 %217  ;;  %v220_v40 = vpop.xlane.xlu1 %219 }
 0x180   :  { %223 = vst.msk [vmem:[%s421_s4 + $0x10] sm:$0xff] %vm204_vm3, %v218_v39  ;;  %224 = vst.msk [vmem:[%s421_s4 + $0x18] sm:$0xff] %vm204_vm3, %v220_v40 }

// kernel: _lambda_.39
= control target key start
LH: loop header
LB: loop body
LE: loop exit
PB: predicated region body
PF: predicated region fallthrough
CT: control target
= control target key end

     0   :  { %vm56_vm0 = vcmask 1043456   ;;  %v155_v0 = vmov 0.0   ;;  %vm156_vm1 = vmmov 0   ;;  %vm52_vm2 = vcmask 588800   ;;  %s209_s1 = inlined_call_operand.vmem [shape: bf16[72,128], index: 1, kind: input, shape index: {}]   ;;  %s210_s0 = inlined_call_operand.vmem [shape: bf16[8,72], index: 0, kind: input, shape index: {}]   ;;  %s211_s2 = inlined_call_operand.vmem [shape: bf16[8,128], index: 2, kind: output, shape index: {0}]   ;;  %s212_s3 = inlined_call_operand.vmem [shape: f32[1,8,1], index: 3, kind: output, shape index: {1}]   ;;  %s213_s4 = inlined_call_operand.vmem [shape: f32[1,8,1], index: 4, kind: output, shape index: {2}]  }
   0x1   :  { %134 = vmatprep.subr.bf16.mxu0 %v155_v0  ;;  %v150_v1 = vld [vmem:[%s209_s1 + $0x20] ss:$0 sps:$4 sm:$0xff]   ;;  %144 = vmatprep.mubr.msk.bf16.mxu0 %vm156_vm1, %v155_v0  ;;  %v151_v3 = vld [vmem:[%s209_s1 + $0x18] sm:$0xff]   ;;  %v152_v4 = vld [vmem:[%s209_s1 + $0x10] sm:$0xff]   ;;  %vm104_vm3 = vcmask 7168  }
   0x2   :  { %v58_v2 = vsel %vm56_vm0, %v150_v1, 0  ;;  %v153_v5 = vld [vmem:[%s209_s1 + $0x8] sm:$0xff]   ;;  %v154_v6 = vld [vmem:[%s209_s1] sm:$0xff]  }
   0x3   :  { %135 = vmatpush3.bf16.msra.mxu0 %v58_v2  ;;  %v15_v7 = vld [vmem:[%s210_s0] sm:$0xf] }
   0x4   :  { %136 = vmatprep.subr.bf16.mxu0 %v155_v0 }
   0x7   :  { %137 = vmatpush3.bf16.msra.mxu0 %v151_v3 }
   0x8   :  { %138 = vmatprep.subr.bf16.mxu0 %v155_v0 }
   0xb   :  { %139 = vmatpush3.bf16.msra.mxu0 %v152_v4 }
   0xc   :  { %140 = vmatprep.subr.bf16.mxu0 %v155_v0 }
   0xf   :  { %141 = vmatpush3.bf16.msra.mxu0 %v153_v5 }
  0x10   :  { %142 = vmatprep.subr.bf16.mxu0 %v155_v0 }
  0x13   :  { %143 = vmatpush3.bf16.msra.mxu0 %v154_v6 }
  0x16   :  { %145 = vmatmul.mubr.msk.bf16.vlgmr.msra.gmra.mxu0 %vm52_vm2, %v15_v7 }
  0xd6   :  { %v94_v8 = vpop.f32.mrf.mxu0 }
  0xd7   :  { %v100_v9 = vpack.c.bf16 %v94_v8, %v94_v8  ;;  %102 = vadd.xlane.f32.xlu0 %v94_v8  ;;  %v106_v11 = vmul.f32 %v94_v8, %v94_v8 }
  0xd8   :  { %v146_v10 = vpop.f32.mrf.mxu0 }
  0xd9   :  { %101 = vst [vmem:[%s211_s2] sm:$0xf] %v100_v9 }
  0xda   :  { %v97_v12 = vpop.f32.mrf.mxu0 }
  0xdb   :  { %107 = vadd.xlane.f32.xlu0 %v106_v11 }
  0xdc   :  { %v147_v13 = vpop.f32.mrf.mxu0 }
 0x160   :  { %v103_v14 = vpop.xlane.xlu0 %102 }
 0x161   :  { %105 = vst.msk [vmem:[%s212_s3] sm:$0xff] %vm104_vm3, %v103_v14 }
 0x164   :  { %v108_v15 = vpop.xlane.xlu0 %107 }
 0x165   :  { %109 = vst.msk [vmem:[%s213_s4] sm:$0xff] %vm104_vm3, %v108_v15 }

// kernel: _lambda_.41
= control target key start
LH: loop header
LB: loop body
LE: loop exit
PB: predicated region body
PF: predicated region fallthrough
CT: control target
= control target key end

     0   :  { %v197_v0 = vmov 0   ;;  %s265_s1 = inlined_call_operand.vmem [shape: f32[32,1], index: 1, kind: input, shape index: {}]   ;;  %s266_s2 = inlined_call_operand.vmem [shape: f32[32,1], index: 2, kind: input, shape index: {}]   ;;  %s267_s0 = inlined_call_operand.vmem [shape: bf16[32,128], index: 0, kind: input, shape index: {}]   ;;  %s268_s3 = inlined_call_operand.vmem [shape: bf16[32,128], index: 3, kind: input, shape index: {}]   ;;  %s269_s4 = inlined_call_operand.vmem [shape: bf16[32,128], index: 4, kind: output, shape index: {}]  }
   0x1   :  { %188 = vset.pattern.permute.xlu1 %v197_v0  ;;  %187 = vset.pattern.permute.xlu0 %v197_v0  ;;  %v27_v1 = vld [vmem:[%s265_s1 + $0x10] sm:$0xff]  ;;  %v25_v3 = vld [vmem:[%s265_s1] sm:$0xff]  ;;  %v28_v8 = vld [vmem:[%s265_s1 + $0x18] sm:$0xff] }
   0x2   :  { %v31_v2 = vld [vmem:[%s266_s2 + $0x10] sm:$0xff]  ;;  %v35_v4 = vmul.f32 0.0078125, %v27_v1  ;;  %v29_v6 = vld [vmem:[%s266_s2] sm:$0xff]  ;;  %v33_v7 = vmul.f32 0.0078125, %v25_v3  ;;  %v32_v9 = vld [vmem:[%s266_s2 + $0x18] sm:$0xff]  ;;  %v36_v11 = vmul.f32 0.0078125, %v28_v8 }
   0x3   :  { %v39_v5 = vmul.f32 0.0078125, %v31_v2  ;;  %v37_v10 = vmul.f32 0.0078125, %v29_v6  ;;  %v40_v12 = vmul.f32 0.0078125, %v32_v9  ;;  %v26_v13 = vld [vmem:[%s265_s1 + $0x8] sm:$0xff]  ;;  %v158_v39 = vld [vmem:[%s267_s0] sm:$0xff]  }
   0x4   :  { %v30_v14 = vld [vmem:[%s266_s2 + $0x8] sm:$0xff]  ;;  %65 = vperm.xlu1 %188, %v35_v4   ;;  %v43_v15 = vmul.f32 %v35_v4, %v35_v4  ;;  %55 = vperm.xlu0 %187, %v33_v7   ;;  %v41_v16 = vmul.f32 %v33_v7, %v33_v7  ;;  %v34_v17 = vmul.f32 0.0078125, %v26_v13  ;;  %v44_v19 = vmul.f32 %v36_v11, %v36_v11  ;;  %v166_v43 = vld [vmem:[%s268_s3] sm:$0xff]  }
   0x5   :  { %v38_v18 = vmul.f32 0.0078125, %v30_v14  ;;  %v159_v40 = vunpack.c.l.bf16 %v158_v39  ;;  %v183_v41 = vld [vmem:[%s267_s0 + $0x8] sm:$0xff]   ;;  %v160_v44 = vunpack.c.h.bf16 %v158_v39  ;;  %v167_v48 = vunpack.c.l.bf16 %v166_v43 }
   0x6   :  { %v47_v20 = vsub.f32 %v39_v5, %v43_v15  ;;  %v45_v21 = vsub.f32 %v37_v10, %v41_v16  ;;  %v42_v22 = vmul.f32 %v34_v17, %v34_v17  ;;  %v48_v23 = vsub.f32 %v40_v12, %v44_v19  ;;  %v184_v50 = vld [vmem:[%s268_s3 + $0x8] sm:$0xff]  }
   0x7   :  { %v163_v46 = vunpack.c.l.bf16 %v183_v41  ;;  %v164_v51 = vunpack.c.h.bf16 %v183_v41  ;;  %v168_v53 = vunpack.c.h.bf16 %v166_v43  ;;  %v171_v59 = vunpack.c.l.bf16 %v184_v50 }
   0x8   :  { %v51_v24 = vmax.f32 %v47_v20, 0.0  ;;  %v49_v25 = vmax.f32 %v45_v21, 0.0  ;;  %70 = vperm.xlu1 %188, %v36_v11   ;;  %v46_v26 = vsub.f32 %v38_v18, %v42_v22  ;;  %60 = vperm.xlu0 %187, %v34_v17   ;;  %v52_v27 = vmax.f32 %v48_v23, 0.0 }
   0x9   :  { %v172_v60 = vunpack.c.h.bf16 %v184_v50 }
   0xa   :  { %v79_v28 = vadd.f32 1e-05, %v51_v24  ;;  %v77_v29 = vadd.f32 1e-05, %v49_v25  ;;  %v50_v30 = vmax.f32 %v46_v26, 0.0 }
   0xb   :  { %v80_v32 = vadd.f32 1e-05, %v52_v27 }
   0xc   :  { %v78_v31 = vadd.f32 1e-05, %v50_v30  ;;  %189 = vrsqrt.f32 %v77_v29 }
   0xd   :  { %191 = vrsqrt.f32 %v79_v28 }
   0xe   :  { %193 = vrsqrt.f32 %v78_v31 }
   0xf   :  { %195 = vrsqrt.f32 %v80_v32 }
  0x19   :  { %v190_v33 = vpop.eup %189 }
  0x1a   :  { %v192_v34 = vpop.eup %191  ;;  %87 = vperm.xlu0 %187, %v190_v33  }
  0x1b   :  { %v194_v35 = vpop.eup %193 }
  0x1c   :  { %92 = vperm.xlu1 %188, %v194_v35   ;;  %v196_v36 = vpop.eup %195 }
  0x1e   :  { %97 = vperm.xlu0 %187, %v192_v34  }
  0x20   :  { %102 = vperm.xlu1 %188, %v196_v36  }
  0x7f   :  { %v56_v37 = vpop.permute.xlu0 %55  ;;  %v66_v38 = vpop.permute.xlu1 %65 }
  0x80   :  { %v73_v47 = vsub.f32 %v159_v40, %v56_v37  ;;  %v75_v56 = vsub.f32 %v163_v46, %v66_v38 }
  0x83   :  { %v61_v42 = vpop.permute.xlu0 %60  ;;  %v71_v45 = vpop.permute.xlu1 %70 }
  0x84   :  { %v74_v52 = vsub.f32 %v160_v44, %v61_v42  ;;  %v76_v62 = vsub.f32 %v164_v51, %v71_v45 }
  0x95   :  { %v88_v49 = vpop.permute.xlu0 %87 }
  0x96   :  { %v105_v54 = vmul.f32 %v88_v49, %v73_v47 }
  0x97   :  { %v93_v55 = vpop.permute.xlu1 %92 }
  0x98   :  { %v106_v57 = vmul.f32 %v93_v55, %v74_v52  ;;  %v117_v58 = vadd.f32 %v167_v48, %v105_v54 }
  0x99   :  { %v98_v61 = vpop.permute.xlu0 %97 }
  0x9a   :  { %v118_v63 = vadd.f32 %v168_v53, %v106_v57  ;;  %v121_v0 = vmax.f32 %v117_v58, 0.0  ;;  %v107_v1 = vmul.f32 %v98_v61, %v75_v56 }
  0x9b   :  { %v103_v2 = vpop.permute.xlu1 %102 }
  0x9c   :  { %v122_v3 = vmax.f32 %v118_v63, 0.0  ;;  %v108_v4 = vmul.f32 %v103_v2, %v76_v62  ;;  %v119_v5 = vadd.f32 %v171_v59, %v107_v1 }
  0x9e   :  { %v176_v6 = vpack.c.bf16 %v122_v3, %v121_v0  ;;  %v120_v7 = vadd.f32 %v172_v60, %v108_v4  ;;  %v123_v8 = vmax.f32 %v119_v5, 0.0 }
  0xa0   :  { %177 = vst [vmem:[%s269_s4] sm:$0xff] %v176_v6   ;;  %v124_v9 = vmax.f32 %v120_v7, 0.0 }
  0xa2   :  { %v181_v10 = vpack.c.bf16 %v124_v9, %v123_v8 }
  0xa4   :  { %185 = vst [vmem:[%s269_s4 + $0x8] sm:$0xff] %v181_v10  }

// kernel: _lambda_.40
= control target key start
LH: loop header
LB: loop body
LE: loop exit
PB: predicated region body
PF: predicated region fallthrough
CT: control target
= control target key end

     0   :  { %v220_v0 = vmov 0   ;;  %vm60_vm0 = vcmask 64512   ;;  %vm67_vm1 = vcmask 1043456   ;;  %vm148_vm2 = vcmask 7168   ;;  %s311_s2 = inlined_call_operand.vmem [shape: f32[8,1], index: 2, kind: input, shape index: {}]   ;;  %s312_s3 = inlined_call_operand.vmem [shape: f32[8,1], index: 3, kind: input, shape index: {}]   ;;  %s313_s0 = inlined_call_operand.vmem [shape: bf16[32,8], index: 0, kind: input, shape index: {}]   ;;  %s314_s1 = inlined_call_operand.vmem [shape: bf16[8,128], index: 1, kind: input, shape index: {}]   ;;  %s315_s4 = inlined_call_operand.vmem [shape: bf16[32,128], index: 4, kind: output, shape index: {0}]   ;;  %s316_s5 = inlined_call_operand.vmem [shape: f32[1,32,1], index: 5, kind: output, shape index: {1}]   ;;  %s317_s6 = inlined_call_operand.vmem [shape: f32[1,32,1], index: 6, kind: output, shape index: {2}]  }
   0x1   :  { %215 = vset.pattern.permute.xlu0 %v220_v0  ;;  %v23_v1 = vld [vmem:[%s311_s2] sm:$0xff]  ;;  %v217_v20 = vld [vmem:[%s313_s0 + $0x8] sm:$0xff]  }
   0x2   :  { %v24_v2 = vld [vmem:[%s312_s3] sm:$0xff]  ;;  %v25_v3 = vmul.f32 0.0078125, %v23_v1 }
   0x3   :  { %v26_v4 = vmul.f32 0.0078125, %v24_v2  ;;  %v216_v10 = vld [vmem:[%s313_s0] sm:$0xff]  }
   0x4   :  { %32 = vperm.xlu0 %215, %v25_v3   ;;  %v27_v5 = vmul.f32 %v25_v3, %v25_v3  ;;  %209 = vmatprep.mubr.msk.bf16.mxu0 %vm60_vm0, %v216_v10  ;;  %v21_v11 = vld [vmem:[%s314_s1] sm:$0xf] }
   0x5   :  { %v22_v13 = vunpack.c.l.bf16 %v21_v11 }
   0x6   :  { %v28_v6 = vsub.f32 %v26_v4, %v27_v5 }
   0x8   :  { %v29_v7 = vmax.f32 %v28_v6, 0.0 }
   0xa   :  { %v36_v8 = vadd.f32 1e-05, %v29_v7 }
   0xc   :  { %218 = vrsqrt.f32 %v36_v8 }
  0x19   :  { %v219_v9 = vpop.eup %218 }
  0x1a   :  { %40 = vperm.xlu0 %215, %v219_v9  }
  0x7f   :  { %v33_v12 = vpop.permute.xlu0 %32 }
  0x80   :  { %v35_v14 = vsub.f32 %v22_v13, %v33_v12 }
  0x95   :  { %v41_v15 = vpop.permute.xlu0 %40 }
  0x96   :  { %v43_v16 = vmul.f32 %v41_v15, %v35_v14 }
  0x98   :  { %v44_v17 = vmax.f32 %v43_v16, 0.0 }
  0x9a   :  { %v49_v18 = vpack.c.bf16 %v44_v17, %v44_v17 }
  0x9c   :  { %213 = vmatprep.subr.msk.bf16.mxu0 %vm67_vm1, %v49_v18  ;;  %v69_v19 = vsel %vm67_vm1, %v49_v18, 0 }
  0x9d   :  { %208 = vmatpush3.bf16.msra.mxu0 %v69_v19 }
  0xa0   :  { %210 = vmatmul.mubr.msk.bf16.vlgmr.msra.gmra.mxu0 %vm60_vm0, %v217_v20 }
 0x160   :  { %v211_v21 = vpop.f32.mrf.mxu0 }
 0x161   :  { %144 = vadd.xlane.f32.xlu0 %v211_v21  ;;  %v155_v25 = vmul.f32 %v211_v21, %v211_v21 }
 0x162   :  { %v105_v22 = vpop.f32.mrf.mxu0 }
 0x163   :  { %140 = vadd.xlane.f32.xlu1 %v105_v22  ;;  %v153_v28 = vmul.f32 %v105_v22, %v105_v22 }
 0x164   :  { %v212_v23 = vpop.f32.mrf.mxu0 }
 0x165   :  { %v201_v24 = vpack.c.bf16 %v212_v23, %v211_v21  ;;  %v156_v30 = vmul.f32 %v212_v23, %v212_v23 }
 0x166   :  { %v108_v26 = vpop.f32.mrf.mxu0 }
 0x167   :  { %v196_v27 = vpack.c.bf16 %v108_v26, %v105_v22  ;;  %203 = vst [vmem:[%s315_s4 + $0x8] sm:$0xff] %v201_v24   ;;  %161 = vadd.xlane.f32.xlu1 %v155_v25  ;;  %v154_v29 = vmul.f32 %v108_v26, %v108_v26 }
 0x169   :  { %197 = vst [vmem:[%s315_s4] sm:$0xff] %v196_v27  }
 0x16b   :  { %146 = vadd.xlane.f32.xlu1 %v212_v23 }
 0x16f   :  { %157 = vadd.xlane.f32.xlu1 %v153_v28 }
 0x173   :  { %142 = vadd.xlane.f32.xlu1 %v108_v26 }
 0x177   :  { %159 = vadd.xlane.f32.xlu1 %v154_v29 }
 0x17b   :  { %163 = vadd.xlane.f32.xlu1 %v156_v30 }
 0x1ea   :  { %v145_v31 = vpop.xlane.xlu0 %144 }
 0x1eb   :  { %151 = vst.msk [vmem:[%s316_s5 + $0x10] sm:$0xff] %vm148_vm2, %v145_v31 }
 0x1ec   :  { %v141_v32 = vpop.xlane.xlu1 %140 }
 0x1ed   :  { %149 = vst.msk [vmem:[%s316_s5] sm:$0xff] %vm148_vm2, %v141_v32 }
 0x1f0   :  { %v162_v33 = vpop.xlane.xlu1 %161 }
 0x1f1   :  { %167 = vst.msk [vmem:[%s317_s6 + $0x10] sm:$0xff] %vm148_vm2, %v162_v33 }
 0x1f4   :  { %v147_v34 = vpop.xlane.xlu1 %146 }
 0x1f5   :  { %152 = vst.msk [vmem:[%s316_s5 + $0x18] sm:$0xff] %vm148_vm2, %v147_v34 }
 0x1f8   :  { %v158_v35 = vpop.xlane.xlu1 %157 }
 0x1f9   :  { %165 = vst.msk [vmem:[%s317_s6] sm:$0xff] %vm148_vm2, %v158_v35 }
 0x1fc   :  { %v143_v36 = vpop.xlane.xlu1 %142 }
 0x1fd   :  { %150 = vst.msk [vmem:[%s316_s5 + $0x8] sm:$0xff] %vm148_vm2, %v143_v36 }
 0x200   :  { %v160_v37 = vpop.xlane.xlu1 %159 }
 0x201   :  { %166 = vst.msk [vmem:[%s317_s6 + $0x8] sm:$0xff] %vm148_vm2, %v160_v37 }
 0x204   :  { %v164_v38 = vpop.xlane.xlu1 %163 }
 0x205   :  { %168 = vst.msk [vmem:[%s317_s6 + $0x18] sm:$0xff] %vm148_vm2, %v164_v38 }

// kernel: _lambda_.48
= control target key start
LH: loop header
LB: loop body
LE: loop exit
PB: predicated region body
PF: predicated region fallthrough
CT: control target
= control target key end

     0   :  { %v96_v0 = vmov 0   ;;  %s135_s1 = inlined_call_operand.vmem [shape: f32[16,1], index: 1, kind: input, shape index: {}]   ;;  %s136_s2 = inlined_call_operand.vmem [shape: f32[16,1], index: 2, kind: input, shape index: {}]   ;;  %s137_s0 = inlined_call_operand.vmem [shape: bf16[16,128], index: 0, kind: input, shape index: {}]   ;;  %s138_s3 = inlined_call_operand.vmem [shape: bf16[16,128], index: 3, kind: output, shape index: {}]  }
   0x1   :  { %90 = vset.pattern.permute.xlu0 %v96_v0  ;;  %v18_v1 = vld [vmem:[%s135_s1] sm:$0xff]  ;;  %v19_v2 = vld [vmem:[%s135_s1 + $0x8] sm:$0xff]  ;;  %91 = vset.pattern.permute.xlu1 %v96_v0 }
   0x2   :  { %v20_v3 = vld [vmem:[%s136_s2] sm:$0xff]  ;;  %v21_v4 = vld [vmem:[%s136_s2 + $0x8] sm:$0xff]  ;;  %v22_v5 = vmul.f32 0.0078125, %v18_v1  ;;  %v23_v7 = vmul.f32 0.0078125, %v19_v2 }
   0x3   :  { %v24_v6 = vmul.f32 0.0078125, %v20_v3  ;;  %v25_v8 = vmul.f32 0.0078125, %v21_v4  ;;  %v81_v19 = vld [vmem:[%s137_s0] sm:$0xff]  }
   0x4   :  { %34 = vperm.xlu0 %90, %v22_v5   ;;  %v26_v9 = vmul.f32 %v22_v5, %v22_v5  ;;  %v27_v10 = vmul.f32 %v23_v7, %v23_v7  ;;  %v82_v21 = vunpack.c.l.bf16 %v81_v19  ;;  %v83_v23 = vunpack.c.h.bf16 %v81_v19 }
   0x6   :  { %v28_v11 = vsub.f32 %v24_v6, %v26_v9  ;;  %v29_v12 = vsub.f32 %v25_v8, %v27_v10 }
   0x8   :  { %v30_v13 = vmax.f32 %v28_v11, 0.0  ;;  %v31_v14 = vmax.f32 %v29_v12, 0.0  ;;  %39 = vperm.xlu0 %90, %v23_v7  }
   0xa   :  { %v44_v15 = vadd.f32 1e-05, %v30_v13  ;;  %v45_v16 = vadd.f32 1e-05, %v31_v14 }
   0xc   :  { %92 = vrsqrt.f32 %v44_v15 }
   0xd   :  { %94 = vrsqrt.f32 %v45_v16 }
  0x19   :  { %v93_v17 = vpop.eup %92 }
  0x1a   :  { %50 = vperm.xlu1 %91, %v93_v17   ;;  %v95_v18 = vpop.eup %94 }
  0x1e   :  { %55 = vperm.xlu1 %91, %v95_v18  }
  0x7f   :  { %v35_v20 = vpop.permute.xlu0 %34 }
  0x80   :  { %v42_v22 = vsub.f32 %v82_v21, %v35_v20 }
  0x83   :  { %v40_v24 = vpop.permute.xlu0 %39 }
  0x84   :  { %v43_v26 = vsub.f32 %v83_v23, %v40_v24 }
  0x95   :  { %v51_v25 = vpop.permute.xlu1 %50 }
  0x96   :  { %v58_v27 = vmul.f32 %v51_v25, %v42_v22 }
  0x98   :  { %v60_v30 = vmax.f32 %v58_v27, 0.0 }
  0x99   :  { %v56_v28 = vpop.permute.xlu1 %55 }
  0x9a   :  { %v59_v29 = vmul.f32 %v56_v28, %v43_v26 }
  0x9c   :  { %v61_v31 = vmax.f32 %v59_v29, 0.0 }
  0x9e   :  { %v87_v32 = vpack.c.bf16 %v61_v31, %v60_v30 }
  0xa0   :  { %88 = vst [vmem:[%s138_s3] sm:$0xff] %v87_v32  }

// kernel: _lambda_.47
= control target key start
LH: loop header
LB: loop body
LE: loop exit
PB: predicated region body
PF: predicated region fallthrough
CT: control target
= control target key end

     0   :  { %v149_v0 = vmov 0.0   ;;  %vm150_vm0 = vmmov 0   ;;  %vm38_vm1 = vcmask 261120   ;;  %vm97_vm2 = vcmask 7168   ;;  %s200_s1 = inlined_call_operand.vmem [shape: bf16[32,128], index: 1, kind: input, shape index: {}]   ;;  %s201_s0 = inlined_call_operand.vmem [shape: bf16[16,32], index: 0, kind: input, shape index: {}]   ;;  %s202_s2 = inlined_call_operand.vmem [shape: bf16[16,128], index: 2, kind: output, shape index: {0}]   ;;  %s203_s3 = inlined_call_operand.vmem [shape: f32[1,16,1], index: 3, kind: output, shape index: {1}]   ;;  %s204_s4 = inlined_call_operand.vmem [shape: f32[1,16,1], index: 4, kind: output, shape index: {2}]  }
   0x1   :  { %136 = vmatprep.subr.bf16.mxu0 %v149_v0  ;;  %v146_v1 = vld [vmem:[%s200_s1 + $0x8] sm:$0xff]   ;;  %140 = vmatprep.mubr.msk.bf16.mxu0 %vm150_vm0, %v149_v0  ;;  %v147_v2 = vld [vmem:[%s200_s1] sm:$0xff]  }
   0x2   :  { %137 = vmatpush3.bf16.msra.mxu0 %v146_v1  ;;  %v148_v3 = vld [vmem:[%s201_s0] sm:$0xff]  }
   0x3   :  { %138 = vmatprep.subr.bf16.mxu0 %v149_v0 }
   0x6   :  { %139 = vmatpush3.bf16.msra.mxu0 %v147_v2 }
   0x9   :  { %141 = vmatmul.mubr.msk.bf16.vlgmr.msra.gmra.mxu0 %vm38_vm1, %v148_v3 }
  0xc9   :  { %v76_v4 = vpop.f32.mrf.mxu0 }
  0xca   :  { %93 = vadd.xlane.f32.xlu0 %v76_v4  ;;  %v100_v5 = vmul.f32 %v76_v4, %v76_v4 }
  0xcb   :  { %v142_v6 = vpop.f32.mrf.mxu0 }
  0xcc   :  { %102 = vadd.xlane.f32.xlu1 %v100_v5 }
  0xcd   :  { %v79_v7 = vpop.f32.mrf.mxu0 }
  0xce   :  { %v131_v8 = vpack.c.bf16 %v79_v7, %v76_v4  ;;  %95 = vadd.xlane.f32.xlu0 %v79_v7  ;;  %v101_v9 = vmul.f32 %v79_v7, %v79_v7 }
  0xcf   :  { %v143_v10 = vpop.f32.mrf.mxu0 }
  0xd0   :  { %132 = vst [vmem:[%s202_s2] sm:$0xff] %v131_v8   ;;  %104 = vadd.xlane.f32.xlu1 %v101_v9 }
 0x153   :  { %v94_v11 = vpop.xlane.xlu0 %93 }
 0x154   :  { %98 = vst.msk [vmem:[%s203_s3] sm:$0xff] %vm97_vm2, %v94_v11 }
 0x155   :  { %v103_v12 = vpop.xlane.xlu1 %102 }
 0x156   :  { %106 = vst.msk [vmem:[%s204_s4] sm:$0xff] %vm97_vm2, %v103_v12 }
 0x157   :  { %v96_v13 = vpop.xlane.xlu0 %95 }
 0x158   :  { %99 = vst.msk [vmem:[%s203_s3 + $0x8] sm:$0xff] %vm97_vm2, %v96_v13 }
 0x159   :  { %v105_v14 = vpop.xlane.xlu1 %104 }
 0x15a   :  { %107 = vst.msk [vmem:[%s204_s4 + $0x8] sm:$0xff] %vm97_vm2, %v105_v14 }

// kernel: _lambda_.49
= control target key start
LH: loop header
LB: loop body
LE: loop exit
PB: predicated region body
PF: predicated region fallthrough
CT: control target
= control target key end

     0   :  { %v214_v0 = vmov 0   ;;  %vm98_vm0 = vcmask 130048   ;;  %vm157_vm1 = vcmask 7168   ;;  %s288_s1 = inlined_call_operand.vmem [shape: bf16[144,128], index: 1, kind: input, shape index: {}]   ;;  %s289_s0 = inlined_call_operand.vmem [shape: bf16[16,144], index: 0, kind: input, shape index: {}]   ;;  %s290_s2 = inlined_call_operand.vmem [shape: bf16[16,128], index: 2, kind: output, shape index: {0}]   ;;  %s291_s3 = inlined_call_operand.vmem [shape: f32[1,16,1], index: 3, kind: output, shape index: {1}]   ;;  %s292_s4 = inlined_call_operand.vmem [shape: f32[1,16,1], index: 4, kind: output, shape index: {2}]  }
   0x1   :  { %102 = vmatprep.subr.bf16.mxu0 %v214_v0  ;;  %v202_v1 = vld [vmem:[%s288_s1 + $0x38] sm:$0xff]   ;;  %v203_v2 = vld [vmem:[%s288_s1 + $0x30] sm:$0xff]   ;;  %v204_v3 = vld [vmem:[%s288_s1 + $0x28] sm:$0xff]  }
   0x2   :  { %103 = vmatpush1.bf16.msra.mxu0 %v202_v1  ;;  %v205_v4 = vld [vmem:[%s288_s1 + $0x20] sm:$0xff]   ;;  %v206_v6 = vld [vmem:[%s288_s1 + $0x18] sm:$0xff]   ;;  %v207_v7 = vld [vmem:[%s288_s1 + $0x10] sm:$0xff]  }
   0x3   :  { %104 = vmatprep.subr.bf16.mxu0 %v214_v0  ;;  %v213_v5 = vld [vmem:[%s289_s0 + $0x4] ss:$8 sps:$4 sm:$0xff]   ;;  %v211_v11 = vld [vmem:[%s289_s0] ss:$8 sps:$4 sm:$0xff]  }
   0x4   :  { %191 = vmatprep.mubr.msk.bf16.mxu0 %vm98_vm0, %v213_v5  ;;  %v208_v8 = vld [vmem:[%s288_s1 + $0x8] sm:$0xff]   ;;  %v209_v9 = vld [vmem:[%s288_s1] sm:$0xff]  }
   0x5   :  { %v210_v10 = vld [vmem:[%s288_s1 + $0x40] sm:$0xff]  }
   0x6   :  { %105 = vmatpush1.bf16.msra.mxu0 %v203_v2 }
   0x7   :  { %106 = vmatprep.subr.bf16.mxu0 %v214_v0 }
   0xa   :  { %107 = vmatpush1.bf16.msra.mxu0 %v204_v3 }
   0xb   :  { %108 = vmatprep.subr.bf16.mxu0 %v214_v0 }
   0xe   :  { %109 = vmatpush1.bf16.msra.mxu0 %v205_v4 }
   0xf   :  { %110 = vmatprep.subr.bf16.mxu0 %v214_v0 }
  0x12   :  { %111 = vmatpush1.bf16.msra.mxu0 %v206_v6 }
  0x13   :  { %112 = vmatprep.subr.bf16.mxu0 %v214_v0 }
  0x16   :  { %113 = vmatpush1.bf16.msra.mxu0 %v207_v7 }
  0x17   :  { %114 = vmatprep.subr.bf16.mxu0 %v214_v0 }
  0x1a   :  { %115 = vmatpush1.bf16.msra.mxu0 %v208_v8 }
  0x1b   :  { %116 = vmatprep.subr.bf16.mxu0 %v214_v0 }
  0x1e   :  { %117 = vmatpush1.bf16.msra.mxu0 %v209_v9 }
  0x1f   :  { %132 = vmatprep.subr.bf16.mxu0 %v214_v0 }
  0x22   :  { %133 = vmatpush2.bf16.msra.mxu0 %v210_v10 }
  0x25   :  { %135 = vmatmul.mubr.bf16.vlgmr.msra.gmra.mxu0 %v211_v11 }
  0xe5   :  { %v136_v12 = vpop.f32.mrf.mxu0 }
  0xe6   :  { %153 = vadd.xlane.f32.xlu0 %v136_v12  ;;  %v160_v13 = vmul.f32 %v136_v12, %v136_v12 }
  0xe7   :  { %v138_v14 = vpop.f32.mrf.mxu0 }
  0xe8   :  { %162 = vadd.xlane.f32.xlu1 %v160_v13 }
  0xe9   :  { %v139_v15 = vpop.f32.mrf.mxu0 }
  0xea   :  { %v199_v16 = vpack.c.bf16 %v139_v15, %v136_v12  ;;  %155 = vadd.xlane.f32.xlu0 %v139_v15  ;;  %v161_v17 = vmul.f32 %v139_v15, %v139_v15 }
  0xeb   :  { %v141_v18 = vpop.f32.mrf.mxu0 }
  0xec   :  { %200 = vst [vmem:[%s290_s2] sm:$0xff] %v199_v16   ;;  %164 = vadd.xlane.f32.xlu1 %v161_v17 }
 0x16f   :  { %v154_v19 = vpop.xlane.xlu0 %153 }
 0x170   :  { %158 = vst.msk [vmem:[%s291_s3] sm:$0xff] %vm157_vm1, %v154_v19 }
 0x171   :  { %v163_v20 = vpop.xlane.xlu1 %162 }
 0x172   :  { %166 = vst.msk [vmem:[%s292_s4] sm:$0xff] %vm157_vm1, %v163_v20 }
 0x173   :  { %v156_v21 = vpop.xlane.xlu0 %155 }
 0x174   :  { %159 = vst.msk [vmem:[%s291_s3 + $0x8] sm:$0xff] %vm157_vm1, %v156_v21 }
 0x175   :  { %v165_v22 = vpop.xlane.xlu1 %164 }
 0x176   :  { %167 = vst.msk [vmem:[%s292_s4 + $0x8] sm:$0xff] %vm157_vm1, %v165_v22 }

// kernel: _lambda_.51
= control target key start
LH: loop header
LB: loop body
LE: loop exit
PB: predicated region body
PF: predicated region fallthrough
CT: control target
= control target key end

     0   :  { %vm59_vm0 = vcmask 261120   ;;  %vm193_vm1 = vcmask 7168   ;;  %s442_s1 = inlined_call_operand.vmem [shape: bf16[32,128], index: 1, kind: input, shape index: {}]   ;;  %s443_s0 = inlined_call_operand.vmem [shape: bf16[64,32], index: 0, kind: input, shape index: {}]   ;;  %s444_s2 = inlined_call_operand.vmem [shape: bf16[64,128], index: 2, kind: output, shape index: {0}]   ;;  %s445_s3 = inlined_call_operand.vmem [shape: f32[1,64,1], index: 3, kind: output, shape index: {1}]   ;;  %s446_s4 = inlined_call_operand.vmem [shape: f32[1,64,1], index: 4, kind: output, shape index: {2}]  }
   0x1   :  { %v317_v0 = vld [vmem:[%s442_s1 + $0x8] sm:$0xff]   ;;  %v318_v1 = vld [vmem:[%s442_s1] sm:$0xff]   ;;  %v320_v3 = vld [vmem:[%s443_s0 + $0x10] sm:$0xff]  }
   0x2   :  { %301 = vmatprep.subr.bf16.mxu0 %v317_v0  ;;  %313 = vmatprep.subr.bf16.mxu1 %v317_v0  ;;  %v319_v2 = vld [vmem:[%s443_s0] sm:$0xff]   ;;  %v321_v4 = vld [vmem:[%s443_s0 + $0x8] sm:$0xff]   ;;  %v322_v5 = vld [vmem:[%s443_s0 + $0x18] sm:$0xff]  }
   0x3   :  { %302 = vmatpush3.bf16.msra.mxu0 %v317_v0  ;;  %315 = vmatpush3.bf16.msra.mxu1 %v317_v0 }
   0x4   :  { %303 = vmatprep.subr.bf16.mxu0 %v318_v1  ;;  %314 = vmatprep.subr.bf16.mxu1 %v318_v1 }
   0x5   :  { %305 = vmatprep.mubr.msk.bf16.mxu0 %vm59_vm0, %v319_v2  ;;  %309 = vmatprep.mubr.msk.bf16.mxu1 %vm59_vm0, %v320_v3 }
   0x7   :  { %304 = vmatpush3.bf16.msra.mxu0 %v318_v1  ;;  %316 = vmatpush3.bf16.msra.mxu1 %v318_v1 }
   0xa   :  { %306 = vmatmul.mubr.msk.bf16.vlgmr.msra.gmra.mxu0 %vm59_vm0, %v321_v4  ;;  %310 = vmatmul.mubr.msk.bf16.vlgmr.msra.gmra.mxu1 %vm59_vm0, %v322_v5 }
  0xca   :  { %v307_v6 = vpop.f32.mrf.mxu0  ;;  %v311_v7 = vpop.f32.mrf.mxu1 }
  0xcb   :  { %189 = vadd.xlane.f32.xlu0 %v311_v7  ;;  %181 = vadd.xlane.f32.xlu1 %v307_v6  ;;  %v204_v18 = vmul.f32 %v307_v6, %v307_v6  ;;  %v208_v24 = vmul.f32 %v311_v7, %v311_v7 }
  0xcc   :  { %v106_v8 = vpop.f32.mrf.mxu0  ;;  %v122_v9 = vpop.f32.mrf.mxu1 }
  0xcd   :  { %v202_v19 = vmul.f32 %v106_v8, %v106_v8  ;;  %v206_v21 = vmul.f32 %v122_v9, %v122_v9 }
  0xce   :  { %v308_v10 = vpop.f32.mrf.mxu0  ;;  %v312_v11 = vpop.f32.mrf.mxu1 }
  0xcf   :  { %v280_v12 = vpack.c.bf16 %v308_v10, %v307_v6  ;;  %v290_v13 = vpack.c.bf16 %v312_v11, %v311_v7  ;;  %177 = vadd.xlane.f32.xlu0 %v106_v8  ;;  %183 = vadd.xlane.f32.xlu1 %v308_v10  ;;  %v205_v20 = vmul.f32 %v308_v10, %v308_v10 }
  0xd0   :  { %v109_v14 = vpop.f32.mrf.mxu0  ;;  %v125_v15 = vpop.f32.mrf.mxu1  ;;  %v209_v25 = vmul.f32 %v312_v11, %v312_v11 }
  0xd1   :  { %292 = vst [vmem:[%s444_s2 + $0x8] sm:$0xff] %v280_v12   ;;  %294 = vst [vmem:[%s444_s2 + $0x18] sm:$0xff] %v290_v13   ;;  %v275_v16 = vpack.c.bf16 %v109_v14, %v106_v8  ;;  %v285_v17 = vpack.c.bf16 %v125_v15, %v122_v9  ;;  %v203_v22 = vmul.f32 %v109_v14, %v109_v14 }
  0xd2   :  { %v207_v23 = vmul.f32 %v125_v15, %v125_v15 }
  0xd3   :  { %276 = vst [vmem:[%s444_s2] sm:$0xff] %v275_v16   ;;  %293 = vst [vmem:[%s444_s2 + $0x10] sm:$0xff] %v285_v17   ;;  %185 = vadd.xlane.f32.xlu0 %v122_v9  ;;  %191 = vadd.xlane.f32.xlu1 %v312_v11 }
  0xd7   :  { %214 = vadd.xlane.f32.xlu0 %v204_v18  ;;  %187 = vadd.xlane.f32.xlu1 %v125_v15 }
  0xdb   :  { %210 = vadd.xlane.f32.xlu0 %v202_v19  ;;  %216 = vadd.xlane.f32.xlu1 %v205_v20 }
  0xdf   :  { %218 = vadd.xlane.f32.xlu0 %v206_v21  ;;  %212 = vadd.xlane.f32.xlu1 %v203_v22 }
  0xe3   :  { %179 = vadd.xlane.f32.xlu0 %v109_v14  ;;  %220 = vadd.xlane.f32.xlu1 %v207_v23 }
  0xe7   :  { %222 = vadd.xlane.f32.xlu0 %v208_v24  ;;  %224 = vadd.xlane.f32.xlu1 %v209_v25 }
 0x154   :  { %v190_v26 = vpop.xlane.xlu0 %189  ;;  %v182_v27 = vpop.xlane.xlu1 %181 }
 0x155   :  { %200 = vst.msk [vmem:[%s445_s3 + $0x30] sm:$0xff] %vm193_vm1, %v190_v26  ;;  %196 = vst.msk [vmem:[%s445_s3 + $0x10] sm:$0xff] %vm193_vm1, %v182_v27 }
 0x158   :  { %v178_v28 = vpop.xlane.xlu0 %177  ;;  %v184_v29 = vpop.xlane.xlu1 %183 }
 0x159   :  { %194 = vst.msk [vmem:[%s445_s3] sm:$0xff] %vm193_vm1, %v178_v28  ;;  %197 = vst.msk [vmem:[%s445_s3 + $0x18] sm:$0xff] %vm193_vm1, %v184_v29 }
 0x15c   :  { %v186_v30 = vpop.xlane.xlu0 %185  ;;  %v192_v31 = vpop.xlane.xlu1 %191 }
 0x15d   :  { %198 = vst.msk [vmem:[%s445_s3 + $0x20] sm:$0xff] %vm193_vm1, %v186_v30  ;;  %201 = vst.msk [vmem:[%s445_s3 + $0x38] sm:$0xff] %vm193_vm1, %v192_v31 }
 0x160   :  { %v215_v32 = vpop.xlane.xlu0 %214  ;;  %v188_v33 = vpop.xlane.xlu1 %187 }
 0x161   :  { %228 = vst.msk [vmem:[%s446_s4 + $0x10] sm:$0xff] %vm193_vm1, %v215_v32  ;;  %199 = vst.msk [vmem:[%s445_s3 + $0x28] sm:$0xff] %vm193_vm1, %v188_v33 }
 0x164   :  { %v211_v34 = vpop.xlane.xlu0 %210  ;;  %v217_v35 = vpop.xlane.xlu1 %216 }
 0x165   :  { %226 = vst.msk [vmem:[%s446_s4] sm:$0xff] %vm193_vm1, %v211_v34  ;;  %229 = vst.msk [vmem:[%s446_s4 + $0x18] sm:$0xff] %vm193_vm1, %v217_v35 }
 0x168   :  { %v219_v36 = vpop.xlane.xlu0 %218  ;;  %v213_v37 = vpop.xlane.xlu1 %212 }
 0x169   :  { %230 = vst.msk [vmem:[%s446_s4 + $0x20] sm:$0xff] %vm193_vm1, %v219_v36  ;;  %227 = vst.msk [vmem:[%s446_s4 + $0x8] sm:$0xff] %vm193_vm1, %v213_v37 }
 0x16c   :  { %v180_v38 = vpop.xlane.xlu0 %179  ;;  %v221_v39 = vpop.xlane.xlu1 %220 }
 0x16d   :  { %195 = vst.msk [vmem:[%s445_s3 + $0x8] sm:$0xff] %vm193_vm1, %v180_v38  ;;  %231 = vst.msk [vmem:[%s446_s4 + $0x28] sm:$0xff] %vm193_vm1, %v221_v39 }
 0x170   :  { %v223_v40 = vpop.xlane.xlu0 %222  ;;  %v225_v41 = vpop.xlane.xlu1 %224 }
 0x171   :  { %232 = vst.msk [vmem:[%s446_s4 + $0x30] sm:$0xff] %vm193_vm1, %v223_v40  ;;  %233 = vst.msk [vmem:[%s446_s4 + $0x38] sm:$0xff] %vm193_vm1, %v225_v41 }

// kernel: _lambda_.50
= control target key start
LH: loop header
LB: loop body
LE: loop exit
PB: predicated region body
PF: predicated region fallthrough
CT: control target
= control target key end

     0   :  { %v381_v0 = vmov 0   ;;  %vm112_vm0 = vcmask 130048   ;;  %v71_v24 = vlaneseq  ;;  %vm246_vm3 = vcmask 7168   ;;  %s524_s2 = inlined_call_operand.vmem [shape: f32[16,1], index: 2, kind: input, shape index: {}]   ;;  %s525_s3 = inlined_call_operand.vmem [shape: f32[16,1], index: 3, kind: input, shape index: {}]   ;;  %s526_s0 = inlined_call_operand.vmem [shape: bf16[64,16], index: 0, kind: input, shape index: {}]   ;;  %s527_s1 = inlined_call_operand.vmem [shape: bf16[16,128], index: 1, kind: input, shape index: {}]   ;;  %s528_s4 = inlined_call_operand.vmem [shape: bf16[64,128], index: 4, kind: output, shape index: {0}]   ;;  %s529_s5 = inlined_call_operand.vmem [shape: f32[1,64,1], index: 5, kind: output, shape index: {1}]   ;;  %s530_s6 = inlined_call_operand.vmem [shape: f32[1,64,1], index: 6, kind: output, shape index: {2}]  }
   0x1   :  { %371 = vset.pattern.permute.xlu0 %v381_v0  ;;  %v25_v1 = vld [vmem:[%s524_s2] sm:$0xff]  ;;  %v26_v2 = vld [vmem:[%s524_s2 + $0x8] sm:$0xff]  ;;  %372 = vset.pattern.permute.xlu1 %v381_v0  ;;  %v374_v20 = vld [vmem:[%s526_s0 + $0x10] sm:$0xff]  }
   0x2   :  { %v27_v3 = vld [vmem:[%s525_s3] sm:$0xff]  ;;  %v28_v4 = vld [vmem:[%s525_s3 + $0x8] sm:$0xff]  ;;  %v29_v5 = vmul.f32 0.03125, %v25_v1  ;;  %v30_v7 = vmul.f32 0.03125, %v26_v2  ;;  %364 = vmatprep.mubr.msk.bf16.mxu1 %vm112_vm0, %v374_v20  ;;  %v72_v29 = vand.u32 127, %v71_v24  ;;  %v376_v38 = vld [vmem:[%s526_s0 + $0x18] sm:$0xff]  }
   0x3   :  { %v31_v6 = vmul.f32 0.03125, %v27_v3  ;;  %v32_v8 = vmul.f32 0.03125, %v28_v4  ;;  %v373_v19 = vld [vmem:[%s526_s0] sm:$0xff]   ;;  %v375_v37 = vld [vmem:[%s526_s0 + $0x8] sm:$0xff]  }
   0x4   :  { %41 = vperm.xlu0 %371, %v29_v5   ;;  %v33_v9 = vmul.f32 %v29_v5, %v29_v5  ;;  %v34_v10 = vmul.f32 %v30_v7, %v30_v7  ;;  %360 = vmatprep.mubr.msk.bf16.mxu0 %vm112_vm0, %v373_v19  ;;  %v327_v21 = vld [vmem:[%s527_s1] sm:$0xff]   ;;  %vm75_vm1 = vcmp.lt.s32.totalorder %v72_v29, 32 }
   0x5   :  { %v328_v23 = vunpack.c.l.bf16 %v327_v21  ;;  %v329_v26 = vunpack.c.h.bf16 %v327_v21  ;;  %vm303_vm2 = vmpackc.low %vm75_vm1, %vm75_vm1 }
   0x6   :  { %v35_v11 = vsub.f32 %v31_v6, %v33_v9  ;;  %v36_v12 = vsub.f32 %v32_v8, %v34_v10 }
   0x8   :  { %v37_v13 = vmax.f32 %v35_v11, 0.0  ;;  %v38_v14 = vmax.f32 %v36_v12, 0.0  ;;  %46 = vperm.xlu0 %371, %v30_v7  }
   0xa   :  { %v51_v15 = vadd.f32 1e-05, %v37_v13  ;;  %v52_v16 = vadd.f32 1e-05, %v38_v14 }
   0xc   :  { %377 = vrsqrt.f32 %v51_v15 }
   0xd   :  { %379 = vrsqrt.f32 %v52_v16 }
  0x19   :  { %v378_v17 = vpop.eup %377 }
  0x1a   :  { %57 = vperm.xlu1 %372, %v378_v17   ;;  %v380_v18 = vpop.eup %379 }
  0x1e   :  { %62 = vperm.xlu1 %372, %v380_v18  }
  0x7f   :  { %v42_v22 = vpop.permute.xlu0 %41 }
  0x80   :  { %v49_v25 = vsub.f32 %v328_v23, %v42_v22 }
  0x83   :  { %v47_v27 = vpop.permute.xlu0 %46 }
  0x84   :  { %v50_v30 = vsub.f32 %v329_v26, %v47_v27 }
  0x95   :  { %v58_v28 = vpop.permute.xlu1 %57 }
  0x96   :  { %v65_v31 = vmul.f32 %v58_v28, %v49_v25 }
  0x98   :  { %v67_v34 = vmax.f32 %v65_v31, 0.0 }
  0x99   :  { %v63_v32 = vpop.permute.xlu1 %62 }
  0x9a   :  { %v66_v33 = vmul.f32 %v63_v32, %v50_v30 }
  0x9c   :  { %v68_v35 = vmax.f32 %v66_v33, 0.0 }
  0x9e   :  { %v304_v36 = vpack.c.bf16 %v68_v35, %v67_v34 }
  0xa0   :  { %358 = vmatprep.subr.msk.bf16.mxu0 %vm303_vm2, %v304_v36  ;;  %368 = vmatprep.subr.msk.bf16.mxu1 %vm303_vm2, %v304_v36 }
  0xa1   :  { %359 = vmatpush3.bf16.msk.msra.mxu0 %vm303_vm2, %v304_v36  ;;  %369 = vmatpush3.bf16.msk.msra.mxu1 %vm303_vm2, %v304_v36 }
  0xa4   :  { %361 = vmatmul.mubr.msk.bf16.vlgmr.msra.gmra.mxu0 %vm112_vm0, %v375_v37  ;;  %365 = vmatmul.mubr.msk.bf16.vlgmr.msra.gmra.mxu1 %vm112_vm0, %v376_v38 }
 0x164   :  { %v362_v39 = vpop.f32.mrf.mxu0  ;;  %v366_v40 = vpop.f32.mrf.mxu1 }
 0x165   :  { %242 = vadd.xlane.f32.xlu1 %v366_v40  ;;  %234 = vadd.xlane.f32.xlu0 %v362_v39  ;;  %v257_v51 = vmul.f32 %v362_v39, %v362_v39  ;;  %v261_v55 = vmul.f32 %v366_v40, %v366_v40 }
 0x166   :  { %v159_v41 = vpop.f32.mrf.mxu0  ;;  %v175_v42 = vpop.f32.mrf.mxu1 }
 0x167   :  { %v255_v52 = vmul.f32 %v159_v41, %v159_v41  ;;  %v259_v53 = vmul.f32 %v175_v42, %v175_v42 }
 0x168   :  { %v363_v43 = vpop.f32.mrf.mxu0  ;;  %v367_v44 = vpop.f32.mrf.mxu1 }
 0x169   :  { %v338_v45 = vpack.c.bf16 %v363_v43, %v362_v39  ;;  %238 = vadd.xlane.f32.xlu1 %v175_v42  ;;  %230 = vadd.xlane.f32.xlu0 %v159_v41  ;;  %v348_v46 = vpack.c.bf16 %v367_v44, %v366_v40  ;;  %v258_v54 = vmul.f32 %v363_v43, %v363_v43 }
 0x16a   :  { %v162_v47 = vpop.f32.mrf.mxu0  ;;  %v178_v48 = vpop.f32.mrf.mxu1  ;;  %v262_v58 = vmul.f32 %v367_v44, %v367_v44 }
 0x16b   :  { %350 = vst [vmem:[%s528_s4 + $0x8] sm:$0xff] %v338_v45   ;;  %v333_v49 = vpack.c.bf16 %v162_v47, %v159_v41  ;;  %352 = vst [vmem:[%s528_s4 + $0x18] sm:$0xff] %v348_v46   ;;  %v343_v50 = vpack.c.bf16 %v178_v48, %v175_v42  ;;  %v256_v56 = vmul.f32 %v162_v47, %v162_v47 }
 0x16c   :  { %v260_v57 = vmul.f32 %v178_v48, %v178_v48 }
 0x16d   :  { %334 = vst [vmem:[%s528_s4] sm:$0xff] %v333_v49   ;;  %351 = vst [vmem:[%s528_s4 + $0x10] sm:$0xff] %v343_v50   ;;  %267 = vadd.xlane.f32.xlu1 %v257_v51  ;;  %236 = vadd.xlane.f32.xlu0 %v363_v43 }
 0x171   :  { %263 = vadd.xlane.f32.xlu1 %v255_v52  ;;  %244 = vadd.xlane.f32.xlu0 %v367_v44 }
 0x175   :  { %271 = vadd.xlane.f32.xlu1 %v259_v53  ;;  %240 = vadd.xlane.f32.xlu0 %v178_v48 }
 0x179   :  { %269 = vadd.xlane.f32.xlu0 %v258_v54  ;;  %232 = vadd.xlane.f32.xlu1 %v162_v47 }
 0x17d   :  { %275 = vadd.xlane.f32.xlu1 %v261_v55  ;;  %265 = vadd.xlane.f32.xlu0 %v256_v56 }
 0x181   :  { %273 = vadd.xlane.f32.xlu0 %v260_v57 }
 0x185   :  { %277 = vadd.xlane.f32.xlu0 %v262_v58 }
 0x1ee   :  { %v243_v59 = vpop.xlane.xlu1 %242  ;;  %v235_v60 = vpop.xlane.xlu0 %234 }
 0x1ef   :  { %253 = vst.msk [vmem:[%s529_s5 + $0x30] sm:$0xff] %vm246_vm3, %v243_v59  ;;  %249 = vst.msk [vmem:[%s529_s5 + $0x10] sm:$0xff] %vm246_vm3, %v235_v60 }
 0x1f2   :  { %v239_v61 = vpop.xlane.xlu1 %238  ;;  %v231_v62 = vpop.xlane.xlu0 %230 }
 0x1f3   :  { %251 = vst.msk [vmem:[%s529_s5 + $0x20] sm:$0xff] %vm246_vm3, %v239_v61  ;;  %247 = vst.msk [vmem:[%s529_s5] sm:$0xff] %vm246_vm3, %v231_v62 }
 0x1f6   :  { %v268_v63 = vpop.xlane.xlu1 %267  ;;  %v237_v0 = vpop.xlane.xlu0 %236 }
 0x1f7   :  { %281 = vst.msk [vmem:[%s530_s6 + $0x10] sm:$0xff] %vm246_vm3, %v268_v63  ;;  %250 = vst.msk [vmem:[%s529_s5 + $0x18] sm:$0xff] %vm246_vm3, %v237_v0 }
 0x1fa   :  { %v264_v1 = vpop.xlane.xlu1 %263  ;;  %v245_v2 = vpop.xlane.xlu0 %244 }
 0x1fb   :  { %279 = vst.msk [vmem:[%s530_s6] sm:$0xff] %vm246_vm3, %v264_v1  ;;  %254 = vst.msk [vmem:[%s529_s5 + $0x38] sm:$0xff] %vm246_vm3, %v245_v2 }
 0x1fe   :  { %v272_v3 = vpop.xlane.xlu1 %271  ;;  %v241_v4 = vpop.xlane.xlu0 %240 }
 0x1ff   :  { %283 = vst.msk [vmem:[%s530_s6 + $0x20] sm:$0xff] %vm246_vm3, %v272_v3  ;;  %252 = vst.msk [vmem:[%s529_s5 + $0x28] sm:$0xff] %vm246_vm3, %v241_v4 }
 0x202   :  { %v270_v5 = vpop.xlane.xlu0 %269  ;;  %v233_v6 = vpop.xlane.xlu1 %232 }
 0x203   :  { %282 = vst.msk [vmem:[%s530_s6 + $0x18] sm:$0xff] %vm246_vm3, %v270_v5  ;;  %248 = vst.msk [vmem:[%s529_s5 + $0x8] sm:$0xff] %vm246_vm3, %v233_v6 }
 0x206   :  { %v276_v7 = vpop.xlane.xlu1 %275  ;;  %v266_v8 = vpop.xlane.xlu0 %265 }
 0x207   :  { %285 = vst.msk [vmem:[%s530_s6 + $0x30] sm:$0xff] %vm246_vm3, %v276_v7  ;;  %280 = vst.msk [vmem:[%s530_s6 + $0x8] sm:$0xff] %vm246_vm3, %v266_v8 }
 0x20a   :  { %v274_v9 = vpop.xlane.xlu0 %273 }
 0x20b   :  { %284 = vst.msk [vmem:[%s530_s6 + $0x28] sm:$0xff] %vm246_vm3, %v274_v9 }
 0x20e   :  { %v278_v10 = vpop.xlane.xlu0 %277 }
 0x20f   :  { %286 = vst.msk [vmem:[%s530_s6 + $0x38] sm:$0xff] %vm246_vm3, %v278_v10 }

// kernel: _lambda_.53
= control target key start
LH: loop header
LB: loop body
LE: loop exit
PB: predicated region body
PF: predicated region fallthrough
CT: control target
= control target key end

     0   :  { %v175_v0 = vmov 0.0   ;;  %vm176_vm0 = vmmov 0   ;;  %vm54_vm1 = vcmask 523264   ;;  %vm113_vm2 = vcmask 7168   ;;  %s232_s1 = inlined_call_operand.vmem [shape: bf16[64,128], index: 1, kind: input, shape index: {}]   ;;  %s233_s0 = inlined_call_operand.vmem [shape: bf16[16,64], index: 0, kind: input, shape index: {}]   ;;  %s234_s2 = inlined_call_operand.vmem [shape: bf16[16,128], index: 2, kind: output, shape index: {0}]   ;;  %s235_s3 = inlined_call_operand.vmem [shape: f32[1,16,1], index: 3, kind: output, shape index: {1}]   ;;  %s236_s4 = inlined_call_operand.vmem [shape: f32[1,16,1], index: 4, kind: output, shape index: {2}]  }
   0x1   :  { %156 = vmatprep.subr.bf16.mxu0 %v175_v0  ;;  %v170_v1 = vld [vmem:[%s232_s1 + $0x18] sm:$0xff]   ;;  %164 = vmatprep.mubr.msk.bf16.mxu0 %vm176_vm0, %v175_v0  ;;  %v171_v2 = vld [vmem:[%s232_s1 + $0x10] sm:$0xff]   ;;  %v172_v3 = vld [vmem:[%s232_s1 + $0x8] sm:$0xff]  }
   0x2   :  { %157 = vmatpush3.bf16.msra.mxu0 %v170_v1  ;;  %v173_v4 = vld [vmem:[%s232_s1] sm:$0xff]  }
   0x3   :  { %158 = vmatprep.subr.bf16.mxu0 %v175_v0  ;;  %v174_v5 = vld [vmem:[%s233_s0] sm:$0xff]  }
   0x6   :  { %159 = vmatpush3.bf16.msra.mxu0 %v171_v2 }
   0x7   :  { %160 = vmatprep.subr.bf16.mxu0 %v175_v0 }
   0xa   :  { %161 = vmatpush3.bf16.msra.mxu0 %v172_v3 }
   0xb   :  { %162 = vmatprep.subr.bf16.mxu0 %v175_v0 }
   0xe   :  { %163 = vmatpush3.bf16.msra.mxu0 %v173_v4 }
  0x11   :  { %165 = vmatmul.mubr.msk.bf16.vlgmr.msra.gmra.mxu0 %vm54_vm1, %v174_v5 }
  0xd1   :  { %v92_v6 = vpop.f32.mrf.mxu0 }
  0xd2   :  { %109 = vadd.xlane.f32.xlu0 %v92_v6  ;;  %v116_v7 = vmul.f32 %v92_v6, %v92_v6 }
  0xd3   :  { %v166_v8 = vpop.f32.mrf.mxu0 }
  0xd4   :  { %118 = vadd.xlane.f32.xlu1 %v116_v7 }
  0xd5   :  { %v95_v9 = vpop.f32.mrf.mxu0 }
  0xd6   :  { %v149_v10 = vpack.c.bf16 %v95_v9, %v92_v6  ;;  %111 = vadd.xlane.f32.xlu0 %v95_v9  ;;  %v117_v11 = vmul.f32 %v95_v9, %v95_v9 }
  0xd7   :  { %v167_v12 = vpop.f32.mrf.mxu0 }
  0xd8   :  { %150 = vst [vmem:[%s234_s2] sm:$0xff] %v149_v10   ;;  %120 = vadd.xlane.f32.xlu1 %v117_v11 }
 0x15b   :  { %v110_v13 = vpop.xlane.xlu0 %109 }
 0x15c   :  { %114 = vst.msk [vmem:[%s235_s3] sm:$0xff] %vm113_vm2, %v110_v13 }
 0x15d   :  { %v119_v14 = vpop.xlane.xlu1 %118 }
 0x15e   :  { %122 = vst.msk [vmem:[%s236_s4] sm:$0xff] %vm113_vm2, %v119_v14 }
 0x15f   :  { %v112_v15 = vpop.xlane.xlu0 %111 }
 0x160   :  { %115 = vst.msk [vmem:[%s235_s3 + $0x8] sm:$0xff] %vm113_vm2, %v112_v15 }
 0x161   :  { %v121_v16 = vpop.xlane.xlu1 %120 }
 0x162   :  { %123 = vst.msk [vmem:[%s236_s4 + $0x8] sm:$0xff] %vm113_vm2, %v121_v16 }

// kernel: _lambda_.52
= control target key start
LH: loop header
LB: loop body
LE: loop exit
PB: predicated region body
PF: predicated region fallthrough
CT: control target
= control target key end

     0   :  { %v660_v0 = vmov 0   ;;  %s882_s1 = inlined_call_operand.vmem [shape: f32[64,1], index: 1, kind: input, shape index: {}]   ;;  %s883_s2 = inlined_call_operand.vmem [shape: f32[64,1], index: 2, kind: input, shape index: {}]   ;;  %s884_s4 = inlined_call_operand.vmem [shape: f32[64,1], index: 4, kind: input, shape index: {}]   ;;  %s885_s5 = inlined_call_operand.vmem [shape: f32[64,1], index: 5, kind: input, shape index: {}]   ;;  %s886_s0 = inlined_call_operand.vmem [shape: bf16[64,128], index: 0, kind: input, shape index: {}]   ;;  %s887_s3 = inlined_call_operand.vmem [shape: bf16[64,128], index: 3, kind: input, shape index: {}]   ;;  %s888_s6 = inlined_call_operand.vmem [shape: bf16[64,128], index: 6, kind: output, shape index: {}]  }
   0x1   :  { %627 = vset.pattern.permute.xlu1 %v660_v0  ;;  %626 = vset.pattern.permute.xlu0 %v660_v0  ;;  %v41_v1 = vld [vmem:[%s882_s1 + $0x10] sm:$0xff]  ;;  %v39_v3 = vld [vmem:[%s882_s1] sm:$0xff]  ;;  %v42_v8 = vld [vmem:[%s882_s1 + $0x18] sm:$0xff] }
   0x2   :  { %v49_v2 = vld [vmem:[%s883_s2 + $0x10] sm:$0xff]  ;;  %v57_v4 = vmul.f32 0.03125, %v41_v1  ;;  %v47_v6 = vld [vmem:[%s883_s2] sm:$0xff]  ;;  %v55_v7 = vmul.f32 0.03125, %v39_v3  ;;  %v50_v9 = vld [vmem:[%s883_s2 + $0x18] sm:$0xff]  ;;  %v58_v11 = vmul.f32 0.03125, %v42_v8 }
   0x3   :  { %v65_v5 = vmul.f32 0.03125, %v49_v2  ;;  %v63_v10 = vmul.f32 0.03125, %v47_v6  ;;  %v66_v12 = vmul.f32 0.03125, %v50_v9  ;;  %v40_v13 = vld [vmem:[%s882_s1 + $0x8] sm:$0xff]  ;;  %v43_v21 = vld [vmem:[%s882_s1 + $0x20] sm:$0xff]  ;;  %v46_v40 = vld [vmem:[%s882_s1 + $0x38] sm:$0xff] }
   0x4   :  { %v48_v14 = vld [vmem:[%s883_s2 + $0x8] sm:$0xff]  ;;  %107 = vperm.xlu1 %627, %v57_v4   ;;  %v73_v16 = vmul.f32 %v57_v4, %v57_v4  ;;  %97 = vperm.xlu0 %626, %v55_v7   ;;  %v71_v17 = vmul.f32 %v55_v7, %v55_v7  ;;  %v56_v18 = vmul.f32 0.03125, %v40_v13  ;;  %v51_v22 = vld [vmem:[%s883_s2 + $0x20] sm:$0xff]  ;;  %v74_v23 = vmul.f32 %v58_v11, %v58_v11  ;;  %v45_v41 = vld [vmem:[%s882_s1 + $0x30] sm:$0xff] }
   0x5   :  { %v44_v15 = vld [vmem:[%s882_s1 + $0x28] sm:$0xff]  ;;  %v64_v19 = vmul.f32 0.03125, %v48_v14  ;;  %v59_v26 = vmul.f32 0.03125, %v43_v21  ;;  %v67_v30 = vmul.f32 0.03125, %v51_v22  ;;  %v62_v47 = vmul.f32 0.03125, %v46_v40  ;;  %v53_v53 = vld [vmem:[%s883_s2 + $0x30] sm:$0xff] }
   0x6   :  { %v52_v20 = vld [vmem:[%s883_s2 + $0x28] sm:$0xff]  ;;  %v60_v24 = vmul.f32 0.03125, %v44_v15  ;;  %v81_v27 = vsub.f32 %v65_v5, %v73_v16  ;;  %v79_v28 = vsub.f32 %v63_v10, %v71_v17  ;;  %v72_v29 = vmul.f32 %v56_v18, %v56_v18  ;;  %v223_v54 = vld [vmem:[%s884_s4] sm:$0xff]  ;;  %v54_v55 = vld [vmem:[%s883_s2 + $0x38] sm:$0xff] }
   0x7   :  { %v68_v25 = vmul.f32 0.03125, %v52_v20  ;;  %v82_v31 = vsub.f32 %v66_v12, %v74_v23  ;;  %v75_v33 = vmul.f32 %v59_v26, %v59_v26  ;;  %v61_v48 = vmul.f32 0.03125, %v45_v41  ;;  %v224_v56 = vld [vmem:[%s884_s4 + $0x8] sm:$0xff]  ;;  %v231_v60 = vld [vmem:[%s885_s5] sm:$0xff]  ;;  %v225_v0 = vld [vmem:[%s884_s4 + $0x10] sm:$0xff] }
   0x8   :  { %v76_v32 = vmul.f32 %v60_v24, %v60_v24  ;;  %v89_v34 = vmax.f32 %v81_v27, 0.0  ;;  %v87_v35 = vmax.f32 %v79_v28, 0.0  ;;  %112 = vperm.xlu1 %627, %v58_v11   ;;  %v80_v36 = vsub.f32 %v64_v19, %v72_v29  ;;  %102 = vperm.xlu0 %626, %v56_v18   ;;  %v232_v1 = vld [vmem:[%s885_s5 + $0x8] sm:$0xff]  ;;  %v226_v6 = vld [vmem:[%s884_s4 + $0x18] sm:$0xff]  ;;  %v233_v13 = vld [vmem:[%s885_s5 + $0x10] sm:$0xff] }
   0x9   :  { %v90_v37 = vmax.f32 %v82_v31, 0.0  ;;  %v83_v39 = vsub.f32 %v67_v30, %v75_v33  ;;  %v69_v57 = vmul.f32 0.03125, %v53_v53  ;;  %v77_v58 = vmul.f32 %v61_v48, %v61_v48  ;;  %v227_v14 = vld [vmem:[%s884_s4 + $0x20] sm:$0xff]  ;;  %v234_v19 = vld [vmem:[%s885_s5 + $0x18] sm:$0xff]  ;;  %v228_v20 = vld [vmem:[%s884_s4 + $0x28] sm:$0xff] }
   0xa   :  { %v84_v38 = vsub.f32 %v68_v25, %v76_v32  ;;  %v145_v42 = vadd.f32 1e-05, %v89_v34  ;;  %v143_v43 = vadd.f32 1e-05, %v87_v35  ;;  %v88_v44 = vmax.f32 %v80_v36, 0.0  ;;  %v235_v27 = vld [vmem:[%s885_s5 + $0x20] sm:$0xff] }
   0xb   :  { %v91_v45 = vmax.f32 %v83_v39, 0.0  ;;  %v146_v49 = vadd.f32 1e-05, %v90_v37  ;;  %v239_v59 = vmul.f32 0.03125, %v223_v54  ;;  %v70_v61 = vmul.f32 0.03125, %v54_v55  ;;  %v229_v28 = vld [vmem:[%s884_s4 + $0x30] sm:$0xff] }
   0xc   :  { %v144_v46 = vadd.f32 1e-05, %v88_v44  ;;  %122 = vperm.xlu1 %627, %v60_v24   ;;  %117 = vperm.xlu0 %626, %v59_v26   ;;  %628 = vrsqrt.f32 %v143_v43  ;;  %v92_v50 = vmax.f32 %v84_v38, 0.0  ;;  %v78_v62 = vmul.f32 %v62_v47, %v62_v47  ;;  %v236_v35 = vld [vmem:[%s885_s5 + $0x28] sm:$0xff]  ;;  %v230_v36 = vld [vmem:[%s884_s4 + $0x38] sm:$0xff]  ;;  %v237_v43 = vld [vmem:[%s885_s5 + $0x30] sm:$0xff] }
   0xd   :  { %630 = vrsqrt.f32 %v145_v42  ;;  %v147_v51 = vadd.f32 1e-05, %v91_v45  ;;  %v753_v63 = vmul.f32 0.03125, %v224_v56  ;;  %v85_v3 = vsub.f32 %v69_v57, %v77_v58 }
   0xe   :  { %632 = vrsqrt.f32 %v144_v46  ;;  %v148_v52 = vadd.f32 1e-05, %v92_v50  ;;  %v247_v4 = vmul.f32 0.03125, %v231_v60  ;;  %v255_v5 = vmul.f32 %v239_v59, %v239_v59 }
   0xf   :  { %634 = vrsqrt.f32 %v146_v49  ;;  %v241_v8 = vmul.f32 0.03125, %v225_v0  ;;  %v86_v10 = vsub.f32 %v70_v61, %v78_v62  ;;  %v248_v11 = vmul.f32 0.03125, %v232_v1  ;;  %v238_v49 = vld [vmem:[%s885_s5 + $0x38] sm:$0xff] }
  0x10   :  { %132 = vperm.xlu1 %627, %v62_v47   ;;  %127 = vperm.xlu0 %626, %v61_v48   ;;  %636 = vrsqrt.f32 %v147_v51  ;;  %v256_v12 = vmul.f32 %v753_v63, %v753_v63  ;;  %v242_v15 = vmul.f32 0.03125, %v226_v6  ;;  %v93_v17 = vmax.f32 %v85_v3, 0.0 }
  0x11   :  { %638 = vrsqrt.f32 %v148_v52  ;;  %v263_v18 = vsub.f32 %v247_v4, %v255_v5  ;;  %v249_v21 = vmul.f32 0.03125, %v233_v13  ;;  %v257_v22 = vmul.f32 %v241_v8, %v241_v8 }
  0x12   :  { %v243_v23 = vmul.f32 0.03125, %v227_v14  ;;  %v94_v25 = vmax.f32 %v86_v10, 0.0  ;;  %v264_v26 = vsub.f32 %v248_v11, %v256_v12  ;;  %v250_v29 = vmul.f32 0.03125, %v234_v19 }
  0x13   :  { %v258_v30 = vmul.f32 %v242_v15, %v242_v15  ;;  %v244_v31 = vmul.f32 0.03125, %v228_v20  ;;  %v149_v33 = vadd.f32 1e-05, %v93_v17  ;;  %v271_v34 = vmax.f32 %v263_v18, 0.0 }
  0x14   :  { %v265_v37 = vsub.f32 %v249_v21, %v257_v22  ;;  %v251_v38 = vmul.f32 0.03125, %v235_v27  ;;  %v259_v39 = vmul.f32 %v243_v23, %v243_v23  ;;  %v245_v40 = vmul.f32 0.03125, %v229_v28 }
  0x15   :  { %v150_v41 = vadd.f32 1e-05, %v94_v25  ;;  %v272_v42 = vmax.f32 %v264_v26, 0.0  ;;  %v266_v44 = vsub.f32 %v250_v29, %v258_v30  ;;  %v252_v45 = vmul.f32 0.03125, %v236_v35 }
  0x16   :  { %v260_v46 = vmul.f32 %v244_v31, %v244_v31  ;;  %v246_v47 = vmul.f32 0.03125, %v230_v36  ;;  %640 = vrsqrt.f32 %v149_v33  ;;  %v327_v48 = vadd.f32 1e-05, %v271_v34 }
  0x17   :  { %v273_v50 = vmax.f32 %v265_v37, 0.0  ;;  %v267_v51 = vsub.f32 %v251_v38, %v259_v39  ;;  %v253_v52 = vmul.f32 0.03125, %v237_v43  ;;  %v261_v53 = vmul.f32 %v245_v40, %v245_v40  ;;  %v542_v37 = vld [vmem:[%s886_s0] sm:$0xff]  }
  0x18   :  { %642 = vrsqrt.f32 %v150_v41  ;;  %v328_v54 = vadd.f32 1e-05, %v272_v42  ;;  %v274_v55 = vmax.f32 %v266_v44, 0.0  ;;  %v268_v56 = vsub.f32 %v252_v45, %v260_v46  ;;  %v558_v38 = vld [vmem:[%s887_s3] sm:$0xff]   ;;  %v613_v41 = vld [vmem:[%s886_s0 + $0x8] sm:$0xff]  }
  0x19   :  { %v629_v2 = vpop.eup %628  ;;  %v254_v57 = vmul.f32 0.03125, %v238_v49  ;;  %v262_v58 = vmul.f32 %v246_v47, %v246_v47  ;;  %644 = vrsqrt.f32 %v327_v48  ;;  %v329_v60 = vadd.f32 1e-05, %v273_v50  ;;  %v616_v44 = vld [vmem:[%s887_s3 + $0x8] sm:$0xff]   ;;  %v614_v48 = vld [vmem:[%s886_s0 + $0x10] sm:$0xff]  }
  0x1a   :  { %v631_v7 = vpop.eup %630  ;;  %161 = vperm.xlu0 %626, %v629_v2   ;;  %v275_v61 = vmax.f32 %v267_v51, 0.0  ;;  %v269_v62 = vsub.f32 %v253_v52, %v261_v53  ;;  %646 = vrsqrt.f32 %v328_v54  ;;  %v330_v0 = vadd.f32 1e-05, %v274_v55  ;;  %v615_v54 = vld [vmem:[%s886_s0 + $0x18] sm:$0xff]  }
  0x1b   :  { %v633_v9 = vpop.eup %632  ;;  %v270_v1 = vsub.f32 %v254_v57, %v262_v58  ;;  %648 = vrsqrt.f32 %v329_v60  ;;  %v543_v42 = vunpack.c.l.bf16 %v542_v37  ;;  %v559_v43 = vunpack.c.l.bf16 %v558_v38  ;;  %v617_v57 = vld [vmem:[%s887_s3 + $0x10] sm:$0xff]  }
  0x1c   :  { %166 = vperm.xlu1 %627, %v633_v9   ;;  %v635_v16 = vpop.eup %634  ;;  %v331_v2 = vadd.f32 1e-05, %v275_v61  ;;  %v277_v3 = vmax.f32 %v269_v62, 0.0  ;;  %650 = vrsqrt.f32 %v330_v0  ;;  %v452_v46 = vlaneseq }
  0x1d   :  { %v637_v24 = vpop.eup %636  ;;  %v278_v4 = vmax.f32 %v270_v1, 0.0  ;;  %v560_v49 = vunpack.c.h.bf16 %v558_v38  ;;  %v547_v50 = vunpack.c.l.bf16 %v613_v41  ;;  %v548_v53 = vunpack.c.h.bf16 %v613_v41 }
  0x1e   :  { %171 = vperm.xlu0 %626, %v631_v7   ;;  %v639_v32 = vpop.eup %638  ;;  %652 = vrsqrt.f32 %v331_v2  ;;  %v333_v6 = vadd.f32 1e-05, %v277_v3  ;;  %v552_v58 = vunpack.c.h.bf16 %v614_v48  ;;  %v551_v60 = vunpack.c.l.bf16 %v614_v48 }
  0x1f   :  { %v564_v61 = vunpack.c.h.bf16 %v616_v44  ;;  %v838_v62 = vand.u32 127, %v452_v46 }
  0x20   :  { %176 = vperm.xlu1 %627, %v635_v16  }
  0x21   :  { %vm456_vm0 = vcmp.lt.s32.totalorder %v838_v62, 32 }
  0x22   :  { %181 = vperm.xlu0 %626, %v637_v24  }
  0x23   :  { %v641_v5 = vpop.eup %640 }
  0x24   :  { %186 = vperm.xlu1 %627, %v639_v32  }
  0x25   :  { %v643_v7 = vpop.eup %642 }
  0x26   :  { %281 = vperm.xlu0 %626, %v239_v59   ;;  %v276_v59 = vmax.f32 %v268_v56, 0.0  ;;  %v645_v9 = vpop.eup %644  ;;  %v563_v56 = vunpack.c.l.bf16 %v616_v44 }
  0x27   :  { %v647_v10 = vpop.eup %646 }
  0x28   :  { %286 = vperm.xlu1 %627, %v753_v63   ;;  %v332_v63 = vadd.f32 1e-05, %v276_v59  ;;  %v649_v11 = vpop.eup %648 }
  0x29   :  { %v651_v12 = vpop.eup %650 }
  0x2a   :  { %291 = vperm.xlu0 %626, %v241_v8   ;;  %654 = vrsqrt.f32 %v332_v63  ;;  %v334_v8 = vadd.f32 1e-05, %v278_v4  ;;  %v556_v4 = vunpack.c.h.bf16 %v615_v54 }
  0x2b   :  { %656 = vrsqrt.f32 %v333_v6  ;;  %v653_v13 = vpop.eup %652  ;;  %v567_v6 = vunpack.c.l.bf16 %v617_v57 }
  0x2c   :  { %296 = vperm.xlu1 %627, %v242_v15   ;;  %658 = vrsqrt.f32 %v334_v8 }
  0x2e   :  { %301 = vperm.xlu0 %626, %v243_v23  }
  0x30   :  { %306 = vperm.xlu1 %627, %v244_v31  }
  0x32   :  { %311 = vperm.xlu0 %626, %v245_v40  }
  0x34   :  { %316 = vperm.xlu1 %627, %v246_v47   ;;  %v544_v47 = vunpack.c.h.bf16 %v542_v37 }
  0x36   :  { %191 = vperm.xlu0 %626, %v641_v5   ;;  %v555_v5 = vunpack.c.l.bf16 %v615_v54 }
  0x37   :  { %v655_v14 = vpop.eup %654 }
  0x38   :  { %196 = vperm.xlu1 %627, %v643_v7   ;;  %v657_v15 = vpop.eup %656 }
  0x39   :  { %v659_v16 = vpop.eup %658 }
  0x3a   :  { %345 = vperm.xlu0 %626, %v645_v9  }
  0x3c   :  { %350 = vperm.xlu1 %627, %v647_v10   ;;  %v618_v10 = vld [vmem:[%s887_s3 + $0x18] sm:$0xff]  }
  0x3d   :  { %v572_v44 = vunpack.c.h.bf16 %v618_v10 }
  0x3e   :  { %355 = vperm.xlu0 %626, %v649_v11  }
  0x40   :  { %360 = vperm.xlu1 %627, %v651_v12  }
  0x42   :  { %365 = vperm.xlu0 %626, %v653_v13  }
  0x44   :  { %370 = vperm.xlu1 %627, %v655_v14  }
  0x46   :  { %375 = vperm.xlu0 %626, %v657_v15   ;;  %v568_v15 = vunpack.c.h.bf16 %v617_v57 }
  0x48   :  { %380 = vperm.xlu1 %627, %v659_v16  }
  0x7f   :  { %v98_v17 = vpop.permute.xlu0 %97  ;;  %v108_v18 = vpop.permute.xlu1 %107 }
  0x80   :  { %v135_v52 = vsub.f32 %v543_v42, %v98_v17  ;;  %v137_v63 = vsub.f32 %v547_v50, %v108_v18 }
  0x83   :  { %v103_v19 = vpop.permute.xlu0 %102  ;;  %v113_v20 = vpop.permute.xlu1 %112 }
  0x84   :  { %v136_v59 = vsub.f32 %v544_v47, %v103_v19  ;;  %v138_v13 = vsub.f32 %v548_v53, %v113_v20 }
  0x87   :  { %v797_v21 = vpop.permute.xlu0 %117  ;;  %v799_v22 = vpop.permute.xlu1 %122 }
  0x88   :  { %v140_v42 = vsub.f32 %v552_v58, %v799_v22 }
  0x8b   :  { %v801_v23 = vpop.permute.xlu0 %127  ;;  %v803_v24 = vpop.permute.xlu1 %132 }
  0x8c   :  { %v141_v48 = vsub.f32 %v555_v5, %v801_v23 }
  0x95   :  { %v162_v25 = vpop.permute.xlu0 %161 }
  0x96   :  { %v199_v1 = vmul.f32 %v162_v25, %v135_v52 }
  0x97   :  { %v167_v26 = vpop.permute.xlu1 %166 }
  0x98   :  { %v200_v8 = vmul.f32 %v167_v26, %v136_v59 }
  0x99   :  { %v172_v27 = vpop.permute.xlu0 %171 }
  0x9a   :  { %v201_v14 = vmul.f32 %v172_v27, %v137_v63 }
  0x9b   :  { %v177_v28 = vpop.permute.xlu1 %176 }
  0x9c   :  { %v202_v26 = vmul.f32 %v177_v28, %v138_v13 }
  0x9d   :  { %v805_v29 = vpop.permute.xlu0 %181 }
  0x9f   :  { %v807_v30 = vpop.permute.xlu1 %186 }
  0xa1   :  { %v282_v31 = vpop.permute.xlu0 %281 }
  0xa2   :  { %v319_v55 = vsub.f32 %v559_v43, %v282_v31  ;;  %v139_v31 = vsub.f32 %v551_v60, %v797_v21 }
  0xa3   :  { %v287_v32 = vpop.permute.xlu1 %286 }
  0xa4   :  { %v320_v2 = vsub.f32 %v560_v49, %v287_v32  ;;  %v203_v43 = vmul.f32 %v805_v29, %v139_v31  ;;  %v204_v49 = vmul.f32 %v807_v30, %v140_v42 }
  0xa5   :  { %v292_v33 = vpop.permute.xlu0 %291 }
  0xa6   :  { %v321_v9 = vsub.f32 %v563_v56, %v292_v33  ;;  %v571_v33 = vunpack.c.l.bf16 %v618_v10 }
  0xa7   :  { %v297_v34 = vpop.permute.xlu1 %296 }
  0xa8   :  { %v322_v17 = vsub.f32 %v564_v61, %v297_v34 }
  0xa9   :  { %v302_v35 = vpop.permute.xlu0 %301 }
  0xaa   :  { %v323_v32 = vsub.f32 %v567_v6, %v302_v35 }
  0xab   :  { %v307_v36 = vpop.permute.xlu1 %306 }
  0xac   :  { %v324_v34 = vsub.f32 %v568_v15, %v307_v36 }
  0xad   :  { %v815_v39 = vpop.permute.xlu0 %311 }
  0xae   :  { %v325_v50 = vsub.f32 %v571_v33, %v815_v39 }
  0xaf   :  { %v817_v40 = vpop.permute.xlu1 %316 }
  0xb0   :  { %v326_v56 = vsub.f32 %v572_v44, %v817_v40 }
  0xb1   :  { %v825_v45 = vpop.permute.xlu0 %191 }
  0xb2   :  { %v205_v57 = vmul.f32 %v825_v45, %v141_v48 }
  0xb3   :  { %v830_v51 = vpop.permute.xlu1 %196 }
  0xb5   :  { %v346_v0 = vpop.permute.xlu0 %345 }
  0xb6   :  { %v383_v3 = vmul.f32 %v346_v0, %v319_v55  ;;  %v142_v55 = vsub.f32 %v556_v4, %v803_v24 }
  0xb7   :  { %v351_v7 = vpop.permute.xlu1 %350 }
  0xb8   :  { %v384_v11 = vmul.f32 %v351_v7, %v320_v2  ;;  %v391_v12 = vadd.f32 %v383_v3, %v199_v1  ;;  %v206_v61 = vmul.f32 %v830_v51, %v142_v55 }
  0xb9   :  { %v356_v16 = vpop.permute.xlu0 %355 }
  0xba   :  { %v392_v18 = vadd.f32 %v384_v11, %v200_v8  ;;  %v399_v19 = vmax.f32 %v391_v12, 0.0  ;;  %v385_v25 = vmul.f32 %v356_v16, %v321_v9 }
  0xbb   :  { %v361_v37 = vpop.permute.xlu1 %360 }
  0xbc   :  { %v400_v38 = vmax.f32 %v392_v18, 0.0  ;;  %v457_v41 = vsel %vm456_vm0, %v399_v19, 0.0  ;;  %v386_v20 = vmul.f32 %v361_v37, %v322_v17  ;;  %v393_v27 = vadd.f32 %v385_v25, %v201_v14 }
  0xbd   :  { %v366_v46 = vpop.permute.xlu0 %365 }
  0xbe   :  { %v458_v21 = vsel %vm456_vm0, %v400_v38, 0.0  ;;  %v394_v28 = vadd.f32 %v386_v20, %v202_v26  ;;  %v401_v35 = vmax.f32 %v393_v27, 0.0  ;;  %v387_v47 = vmul.f32 %v366_v46, %v323_v32 }
  0xbf   :  { %v596_v52 = vpack.c.bf16 %v458_v21, %v457_v41  ;;  %v371_v53 = vpop.permute.xlu1 %370 }
  0xc0   :  { %v402_v22 = vmax.f32 %v394_v28, 0.0  ;;  %v459_v29 = vsel %vm456_vm0, %v401_v35, 0.0  ;;  %v388_v36 = vmul.f32 %v371_v53, %v324_v34  ;;  %v395_v54 = vadd.f32 %v387_v47, %v203_v43 }
  0xc1   :  { %597 = vst [vmem:[%s888_s6] sm:$0xff] %v596_v52   ;;  %v376_v23 = vpop.permute.xlu0 %375 }
  0xc2   :  { %v460_v30 = vsel %vm456_vm0, %v402_v22, 0.0  ;;  %v396_v39 = vadd.f32 %v388_v36, %v204_v49  ;;  %v403_v58 = vmax.f32 %v395_v54, 0.0  ;;  %v389_v60 = vmul.f32 %v376_v23, %v325_v50 }
  0xc3   :  { %v601_v0 = vpack.c.bf16 %v460_v30, %v459_v29  ;;  %v381_v59 = vpop.permute.xlu1 %380 }
  0xc4   :  { %v404_v24 = vmax.f32 %v396_v39, 0.0  ;;  %v461_v40 = vsel %vm456_vm0, %v403_v58, 0.0  ;;  %v390_v45 = vmul.f32 %v381_v59, %v326_v56  ;;  %v397_v1 = vadd.f32 %v389_v60, %v205_v57 }
  0xc5   :  { %622 = vst [vmem:[%s888_s6 + $0x8] sm:$0xff] %v601_v0  }
  0xc6   :  { %v462_v2 = vsel %vm456_vm0, %v404_v24, 0.0  ;;  %v398_v3 = vadd.f32 %v390_v45, %v206_v61  ;;  %v405_v63 = vmax.f32 %v397_v1, 0.0 }
  0xc7   :  { %v606_v4 = vpack.c.bf16 %v462_v2, %v461_v40 }
  0xc8   :  { %v406_v5 = vmax.f32 %v398_v3, 0.0  ;;  %v463_v51 = vsel %vm456_vm0, %v405_v63, 0.0 }
  0xc9   :  { %623 = vst [vmem:[%s888_s6 + $0x10] sm:$0xff] %v606_v4  }
  0xca   :  { %v464_v6 = vsel %vm456_vm0, %v406_v5, 0.0 }
  0xcb   :  { %v611_v7 = vpack.c.bf16 %v464_v6, %v463_v51 }
  0xcd   :  { %624 = vst [vmem:[%s888_s6 + $0x18] sm:$0xff] %v611_v7  }

// kernel: _lambda_.54
= control target key start
LH: loop header
LB: loop body
LE: loop exit
PB: predicated region body
PF: predicated region fallthrough
CT: control target
= control target key end

     0   :  { %v127_v0 = vmov 0   ;;  %v77_v23 = vlaneseq  ;;  %s166_s1 = inlined_call_operand.vmem [shape: f32[16,1], index: 1, kind: input, shape index: {}]   ;;  %s167_s2 = inlined_call_operand.vmem [shape: f32[16,1], index: 2, kind: input, shape index: {}]   ;;  %s168_s0 = inlined_call_operand.vmem [shape: bf16[16,128], index: 0, kind: input, shape index: {}]   ;;  %s169_s3 = inlined_call_operand.vmem [shape: bf16[16,128], index: 3, kind: output, shape index: {}]  }
   0x1   :  { %121 = vset.pattern.permute.xlu0 %v127_v0  ;;  %v18_v1 = vld [vmem:[%s166_s1] sm:$0xff]  ;;  %v19_v2 = vld [vmem:[%s166_s1 + $0x8] sm:$0xff]  ;;  %122 = vset.pattern.permute.xlu1 %v127_v0 }
   0x2   :  { %v20_v3 = vld [vmem:[%s167_s2] sm:$0xff]  ;;  %v21_v4 = vld [vmem:[%s167_s2 + $0x8] sm:$0xff]  ;;  %v22_v5 = vmul.f32 0.03125, %v18_v1  ;;  %v23_v7 = vmul.f32 0.03125, %v19_v2  ;;  %v78_v28 = vand.u32 127, %v77_v23 }
   0x3   :  { %v24_v6 = vmul.f32 0.03125, %v20_v3  ;;  %v25_v8 = vmul.f32 0.03125, %v21_v4  ;;  %v107_v19 = vld [vmem:[%s168_s0] sm:$0xff]  }
   0x4   :  { %34 = vperm.xlu0 %121, %v22_v5   ;;  %v26_v9 = vmul.f32 %v22_v5, %v22_v5  ;;  %v27_v10 = vmul.f32 %v23_v7, %v23_v7  ;;  %v108_v20 = vunpack.c.l.bf16 %v107_v19  ;;  %v109_v24 = vunpack.c.h.bf16 %v107_v19 }
   0x5   :  { %vm81_vm0 = vcmp.lt.s32.totalorder %v78_v28, 32 }
   0x6   :  { %v28_v11 = vsub.f32 %v24_v6, %v26_v9  ;;  %v29_v12 = vsub.f32 %v25_v8, %v27_v10 }
   0x8   :  { %v30_v13 = vmax.f32 %v28_v11, 0.0  ;;  %v31_v14 = vmax.f32 %v29_v12, 0.0  ;;  %39 = vperm.xlu0 %121, %v23_v7  }
   0xa   :  { %v44_v15 = vadd.f32 1e-05, %v30_v13  ;;  %v45_v16 = vadd.f32 1e-05, %v31_v14 }
   0xc   :  { %123 = vrsqrt.f32 %v44_v15 }
   0xd   :  { %125 = vrsqrt.f32 %v45_v16 }
  0x19   :  { %v124_v17 = vpop.eup %123 }
  0x1a   :  { %50 = vperm.xlu1 %122, %v124_v17   ;;  %v126_v18 = vpop.eup %125 }
  0x1e   :  { %55 = vperm.xlu1 %122, %v126_v18  }
  0x7f   :  { %v35_v21 = vpop.permute.xlu0 %34 }
  0x80   :  { %v42_v22 = vsub.f32 %v108_v20, %v35_v21 }
  0x83   :  { %v40_v25 = vpop.permute.xlu0 %39 }
  0x84   :  { %v43_v29 = vsub.f32 %v109_v24, %v40_v25 }
  0x95   :  { %v51_v26 = vpop.permute.xlu1 %50 }
  0x96   :  { %v58_v27 = vmul.f32 %v51_v26, %v42_v22 }
  0x98   :  { %v60_v31 = vmax.f32 %v58_v27, 0.0 }
  0x99   :  { %v56_v30 = vpop.permute.xlu1 %55 }
  0x9a   :  { %v59_v32 = vmul.f32 %v56_v30, %v43_v29  ;;  %v82_v34 = vsel %vm81_vm0, %v60_v31, 0.0 }
  0x9c   :  { %v61_v33 = vmax.f32 %v59_v32, 0.0 }
  0x9e   :  { %v83_v35 = vsel %vm81_vm0, %v61_v33, 0.0 }
  0x9f   :  { %v118_v36 = vpack.c.bf16 %v83_v35, %v82_v34 }
  0xa1   :  { %119 = vst [vmem:[%s169_s3] sm:$0xff] %v118_v36  }

// kernel: _lambda_.58
= control target key start
LH: loop header
LB: loop body
LE: loop exit
PB: predicated region body
PF: predicated region fallthrough
CT: control target
= control target key end

     0   :  { %vm58_vm0 = vcmask 523264   ;;  %vm135_vm1 = vcmask 7168   ;;  %s273_s1 = inlined_call_operand.vmem [shape: bf16[64,128], index: 1, kind: input, shape index: {}]   ;;  %s274_s0 = inlined_call_operand.vmem [shape: bf16[24,64], index: 0, kind: input, shape index: {}]   ;;  %s275_s2 = inlined_call_operand.vmem [shape: bf16[24,128], index: 2, kind: output, shape index: {0}]   ;;  %s276_s3 = inlined_call_operand.vmem [shape: f32[1,24,1], index: 3, kind: output, shape index: {1}]   ;;  %s277_s4 = inlined_call_operand.vmem [shape: f32[1,24,1], index: 4, kind: output, shape index: {2}]  }
   0x1   :  { %v200_v0 = vld [vmem:[%s273_s1 + $0x18] sm:$0xff]   ;;  %v201_v1 = vld [vmem:[%s273_s1 + $0x10] sm:$0xff]   ;;  %v202_v2 = vld [vmem:[%s273_s1 + $0x8] sm:$0xff]  }
   0x2   :  { %188 = vmatprep.subr.bf16.mxu0 %v200_v0  ;;  %v204_v3 = vld [vmem:[%s274_s0] sm:$0xff]   ;;  %v205_v5 = vld [vmem:[%s274_s0 + $0x8] ss:$0 sps:$4 sm:$0xff]  }
   0x3   :  { %189 = vmatpush3.bf16.msra.mxu0 %v200_v0  ;;  %196 = vmatprep.mubr.msk.bf16.mxu0 %vm58_vm0, %v204_v3  ;;  %v203_v4 = vld [vmem:[%s273_s1] sm:$0xff]  }
   0x4   :  { %190 = vmatprep.subr.bf16.mxu0 %v201_v1 }
   0x7   :  { %191 = vmatpush3.bf16.msra.mxu0 %v201_v1 }
   0x8   :  { %192 = vmatprep.subr.bf16.mxu0 %v202_v2 }
   0xb   :  { %193 = vmatpush3.bf16.msra.mxu0 %v202_v2 }
   0xc   :  { %194 = vmatprep.subr.bf16.mxu0 %v203_v4 }
   0xf   :  { %195 = vmatpush3.bf16.msra.mxu0 %v203_v4 }
  0x12   :  { %197 = vmatmul.mubr.msk.bf16.vlgmr.msra.gmra.mxu0 %vm58_vm0, %v205_v5 }
  0xd2   :  { %v198_v6 = vpop.f32.mrf.mxu0 }
  0xd3   :  { %v176_v7 = vpack.c.bf16 %v198_v6, %v198_v6  ;;  %133 = vadd.xlane.f32.xlu1 %v198_v6  ;;  %v141_v13 = vmul.f32 %v198_v6, %v198_v6 }
  0xd4   :  { %v99_v8 = vpop.f32.mrf.mxu0 }
  0xd5   :  { %129 = vadd.xlane.f32.xlu0 %v99_v8  ;;  %v139_v9 = vmul.f32 %v99_v8, %v99_v8  ;;  %128 = vst [vmem:[%s275_s2 + $0x8] sm:$0xf] %v176_v7 }
  0xd6   :  { %v199_v10 = vpop.f32.mrf.mxu0 }
  0xd7   :  { %142 = vadd.xlane.f32.xlu1 %v139_v9 }
  0xd8   :  { %v102_v11 = vpop.f32.mrf.mxu0 }
  0xd9   :  { %v180_v12 = vpack.c.bf16 %v102_v11, %v99_v8  ;;  %131 = vadd.xlane.f32.xlu0 %v102_v11  ;;  %v140_v14 = vmul.f32 %v102_v11, %v102_v11 }
  0xdb   :  { %181 = vst [vmem:[%s275_s2] sm:$0xff] %v180_v12   ;;  %146 = vadd.xlane.f32.xlu1 %v141_v13 }
  0xdd   :  { %144 = vadd.xlane.f32.xlu0 %v140_v14 }
 0x15c   :  { %v134_v15 = vpop.xlane.xlu1 %133 }
 0x15d   :  { %138 = vst.msk [vmem:[%s276_s3 + $0x10] sm:$0xff] %vm135_vm1, %v134_v15 }
 0x15e   :  { %v130_v16 = vpop.xlane.xlu0 %129 }
 0x15f   :  { %136 = vst.msk [vmem:[%s276_s3] sm:$0xff] %vm135_vm1, %v130_v16 }
 0x160   :  { %v143_v17 = vpop.xlane.xlu1 %142 }
 0x161   :  { %148 = vst.msk [vmem:[%s277_s4] sm:$0xff] %vm135_vm1, %v143_v17 }
 0x162   :  { %v132_v18 = vpop.xlane.xlu0 %131 }
 0x163   :  { %137 = vst.msk [vmem:[%s276_s3 + $0x8] sm:$0xff] %vm135_vm1, %v132_v18 }
 0x164   :  { %v147_v19 = vpop.xlane.xlu1 %146 }
 0x165   :  { %150 = vst.msk [vmem:[%s277_s4 + $0x10] sm:$0xff] %vm135_vm1, %v147_v19 }
 0x166   :  { %v145_v20 = vpop.xlane.xlu0 %144 }
 0x167   :  { %149 = vst.msk [vmem:[%s277_s4 + $0x8] sm:$0xff] %vm135_vm1, %v145_v20 }

// kernel: _lambda_.57
= control target key start
LH: loop header
LB: loop body
LE: loop exit
PB: predicated region body
PF: predicated region fallthrough
CT: control target
= control target key end

     0   :  { %v470_v0 = vmov 0   ;;  %s599_s1 = inlined_call_operand.vmem [shape: f32[64,1], index: 1, kind: input, shape index: {}]   ;;  %s600_s2 = inlined_call_operand.vmem [shape: f32[64,1], index: 2, kind: input, shape index: {}]   ;;  %s601_s0 = inlined_call_operand.vmem [shape: bf16[64,128], index: 0, kind: input, shape index: {}]   ;;  %s602_s3 = inlined_call_operand.vmem [shape: bf16[64,128], index: 3, kind: input, shape index: {}]   ;;  %s603_s4 = inlined_call_operand.vmem [shape: bf16[64,128], index: 4, kind: output, shape index: {}]  }
   0x1   :  { %453 = vset.pattern.permute.xlu1 %v470_v0  ;;  %452 = vset.pattern.permute.xlu0 %v470_v0  ;;  %v35_v1 = vld [vmem:[%s599_s1 + $0x10] sm:$0xff]  ;;  %v33_v3 = vld [vmem:[%s599_s1] sm:$0xff]  ;;  %v36_v8 = vld [vmem:[%s599_s1 + $0x18] sm:$0xff] }
   0x2   :  { %v43_v2 = vld [vmem:[%s600_s2 + $0x10] sm:$0xff]  ;;  %v51_v4 = vmul.f32 0.03125, %v35_v1  ;;  %v41_v6 = vld [vmem:[%s600_s2] sm:$0xff]  ;;  %v49_v7 = vmul.f32 0.03125, %v33_v3  ;;  %v44_v9 = vld [vmem:[%s600_s2 + $0x18] sm:$0xff]  ;;  %v52_v11 = vmul.f32 0.03125, %v36_v8 }
   0x3   :  { %v59_v5 = vmul.f32 0.03125, %v43_v2  ;;  %v57_v10 = vmul.f32 0.03125, %v41_v6  ;;  %v60_v12 = vmul.f32 0.03125, %v44_v9  ;;  %v34_v13 = vld [vmem:[%s599_s1 + $0x8] sm:$0xff]  ;;  %v37_v21 = vld [vmem:[%s599_s1 + $0x20] sm:$0xff]  ;;  %v40_v27 = vld [vmem:[%s599_s1 + $0x38] sm:$0xff] }
   0x4   :  { %v42_v14 = vld [vmem:[%s600_s2 + $0x8] sm:$0xff]  ;;  %101 = vperm.xlu1 %453, %v51_v4   ;;  %v67_v16 = vmul.f32 %v51_v4, %v51_v4  ;;  %91 = vperm.xlu0 %452, %v49_v7   ;;  %v65_v17 = vmul.f32 %v49_v7, %v49_v7  ;;  %v50_v18 = vmul.f32 0.03125, %v34_v13  ;;  %v45_v22 = vld [vmem:[%s600_s2 + $0x20] sm:$0xff]  ;;  %v68_v23 = vmul.f32 %v52_v11, %v52_v11  ;;  %v48_v28 = vld [vmem:[%s600_s2 + $0x38] sm:$0xff] }
   0x5   :  { %v38_v15 = vld [vmem:[%s599_s1 + $0x28] sm:$0xff]  ;;  %v58_v19 = vmul.f32 0.03125, %v42_v14  ;;  %v53_v26 = vmul.f32 0.03125, %v37_v21  ;;  %v61_v32 = vmul.f32 0.03125, %v45_v22  ;;  %v56_v36 = vmul.f32 0.03125, %v40_v27  ;;  %v39_v37 = vld [vmem:[%s599_s1 + $0x30] sm:$0xff] }
   0x6   :  { %v46_v20 = vld [vmem:[%s600_s2 + $0x28] sm:$0xff]  ;;  %v54_v24 = vmul.f32 0.03125, %v38_v15  ;;  %v75_v29 = vsub.f32 %v59_v5, %v67_v16  ;;  %v73_v30 = vsub.f32 %v57_v10, %v65_v17  ;;  %v66_v31 = vmul.f32 %v50_v18, %v50_v18  ;;  %v47_v46 = vld [vmem:[%s600_s2 + $0x30] sm:$0xff]  ;;  %v368_v14 = vld [vmem:[%s601_s0] sm:$0xff]  }
   0x7   :  { %v62_v25 = vmul.f32 0.03125, %v46_v20  ;;  %v76_v33 = vsub.f32 %v60_v12, %v68_v23  ;;  %v69_v35 = vmul.f32 %v53_v26, %v53_v26  ;;  %v64_v41 = vmul.f32 0.03125, %v48_v28  ;;  %v439_v17 = vld [vmem:[%s601_s0 + $0x8] sm:$0xff]  }
   0x8   :  { %v70_v34 = vmul.f32 %v54_v24, %v54_v24  ;;  %v83_v38 = vmax.f32 %v75_v29, 0.0  ;;  %v81_v39 = vmax.f32 %v73_v30, 0.0  ;;  %106 = vperm.xlu1 %453, %v52_v11   ;;  %v74_v40 = vsub.f32 %v58_v19, %v66_v31  ;;  %96 = vperm.xlu0 %452, %v50_v18   ;;  %v384_v19 = vld [vmem:[%s602_s3] sm:$0xff]   ;;  %v442_v29 = vld [vmem:[%s602_s3 + $0x8] sm:$0xff]  }
   0x9   :  { %v84_v42 = vmax.f32 %v76_v33, 0.0  ;;  %v77_v44 = vsub.f32 %v61_v32, %v69_v35  ;;  %v72_v45 = vmul.f32 %v56_v36, %v56_v36  ;;  %v55_v50 = vmul.f32 0.03125, %v39_v37  ;;  %v441_v37 = vld [vmem:[%s601_s0 + $0x18] sm:$0xff]  }
   0xa   :  { %v78_v43 = vsub.f32 %v62_v25, %v70_v34  ;;  %v139_v47 = vadd.f32 1e-05, %v83_v38  ;;  %v137_v48 = vadd.f32 1e-05, %v81_v39  ;;  %v82_v49 = vmax.f32 %v74_v40, 0.0  ;;  %v440_v25 = vld [vmem:[%s601_s0 + $0x10] sm:$0xff]  }
   0xb   :  { %v85_v51 = vmax.f32 %v77_v44, 0.0  ;;  %v63_v53 = vmul.f32 0.03125, %v47_v46  ;;  %v71_v54 = vmul.f32 %v55_v50, %v55_v50  ;;  %v140_v55 = vadd.f32 1e-05, %v84_v42 }
   0xc   :  { %v138_v52 = vadd.f32 1e-05, %v82_v49  ;;  %116 = vperm.xlu1 %453, %v54_v24   ;;  %111 = vperm.xlu0 %452, %v53_v26   ;;  %454 = vrsqrt.f32 %v137_v48  ;;  %v86_v56 = vmax.f32 %v78_v43, 0.0  ;;  %v80_v57 = vsub.f32 %v64_v41, %v72_v45  ;;  %v443_v41 = vld [vmem:[%s602_s3 + $0x10] sm:$0xff]  }
   0xd   :  { %456 = vrsqrt.f32 %v139_v47  ;;  %v79_v58 = vsub.f32 %v63_v53, %v71_v54  ;;  %v141_v59 = vadd.f32 1e-05, %v85_v51  ;;  %v369_v16 = vunpack.c.l.bf16 %v368_v14 }
   0xe   :  { %458 = vrsqrt.f32 %v138_v52  ;;  %v142_v61 = vadd.f32 1e-05, %v86_v56  ;;  %v88_v62 = vmax.f32 %v80_v57, 0.0  ;;  %v278_v20 = vlaneseq  ;;  %v444_v57 = vld [vmem:[%s602_s3 + $0x18] sm:$0xff]  }
   0xf   :  { %v87_v60 = vmax.f32 %v79_v58, 0.0  ;;  %460 = vrsqrt.f32 %v140_v55  ;;  %v370_v21 = vunpack.c.h.bf16 %v368_v14  ;;  %v373_v23 = vunpack.c.l.bf16 %v439_v17 }
  0x10   :  { %126 = vperm.xlu1 %453, %v56_v36   ;;  %121 = vperm.xlu0 %452, %v55_v50   ;;  %462 = vrsqrt.f32 %v141_v59  ;;  %v144_v0 = vadd.f32 1e-05, %v88_v62  ;;  %v385_v26 = vunpack.c.l.bf16 %v384_v19  ;;  %v556_v27 = vand.u32 127, %v278_v20 }
  0x11   :  { %v143_v63 = vadd.f32 1e-05, %v87_v60  ;;  %464 = vrsqrt.f32 %v142_v61  ;;  %v374_v30 = vunpack.c.h.bf16 %v439_v17  ;;  %v386_v32 = vunpack.c.h.bf16 %v384_v19 }
  0x12   :  { %v377_v34 = vunpack.c.l.bf16 %v440_v25  ;;  %v389_v40 = vunpack.c.l.bf16 %v442_v29  ;;  %v378_v42 = vunpack.c.h.bf16 %v440_v25  ;;  %vm282_vm0 = vcmp.lt.s32.totalorder %v556_v27, 32 }
  0x13   :  { %466 = vrsqrt.f32 %v143_v63  ;;  %v390_v43 = vunpack.c.h.bf16 %v442_v29  ;;  %v381_v50 = vunpack.c.l.bf16 %v441_v37  ;;  %v393_v52 = vunpack.c.l.bf16 %v443_v41 }
  0x14   :  { %468 = vrsqrt.f32 %v144_v0  ;;  %v382_v59 = vunpack.c.h.bf16 %v441_v37  ;;  %v394_v60 = vunpack.c.h.bf16 %v443_v41 }
  0x19   :  { %v455_v1 = vpop.eup %454 }
  0x1a   :  { %v457_v2 = vpop.eup %456  ;;  %155 = vperm.xlu0 %452, %v455_v1  }
  0x1b   :  { %v459_v3 = vpop.eup %458 }
  0x1c   :  { %160 = vperm.xlu1 %453, %v459_v3   ;;  %v461_v4 = vpop.eup %460 }
  0x1d   :  { %v463_v5 = vpop.eup %462 }
  0x1e   :  { %165 = vperm.xlu0 %452, %v457_v2   ;;  %v465_v6 = vpop.eup %464 }
  0x20   :  { %170 = vperm.xlu1 %453, %v461_v4   ;;  %v467_v7 = vpop.eup %466 }
  0x21   :  { %v469_v8 = vpop.eup %468 }
  0x22   :  { %175 = vperm.xlu0 %452, %v463_v5   ;;  %v397_v5 = vunpack.c.l.bf16 %v444_v57 }
  0x24   :  { %180 = vperm.xlu1 %453, %v465_v6  }
  0x26   :  { %185 = vperm.xlu0 %452, %v467_v7  }
  0x28   :  { %190 = vperm.xlu1 %453, %v469_v8  }
  0x7f   :  { %v92_v9 = vpop.permute.xlu0 %91  ;;  %v102_v10 = vpop.permute.xlu1 %101 }
  0x80   :  { %v129_v24 = vsub.f32 %v369_v16, %v92_v9  ;;  %v131_v36 = vsub.f32 %v373_v23, %v102_v10 }
  0x83   :  { %v97_v11 = vpop.permute.xlu0 %96  ;;  %v107_v12 = vpop.permute.xlu1 %106 }
  0x84   :  { %v130_v31 = vsub.f32 %v370_v21, %v97_v11  ;;  %v132_v45 = vsub.f32 %v374_v30, %v107_v12  ;;  %v398_v11 = vunpack.c.h.bf16 %v444_v57 }
  0x87   :  { %v112_v13 = vpop.permute.xlu0 %111  ;;  %v117_v15 = vpop.permute.xlu1 %116 }
  0x88   :  { %v133_v49 = vsub.f32 %v377_v34, %v112_v13  ;;  %v134_v58 = vsub.f32 %v378_v42, %v117_v15 }
  0x8b   :  { %v122_v18 = vpop.permute.xlu0 %121  ;;  %v127_v22 = vpop.permute.xlu1 %126 }
  0x8c   :  { %v135_v2 = vsub.f32 %v381_v50, %v122_v18  ;;  %v136_v10 = vsub.f32 %v382_v59, %v127_v22 }
  0x95   :  { %v156_v28 = vpop.permute.xlu0 %155 }
  0x96   :  { %v193_v33 = vmul.f32 %v156_v28, %v129_v24 }
  0x97   :  { %v161_v35 = vpop.permute.xlu1 %160 }
  0x98   :  { %v194_v38 = vmul.f32 %v161_v35, %v130_v31  ;;  %v217_v39 = vadd.f32 %v385_v26, %v193_v33 }
  0x99   :  { %v166_v44 = vpop.permute.xlu0 %165 }
  0x9a   :  { %v218_v46 = vadd.f32 %v386_v32, %v194_v38  ;;  %v225_v47 = vmax.f32 %v217_v39, 0.0  ;;  %v195_v48 = vmul.f32 %v166_v44, %v131_v36 }
  0x9b   :  { %v171_v51 = vpop.permute.xlu1 %170 }
  0x9c   :  { %v226_v53 = vmax.f32 %v218_v46, 0.0  ;;  %v283_v54 = vsel %vm282_vm0, %v225_v47, 0.0  ;;  %v196_v55 = vmul.f32 %v171_v51, %v132_v45  ;;  %v219_v56 = vadd.f32 %v389_v40, %v195_v48 }
  0x9d   :  { %v176_v61 = vpop.permute.xlu0 %175 }
  0x9e   :  { %v284_v62 = vsel %vm282_vm0, %v226_v53, 0.0  ;;  %v220_v63 = vadd.f32 %v390_v43, %v196_v55  ;;  %v227_v0 = vmax.f32 %v219_v56, 0.0  ;;  %v197_v1 = vmul.f32 %v176_v61, %v133_v49 }
  0x9f   :  { %v422_v3 = vpack.c.bf16 %v284_v62, %v283_v54  ;;  %v181_v4 = vpop.permute.xlu1 %180 }
  0xa0   :  { %v228_v6 = vmax.f32 %v220_v63, 0.0  ;;  %v285_v7 = vsel %vm282_vm0, %v227_v0, 0.0  ;;  %v198_v8 = vmul.f32 %v181_v4, %v134_v58  ;;  %v221_v9 = vadd.f32 %v393_v52, %v197_v1 }
  0xa1   :  { %423 = vst [vmem:[%s603_s4] sm:$0xff] %v422_v3   ;;  %v186_v12 = vpop.permute.xlu0 %185 }
  0xa2   :  { %v286_v13 = vsel %vm282_vm0, %v228_v6, 0.0  ;;  %v222_v14 = vadd.f32 %v394_v60, %v198_v8  ;;  %v229_v15 = vmax.f32 %v221_v9, 0.0  ;;  %v199_v16 = vmul.f32 %v186_v12, %v135_v2 }
  0xa3   :  { %v427_v17 = vpack.c.bf16 %v286_v13, %v285_v7  ;;  %v191_v18 = vpop.permute.xlu1 %190 }
  0xa4   :  { %v230_v19 = vmax.f32 %v222_v14, 0.0  ;;  %v287_v20 = vsel %vm282_vm0, %v229_v15, 0.0  ;;  %v200_v21 = vmul.f32 %v191_v18, %v136_v10  ;;  %v223_v22 = vadd.f32 %v397_v5, %v199_v16 }
  0xa5   :  { %448 = vst [vmem:[%s603_s4 + $0x8] sm:$0xff] %v427_v17  }
  0xa6   :  { %v288_v23 = vsel %vm282_vm0, %v230_v19, 0.0  ;;  %v224_v24 = vadd.f32 %v398_v11, %v200_v21  ;;  %v231_v25 = vmax.f32 %v223_v22, 0.0 }
  0xa7   :  { %v432_v26 = vpack.c.bf16 %v288_v23, %v287_v20 }
  0xa8   :  { %v232_v28 = vmax.f32 %v224_v24, 0.0  ;;  %v289_v29 = vsel %vm282_vm0, %v231_v25, 0.0 }
  0xa9   :  { %449 = vst [vmem:[%s603_s4 + $0x10] sm:$0xff] %v432_v26  }
  0xaa   :  { %v290_v30 = vsel %vm282_vm0, %v232_v28, 0.0 }
  0xab   :  { %v437_v31 = vpack.c.bf16 %v290_v30, %v289_v29 }
  0xad   :  { %450 = vst [vmem:[%s603_s4 + $0x18] sm:$0xff] %v437_v31  }

// kernel: _lambda_.59
= control target key start
LH: loop header
LB: loop body
LE: loop exit
PB: predicated region body
PF: predicated region fallthrough
CT: control target
= control target key end

     0   :  { %v170_v0 = vmov 0   ;;  %v107_v31 = vlaneseq  ;;  %s224_s1 = inlined_call_operand.vmem [shape: f32[24,1], index: 1, kind: input, shape index: {}]   ;;  %s225_s2 = inlined_call_operand.vmem [shape: f32[24,1], index: 2, kind: input, shape index: {}]   ;;  %s226_s0 = inlined_call_operand.vmem [shape: bf16[24,128], index: 0, kind: input, shape index: {}]   ;;  %s227_s3 = inlined_call_operand.vmem [shape: bf16[24,128], index: 3, kind: output, shape index: {}]  }
   0x1   :  { %162 = vset.pattern.permute.xlu0 %v170_v0  ;;  %v20_v1 = vld [vmem:[%s224_s1] sm:$0xff]  ;;  %163 = vset.pattern.permute.xlu1 %v170_v0  ;;  %v22_v3 = vld [vmem:[%s224_s1 + $0x10] sm:$0xff]  ;;  %v21_v8 = vld [vmem:[%s224_s1 + $0x8] sm:$0xff] }
   0x2   :  { %v23_v2 = vld [vmem:[%s225_s2] sm:$0xff]  ;;  %v26_v4 = vmul.f32 0.03125, %v20_v1  ;;  %v25_v6 = vld [vmem:[%s225_s2 + $0x10] sm:$0xff]  ;;  %v28_v7 = vmul.f32 0.03125, %v22_v3  ;;  %v24_v9 = vld [vmem:[%s225_s2 + $0x8] sm:$0xff]  ;;  %v27_v11 = vmul.f32 0.03125, %v21_v8 }
   0x3   :  { %v29_v5 = vmul.f32 0.03125, %v23_v2  ;;  %v31_v10 = vmul.f32 0.03125, %v25_v6  ;;  %v30_v12 = vmul.f32 0.03125, %v24_v9  ;;  %v148_v29 = vld [vmem:[%s226_s0] sm:$0xff]   ;;  %v16_v33 = vld [vmem:[%s226_s0 + $0x8] sm:$0xf] }
   0x4   :  { %43 = vperm.xlu0 %162, %v26_v4   ;;  %v32_v13 = vmul.f32 %v26_v4, %v26_v4  ;;  %53 = vperm.xlu1 %163, %v28_v7   ;;  %v34_v14 = vmul.f32 %v28_v7, %v28_v7  ;;  %v33_v15 = vmul.f32 %v27_v11, %v27_v11  ;;  %v149_v32 = vunpack.c.l.bf16 %v148_v29 }
   0x5   :  { %v150_v35 = vunpack.c.h.bf16 %v148_v29  ;;  %v108_v36 = vand.u32 127, %v107_v31  ;;  %v19_v38 = vunpack.c.l.bf16 %v16_v33 }
   0x6   :  { %v35_v16 = vsub.f32 %v29_v5, %v32_v13  ;;  %v37_v17 = vsub.f32 %v31_v10, %v34_v14  ;;  %v36_v18 = vsub.f32 %v30_v12, %v33_v15 }
   0x7   :  { %vm111_vm0 = vcmp.lt.s32.totalorder %v108_v36, 32 }
   0x8   :  { %v38_v19 = vmax.f32 %v35_v16, 0.0  ;;  %v40_v20 = vmax.f32 %v37_v17, 0.0  ;;  %48 = vperm.xlu0 %162, %v27_v11   ;;  %v39_v21 = vmax.f32 %v36_v18, 0.0 }
   0xa   :  { %v59_v22 = vadd.f32 1e-05, %v38_v19  ;;  %v61_v23 = vadd.f32 1e-05, %v40_v20  ;;  %v60_v24 = vadd.f32 1e-05, %v39_v21 }
   0xc   :  { %164 = vrsqrt.f32 %v59_v22 }
   0xd   :  { %166 = vrsqrt.f32 %v61_v23 }
   0xe   :  { %168 = vrsqrt.f32 %v60_v24 }
  0x19   :  { %v165_v25 = vpop.eup %164 }
  0x1a   :  { %v167_v26 = vpop.eup %166  ;;  %67 = vperm.xlu1 %163, %v165_v25  }
  0x1b   :  { %v169_v27 = vpop.eup %168 }
  0x1c   :  { %72 = vperm.xlu0 %162, %v169_v27  }
  0x1e   :  { %77 = vperm.xlu1 %163, %v167_v26  }
  0x7f   :  { %v44_v28 = vpop.permute.xlu0 %43  ;;  %v54_v30 = vpop.permute.xlu1 %53 }
  0x80   :  { %v56_v37 = vsub.f32 %v149_v32, %v44_v28  ;;  %v58_v43 = vsub.f32 %v19_v38, %v54_v30 }
  0x83   :  { %v49_v34 = vpop.permute.xlu0 %48 }
  0x84   :  { %v57_v40 = vsub.f32 %v150_v35, %v49_v34 }
  0x95   :  { %v68_v39 = vpop.permute.xlu1 %67 }
  0x96   :  { %v80_v41 = vmul.f32 %v68_v39, %v56_v37 }
  0x97   :  { %v73_v42 = vpop.permute.xlu0 %72 }
  0x98   :  { %v81_v44 = vmul.f32 %v73_v42, %v57_v40  ;;  %v83_v45 = vmax.f32 %v80_v41, 0.0 }
  0x99   :  { %v78_v46 = vpop.permute.xlu1 %77 }
  0x9a   :  { %v84_v47 = vmax.f32 %v81_v44, 0.0  ;;  %v112_v48 = vsel %vm111_vm0, %v83_v45, 0.0  ;;  %v82_v49 = vmul.f32 %v78_v46, %v58_v43 }
  0x9c   :  { %v113_v50 = vsel %vm111_vm0, %v84_v47, 0.0  ;;  %v85_v51 = vmax.f32 %v82_v49, 0.0 }
  0x9d   :  { %v159_v52 = vpack.c.bf16 %v113_v50, %v112_v48 }
  0x9e   :  { %v143_v53 = vpack.c.bf16 %v85_v51, %v85_v51  ;;  %v114_v54 = vsel %vm111_vm0, %v85_v51, 0.0 }
  0x9f   :  { %160 = vst [vmem:[%s227_s3] sm:$0xff] %v159_v52   ;;  %v146_v55 = vpack.c.bf16 %v114_v54, %v114_v54 }
  0xa0   :  { %101 = vst [vmem:[%s227_s3 + $0x8] sm:$0xf] %v143_v53 }
  0xa1   :  { %130 = vst [vmem:[%s227_s3 + $0x8] sm:$0xf] %v146_v55 }

// kernel: _lambda_.60
= control target key start
LH: loop header
LB: loop body
LE: loop exit
PB: predicated region body
PF: predicated region fallthrough
CT: control target
= control target key end

     0   :  { %v329_v0 = vmov 0   ;;  %vm141_vm0 = vcmask 719872   ;;  %vm148_vm1 = vcmask 1043456   ;;  %vm222_vm2 = vcmask 7168   ;;  %s458_s1 = inlined_call_operand.vmem [shape: bf16[216,128], index: 1, kind: input, shape index: {}]   ;;  %s459_s0 = inlined_call_operand.vmem [shape: bf16[24,216], index: 0, kind: input, shape index: {}]   ;;  %s460_s2 = inlined_call_operand.vmem [shape: bf16[24,128], index: 2, kind: output, shape index: {0}]   ;;  %s461_s3 = inlined_call_operand.vmem [shape: f32[1,24,1], index: 3, kind: output, shape index: {1}]   ;;  %s462_s4 = inlined_call_operand.vmem [shape: f32[1,24,1], index: 4, kind: output, shape index: {2}]  }
   0x1   :  { %152 = vmatprep.subr.bf16.mxu0 %v329_v0  ;;  %281 = vmatprep.subr.bf16.mxu1 %v329_v0  ;;  %v310_v1 = vld [vmem:[%s458_s1 + $0x38] sm:$0xff]   ;;  %v311_v2 = vld [vmem:[%s458_s1 + $0x30] sm:$0xff]   ;;  %v312_v3 = vld [vmem:[%s458_s1 + $0x28] sm:$0xff]  }
   0x2   :  { %153 = vmatpush1.bf16.msra.mxu0 %v310_v1  ;;  %295 = vmatpush1.bf16.msra.mxu1 %v310_v1  ;;  %v313_v4 = vld [vmem:[%s458_s1 + $0x20] sm:$0xff]   ;;  %v314_v5 = vld [vmem:[%s458_s1 + $0x18] sm:$0xff]   ;;  %v17_v7 = vld [vmem:[%s459_s0 + $0x10] sm:$0xff] }
   0x3   :  { %154 = vmatprep.subr.bf16.mxu0 %v329_v0  ;;  %282 = vmatprep.subr.bf16.mxu1 %v329_v0  ;;  %v326_v6 = vld [vmem:[%s459_s0 + $0x4] ss:$8 sps:$4 sm:$0xff]   ;;  %v253_v8 = vcombine.high %v17_v7, %v17_v7  ;;  %v315_v9 = vld [vmem:[%s458_s1 + $0x10] sm:$0xff]   ;;  %v318_v12 = vld [vmem:[%s458_s1 + $0x68] ss:$0 sps:$4 sm:$0xff]   ;;  %v252_v20 = vcombine.low %v17_v7, %v17_v7 }
   0x4   :  { %268 = vmatprep.mubr.msk.bf16.mxu0 %vm141_vm0, %v326_v6  ;;  %v316_v10 = vld [vmem:[%s458_s1 + $0x8] sm:$0xff]   ;;  %v317_v11 = vld [vmem:[%s458_s1] sm:$0xff]   ;;  %v150_v13 = vsel %vm148_vm1, %v318_v12, 0  ;;  %v320_v15 = vld [vmem:[%s458_s1 + $0x58] sm:$0xff]  }
   0x5   :  { %269 = vmatprep.mubr.msk.bf16.mxu1 %vm141_vm0, %v253_v8  ;;  %v319_v14 = vld [vmem:[%s458_s1 + $0x60] sm:$0xff]   ;;  %v321_v16 = vld [vmem:[%s458_s1 + $0x50] sm:$0xff]   ;;  %v322_v17 = vld [vmem:[%s458_s1 + $0x48] sm:$0xff]  }
   0x6   :  { %155 = vmatpush1.bf16.msra.mxu0 %v311_v2  ;;  %296 = vmatpush1.bf16.msra.mxu1 %v311_v2  ;;  %v323_v18 = vld [vmem:[%s458_s1 + $0x40] sm:$0xff]  }
   0x7   :  { %156 = vmatprep.subr.bf16.mxu0 %v329_v0  ;;  %283 = vmatprep.subr.bf16.mxu1 %v329_v0  ;;  %v324_v19 = vld [vmem:[%s459_s0] ss:$8 sps:$4 sm:$0xff]  }
   0xa   :  { %157 = vmatpush1.bf16.msra.mxu0 %v312_v3  ;;  %297 = vmatpush1.bf16.msra.mxu1 %v312_v3 }
   0xb   :  { %158 = vmatprep.subr.bf16.mxu0 %v329_v0  ;;  %284 = vmatprep.subr.bf16.mxu1 %v329_v0 }
   0xe   :  { %159 = vmatpush1.bf16.msra.mxu0 %v313_v4  ;;  %298 = vmatpush1.bf16.msra.mxu1 %v313_v4 }
   0xf   :  { %160 = vmatprep.subr.bf16.mxu0 %v329_v0  ;;  %285 = vmatprep.subr.bf16.mxu1 %v329_v0 }
  0x12   :  { %161 = vmatpush1.bf16.msra.mxu0 %v314_v5  ;;  %299 = vmatpush1.bf16.msra.mxu1 %v314_v5 }
  0x13   :  { %162 = vmatprep.subr.bf16.mxu0 %v329_v0  ;;  %286 = vmatprep.subr.bf16.mxu1 %v329_v0 }
  0x16   :  { %163 = vmatpush1.bf16.msra.mxu0 %v315_v9  ;;  %300 = vmatpush1.bf16.msra.mxu1 %v315_v9 }
  0x17   :  { %164 = vmatprep.subr.bf16.mxu0 %v329_v0  ;;  %287 = vmatprep.subr.bf16.mxu1 %v329_v0 }
  0x1a   :  { %165 = vmatpush1.bf16.msra.mxu0 %v316_v10  ;;  %301 = vmatpush1.bf16.msra.mxu1 %v316_v10 }
  0x1b   :  { %166 = vmatprep.subr.bf16.mxu0 %v329_v0  ;;  %288 = vmatprep.subr.bf16.mxu1 %v329_v0 }
  0x1e   :  { %167 = vmatpush1.bf16.msra.mxu0 %v317_v11  ;;  %302 = vmatpush1.bf16.msra.mxu1 %v317_v11 }
  0x1f   :  { %172 = vmatprep.subr.bf16.mxu0 %v329_v0  ;;  %289 = vmatprep.subr.bf16.mxu1 %v329_v0 }
  0x22   :  { %173 = vmatpush2.bf16.msra.mxu0 %v150_v13  ;;  %303 = vmatpush2.bf16.msra.mxu1 %v150_v13 }
  0x23   :  { %174 = vmatprep.subr.bf16.mxu0 %v329_v0  ;;  %290 = vmatprep.subr.bf16.mxu1 %v329_v0 }
  0x26   :  { %175 = vmatpush2.bf16.msra.mxu0 %v319_v14  ;;  %304 = vmatpush2.bf16.msra.mxu1 %v319_v14 }
  0x27   :  { %176 = vmatprep.subr.bf16.mxu0 %v329_v0  ;;  %291 = vmatprep.subr.bf16.mxu1 %v329_v0 }
  0x2a   :  { %177 = vmatpush2.bf16.msra.mxu0 %v320_v15  ;;  %305 = vmatpush2.bf16.msra.mxu1 %v320_v15 }
  0x2b   :  { %178 = vmatprep.subr.bf16.mxu0 %v329_v0  ;;  %292 = vmatprep.subr.bf16.mxu1 %v329_v0 }
  0x2e   :  { %179 = vmatpush2.bf16.msra.mxu0 %v321_v16  ;;  %306 = vmatpush2.bf16.msra.mxu1 %v321_v16 }
  0x2f   :  { %180 = vmatprep.subr.bf16.mxu0 %v329_v0  ;;  %293 = vmatprep.subr.bf16.mxu1 %v329_v0 }
  0x32   :  { %181 = vmatpush2.bf16.msra.mxu0 %v322_v17  ;;  %307 = vmatpush2.bf16.msra.mxu1 %v322_v17 }
  0x33   :  { %182 = vmatprep.subr.bf16.mxu0 %v329_v0  ;;  %294 = vmatprep.subr.bf16.mxu1 %v329_v0 }
  0x36   :  { %183 = vmatpush2.bf16.msra.mxu0 %v323_v18  ;;  %308 = vmatpush2.bf16.msra.mxu1 %v323_v18 }
  0x39   :  { %185 = vmatmul.mubr.bf16.vlgmr.msra.gmra.mxu0 %v324_v19  ;;  %193 = vmatmul.mubr.bf16.vlgmr.msra.gmra.mxu1 %v252_v20 }
  0xf9   :  { %v186_v21 = vpop.f32.mrf.mxu0  ;;  %v194_v22 = vpop.f32.mrf.mxu1 }
  0xfa   :  { %v275_v23 = vpack.c.bf16 %v194_v22, %v194_v22  ;;  %220 = vadd.xlane.f32.xlu1 %v194_v22  ;;  %216 = vadd.xlane.f32.xlu0 %v186_v21  ;;  %v226_v26 = vmul.f32 %v186_v21, %v186_v21  ;;  %v228_v32 = vmul.f32 %v194_v22, %v194_v22 }
  0xfb   :  { %v188_v24 = vpop.f32.mrf.mxu0  ;;  %v196_v25 = vpop.f32.mrf.mxu1 }
  0xfc   :  { %215 = vst [vmem:[%s460_s2 + $0x8] sm:$0xf] %v275_v23 }
  0xfd   :  { %v189_v27 = vpop.f32.mrf.mxu0  ;;  %v197_v28 = vpop.f32.mrf.mxu1 }
  0xfe   :  { %v279_v29 = vpack.c.bf16 %v189_v27, %v186_v21  ;;  %229 = vadd.xlane.f32.xlu1 %v226_v26  ;;  %218 = vadd.xlane.f32.xlu0 %v189_v27  ;;  %v227_v33 = vmul.f32 %v189_v27, %v189_v27 }
  0xff   :  { %v191_v30 = vpop.f32.mrf.mxu0  ;;  %v198_v31 = vpop.f32.mrf.mxu1 }
 0x100   :  { %280 = vst [vmem:[%s460_s2] sm:$0xff] %v279_v29  }
 0x102   :  { %233 = vadd.xlane.f32.xlu1 %v228_v32  ;;  %231 = vadd.xlane.f32.xlu0 %v227_v33 }
 0x183   :  { %v221_v34 = vpop.xlane.xlu1 %220  ;;  %v217_v35 = vpop.xlane.xlu0 %216 }
 0x184   :  { %225 = vst.msk [vmem:[%s461_s3 + $0x10] sm:$0xff] %vm222_vm2, %v221_v34  ;;  %223 = vst.msk [vmem:[%s461_s3] sm:$0xff] %vm222_vm2, %v217_v35 }
 0x187   :  { %v230_v36 = vpop.xlane.xlu1 %229  ;;  %v219_v37 = vpop.xlane.xlu0 %218 }
 0x188   :  { %235 = vst.msk [vmem:[%s462_s4] sm:$0xff] %vm222_vm2, %v230_v36  ;;  %224 = vst.msk [vmem:[%s461_s3 + $0x8] sm:$0xff] %vm222_vm2, %v219_v37 }
 0x18b   :  { %v234_v38 = vpop.xlane.xlu1 %233  ;;  %v232_v39 = vpop.xlane.xlu0 %231 }
 0x18c   :  { %237 = vst.msk [vmem:[%s462_s4 + $0x10] sm:$0xff] %vm222_vm2, %v234_v38  ;;  %236 = vst.msk [vmem:[%s462_s4 + $0x8] sm:$0xff] %vm222_vm2, %v232_v39 }

// kernel: _lambda_.62
= control target key start
LH: loop header
LB: loop body
LE: loop exit
PB: predicated region body
PF: predicated region fallthrough
CT: control target
= control target key end

     0   :  { %vm89_vm0 = vcmask 523264   ;;  %vm273_vm1 = vcmask 7168   ;;  %s644_s1 = inlined_call_operand.vmem [shape: bf16[64,128], index: 1, kind: input, shape index: {}]   ;;  %s645_s0 = inlined_call_operand.vmem [shape: bf16[96,64], index: 0, kind: input, shape index: {}]   ;;  %s646_s2 = inlined_call_operand.vmem [shape: bf16[96,128], index: 2, kind: output, shape index: {0}]   ;;  %s647_s3 = inlined_call_operand.vmem [shape: f32[1,96,1], index: 3, kind: output, shape index: {1}]   ;;  %s648_s4 = inlined_call_operand.vmem [shape: f32[1,96,1], index: 4, kind: output, shape index: {2}]  }
   0x1   :  { %v459_v0 = vld [vmem:[%s644_s1 + $0x18] sm:$0xff]   ;;  %v460_v1 = vld [vmem:[%s644_s1 + $0x10] sm:$0xff]   ;;  %v461_v2 = vld [vmem:[%s644_s1 + $0x8] sm:$0xff]  }
   0x2   :  { %431 = vmatprep.subr.bf16.mxu0 %v459_v0  ;;  %451 = vmatprep.subr.bf16.mxu1 %v459_v0  ;;  %v463_v3 = vld [vmem:[%s645_s0] sm:$0xff]   ;;  %v464_v4 = vld [vmem:[%s645_s0 + $0x10] sm:$0xff]   ;;  %v465_v6 = vld [vmem:[%s645_s0 + $0x8] sm:$0xff]  }
   0x3   :  { %432 = vmatpush3.bf16.msra.mxu0 %v459_v0  ;;  %455 = vmatpush3.bf16.msra.mxu1 %v459_v0  ;;  %v462_v5 = vld [vmem:[%s644_s1] sm:$0xff]   ;;  %v466_v7 = vld [vmem:[%s645_s0 + $0x18] sm:$0xff]   ;;  %v468_v9 = vld [vmem:[%s645_s0 + $0x28] sm:$0xff]  }
   0x4   :  { %433 = vmatprep.subr.bf16.mxu0 %v460_v1  ;;  %452 = vmatprep.subr.bf16.mxu1 %v460_v1  ;;  %v467_v8 = vld [vmem:[%s645_s0 + $0x20] sm:$0xff]  }
   0x5   :  { %439 = vmatprep.mubr.msk.bf16.mxu0 %vm89_vm0, %v463_v3  ;;  %443 = vmatprep.mubr.msk.bf16.mxu1 %vm89_vm0, %v464_v4 }
   0x7   :  { %434 = vmatpush3.bf16.msra.mxu0 %v460_v1  ;;  %456 = vmatpush3.bf16.msra.mxu1 %v460_v1 }
   0x8   :  { %435 = vmatprep.subr.bf16.mxu0 %v461_v2  ;;  %453 = vmatprep.subr.bf16.mxu1 %v461_v2 }
   0xb   :  { %436 = vmatpush3.bf16.msra.mxu0 %v461_v2  ;;  %457 = vmatpush3.bf16.msra.mxu1 %v461_v2 }
   0xc   :  { %437 = vmatprep.subr.bf16.mxu0 %v462_v5  ;;  %454 = vmatprep.subr.bf16.mxu1 %v462_v5 }
   0xf   :  { %438 = vmatpush3.bf16.msra.mxu0 %v462_v5  ;;  %458 = vmatpush3.bf16.msra.mxu1 %v462_v5 }
  0x12   :  { %440 = vmatmul.mubr.msk.bf16.vlgmr.msra.gmra.mxu0 %vm89_vm0, %v465_v6  ;;  %444 = vmatmul.mubr.msk.bf16.vlgmr.msra.gmra.mxu1 %vm89_vm0, %v466_v7 }
  0x13   :  { %447 = vmatprep.mubr.msk.bf16.mxu1 %vm89_vm0, %v467_v8 }
  0x1a   :  { %448 = vmatmul.mubr.msk.bf16.gmra.mxu1 %vm89_vm0, %v468_v9 }
  0xd2   :  { %v441_v10 = vpop.f32.mrf.mxu0  ;;  %v445_v11 = vpop.f32.mrf.mxu1 }
  0xd3   :  { %261 = vadd.xlane.f32.xlu0 %v445_v11  ;;  %253 = vadd.xlane.f32.xlu1 %v441_v10  ;;  %v288_v24 = vmul.f32 %v441_v10, %v441_v10  ;;  %v292_v28 = vmul.f32 %v445_v11, %v445_v11 }
  0xd4   :  { %v142_v12 = vpop.f32.mrf.mxu0  ;;  %v158_v13 = vpop.f32.mrf.mxu1 }
  0xd5   :  { %v286_v31 = vmul.f32 %v142_v12, %v142_v12  ;;  %v290_v33 = vmul.f32 %v158_v13, %v158_v13 }
  0xd6   :  { %v442_v14 = vpop.f32.mrf.mxu0  ;;  %v446_v15 = vpop.f32.mrf.mxu1 }
  0xd7   :  { %v394_v16 = vpack.c.bf16 %v442_v14, %v441_v10  ;;  %v404_v17 = vpack.c.bf16 %v446_v15, %v445_v11  ;;  %249 = vadd.xlane.f32.xlu0 %v142_v12  ;;  %255 = vadd.xlane.f32.xlu1 %v442_v14  ;;  %v289_v29 = vmul.f32 %v442_v14, %v442_v14 }
  0xd8   :  { %v145_v18 = vpop.f32.mrf.mxu0  ;;  %v161_v19 = vpop.f32.mrf.mxu1  ;;  %v293_v32 = vmul.f32 %v446_v15, %v446_v15 }
  0xd9   :  { %416 = vst [vmem:[%s646_s2 + $0x8] sm:$0xff] %v394_v16   ;;  %418 = vst [vmem:[%s646_s2 + $0x18] sm:$0xff] %v404_v17   ;;  %v389_v20 = vpack.c.bf16 %v145_v18, %v142_v12  ;;  %v399_v21 = vpack.c.bf16 %v161_v19, %v158_v13  ;;  %v287_v34 = vmul.f32 %v145_v18, %v145_v18 }
  0xda   :  { %v449_v22 = vpop.f32.mrf.mxu1  ;;  %v291_v35 = vmul.f32 %v161_v19, %v161_v19 }
  0xdb   :  { %390 = vst [vmem:[%s646_s2] sm:$0xff] %v389_v20   ;;  %417 = vst [vmem:[%s646_s2 + $0x10] sm:$0xff] %v399_v21   ;;  %257 = vadd.xlane.f32.xlu0 %v158_v13  ;;  %263 = vadd.xlane.f32.xlu1 %v446_v15  ;;  %v296_v38 = vmul.f32 %v449_v22, %v449_v22 }
  0xdc   :  { %v174_v23 = vpop.f32.mrf.mxu1 }
  0xdd   :  { %v294_v36 = vmul.f32 %v174_v23, %v174_v23 }
  0xde   :  { %v450_v25 = vpop.f32.mrf.mxu1 }
  0xdf   :  { %302 = vadd.xlane.f32.xlu0 %v288_v24  ;;  %259 = vadd.xlane.f32.xlu1 %v161_v19  ;;  %v414_v26 = vpack.c.bf16 %v450_v25, %v449_v22  ;;  %v297_v39 = vmul.f32 %v450_v25, %v450_v25 }
  0xe0   :  { %v177_v27 = vpop.f32.mrf.mxu1 }
  0xe1   :  { %420 = vst [vmem:[%s646_s2 + $0x28] sm:$0xff] %v414_v26   ;;  %v409_v30 = vpack.c.bf16 %v177_v27, %v174_v23  ;;  %v295_v37 = vmul.f32 %v177_v27, %v177_v27 }
  0xe3   :  { %310 = vadd.xlane.f32.xlu0 %v292_v28  ;;  %304 = vadd.xlane.f32.xlu1 %v289_v29  ;;  %419 = vst [vmem:[%s646_s2 + $0x20] sm:$0xff] %v409_v30  }
  0xe7   :  { %298 = vadd.xlane.f32.xlu0 %v286_v31  ;;  %312 = vadd.xlane.f32.xlu1 %v293_v32 }
  0xeb   :  { %306 = vadd.xlane.f32.xlu0 %v290_v33  ;;  %300 = vadd.xlane.f32.xlu1 %v287_v34 }
  0xef   :  { %251 = vadd.xlane.f32.xlu0 %v145_v18  ;;  %308 = vadd.xlane.f32.xlu1 %v291_v35 }
  0xf3   :  { %269 = vadd.xlane.f32.xlu0 %v449_v22  ;;  %271 = vadd.xlane.f32.xlu1 %v450_v25 }
  0xf7   :  { %265 = vadd.xlane.f32.xlu0 %v174_v23  ;;  %267 = vadd.xlane.f32.xlu1 %v177_v27 }
  0xfb   :  { %314 = vadd.xlane.f32.xlu0 %v294_v36  ;;  %316 = vadd.xlane.f32.xlu1 %v295_v37 }
  0xff   :  { %318 = vadd.xlane.f32.xlu0 %v296_v38  ;;  %320 = vadd.xlane.f32.xlu1 %v297_v39 }
 0x15c   :  { %v262_v40 = vpop.xlane.xlu0 %261  ;;  %v254_v41 = vpop.xlane.xlu1 %253 }
 0x15d   :  { %280 = vst.msk [vmem:[%s647_s3 + $0x30] sm:$0xff] %vm273_vm1, %v262_v40  ;;  %276 = vst.msk [vmem:[%s647_s3 + $0x10] sm:$0xff] %vm273_vm1, %v254_v41 }
 0x160   :  { %v250_v42 = vpop.xlane.xlu0 %249  ;;  %v256_v43 = vpop.xlane.xlu1 %255 }
 0x161   :  { %274 = vst.msk [vmem:[%s647_s3] sm:$0xff] %vm273_vm1, %v250_v42  ;;  %277 = vst.msk [vmem:[%s647_s3 + $0x18] sm:$0xff] %vm273_vm1, %v256_v43 }
 0x164   :  { %v258_v44 = vpop.xlane.xlu0 %257  ;;  %v264_v45 = vpop.xlane.xlu1 %263 }
 0x165   :  { %278 = vst.msk [vmem:[%s647_s3 + $0x20] sm:$0xff] %vm273_vm1, %v258_v44  ;;  %281 = vst.msk [vmem:[%s647_s3 + $0x38] sm:$0xff] %vm273_vm1, %v264_v45 }
 0x168   :  { %v303_v46 = vpop.xlane.xlu0 %302  ;;  %v260_v47 = vpop.xlane.xlu1 %259 }
 0x169   :  { %324 = vst.msk [vmem:[%s648_s4 + $0x10] sm:$0xff] %vm273_vm1, %v303_v46  ;;  %279 = vst.msk [vmem:[%s647_s3 + $0x28] sm:$0xff] %vm273_vm1, %v260_v47 }
 0x16c   :  { %v311_v48 = vpop.xlane.xlu0 %310  ;;  %v305_v49 = vpop.xlane.xlu1 %304 }
 0x16d   :  { %328 = vst.msk [vmem:[%s648_s4 + $0x30] sm:$0xff] %vm273_vm1, %v311_v48  ;;  %325 = vst.msk [vmem:[%s648_s4 + $0x18] sm:$0xff] %vm273_vm1, %v305_v49 }
 0x170   :  { %v299_v50 = vpop.xlane.xlu0 %298  ;;  %v313_v51 = vpop.xlane.xlu1 %312 }
 0x171   :  { %322 = vst.msk [vmem:[%s648_s4] sm:$0xff] %vm273_vm1, %v299_v50  ;;  %329 = vst.msk [vmem:[%s648_s4 + $0x38] sm:$0xff] %vm273_vm1, %v313_v51 }
 0x174   :  { %v307_v52 = vpop.xlane.xlu0 %306  ;;  %v301_v53 = vpop.xlane.xlu1 %300 }
 0x175   :  { %326 = vst.msk [vmem:[%s648_s4 + $0x20] sm:$0xff] %vm273_vm1, %v307_v52  ;;  %323 = vst.msk [vmem:[%s648_s4 + $0x8] sm:$0xff] %vm273_vm1, %v301_v53 }
 0x178   :  { %v252_v54 = vpop.xlane.xlu0 %251  ;;  %v309_v55 = vpop.xlane.xlu1 %308 }
 0x179   :  { %275 = vst.msk [vmem:[%s647_s3 + $0x8] sm:$0xff] %vm273_vm1, %v252_v54  ;;  %327 = vst.msk [vmem:[%s648_s4 + $0x28] sm:$0xff] %vm273_vm1, %v309_v55 }
 0x17c   :  { %v270_v56 = vpop.xlane.xlu0 %269  ;;  %v272_v57 = vpop.xlane.xlu1 %271 }
 0x17d   :  { %284 = vst.msk [vmem:[%s647_s3 + $0x50] sm:$0xff] %vm273_vm1, %v270_v56  ;;  %285 = vst.msk [vmem:[%s647_s3 + $0x58] sm:$0xff] %vm273_vm1, %v272_v57 }
 0x180   :  { %v266_v58 = vpop.xlane.xlu0 %265  ;;  %v268_v59 = vpop.xlane.xlu1 %267 }
 0x181   :  { %282 = vst.msk [vmem:[%s647_s3 + $0x40] sm:$0xff] %vm273_vm1, %v266_v58  ;;  %283 = vst.msk [vmem:[%s647_s3 + $0x48] sm:$0xff] %vm273_vm1, %v268_v59 }
 0x184   :  { %v315_v60 = vpop.xlane.xlu0 %314  ;;  %v317_v61 = vpop.xlane.xlu1 %316 }
 0x185   :  { %330 = vst.msk [vmem:[%s648_s4 + $0x40] sm:$0xff] %vm273_vm1, %v315_v60  ;;  %331 = vst.msk [vmem:[%s648_s4 + $0x48] sm:$0xff] %vm273_vm1, %v317_v61 }
 0x188   :  { %v319_v62 = vpop.xlane.xlu0 %318  ;;  %v321_v63 = vpop.xlane.xlu1 %320 }
 0x189   :  { %332 = vst.msk [vmem:[%s648_s4 + $0x50] sm:$0xff] %vm273_vm1, %v319_v62  ;;  %333 = vst.msk [vmem:[%s648_s4 + $0x58] sm:$0xff] %vm273_vm1, %v321_v63 }

// kernel: _lambda_.61
= control target key start
LH: loop header
LB: loop body
LE: loop exit
PB: predicated region body
PF: predicated region fallthrough
CT: control target
= control target key end

     0   :  { %v537_v0 = vmov 0   ;;  %vm153_vm0 = vcmask 195584   ;;  %v95_v34 = vlaneseq  ;;  %vm172_vm2 = vcmask 1043456   ;;  %s735_s2 = inlined_call_operand.vmem [shape: f32[24,1], index: 2, kind: input, shape index: {}]   ;;  %s736_s3 = inlined_call_operand.vmem [shape: f32[24,1], index: 3, kind: input, shape index: {}]   ;;  %s737_s0 = inlined_call_operand.vmem [shape: bf16[96,24], index: 0, kind: input, shape index: {}]   ;;  %s738_s1 = inlined_call_operand.vmem [shape: bf16[24,128], index: 1, kind: input, shape index: {}]   ;;  %s739_s4 = inlined_call_operand.vmem [shape: bf16[96,128], index: 4, kind: output, shape index: {0}]   ;;  %s740_s5 = inlined_call_operand.vmem [shape: f32[1,96,1], index: 5, kind: output, shape index: {1}]   ;;  %s741_s6 = inlined_call_operand.vmem [shape: f32[1,96,1], index: 6, kind: output, shape index: {2}]  }
   0x1   :  { %524 = vset.pattern.permute.xlu1 %v537_v0  ;;  %v27_v1 = vld [vmem:[%s735_s2] sm:$0xff]  ;;  %523 = vset.pattern.permute.xlu0 %v537_v0  ;;  %v29_v3 = vld [vmem:[%s735_s2 + $0x10] sm:$0xff]  ;;  %v28_v8 = vld [vmem:[%s735_s2 + $0x8] sm:$0xff]  ;;  %vm341_vm4 = vcmask 7168  }
   0x2   :  { %v30_v2 = vld [vmem:[%s736_s3] sm:$0xff]  ;;  %v33_v4 = vmul.f32 0.125, %v27_v1  ;;  %v32_v6 = vld [vmem:[%s736_s3 + $0x10] sm:$0xff]  ;;  %v35_v7 = vmul.f32 0.125, %v29_v3  ;;  %v31_v9 = vld [vmem:[%s736_s3 + $0x8] sm:$0xff]  ;;  %v34_v11 = vmul.f32 0.125, %v28_v8 }
   0x3   :  { %v36_v5 = vmul.f32 0.125, %v30_v2  ;;  %v38_v10 = vmul.f32 0.125, %v32_v6  ;;  %v37_v12 = vmul.f32 0.125, %v31_v9  ;;  %v525_v28 = vld [vmem:[%s737_s0] sm:$0xff]   ;;  %v526_v29 = vld [vmem:[%s737_s0 + $0x10] sm:$0xff]   ;;  %v96_v38 = vand.u32 127, %v95_v34 }
   0x4   :  { %50 = vperm.xlu1 %524, %v33_v4   ;;  %v39_v13 = vmul.f32 %v33_v4, %v33_v4  ;;  %60 = vperm.xlu0 %523, %v35_v7   ;;  %v41_v14 = vmul.f32 %v35_v7, %v35_v7  ;;  %v40_v15 = vmul.f32 %v34_v11, %v34_v11  ;;  %v454_v31 = vld [vmem:[%s738_s1] sm:$0xff]   ;;  %v23_v32 = vld [vmem:[%s738_s1 + $0x8] sm:$0xf]  ;;  %v528_v57 = vld [vmem:[%s737_s0 + $0x18] sm:$0xff]  }
   0x5   :  { %504 = vmatprep.mubr.msk.bf16.mxu0 %vm153_vm0, %v525_v28  ;;  %508 = vmatprep.mubr.msk.bf16.mxu1 %vm153_vm0, %v526_v29  ;;  %v26_v35 = vunpack.c.l.bf16 %v23_v32  ;;  %v456_v37 = vunpack.c.h.bf16 %v454_v31  ;;  %v455_v39 = vunpack.c.l.bf16 %v454_v31  ;;  %vm99_vm1 = vcmp.lt.s32.totalorder %v96_v38, 8  ;;  %v527_v56 = vld [vmem:[%s737_s0 + $0x8] sm:$0xff]   ;;  %v529_v58 = vld [vmem:[%s737_s0 + $0x20] sm:$0xff]  }
   0x6   :  { %v42_v16 = vsub.f32 %v36_v5, %v39_v13  ;;  %v44_v17 = vsub.f32 %v38_v10, %v41_v14  ;;  %v43_v18 = vsub.f32 %v37_v12, %v40_v15  ;;  %vm420_vm3 = vmpackc.low %vm99_vm1, %vm99_vm1  ;;  %v530_v59 = vld [vmem:[%s737_s0 + $0x28] sm:$0xff]  }
   0x8   :  { %v45_v19 = vmax.f32 %v42_v16, 0.0  ;;  %v47_v20 = vmax.f32 %v44_v17, 0.0  ;;  %55 = vperm.xlu1 %524, %v34_v11   ;;  %v46_v21 = vmax.f32 %v43_v18, 0.0 }
   0xa   :  { %v68_v22 = vadd.f32 1e-05, %v47_v20  ;;  %v66_v23 = vadd.f32 1e-05, %v45_v19  ;;  %v67_v24 = vadd.f32 1e-05, %v46_v21 }
   0xc   :  { %531 = vrsqrt.f32 %v68_v22 }
   0xd   :  { %533 = vrsqrt.f32 %v67_v24 }
   0xe   :  { %535 = vrsqrt.f32 %v66_v23 }
  0x19   :  { %v532_v25 = vpop.eup %531 }
  0x1a   :  { %v534_v26 = vpop.eup %533  ;;  %84 = vperm.xlu0 %523, %v532_v25  }
  0x1b   :  { %v536_v27 = vpop.eup %535  ;;  %79 = vperm.xlu1 %524, %v534_v26  }
  0x1e   :  { %74 = vperm.xlu0 %523, %v536_v27  }
  0x7f   :  { %v51_v30 = vpop.permute.xlu1 %50  ;;  %v61_v33 = vpop.permute.xlu0 %60 }
  0x80   :  { %v65_v40 = vsub.f32 %v26_v35, %v61_v33  ;;  %v63_v45 = vsub.f32 %v455_v39, %v51_v30 }
  0x83   :  { %v56_v36 = vpop.permute.xlu1 %55 }
  0x84   :  { %v64_v41 = vsub.f32 %v456_v37, %v56_v36 }
  0x95   :  { %v85_v42 = vpop.permute.xlu0 %84 }
  0x96   :  { %v89_v43 = vmul.f32 %v85_v42, %v65_v40  ;;  %v80_v44 = vpop.permute.xlu1 %79 }
  0x97   :  { %v88_v47 = vmul.f32 %v80_v44, %v64_v41 }
  0x98   :  { %v92_v46 = vmax.f32 %v89_v43, 0.0 }
  0x99   :  { %v75_v48 = vpop.permute.xlu0 %74  ;;  %v91_v52 = vmax.f32 %v88_v47, 0.0 }
  0x9a   :  { %v102_v49 = vsel %vm99_vm1, %v92_v46, 0.0  ;;  %v87_v50 = vmul.f32 %v75_v48, %v63_v45 }
  0x9b   :  { %v122_v51 = vpack.c.bf16 %v102_v49, %v102_v49 }
  0x9c   :  { %v90_v53 = vmax.f32 %v87_v50, 0.0 }
  0x9d   :  { %520 = vmatprep.subr.msk.bf16.mxu0 %vm172_vm2, %v122_v51  ;;  %521 = vmatprep.subr.msk.bf16.mxu1 %vm172_vm2, %v122_v51  ;;  %v174_v54 = vsel %vm172_vm2, %v122_v51, 0 }
  0x9e   :  { %v421_v55 = vpack.c.bf16 %v91_v52, %v90_v53  ;;  %501 = vmatpush3.bf16.msra.mxu0 %v174_v54  ;;  %518 = vmatpush3.bf16.msra.mxu1 %v174_v54 }
  0xa0   :  { %502 = vmatprep.subr.msk.bf16.mxu0 %vm420_vm3, %v421_v55  ;;  %517 = vmatprep.subr.msk.bf16.mxu1 %vm420_vm3, %v421_v55 }
  0xa2   :  { %503 = vmatpush3.bf16.msk.msra.mxu0 %vm420_vm3, %v421_v55  ;;  %519 = vmatpush3.bf16.msk.msra.mxu1 %vm420_vm3, %v421_v55 }
  0xa5   :  { %505 = vmatmul.mubr.msk.bf16.vlgmr.msra.gmra.mxu0 %vm153_vm0, %v527_v56  ;;  %509 = vmatmul.mubr.msk.bf16.vlgmr.msra.gmra.mxu1 %vm153_vm0, %v528_v57 }
  0xa6   :  { %512 = vmatprep.mubr.msk.bf16.mxu1 %vm153_vm0, %v529_v58 }
  0xad   :  { %513 = vmatmul.mubr.msk.bf16.gmra.mxu1 %vm153_vm0, %v530_v59 }
 0x165   :  { %v506_v60 = vpop.f32.mrf.mxu0  ;;  %v510_v61 = vpop.f32.mrf.mxu1 }
 0x166   :  { %329 = vadd.xlane.f32.xlu1 %v510_v61  ;;  %321 = vadd.xlane.f32.xlu0 %v506_v60  ;;  %v356_v8 = vmul.f32 %v506_v60, %v506_v60  ;;  %v360_v11 = vmul.f32 %v510_v61, %v510_v61 }
 0x167   :  { %v210_v62 = vpop.f32.mrf.mxu0  ;;  %v226_v63 = vpop.f32.mrf.mxu1 }
 0x168   :  { %v354_v15 = vmul.f32 %v210_v62, %v210_v62  ;;  %v358_v17 = vmul.f32 %v226_v63, %v226_v63 }
 0x169   :  { %v507_v0 = vpop.f32.mrf.mxu0  ;;  %v511_v1 = vpop.f32.mrf.mxu1 }
 0x16a   :  { %v465_v2 = vpack.c.bf16 %v507_v0, %v506_v60  ;;  %325 = vadd.xlane.f32.xlu1 %v226_v63  ;;  %317 = vadd.xlane.f32.xlu0 %v210_v62  ;;  %v475_v3 = vpack.c.bf16 %v511_v1, %v510_v61  ;;  %v357_v18 = vmul.f32 %v507_v0, %v507_v0 }
 0x16b   :  { %v213_v4 = vpop.f32.mrf.mxu0  ;;  %v229_v5 = vpop.f32.mrf.mxu1  ;;  %v361_v19 = vmul.f32 %v511_v1, %v511_v1 }
 0x16c   :  { %487 = vst [vmem:[%s739_s4 + $0x8] sm:$0xff] %v465_v2   ;;  %v460_v6 = vpack.c.bf16 %v213_v4, %v210_v62  ;;  %489 = vst [vmem:[%s739_s4 + $0x18] sm:$0xff] %v475_v3   ;;  %v470_v7 = vpack.c.bf16 %v229_v5, %v226_v63  ;;  %v355_v20 = vmul.f32 %v213_v4, %v213_v4 }
 0x16d   :  { %v514_v9 = vpop.f32.mrf.mxu1  ;;  %v359_v21 = vmul.f32 %v229_v5, %v229_v5 }
 0x16e   :  { %461 = vst [vmem:[%s739_s4] sm:$0xff] %v460_v6   ;;  %488 = vst [vmem:[%s739_s4 + $0x10] sm:$0xff] %v470_v7   ;;  %370 = vadd.xlane.f32.xlu1 %v356_v8  ;;  %323 = vadd.xlane.f32.xlu0 %v507_v0  ;;  %v364_v23 = vmul.f32 %v514_v9, %v514_v9 }
 0x16f   :  { %v242_v10 = vpop.f32.mrf.mxu1 }
 0x170   :  { %v362_v22 = vmul.f32 %v242_v10, %v242_v10 }
 0x171   :  { %v515_v12 = vpop.f32.mrf.mxu1 }
 0x172   :  { %378 = vadd.xlane.f32.xlu1 %v360_v11  ;;  %331 = vadd.xlane.f32.xlu0 %v511_v1  ;;  %v485_v13 = vpack.c.bf16 %v515_v12, %v514_v9  ;;  %v365_v25 = vmul.f32 %v515_v12, %v515_v12 }
 0x173   :  { %v245_v14 = vpop.f32.mrf.mxu1 }
 0x174   :  { %491 = vst [vmem:[%s739_s4 + $0x28] sm:$0xff] %v485_v13   ;;  %v480_v16 = vpack.c.bf16 %v245_v14, %v242_v10  ;;  %v363_v24 = vmul.f32 %v245_v14, %v245_v14 }
 0x176   :  { %366 = vadd.xlane.f32.xlu1 %v354_v15  ;;  %327 = vadd.xlane.f32.xlu0 %v229_v5  ;;  %490 = vst [vmem:[%s739_s4 + $0x20] sm:$0xff] %v480_v16  }
 0x17a   :  { %374 = vadd.xlane.f32.xlu1 %v358_v17  ;;  %372 = vadd.xlane.f32.xlu0 %v357_v18 }
 0x17e   :  { %380 = vadd.xlane.f32.xlu0 %v361_v19  ;;  %319 = vadd.xlane.f32.xlu1 %v213_v4 }
 0x182   :  { %337 = vadd.xlane.f32.xlu1 %v514_v9  ;;  %368 = vadd.xlane.f32.xlu0 %v355_v20 }
 0x186   :  { %333 = vadd.xlane.f32.xlu1 %v242_v10  ;;  %376 = vadd.xlane.f32.xlu0 %v359_v21 }
 0x18a   :  { %382 = vadd.xlane.f32.xlu1 %v362_v22  ;;  %339 = vadd.xlane.f32.xlu0 %v515_v12 }
 0x18e   :  { %386 = vadd.xlane.f32.xlu1 %v364_v23  ;;  %335 = vadd.xlane.f32.xlu0 %v245_v14 }
 0x192   :  { %384 = vadd.xlane.f32.xlu0 %v363_v24 }
 0x196   :  { %388 = vadd.xlane.f32.xlu0 %v365_v25 }
 0x1ef   :  { %v330_v26 = vpop.xlane.xlu1 %329  ;;  %v322_v27 = vpop.xlane.xlu0 %321 }
 0x1f0   :  { %348 = vst.msk [vmem:[%s740_s5 + $0x30] sm:$0xff] %vm341_vm4, %v330_v26  ;;  %344 = vst.msk [vmem:[%s740_s5 + $0x10] sm:$0xff] %vm341_vm4, %v322_v27 }
 0x1f3   :  { %v326_v28 = vpop.xlane.xlu1 %325  ;;  %v318_v29 = vpop.xlane.xlu0 %317 }
 0x1f4   :  { %346 = vst.msk [vmem:[%s740_s5 + $0x20] sm:$0xff] %vm341_vm4, %v326_v28  ;;  %342 = vst.msk [vmem:[%s740_s5] sm:$0xff] %vm341_vm4, %v318_v29 }
 0x1f7   :  { %v371_v30 = vpop.xlane.xlu1 %370  ;;  %v324_v31 = vpop.xlane.xlu0 %323 }
 0x1f8   :  { %392 = vst.msk [vmem:[%s741_s6 + $0x10] sm:$0xff] %vm341_vm4, %v371_v30  ;;  %345 = vst.msk [vmem:[%s740_s5 + $0x18] sm:$0xff] %vm341_vm4, %v324_v31 }
 0x1fb   :  { %v379_v32 = vpop.xlane.xlu1 %378  ;;  %v332_v33 = vpop.xlane.xlu0 %331 }
 0x1fc   :  { %396 = vst.msk [vmem:[%s741_s6 + $0x30] sm:$0xff] %vm341_vm4, %v379_v32  ;;  %349 = vst.msk [vmem:[%s740_s5 + $0x38] sm:$0xff] %vm341_vm4, %v332_v33 }
 0x1ff   :  { %v367_v34 = vpop.xlane.xlu1 %366  ;;  %v328_v35 = vpop.xlane.xlu0 %327 }
 0x200   :  { %390 = vst.msk [vmem:[%s741_s6] sm:$0xff] %vm341_vm4, %v367_v34  ;;  %347 = vst.msk [vmem:[%s740_s5 + $0x28] sm:$0xff] %vm341_vm4, %v328_v35 }
 0x203   :  { %v375_v36 = vpop.xlane.xlu1 %374  ;;  %v373_v37 = vpop.xlane.xlu0 %372 }
 0x204   :  { %394 = vst.msk [vmem:[%s741_s6 + $0x20] sm:$0xff] %vm341_vm4, %v375_v36  ;;  %393 = vst.msk [vmem:[%s741_s6 + $0x18] sm:$0xff] %vm341_vm4, %v373_v37 }
 0x207   :  { %v381_v38 = vpop.xlane.xlu0 %380  ;;  %v320_v39 = vpop.xlane.xlu1 %319 }
 0x208   :  { %397 = vst.msk [vmem:[%s741_s6 + $0x38] sm:$0xff] %vm341_vm4, %v381_v38  ;;  %343 = vst.msk [vmem:[%s740_s5 + $0x8] sm:$0xff] %vm341_vm4, %v320_v39 }
 0x20b   :  { %v338_v40 = vpop.xlane.xlu1 %337  ;;  %v369_v41 = vpop.xlane.xlu0 %368 }
 0x20c   :  { %352 = vst.msk [vmem:[%s740_s5 + $0x50] sm:$0xff] %vm341_vm4, %v338_v40  ;;  %391 = vst.msk [vmem:[%s741_s6 + $0x8] sm:$0xff] %vm341_vm4, %v369_v41 }
 0x20f   :  { %v334_v42 = vpop.xlane.xlu1 %333  ;;  %v377_v43 = vpop.xlane.xlu0 %376 }
 0x210   :  { %350 = vst.msk [vmem:[%s740_s5 + $0x40] sm:$0xff] %vm341_vm4, %v334_v42  ;;  %395 = vst.msk [vmem:[%s741_s6 + $0x28] sm:$0xff] %vm341_vm4, %v377_v43 }
 0x213   :  { %v383_v44 = vpop.xlane.xlu1 %382  ;;  %v340_v45 = vpop.xlane.xlu0 %339 }
 0x214   :  { %398 = vst.msk [vmem:[%s741_s6 + $0x40] sm:$0xff] %vm341_vm4, %v383_v44  ;;  %353 = vst.msk [vmem:[%s740_s5 + $0x58] sm:$0xff] %vm341_vm4, %v340_v45 }
 0x217   :  { %v387_v46 = vpop.xlane.xlu1 %386  ;;  %v336_v47 = vpop.xlane.xlu0 %335 }
 0x218   :  { %400 = vst.msk [vmem:[%s741_s6 + $0x50] sm:$0xff] %vm341_vm4, %v387_v46  ;;  %351 = vst.msk [vmem:[%s740_s5 + $0x48] sm:$0xff] %vm341_vm4, %v336_v47 }
 0x21b   :  { %v385_v48 = vpop.xlane.xlu0 %384 }
 0x21c   :  { %399 = vst.msk [vmem:[%s741_s6 + $0x48] sm:$0xff] %vm341_vm4, %v385_v48 }
 0x21f   :  { %v389_v49 = vpop.xlane.xlu0 %388 }
 0x220   :  { %401 = vst.msk [vmem:[%s741_s6 + $0x58] sm:$0xff] %vm341_vm4, %v389_v49 }

// kernel: _lambda_.63
= control target key start
LH: loop header
LB: loop body
LE: loop exit
PB: predicated region body
PF: predicated region fallthrough
CT: control target
= control target key end

     0   :  { %v972_v0 = vmov 0   ;;  %s1347_s1 = inlined_call_operand.vmem [shape: f32[96,1], index: 1, kind: input, shape index: {}]   ;;  %s1348_s2 = inlined_call_operand.vmem [shape: f32[96,1], index: 2, kind: input, shape index: {}]   ;;  %s1349_s4 = inlined_call_operand.vmem [shape: f32[96,1], index: 4, kind: input, shape index: {}]   ;;  %s1350_s5 = inlined_call_operand.vmem [shape: f32[96,1], index: 5, kind: input, shape index: {}]   ;;  %s1351_s0 = inlined_call_operand.vmem [shape: bf16[96,128], index: 0, kind: input, shape index: {}]   ;;  %s1352_s3 = inlined_call_operand.vmem [shape: bf16[96,128], index: 3, kind: input, shape index: {}]   ;;  %s1353_s6 = inlined_call_operand.vmem [shape: bf16[96,128], index: 6, kind: output, shape index: {}]  }
   0x1   :  { %923 = vset.pattern.permute.xlu1 %v972_v0  ;;  %922 = vset.pattern.permute.xlu0 %v972_v0  ;;  %v49_v1 = vld [vmem:[%s1347_s1 + $0x10] sm:$0xff]  ;;  %v47_v3 = vld [vmem:[%s1347_s1] sm:$0xff]  ;;  %v50_v8 = vld [vmem:[%s1347_s1 + $0x18] sm:$0xff] }
   0x2   :  { %v61_v2 = vld [vmem:[%s1348_s2 + $0x10] sm:$0xff]  ;;  %v73_v4 = vmul.f32 0.125, %v49_v1  ;;  %v59_v6 = vld [vmem:[%s1348_s2] sm:$0xff]  ;;  %v71_v7 = vmul.f32 0.125, %v47_v3  ;;  %v62_v9 = vld [vmem:[%s1348_s2 + $0x18] sm:$0xff]  ;;  %v74_v11 = vmul.f32 0.125, %v50_v8 }
   0x3   :  { %v85_v5 = vmul.f32 0.125, %v61_v2  ;;  %v83_v10 = vmul.f32 0.125, %v59_v6  ;;  %v86_v12 = vmul.f32 0.125, %v62_v9  ;;  %v48_v13 = vld [vmem:[%s1347_s1 + $0x8] sm:$0xff]  ;;  %v51_v21 = vld [vmem:[%s1347_s1 + $0x20] sm:$0xff]  ;;  %v54_v27 = vld [vmem:[%s1347_s1 + $0x38] sm:$0xff] }
   0x4   :  { %v60_v14 = vld [vmem:[%s1348_s2 + $0x8] sm:$0xff]  ;;  %143 = vperm.xlu1 %923, %v73_v4   ;;  %v97_v16 = vmul.f32 %v73_v4, %v73_v4  ;;  %133 = vperm.xlu0 %922, %v71_v7   ;;  %v95_v17 = vmul.f32 %v71_v7, %v71_v7  ;;  %v72_v18 = vmul.f32 0.125, %v48_v13  ;;  %v63_v22 = vld [vmem:[%s1348_s2 + $0x20] sm:$0xff]  ;;  %v98_v23 = vmul.f32 %v74_v11, %v74_v11  ;;  %v66_v28 = vld [vmem:[%s1348_s2 + $0x38] sm:$0xff] }
   0x5   :  { %v52_v15 = vld [vmem:[%s1347_s1 + $0x28] sm:$0xff]  ;;  %v84_v19 = vmul.f32 0.125, %v60_v14  ;;  %v75_v26 = vmul.f32 0.125, %v51_v21  ;;  %v87_v32 = vmul.f32 0.125, %v63_v22  ;;  %v78_v36 = vmul.f32 0.125, %v54_v27  ;;  %v53_v37 = vld [vmem:[%s1347_s1 + $0x30] sm:$0xff] }
   0x6   :  { %v64_v20 = vld [vmem:[%s1348_s2 + $0x28] sm:$0xff]  ;;  %v76_v24 = vmul.f32 0.125, %v52_v15  ;;  %v109_v29 = vsub.f32 %v85_v5, %v97_v16  ;;  %v107_v30 = vsub.f32 %v83_v10, %v95_v17  ;;  %v96_v31 = vmul.f32 %v72_v18, %v72_v18  ;;  %v65_v46 = vld [vmem:[%s1348_s2 + $0x30] sm:$0xff]  ;;  %v55_v59 = vld [vmem:[%s1347_s1 + $0x40] sm:$0xff] }
   0x7   :  { %v88_v25 = vmul.f32 0.125, %v64_v20  ;;  %v110_v33 = vsub.f32 %v86_v12, %v98_v23  ;;  %v99_v35 = vmul.f32 %v75_v26, %v75_v26  ;;  %v90_v41 = vmul.f32 0.125, %v66_v28  ;;  %v56_v54 = vld [vmem:[%s1347_s1 + $0x48] sm:$0xff]  ;;  %v67_v60 = vld [vmem:[%s1348_s2 + $0x40] sm:$0xff]  ;;  %v58_v62 = vld [vmem:[%s1347_s1 + $0x58] sm:$0xff] }
   0x8   :  { %v100_v34 = vmul.f32 %v76_v24, %v76_v24  ;;  %v121_v38 = vmax.f32 %v109_v29, 0.0  ;;  %v119_v39 = vmax.f32 %v107_v30, 0.0  ;;  %148 = vperm.xlu1 %923, %v74_v11   ;;  %v108_v40 = vsub.f32 %v84_v19, %v96_v31  ;;  %138 = vperm.xlu0 %922, %v72_v18   ;;  %v68_v55 = vld [vmem:[%s1348_s2 + $0x48] sm:$0xff]  ;;  %v70_v3 = vld [vmem:[%s1348_s2 + $0x58] sm:$0xff]  ;;  %v57_v4 = vld [vmem:[%s1347_s1 + $0x50] sm:$0xff] }
   0x9   :  { %v122_v42 = vmax.f32 %v110_v33, 0.0  ;;  %v111_v44 = vsub.f32 %v87_v32, %v99_v35  ;;  %v102_v45 = vmul.f32 %v78_v36, %v78_v36  ;;  %v77_v50 = vmul.f32 0.125, %v53_v37  ;;  %v69_v12 = vld [vmem:[%s1348_s2 + $0x50] sm:$0xff] }
   0xa   :  { %v112_v43 = vsub.f32 %v88_v25, %v100_v34  ;;  %v205_v47 = vadd.f32 1e-05, %v121_v38  ;;  %v203_v48 = vadd.f32 1e-05, %v119_v39  ;;  %v120_v49 = vmax.f32 %v108_v40, 0.0 }
   0xb   :  { %v123_v52 = vmax.f32 %v111_v44, 0.0  ;;  %v114_v53 = vsub.f32 %v90_v41, %v102_v45  ;;  %v89_v57 = vmul.f32 0.125, %v65_v46  ;;  %v101_v58 = vmul.f32 %v77_v50, %v77_v50  ;;  %v323_v41 = vld [vmem:[%s1349_s4] sm:$0xff]  ;;  %v326_v45 = vld [vmem:[%s1349_s4 + $0x18] sm:$0xff] }
   0xc   :  { %v124_v51 = vmax.f32 %v112_v43, 0.0  ;;  %924 = vrsqrt.f32 %v205_v47  ;;  %v204_v56 = vadd.f32 1e-05, %v120_v49  ;;  %158 = vperm.xlu1 %923, %v76_v24   ;;  %153 = vperm.xlu0 %922, %v75_v26   ;;  %v206_v61 = vadd.f32 1e-05, %v122_v42  ;;  %v324_v42 = vld [vmem:[%s1349_s4 + $0x8] sm:$0xff] }
   0xd   :  { %926 = vrsqrt.f32 %v203_v48  ;;  %v113_v0 = vsub.f32 %v89_v57, %v101_v58  ;;  %v80_v1 = vmul.f32 0.125, %v56_v54  ;;  %v92_v2 = vmul.f32 0.125, %v68_v55  ;;  %v335_v44 = vld [vmem:[%s1350_s5] sm:$0xff]  ;;  %v336_v47 = vld [vmem:[%s1350_s5 + $0x8] sm:$0xff]  ;;  %v325_v49 = vld [vmem:[%s1349_s4 + $0x10] sm:$0xff] }
   0xe   :  { %v208_v63 = vadd.f32 1e-05, %v124_v51  ;;  %928 = vrsqrt.f32 %v204_v56  ;;  %v207_v5 = vadd.f32 1e-05, %v123_v52  ;;  %v79_v6 = vmul.f32 0.125, %v55_v59  ;;  %v338_v51 = vld [vmem:[%s1350_s5 + $0x18] sm:$0xff] }
   0xf   :  { %v91_v7 = vmul.f32 0.125, %v67_v60  ;;  %v126_v8 = vmax.f32 %v114_v53, 0.0  ;;  %v125_v9 = vmax.f32 %v113_v0, 0.0  ;;  %v104_v10 = vmul.f32 %v80_v1, %v80_v1  ;;  %v337_v55 = vld [vmem:[%s1350_s5 + $0x10] sm:$0xff]  ;;  %v327_v0 = vld [vmem:[%s1349_s4 + $0x20] sm:$0xff] }
  0x10   :  { %168 = vperm.xlu1 %923, %v78_v36   ;;  %163 = vperm.xlu0 %922, %v77_v50   ;;  %v82_v11 = vmul.f32 0.125, %v58_v62  ;;  %930 = vrsqrt.f32 %v206_v61  ;;  %v103_v13 = vmul.f32 %v79_v6, %v79_v6  ;;  %v94_v14 = vmul.f32 0.125, %v70_v3  ;;  %v340_v3 = vld [vmem:[%s1350_s5 + $0x28] sm:$0xff] }
  0x11   :  { %v81_v15 = vmul.f32 0.125, %v57_v4  ;;  %v116_v16 = vsub.f32 %v92_v2, %v104_v10  ;;  %932 = vrsqrt.f32 %v208_v63  ;;  %v93_v19 = vmul.f32 0.125, %v69_v12  ;;  %v328_v63 = vld [vmem:[%s1349_s4 + $0x28] sm:$0xff] }
  0x12   :  { %v106_v17 = vmul.f32 %v82_v11, %v82_v11  ;;  %v115_v18 = vsub.f32 %v91_v7, %v103_v13  ;;  %934 = vrsqrt.f32 %v207_v5  ;;  %v210_v21 = vadd.f32 1e-05, %v126_v8  ;;  %v339_v5 = vld [vmem:[%s1350_s5 + $0x20] sm:$0xff] }
  0x13   :  { %v105_v20 = vmul.f32 %v81_v15, %v81_v15  ;;  %v209_v22 = vadd.f32 1e-05, %v125_v9  ;;  %v128_v23 = vmax.f32 %v116_v16, 0.0  ;;  %v347_v48 = vmul.f32 0.125, %v323_v41 }
  0x14   :  { %178 = vperm.xlu1 %923, %v80_v1   ;;  %173 = vperm.xlu0 %922, %v79_v6   ;;  %v127_v24 = vmax.f32 %v115_v18, 0.0  ;;  %v118_v25 = vsub.f32 %v94_v14, %v106_v17  ;;  %v348_v50 = vmul.f32 0.125, %v324_v42  ;;  %v359_v52 = vmul.f32 0.125, %v335_v44  ;;  %v330_v17 = vld [vmem:[%s1349_s4 + $0x38] sm:$0xff] }
  0x15   :  { %v117_v26 = vsub.f32 %v93_v19, %v105_v20  ;;  %936 = vrsqrt.f32 %v209_v22  ;;  %v212_v30 = vadd.f32 1e-05, %v128_v23  ;;  %v371_v53 = vmul.f32 %v347_v48, %v347_v48  ;;  %v341_v19 = vld [vmem:[%s1350_s5 + $0x30] sm:$0xff] }
  0x16   :  { %v211_v27 = vadd.f32 1e-05, %v127_v24  ;;  %938 = vrsqrt.f32 %v210_v21  ;;  %v130_v31 = vmax.f32 %v118_v25, 0.0  ;;  %v350_v54 = vmul.f32 0.125, %v326_v45  ;;  %v342_v21 = vld [vmem:[%s1350_s5 + $0x38] sm:$0xff] }
  0x17   :  { %v129_v28 = vmax.f32 %v117_v26, 0.0  ;;  %v360_v57 = vmul.f32 0.125, %v336_v47  ;;  %v372_v58 = vmul.f32 %v348_v50, %v348_v50  ;;  %v349_v59 = vmul.f32 0.125, %v325_v49  ;;  %v334_v47 = vld [vmem:[%s1349_s4 + $0x58] sm:$0xff] }
  0x18   :  { %188 = vperm.xlu1 %923, %v82_v11   ;;  %183 = vperm.xlu0 %922, %v81_v15   ;;  %940 = vrsqrt.f32 %v211_v27  ;;  %v214_v35 = vadd.f32 1e-05, %v130_v31  ;;  %v362_v61 = vmul.f32 0.125, %v338_v51  ;;  %v374_v62 = vmul.f32 %v350_v54, %v350_v54  ;;  %v329_v15 = vld [vmem:[%s1349_s4 + $0x30] sm:$0xff]  ;;  %v331_v27 = vld [vmem:[%s1349_s4 + $0x40] sm:$0xff]  ;;  %v332_v31 = vld [vmem:[%s1349_s4 + $0x48] sm:$0xff] }
  0x19   :  { %v925_v29 = vpop.eup %924  ;;  %v213_v34 = vadd.f32 1e-05, %v129_v28  ;;  %942 = vrsqrt.f32 %v212_v30  ;;  %v361_v1 = vmul.f32 0.125, %v337_v55  ;;  %v373_v2 = vmul.f32 %v349_v59, %v349_v59  ;;  %v345_v51 = vld [vmem:[%s1350_s5 + $0x50] sm:$0xff] }
  0x1a   :  { %v927_v32 = vpop.eup %926  ;;  %v383_v4 = vsub.f32 %v359_v52, %v371_v53  ;;  %v384_v6 = vsub.f32 %v360_v57, %v372_v58  ;;  %v352_v7 = vmul.f32 0.125, %v328_v63  ;;  %v351_v8 = vmul.f32 0.125, %v327_v0  ;;  %v346_v52 = vld [vmem:[%s1350_s5 + $0x58] sm:$0xff] }
  0x1b   :  { %v929_v33 = vpop.eup %928  ;;  %944 = vrsqrt.f32 %v213_v34  ;;  %v386_v9 = vsub.f32 %v362_v61, %v374_v62  ;;  %v364_v10 = vmul.f32 0.125, %v340_v3  ;;  %v385_v11 = vsub.f32 %v361_v1, %v373_v2 }
  0x1c   :  { %229 = vperm.xlu0 %922, %v927_v32   ;;  %234 = vperm.xlu1 %923, %v929_v33   ;;  %946 = vrsqrt.f32 %v214_v35  ;;  %v376_v12 = vmul.f32 %v352_v7, %v352_v7  ;;  %v363_v13 = vmul.f32 0.125, %v339_v5  ;;  %v375_v14 = vmul.f32 %v351_v8, %v351_v8  ;;  %v343_v35 = vld [vmem:[%s1350_s5 + $0x40] sm:$0xff] }
  0x1d   :  { %v931_v36 = vpop.eup %930  ;;  %v395_v16 = vmax.f32 %v383_v4, 0.0  ;;  %v396_v18 = vmax.f32 %v384_v6, 0.0  ;;  %v398_v20 = vmax.f32 %v386_v9, 0.0  ;;  %v353_v22 = vmul.f32 0.125, %v329_v15 }
  0x1e   :  { %v933_v37 = vpop.eup %932  ;;  %v397_v23 = vmax.f32 %v385_v11, 0.0  ;;  %v388_v24 = vsub.f32 %v364_v10, %v376_v12  ;;  %v387_v25 = vsub.f32 %v363_v13, %v375_v14  ;;  %v354_v26 = vmul.f32 0.125, %v330_v17 }
  0x1f   :  { %v935_v38 = vpop.eup %934  ;;  %v479_v28 = vadd.f32 1e-05, %v395_v16  ;;  %v377_v30 = vmul.f32 %v353_v22, %v353_v22  ;;  %v480_v32 = vadd.f32 1e-05, %v396_v18  ;;  %v366_v33 = vmul.f32 0.125, %v342_v21 }
  0x20   :  { %239 = vperm.xlu0 %922, %v925_v29   ;;  %244 = vperm.xlu1 %923, %v931_v36   ;;  %v365_v29 = vmul.f32 0.125, %v341_v19  ;;  %v378_v34 = vmul.f32 %v354_v26, %v354_v26  ;;  %v482_v36 = vadd.f32 1e-05, %v398_v20  ;;  %v399_v41 = vmax.f32 %v387_v25, 0.0 }
  0x21   :  { %v356_v42 = vmul.f32 0.125, %v332_v31  ;;  %948 = vrsqrt.f32 %v479_v28  ;;  %v367_v45 = vmul.f32 0.125, %v343_v35  ;;  %v370_v63 = vmul.f32 0.125, %v346_v52 }
  0x22   :  { %v937_v39 = vpop.eup %936  ;;  %v389_v44 = vsub.f32 %v365_v29, %v377_v30  ;;  %950 = vrsqrt.f32 %v480_v32  ;;  %v483_v55 = vadd.f32 1e-05, %v399_v41 }
  0x23   :  { %v939_v40 = vpop.eup %938  ;;  %952 = vrsqrt.f32 %v482_v36 }
  0x24   :  { %249 = vperm.xlu0 %922, %v935_v38   ;;  %254 = vperm.xlu1 %923, %v933_v37   ;;  %v344_v37 = vld [vmem:[%s1350_s5 + $0x48] sm:$0xff]  ;;  %v355_v38 = vmul.f32 0.125, %v331_v27  ;;  %v401_v57 = vmax.f32 %v389_v44, 0.0 }
  0x25   :  { %v941_v43 = vpop.eup %940  ;;  %v368_v49 = vmul.f32 0.125, %v344_v37 }
  0x26   :  { %v943_v46 = vpop.eup %942  ;;  %v485_v1 = vadd.f32 1e-05, %v401_v57  ;;  %v794_v57 = vld [vmem:[%s1351_s0] sm:$0xff]  }
  0x28   :  { %259 = vperm.xlu0 %922, %v937_v39   ;;  %264 = vperm.xlu1 %923, %v939_v40   ;;  %v945_v56 = vpop.eup %944  ;;  %v481_v39 = vadd.f32 1e-05, %v397_v23  ;;  %v400_v40 = vmax.f32 %v388_v24, 0.0 }
  0x29   :  { %v947_v60 = vpop.eup %946 }
  0x2a   :  { %954 = vrsqrt.f32 %v481_v39 }
  0x2b   :  { %956 = vrsqrt.f32 %v483_v55 }
  0x2c   :  { %269 = vperm.xlu0 %922, %v941_v43   ;;  %274 = vperm.xlu1 %923, %v943_v46   ;;  %v333_v43 = vld [vmem:[%s1349_s4 + $0x50] sm:$0xff]  ;;  %v379_v46 = vmul.f32 %v355_v38, %v355_v38 }
  0x2d   :  { %v357_v53 = vmul.f32 0.125, %v333_v43 }
  0x2e   :  { %v391_v58 = vsub.f32 %v367_v45, %v379_v46  ;;  %v949_v9 = vpop.eup %948 }
  0x2f   :  { %v951_v12 = vpop.eup %950 }
  0x30   :  { %279 = vperm.xlu0 %922, %v945_v56   ;;  %284 = vperm.xlu1 %923, %v947_v60   ;;  %v358_v56 = vmul.f32 0.125, %v334_v47  ;;  %v381_v60 = vmul.f32 %v357_v53, %v357_v53  ;;  %v403_v2 = vmax.f32 %v391_v58, 0.0  ;;  %v953_v13 = vpop.eup %952  ;;  %v818_v58 = vld [vmem:[%s1352_s3] sm:$0xff]  }
  0x32   :  { %v382_v0 = vmul.f32 %v358_v56, %v358_v56 }
  0x34   :  { %409 = vperm.xlu0 %922, %v347_v48   ;;  %414 = vperm.xlu1 %923, %v348_v50   ;;  %v390_v48 = vsub.f32 %v366_v33, %v378_v34  ;;  %v380_v50 = vmul.f32 %v356_v42, %v356_v42  ;;  %v394_v6 = vsub.f32 %v370_v63, %v382_v0  ;;  %v795_v63 = vunpack.c.l.bf16 %v794_v57  ;;  %v1221_v0 = vld [vmem:[%s1351_s0 + $0x18] sm:$0xff]  }
  0x36   :  { %v402_v61 = vmax.f32 %v390_v48, 0.0  ;;  %v392_v62 = vsub.f32 %v368_v49, %v380_v50  ;;  %v406_v11 = vmax.f32 %v394_v6, 0.0  ;;  %v906_v6 = vld [vmem:[%s1352_s3 + $0x8] sm:$0xff]  }
  0x37   :  { %v955_v14 = vpop.eup %954 }
  0x38   :  { %419 = vperm.xlu0 %922, %v349_v59   ;;  %424 = vperm.xlu1 %923, %v350_v54   ;;  %v484_v54 = vadd.f32 1e-05, %v400_v40  ;;  %v369_v59 = vmul.f32 0.125, %v345_v51  ;;  %v486_v4 = vadd.f32 1e-05, %v402_v61  ;;  %v404_v5 = vmax.f32 %v392_v62, 0.0  ;;  %v957_v17 = vpop.eup %956 }
  0x39   :  { %v490_v16 = vadd.f32 1e-05, %v406_v11  ;;  %v901_v61 = vld [vmem:[%s1351_s0 + $0x8] sm:$0xff]   ;;  %v1216_v62 = vld [vmem:[%s1351_s0 + $0x10] sm:$0xff]  }
  0x3a   :  { %v393_v3 = vsub.f32 %v369_v59, %v381_v60  ;;  %958 = vrsqrt.f32 %v484_v54  ;;  %v488_v10 = vadd.f32 1e-05, %v404_v5  ;;  %v820_v5 = vunpack.c.h.bf16 %v818_v58 }
  0x3b   :  { %960 = vrsqrt.f32 %v485_v1  ;;  %v1226_v1 = vld [vmem:[%s1351_s0 + $0x20] sm:$0xff]   ;;  %v804_v11 = vunpack.c.h.bf16 %v1216_v62 }
  0x3c   :  { %429 = vperm.xlu0 %922, %v351_v8   ;;  %434 = vperm.xlu1 %923, %v352_v7   ;;  %v487_v7 = vadd.f32 1e-05, %v403_v2  ;;  %v405_v8 = vmax.f32 %v393_v3, 0.0  ;;  %962 = vrsqrt.f32 %v486_v4  ;;  %v819_v2 = vunpack.c.l.bf16 %v818_v58  ;;  %v1231_v4 = vld [vmem:[%s1351_s0 + $0x28] sm:$0xff]  }
  0x3d   :  { %v796_v3 = vunpack.c.h.bf16 %v794_v57  ;;  %v824_v58 = vunpack.c.h.bf16 %v906_v6 }
  0x3e   :  { %964 = vrsqrt.f32 %v487_v7  ;;  %v489_v15 = vadd.f32 1e-05, %v405_v8  ;;  %v664_v8 = vlaneseq }
  0x3f   :  { %966 = vrsqrt.f32 %v488_v10  ;;  %v800_v10 = vunpack.c.h.bf16 %v901_v61 }
  0x40   :  { %439 = vperm.xlu0 %922, %v353_v22   ;;  %444 = vperm.xlu1 %923, %v354_v26   ;;  %968 = vrsqrt.f32 %v489_v15  ;;  %v807_v15 = vunpack.c.l.bf16 %v1221_v0 }
  0x41   :  { %970 = vrsqrt.f32 %v490_v16 }
  0x44   :  { %449 = vperm.xlu0 %922, %v355_v38   ;;  %454 = vperm.xlu1 %923, %v356_v42  }
  0x47   :  { %v959_v18 = vpop.eup %958 }
  0x48   :  { %459 = vperm.xlu0 %922, %v357_v53   ;;  %464 = vperm.xlu1 %923, %v358_v56   ;;  %v961_v19 = vpop.eup %960 }
  0x49   :  { %v963_v20 = vpop.eup %962 }
  0x4b   :  { %v965_v21 = vpop.eup %964 }
  0x4c   :  { %505 = vperm.xlu0 %922, %v949_v9   ;;  %510 = vperm.xlu1 %923, %v951_v12   ;;  %v967_v22 = vpop.eup %966  ;;  %v799_v9 = vunpack.c.l.bf16 %v901_v61  ;;  %v803_v12 = vunpack.c.l.bf16 %v1216_v62  ;;  %v1253_v61 = vand.u32 127, %v664_v8 }
  0x4d   :  { %v969_v23 = vpop.eup %968 }
  0x4e   :  { %v971_v24 = vpop.eup %970  ;;  %vm668_vm0 = vcmp.lt.s32.totalorder %v1253_v61, 8 }
  0x50   :  { %515 = vperm.xlu0 %922, %v955_v14   ;;  %520 = vperm.xlu1 %923, %v953_v13  }
  0x54   :  { %525 = vperm.xlu0 %922, %v957_v17   ;;  %530 = vperm.xlu1 %923, %v959_v18   ;;  %v907_v18 = vld [vmem:[%s1352_s3 + $0x10] sm:$0xff]  }
  0x55   :  { %v828_v14 = vunpack.c.h.bf16 %v907_v18 }
  0x58   :  { %535 = vperm.xlu0 %922, %v961_v19   ;;  %540 = vperm.xlu1 %923, %v963_v20   ;;  %v827_v20 = vunpack.c.l.bf16 %v907_v18 }
  0x5c   :  { %545 = vperm.xlu0 %922, %v965_v21   ;;  %550 = vperm.xlu1 %923, %v967_v22   ;;  %v823_v22 = vunpack.c.l.bf16 %v906_v6 }
  0x60   :  { %555 = vperm.xlu0 %922, %v969_v23   ;;  %560 = vperm.xlu1 %923, %v971_v24   ;;  %v908_v23 = vld [vmem:[%s1352_s3 + $0x18] sm:$0xff]  }
  0x7f   :  { %v1152_v25 = vpop.permute.xlu1 %143  ;;  %v134_v26 = vpop.permute.xlu0 %133 }
  0x80   :  { %v191_v19 = vsub.f32 %v795_v63, %v134_v26 }
  0x83   :  { %v1154_v27 = vpop.permute.xlu1 %148  ;;  %v139_v28 = vpop.permute.xlu0 %138 }
  0x84   :  { %v192_v24 = vsub.f32 %v796_v3, %v139_v28  ;;  %v194_v8 = vsub.f32 %v800_v10, %v1154_v27  ;;  %v910_v10 = vld [vmem:[%s1352_s3 + $0x28] sm:$0xff]  }
  0x87   :  { %v1156_v29 = vpop.permute.xlu1 %158  ;;  %v1158_v30 = vpop.permute.xlu0 %153 }
  0x88   :  { %v195_v27 = vsub.f32 %v803_v12, %v1158_v30 }
  0x8b   :  { %v1160_v31 = vpop.permute.xlu1 %168  ;;  %v1162_v32 = vpop.permute.xlu0 %163 }
  0x8f   :  { %v1164_v33 = vpop.permute.xlu1 %178  ;;  %v1166_v34 = vpop.permute.xlu0 %173 }
  0x93   :  { %v1168_v35 = vpop.permute.xlu1 %188  ;;  %v1170_v36 = vpop.permute.xlu0 %183 }
  0x97   :  { %v230_v37 = vpop.permute.xlu0 %229  ;;  %v235_v38 = vpop.permute.xlu1 %234 }
  0x98   :  { %v287_v17 = vmul.f32 %v230_v37, %v191_v19  ;;  %v288_v63 = vmul.f32 %v235_v38, %v192_v24 }
  0x9b   :  { %v1172_v39 = vpop.permute.xlu0 %239  ;;  %v1174_v40 = vpop.permute.xlu1 %244 }
  0x9f   :  { %v1176_v41 = vpop.permute.xlu0 %249  ;;  %v1178_v42 = vpop.permute.xlu1 %254 }
  0xa0   :  { %v291_v30 = vmul.f32 %v1176_v41, %v195_v27 }
  0xa3   :  { %v1180_v43 = vpop.permute.xlu0 %259  ;;  %v1182_v44 = vpop.permute.xlu1 %264 }
  0xa7   :  { %v1184_v45 = vpop.permute.xlu0 %269  ;;  %v1186_v46 = vpop.permute.xlu1 %274 }
  0xab   :  { %v1188_v47 = vpop.permute.xlu0 %279  ;;  %v1190_v48 = vpop.permute.xlu1 %284 }
  0xac   :  { %1354 = vst [vmem:[#allocation2_spill] sm:$0xff] %v1190_v48 }
  0xaf   :  { %v410_v49 = vpop.permute.xlu0 %409  ;;  %v415_v50 = vpop.permute.xlu1 %414 }
  0xb0   :  { %v467_v21 = vsub.f32 %v819_v2, %v410_v49  ;;  %v468_v57 = vsub.f32 %v820_v5, %v415_v50  ;;  %v832_v49 = vunpack.c.h.bf16 %v908_v23  ;;  %v1259_v2 = vld [vmem:[%s1352_s3 + $0x20] sm:$0xff]   ;;  %v193_v50 = vsub.f32 %v799_v9, %v1152_v25 }
  0xb1   :  { %v831_v5 = vunpack.c.l.bf16 %v908_v23  ;;  %v835_v25 = vunpack.c.l.bf16 %v1259_v2 }
  0xb2   :  { %v289_v18 = vmul.f32 %v1172_v39, %v193_v50 }
  0xb3   :  { %v420_v51 = vpop.permute.xlu0 %419  ;;  %v425_v52 = vpop.permute.xlu1 %424 }
  0xb4   :  { %v469_v3 = vsub.f32 %v823_v22, %v420_v51  ;;  %v470_v37 = vsub.f32 %v824_v58, %v425_v52  ;;  %v196_v22 = vsub.f32 %v804_v11, %v1156_v29  ;;  %v197_v29 = vsub.f32 %v807_v15, %v1162_v32 }
  0xb7   :  { %v1192_v53 = vpop.permute.xlu0 %429  ;;  %v1194_v54 = vpop.permute.xlu1 %434 }
  0xb8   :  { %v471_v52 = vsub.f32 %v827_v20, %v1192_v53 }
  0xbb   :  { %v1196_v55 = vpop.permute.xlu0 %439  ;;  %v1198_v56 = vpop.permute.xlu1 %444 }
  0xbf   :  { %v1206_v59 = vpop.permute.xlu0 %449  ;;  %v1208_v60 = vpop.permute.xlu1 %454 }
  0xc3   :  { %v1236_v7 = vpop.permute.xlu0 %459  ;;  %v1240_v13 = vpop.permute.xlu1 %464 }
  0xc7   :  { %v506_v62 = vpop.permute.xlu0 %505  ;;  %v511_v48 = vpop.permute.xlu1 %510 }
  0xc8   :  { %v563_v26 = vmul.f32 %v506_v62, %v467_v21  ;;  %v564_v28 = vmul.f32 %v511_v48, %v468_v57  ;;  %v836_v21 = vunpack.c.h.bf16 %v1259_v2  ;;  %v290_v48 = vmul.f32 %v1174_v40, %v194_v8 }
  0xc9   :  { %v472_v40 = vsub.f32 %v828_v14, %v1194_v54  ;;  %v840_v2 = vunpack.c.h.bf16 %v910_v10  ;;  %v473_v54 = vsub.f32 %v831_v5, %v1196_v55  ;;  %v1355_v14 = vunpack.c.h.bf16 %v1221_v0 }
  0xca   :  { %v575_v6 = vadd.f32 %v563_v26, %v287_v17  ;;  %v576_v19 = vadd.f32 %v564_v28, %v288_v63  ;;  %v292_v63 = vmul.f32 %v1178_v42, %v196_v22  ;;  %v474_v42 = vsub.f32 %v832_v49, %v1198_v56 }
  0xcb   :  { %v516_v38 = vpop.permute.xlu0 %515  ;;  %v521_v62 = vpop.permute.xlu1 %520  ;;  %v198_v50 = vsub.f32 %v1355_v14, %v1160_v31  ;;  %v293_v55 = vmul.f32 %v1180_v43, %v197_v29  ;;  %v1356_v31 = vunpack.c.l.bf16 %v1226_v1  ;;  %v475_v0 = vsub.f32 %v835_v25, %v1206_v59 }
  0xcc   :  { %v587_v24 = vmax.f32 %v575_v6, 0.0  ;;  %v565_v16 = vmul.f32 %v516_v38, %v469_v3  ;;  %v588_v51 = vmax.f32 %v576_v19, 0.0  ;;  %v566_v9 = vmul.f32 %v521_v62, %v470_v37 }
  0xcd   :  { %v294_v19 = vmul.f32 %v1182_v44, %v198_v50  ;;  %v839_v38 = vunpack.c.l.bf16 %v910_v10  ;;  %v199_v56 = vsub.f32 %v1356_v31, %v1166_v34  ;;  %v1357_v44 = vunpack.c.h.bf16 %v1226_v1 }
  0xce   :  { %v669_v39 = vsel %vm668_vm0, %v587_v24, 0.0  ;;  %v577_v17 = vadd.f32 %v565_v16, %v289_v18  ;;  %v670_v23 = vsel %vm668_vm0, %v588_v51, 0.0  ;;  %v578_v57 = vadd.f32 %v566_v9, %v290_v48 }
  0xcf   :  { %v526_v58 = vpop.permute.xlu0 %525  ;;  %v874_v53 = vpack.c.bf16 %v670_v23, %v669_v39  ;;  %v531_v20 = vpop.permute.xlu1 %530  ;;  %v200_v62 = vsub.f32 %v1357_v44, %v1164_v33  ;;  %v476_v48 = vsub.f32 %v836_v21, %v1208_v60  ;;  %v295_v59 = vmul.f32 %v1184_v45, %v199_v56 }
  0xd0   :  { %v589_v12 = vmax.f32 %v577_v17, 0.0  ;;  %v567_v26 = vmul.f32 %v526_v58, %v471_v52  ;;  %v590_v28 = vmax.f32 %v578_v57, 0.0  ;;  %v568_v16 = vmul.f32 %v531_v20, %v472_v40 }
  0xd1   :  { %875 = vst [vmem:[%s1353_s6] sm:$0xff] %v874_v53   ;;  %v296_v39 = vmul.f32 %v1186_v46, %v200_v62  ;;  %v1358_v33 = vunpack.c.l.bf16 %v1231_v4  ;;  %v477_v60 = vsub.f32 %v839_v38, %v1236_v7  ;;  %v1359_v40 = vunpack.c.h.bf16 %v1231_v4 }
  0xd2   :  { %v671_v41 = vsel %vm668_vm0, %v589_v12, 0.0  ;;  %v579_v11 = vadd.f32 %v567_v26, %v291_v30  ;;  %v672_v3 = vsel %vm668_vm0, %v590_v28, 0.0  ;;  %v580_v32 = vadd.f32 %v568_v16, %v292_v63  ;;  %v1360_v26 = vld [vmem:[#allocation2_spill] sm:$0xff] }
  0xd3   :  { %v536_v15 = vpop.permute.xlu0 %535  ;;  %v879_v5 = vpack.c.bf16 %v672_v3, %v671_v41  ;;  %v541_v8 = vpop.permute.xlu1 %540  ;;  %v201_v1 = vsub.f32 %v1358_v33, %v1170_v36  ;;  %v202_v46 = vsub.f32 %v1359_v40, %v1168_v35  ;;  %v478_v23 = vsub.f32 %v840_v2, %v1240_v13 }
  0xd4   :  { %v591_v6 = vmax.f32 %v579_v11, 0.0  ;;  %v569_v37 = vmul.f32 %v536_v15, %v473_v54  ;;  %v592_v18 = vmax.f32 %v580_v32, 0.0  ;;  %v570_v24 = vmul.f32 %v541_v8, %v474_v42 }
  0xd5   :  { %916 = vst [vmem:[%s1353_s6 + $0x8] sm:$0xff] %v879_v5   ;;  %v297_v7 = vmul.f32 %v1188_v47, %v201_v1  ;;  %v298_v63 = vmul.f32 %v1360_v26, %v202_v46 }
  0xd6   :  { %v673_v43 = vsel %vm668_vm0, %v591_v6, 0.0  ;;  %v581_v49 = vadd.f32 %v569_v37, %v293_v55  ;;  %v674_v51 = vsel %vm668_vm0, %v592_v18, 0.0  ;;  %v582_v34 = vadd.f32 %v570_v24, %v294_v19 }
  0xd7   :  { %v546_v9 = vpop.permute.xlu0 %545  ;;  %v884_v25 = vpack.c.bf16 %v674_v51, %v673_v43  ;;  %v551_v52 = vpop.permute.xlu1 %550 }
  0xd8   :  { %v593_v27 = vmax.f32 %v581_v49, 0.0  ;;  %v571_v10 = vmul.f32 %v546_v9, %v475_v0  ;;  %v594_v17 = vmax.f32 %v582_v34, 0.0  ;;  %v572_v22 = vmul.f32 %v551_v52, %v476_v48 }
  0xd9   :  { %917 = vst [vmem:[%s1353_s6 + $0x10] sm:$0xff] %v884_v25  }
  0xda   :  { %v675_v45 = vsel %vm668_vm0, %v593_v27, 0.0  ;;  %v583_v21 = vadd.f32 %v571_v10, %v295_v59  ;;  %v676_v57 = vsel %vm668_vm0, %v594_v17, 0.0  ;;  %v584_v36 = vadd.f32 %v572_v22, %v296_v39 }
  0xdb   :  { %v556_v58 = vpop.permute.xlu0 %555  ;;  %v889_v30 = vpack.c.bf16 %v676_v57, %v675_v45  ;;  %v561_v12 = vpop.permute.xlu1 %560 }
  0xdc   :  { %v595_v53 = vmax.f32 %v583_v21, 0.0  ;;  %v573_v20 = vmul.f32 %v556_v58, %v477_v60  ;;  %v596_v28 = vmax.f32 %v584_v36, 0.0  ;;  %v574_v16 = vmul.f32 %v561_v12, %v478_v23 }
  0xdd   :  { %918 = vst [vmem:[%s1353_s6 + $0x18] sm:$0xff] %v889_v30  }
  0xde   :  { %v677_v35 = vsel %vm668_vm0, %v595_v53, 0.0  ;;  %v585_v4 = vadd.f32 %v573_v20, %v297_v7  ;;  %v678_v13 = vsel %vm668_vm0, %v596_v28, 0.0  ;;  %v586_v47 = vadd.f32 %v574_v16, %v298_v63 }
  0xdf   :  { %v894_v2 = vpack.c.bf16 %v678_v13, %v677_v35 }
  0xe0   :  { %v597_v29 = vmax.f32 %v585_v4, 0.0  ;;  %v598_v54 = vmax.f32 %v586_v47, 0.0 }
  0xe1   :  { %919 = vst [vmem:[%s1353_s6 + $0x20] sm:$0xff] %v894_v2  }
  0xe2   :  { %v679_v41 = vsel %vm668_vm0, %v597_v29, 0.0  ;;  %v680_v11 = vsel %vm668_vm0, %v598_v54, 0.0 }
  0xe3   :  { %v899_v14 = vpack.c.bf16 %v680_v11, %v679_v41 }
  0xe5   :  { %920 = vst [vmem:[%s1353_s6 + $0x28] sm:$0xff] %v899_v14  }

// kernel: _lambda_.64
= control target key start
LH: loop header
LB: loop body
LE: loop exit
PB: predicated region body
PF: predicated region fallthrough
CT: control target
= control target key end

     0   :  { %vm74_vm0 = vcmask 785408   ;;  %vm151_vm1 = vcmask 7168   ;;  %s307_s1 = inlined_call_operand.vmem [shape: bf16[96,128], index: 1, kind: input, shape index: {}]   ;;  %s308_s0 = inlined_call_operand.vmem [shape: bf16[24,96], index: 0, kind: input, shape index: {}]   ;;  %s309_s2 = inlined_call_operand.vmem [shape: bf16[24,128], index: 2, kind: output, shape index: {0}]   ;;  %s310_s3 = inlined_call_operand.vmem [shape: f32[1,24,1], index: 3, kind: output, shape index: {1}]   ;;  %s311_s4 = inlined_call_operand.vmem [shape: f32[1,24,1], index: 4, kind: output, shape index: {2}]  }
   0x1   :  { %v224_v0 = vld [vmem:[%s307_s1 + $0x28] sm:$0xff]   ;;  %v225_v1 = vld [vmem:[%s307_s1 + $0x20] sm:$0xff]   ;;  %v226_v2 = vld [vmem:[%s307_s1 + $0x18] sm:$0xff]  }
   0x2   :  { %208 = vmatprep.subr.bf16.mxu0 %v224_v0  ;;  %v230_v3 = vld [vmem:[%s308_s0] sm:$0xff]   ;;  %v227_v4 = vld [vmem:[%s307_s1 + $0x10] sm:$0xff]   ;;  %v228_v5 = vld [vmem:[%s307_s1 + $0x8] sm:$0xff]  }
   0x3   :  { %209 = vmatpush3.bf16.msra.mxu0 %v224_v0  ;;  %220 = vmatprep.mubr.msk.bf16.mxu0 %vm74_vm0, %v230_v3  ;;  %v229_v6 = vld [vmem:[%s307_s1] sm:$0xff]   ;;  %v231_v7 = vld [vmem:[%s308_s0 + $0x8] ss:$0 sps:$4 sm:$0xff]  }
   0x4   :  { %210 = vmatprep.subr.bf16.mxu0 %v225_v1 }
   0x7   :  { %211 = vmatpush3.bf16.msra.mxu0 %v225_v1 }
   0x8   :  { %212 = vmatprep.subr.bf16.mxu0 %v226_v2 }
   0xb   :  { %213 = vmatpush3.bf16.msra.mxu0 %v226_v2 }
   0xc   :  { %214 = vmatprep.subr.bf16.mxu0 %v227_v4 }
   0xf   :  { %215 = vmatpush3.bf16.msra.mxu0 %v227_v4 }
  0x10   :  { %216 = vmatprep.subr.bf16.mxu0 %v228_v5 }
  0x13   :  { %217 = vmatpush3.bf16.msra.mxu0 %v228_v5 }
  0x14   :  { %218 = vmatprep.subr.bf16.mxu0 %v229_v6 }
  0x17   :  { %219 = vmatpush3.bf16.msra.mxu0 %v229_v6 }
  0x1a   :  { %221 = vmatmul.mubr.msk.bf16.vlgmr.msra.gmra.mxu0 %vm74_vm0, %v231_v7 }
  0xda   :  { %v222_v8 = vpop.f32.mrf.mxu0 }
  0xdb   :  { %v194_v9 = vpack.c.bf16 %v222_v8, %v222_v8  ;;  %149 = vadd.xlane.f32.xlu1 %v222_v8  ;;  %v157_v15 = vmul.f32 %v222_v8, %v222_v8 }
  0xdc   :  { %v115_v10 = vpop.f32.mrf.mxu0 }
  0xdd   :  { %145 = vadd.xlane.f32.xlu0 %v115_v10  ;;  %v155_v11 = vmul.f32 %v115_v10, %v115_v10  ;;  %144 = vst [vmem:[%s309_s2 + $0x8] sm:$0xf] %v194_v9 }
  0xde   :  { %v223_v12 = vpop.f32.mrf.mxu0 }
  0xdf   :  { %158 = vadd.xlane.f32.xlu1 %v155_v11 }
  0xe0   :  { %v118_v13 = vpop.f32.mrf.mxu0 }
  0xe1   :  { %v198_v14 = vpack.c.bf16 %v118_v13, %v115_v10  ;;  %147 = vadd.xlane.f32.xlu0 %v118_v13  ;;  %v156_v16 = vmul.f32 %v118_v13, %v118_v13 }
  0xe3   :  { %199 = vst [vmem:[%s309_s2] sm:$0xff] %v198_v14   ;;  %162 = vadd.xlane.f32.xlu1 %v157_v15 }
  0xe5   :  { %160 = vadd.xlane.f32.xlu0 %v156_v16 }
 0x164   :  { %v150_v17 = vpop.xlane.xlu1 %149 }
 0x165   :  { %154 = vst.msk [vmem:[%s310_s3 + $0x10] sm:$0xff] %vm151_vm1, %v150_v17 }
 0x166   :  { %v146_v18 = vpop.xlane.xlu0 %145 }
 0x167   :  { %152 = vst.msk [vmem:[%s310_s3] sm:$0xff] %vm151_vm1, %v146_v18 }
 0x168   :  { %v159_v19 = vpop.xlane.xlu1 %158 }
 0x169   :  { %164 = vst.msk [vmem:[%s311_s4] sm:$0xff] %vm151_vm1, %v159_v19 }
 0x16a   :  { %v148_v20 = vpop.xlane.xlu0 %147 }
 0x16b   :  { %153 = vst.msk [vmem:[%s310_s3 + $0x8] sm:$0xff] %vm151_vm1, %v148_v20 }
 0x16c   :  { %v163_v21 = vpop.xlane.xlu1 %162 }
 0x16d   :  { %166 = vst.msk [vmem:[%s311_s4 + $0x10] sm:$0xff] %vm151_vm1, %v163_v21 }
 0x16e   :  { %v161_v22 = vpop.xlane.xlu0 %160 }
 0x16f   :  { %165 = vst.msk [vmem:[%s311_s4 + $0x8] sm:$0xff] %vm151_vm1, %v161_v22 }

// kernel: _lambda_.65
= control target key start
LH: loop header
LB: loop body
LE: loop exit
PB: predicated region body
PF: predicated region fallthrough
CT: control target
= control target key end

     0   :  { %v170_v0 = vmov 0   ;;  %v107_v31 = vlaneseq  ;;  %s224_s1 = inlined_call_operand.vmem [shape: f32[24,1], index: 1, kind: input, shape index: {}]   ;;  %s225_s2 = inlined_call_operand.vmem [shape: f32[24,1], index: 2, kind: input, shape index: {}]   ;;  %s226_s0 = inlined_call_operand.vmem [shape: bf16[24,128], index: 0, kind: input, shape index: {}]   ;;  %s227_s3 = inlined_call_operand.vmem [shape: bf16[24,128], index: 3, kind: output, shape index: {}]  }
   0x1   :  { %162 = vset.pattern.permute.xlu0 %v170_v0  ;;  %v20_v1 = vld [vmem:[%s224_s1] sm:$0xff]  ;;  %163 = vset.pattern.permute.xlu1 %v170_v0  ;;  %v22_v3 = vld [vmem:[%s224_s1 + $0x10] sm:$0xff]  ;;  %v21_v8 = vld [vmem:[%s224_s1 + $0x8] sm:$0xff] }
   0x2   :  { %v23_v2 = vld [vmem:[%s225_s2] sm:$0xff]  ;;  %v26_v4 = vmul.f32 0.125, %v20_v1  ;;  %v25_v6 = vld [vmem:[%s225_s2 + $0x10] sm:$0xff]  ;;  %v28_v7 = vmul.f32 0.125, %v22_v3  ;;  %v24_v9 = vld [vmem:[%s225_s2 + $0x8] sm:$0xff]  ;;  %v27_v11 = vmul.f32 0.125, %v21_v8 }
   0x3   :  { %v29_v5 = vmul.f32 0.125, %v23_v2  ;;  %v31_v10 = vmul.f32 0.125, %v25_v6  ;;  %v30_v12 = vmul.f32 0.125, %v24_v9  ;;  %v148_v29 = vld [vmem:[%s226_s0] sm:$0xff]   ;;  %v16_v33 = vld [vmem:[%s226_s0 + $0x8] sm:$0xf] }
   0x4   :  { %43 = vperm.xlu0 %162, %v26_v4   ;;  %v32_v13 = vmul.f32 %v26_v4, %v26_v4  ;;  %53 = vperm.xlu1 %163, %v28_v7   ;;  %v34_v14 = vmul.f32 %v28_v7, %v28_v7  ;;  %v33_v15 = vmul.f32 %v27_v11, %v27_v11  ;;  %v149_v32 = vunpack.c.l.bf16 %v148_v29 }
   0x5   :  { %v150_v35 = vunpack.c.h.bf16 %v148_v29  ;;  %v108_v36 = vand.u32 127, %v107_v31  ;;  %v19_v38 = vunpack.c.l.bf16 %v16_v33 }
   0x6   :  { %v35_v16 = vsub.f32 %v29_v5, %v32_v13  ;;  %v37_v17 = vsub.f32 %v31_v10, %v34_v14  ;;  %v36_v18 = vsub.f32 %v30_v12, %v33_v15 }
   0x7   :  { %vm111_vm0 = vcmp.lt.s32.totalorder %v108_v36, 8 }
   0x8   :  { %v38_v19 = vmax.f32 %v35_v16, 0.0  ;;  %v40_v20 = vmax.f32 %v37_v17, 0.0  ;;  %48 = vperm.xlu0 %162, %v27_v11   ;;  %v39_v21 = vmax.f32 %v36_v18, 0.0 }
   0xa   :  { %v59_v22 = vadd.f32 1e-05, %v38_v19  ;;  %v61_v23 = vadd.f32 1e-05, %v40_v20  ;;  %v60_v24 = vadd.f32 1e-05, %v39_v21 }
   0xc   :  { %164 = vrsqrt.f32 %v59_v22 }
   0xd   :  { %166 = vrsqrt.f32 %v61_v23 }
   0xe   :  { %168 = vrsqrt.f32 %v60_v24 }
  0x19   :  { %v165_v25 = vpop.eup %164 }
  0x1a   :  { %v167_v26 = vpop.eup %166  ;;  %67 = vperm.xlu1 %163, %v165_v25  }
  0x1b   :  { %v169_v27 = vpop.eup %168 }
  0x1c   :  { %72 = vperm.xlu0 %162, %v169_v27  }
  0x1e   :  { %77 = vperm.xlu1 %163, %v167_v26  }
  0x7f   :  { %v44_v28 = vpop.permute.xlu0 %43  ;;  %v54_v30 = vpop.permute.xlu1 %53 }
  0x80   :  { %v56_v37 = vsub.f32 %v149_v32, %v44_v28  ;;  %v58_v43 = vsub.f32 %v19_v38, %v54_v30 }
  0x83   :  { %v49_v34 = vpop.permute.xlu0 %48 }
  0x84   :  { %v57_v40 = vsub.f32 %v150_v35, %v49_v34 }
  0x95   :  { %v68_v39 = vpop.permute.xlu1 %67 }
  0x96   :  { %v80_v41 = vmul.f32 %v68_v39, %v56_v37 }
  0x97   :  { %v73_v42 = vpop.permute.xlu0 %72 }
  0x98   :  { %v81_v44 = vmul.f32 %v73_v42, %v57_v40  ;;  %v83_v45 = vmax.f32 %v80_v41, 0.0 }
  0x99   :  { %v78_v46 = vpop.permute.xlu1 %77 }
  0x9a   :  { %v84_v47 = vmax.f32 %v81_v44, 0.0  ;;  %v112_v48 = vsel %vm111_vm0, %v83_v45, 0.0  ;;  %v82_v49 = vmul.f32 %v78_v46, %v58_v43 }
  0x9c   :  { %v113_v50 = vsel %vm111_vm0, %v84_v47, 0.0  ;;  %v85_v51 = vmax.f32 %v82_v49, 0.0 }
  0x9d   :  { %v159_v52 = vpack.c.bf16 %v113_v50, %v112_v48 }
  0x9e   :  { %v143_v53 = vpack.c.bf16 %v85_v51, %v85_v51  ;;  %v114_v54 = vsel %vm111_vm0, %v85_v51, 0.0 }
  0x9f   :  { %160 = vst [vmem:[%s227_s3] sm:$0xff] %v159_v52   ;;  %v146_v55 = vpack.c.bf16 %v114_v54, %v114_v54 }
  0xa0   :  { %101 = vst [vmem:[%s227_s3 + $0x8] sm:$0xf] %v143_v53 }
  0xa1   :  { %130 = vst [vmem:[%s227_s3 + $0x8] sm:$0xf] %v146_v55 }

// kernel: _lambda_.68
= control target key start
LH: loop header
LB: loop body
LE: loop exit
PB: predicated region body
PF: predicated region fallthrough
CT: control target
= control target key end

     0   :  { %v690_v0 = vmov 0   ;;  %s887_s1 = inlined_call_operand.vmem [shape: f32[96,1], index: 1, kind: input, shape index: {}]   ;;  %s888_s2 = inlined_call_operand.vmem [shape: f32[96,1], index: 2, kind: input, shape index: {}]   ;;  %s889_s0 = inlined_call_operand.vmem [shape: bf16[96,128], index: 0, kind: input, shape index: {}]   ;;  %s890_s3 = inlined_call_operand.vmem [shape: bf16[96,128], index: 3, kind: input, shape index: {}]   ;;  %s891_s4 = inlined_call_operand.vmem [shape: bf16[96,128], index: 4, kind: output, shape index: {}]  }
   0x1   :  { %665 = vset.pattern.permute.xlu1 %v690_v0  ;;  %664 = vset.pattern.permute.xlu0 %v690_v0  ;;  %v43_v1 = vld [vmem:[%s887_s1 + $0x10] sm:$0xff]  ;;  %v41_v3 = vld [vmem:[%s887_s1] sm:$0xff]  ;;  %v44_v8 = vld [vmem:[%s887_s1 + $0x18] sm:$0xff] }
   0x2   :  { %v55_v2 = vld [vmem:[%s888_s2 + $0x10] sm:$0xff]  ;;  %v67_v4 = vmul.f32 0.125, %v43_v1  ;;  %v53_v6 = vld [vmem:[%s888_s2] sm:$0xff]  ;;  %v65_v7 = vmul.f32 0.125, %v41_v3  ;;  %v56_v9 = vld [vmem:[%s888_s2 + $0x18] sm:$0xff]  ;;  %v68_v11 = vmul.f32 0.125, %v44_v8 }
   0x3   :  { %v79_v5 = vmul.f32 0.125, %v55_v2  ;;  %v77_v10 = vmul.f32 0.125, %v53_v6  ;;  %v80_v12 = vmul.f32 0.125, %v56_v9  ;;  %v42_v13 = vld [vmem:[%s887_s1 + $0x8] sm:$0xff]  ;;  %v45_v21 = vld [vmem:[%s887_s1 + $0x20] sm:$0xff]  ;;  %v48_v27 = vld [vmem:[%s887_s1 + $0x38] sm:$0xff] }
   0x4   :  { %v54_v14 = vld [vmem:[%s888_s2 + $0x8] sm:$0xff]  ;;  %137 = vperm.xlu1 %665, %v67_v4   ;;  %v91_v16 = vmul.f32 %v67_v4, %v67_v4  ;;  %127 = vperm.xlu0 %664, %v65_v7   ;;  %v89_v17 = vmul.f32 %v65_v7, %v65_v7  ;;  %v66_v18 = vmul.f32 0.125, %v42_v13  ;;  %v57_v22 = vld [vmem:[%s888_s2 + $0x20] sm:$0xff]  ;;  %v92_v23 = vmul.f32 %v68_v11, %v68_v11  ;;  %v60_v28 = vld [vmem:[%s888_s2 + $0x38] sm:$0xff] }
   0x5   :  { %v46_v15 = vld [vmem:[%s887_s1 + $0x28] sm:$0xff]  ;;  %v78_v19 = vmul.f32 0.125, %v54_v14  ;;  %v69_v26 = vmul.f32 0.125, %v45_v21  ;;  %v81_v32 = vmul.f32 0.125, %v57_v22  ;;  %v72_v36 = vmul.f32 0.125, %v48_v27  ;;  %v47_v37 = vld [vmem:[%s887_s1 + $0x30] sm:$0xff] }
   0x6   :  { %v58_v20 = vld [vmem:[%s888_s2 + $0x28] sm:$0xff]  ;;  %v70_v24 = vmul.f32 0.125, %v46_v15  ;;  %v103_v29 = vsub.f32 %v79_v5, %v91_v16  ;;  %v101_v30 = vsub.f32 %v77_v10, %v89_v17  ;;  %v90_v31 = vmul.f32 %v66_v18, %v66_v18  ;;  %v59_v46 = vld [vmem:[%s888_s2 + $0x30] sm:$0xff]  ;;  %v49_v59 = vld [vmem:[%s887_s1 + $0x40] sm:$0xff] }
   0x7   :  { %v82_v25 = vmul.f32 0.125, %v58_v20  ;;  %v104_v33 = vsub.f32 %v80_v12, %v92_v23  ;;  %v93_v35 = vmul.f32 %v69_v26, %v69_v26  ;;  %v84_v41 = vmul.f32 0.125, %v60_v28  ;;  %v50_v54 = vld [vmem:[%s887_s1 + $0x48] sm:$0xff]  ;;  %v61_v60 = vld [vmem:[%s888_s2 + $0x40] sm:$0xff]  ;;  %v52_v62 = vld [vmem:[%s887_s1 + $0x58] sm:$0xff] }
   0x8   :  { %v94_v34 = vmul.f32 %v70_v24, %v70_v24  ;;  %v115_v38 = vmax.f32 %v103_v29, 0.0  ;;  %v113_v39 = vmax.f32 %v101_v30, 0.0  ;;  %142 = vperm.xlu1 %665, %v68_v11   ;;  %v102_v40 = vsub.f32 %v78_v19, %v90_v31  ;;  %132 = vperm.xlu0 %664, %v66_v18   ;;  %v62_v55 = vld [vmem:[%s888_s2 + $0x48] sm:$0xff]  ;;  %v64_v3 = vld [vmem:[%s888_s2 + $0x58] sm:$0xff]  ;;  %v51_v4 = vld [vmem:[%s887_s1 + $0x50] sm:$0xff] }
   0x9   :  { %v116_v42 = vmax.f32 %v104_v33, 0.0  ;;  %v105_v44 = vsub.f32 %v81_v32, %v93_v35  ;;  %v96_v45 = vmul.f32 %v72_v36, %v72_v36  ;;  %v71_v50 = vmul.f32 0.125, %v47_v37  ;;  %v63_v12 = vld [vmem:[%s888_s2 + $0x50] sm:$0xff] }
   0xa   :  { %v106_v43 = vsub.f32 %v82_v25, %v94_v34  ;;  %v199_v47 = vadd.f32 1e-05, %v115_v38  ;;  %v197_v48 = vadd.f32 1e-05, %v113_v39  ;;  %v114_v49 = vmax.f32 %v102_v40, 0.0 }
   0xb   :  { %v117_v52 = vmax.f32 %v105_v44, 0.0  ;;  %v108_v53 = vsub.f32 %v84_v41, %v96_v45  ;;  %v83_v57 = vmul.f32 0.125, %v59_v46  ;;  %v95_v58 = vmul.f32 %v71_v50, %v71_v50 }
   0xc   :  { %v118_v51 = vmax.f32 %v106_v43, 0.0  ;;  %666 = vrsqrt.f32 %v199_v47  ;;  %v198_v56 = vadd.f32 1e-05, %v114_v49  ;;  %152 = vperm.xlu1 %665, %v70_v24   ;;  %147 = vperm.xlu0 %664, %v69_v26   ;;  %v200_v61 = vadd.f32 1e-05, %v116_v42 }
   0xd   :  { %668 = vrsqrt.f32 %v197_v48  ;;  %v107_v0 = vsub.f32 %v83_v57, %v95_v58  ;;  %v74_v1 = vmul.f32 0.125, %v50_v54  ;;  %v86_v2 = vmul.f32 0.125, %v62_v55  ;;  %v643_v57 = vld [vmem:[%s889_s0 + $0x8] sm:$0xff]  }
   0xe   :  { %v202_v63 = vadd.f32 1e-05, %v118_v51  ;;  %670 = vrsqrt.f32 %v198_v56  ;;  %v201_v5 = vadd.f32 1e-05, %v117_v52  ;;  %v73_v6 = vmul.f32 0.125, %v49_v59 }
   0xf   :  { %v85_v7 = vmul.f32 0.125, %v61_v60  ;;  %v120_v8 = vmax.f32 %v108_v53, 0.0  ;;  %v119_v9 = vmax.f32 %v107_v0, 0.0  ;;  %v98_v10 = vmul.f32 %v74_v1, %v74_v1  ;;  %v536_v53 = vld [vmem:[%s889_s0] sm:$0xff]  }
  0x10   :  { %162 = vperm.xlu1 %665, %v72_v36   ;;  %157 = vperm.xlu0 %664, %v71_v50   ;;  %v76_v11 = vmul.f32 0.125, %v52_v62  ;;  %672 = vrsqrt.f32 %v200_v61  ;;  %v97_v13 = vmul.f32 %v73_v6, %v73_v6  ;;  %v88_v14 = vmul.f32 0.125, %v64_v3  ;;  %v560_v61 = vld [vmem:[%s890_s3] sm:$0xff]  }
  0x11   :  { %v75_v15 = vmul.f32 0.125, %v51_v4  ;;  %v110_v16 = vsub.f32 %v86_v2, %v98_v10  ;;  %674 = vrsqrt.f32 %v202_v63  ;;  %v87_v19 = vmul.f32 0.125, %v63_v12 }
  0x12   :  { %v100_v17 = vmul.f32 %v76_v11, %v76_v11  ;;  %v109_v18 = vsub.f32 %v85_v7, %v97_v13  ;;  %676 = vrsqrt.f32 %v201_v5  ;;  %v204_v21 = vadd.f32 1e-05, %v120_v8  ;;  %v648_v8 = vld [vmem:[%s890_s3 + $0x8] sm:$0xff]  }
  0x13   :  { %v99_v20 = vmul.f32 %v75_v15, %v75_v15  ;;  %v203_v22 = vadd.f32 1e-05, %v119_v9  ;;  %v122_v23 = vmax.f32 %v110_v16, 0.0  ;;  %v537_v56 = vunpack.c.l.bf16 %v536_v53 }
  0x14   :  { %172 = vperm.xlu1 %665, %v74_v1   ;;  %167 = vperm.xlu0 %664, %v73_v6   ;;  %v121_v24 = vmax.f32 %v109_v18, 0.0  ;;  %v112_v25 = vsub.f32 %v88_v14, %v100_v17  ;;  %v538_v58 = vunpack.c.h.bf16 %v536_v53  ;;  %v406_v62 = vlaneseq  ;;  %v644_v1 = vld [vmem:[%s889_s0 + $0x10] sm:$0xff]  }
  0x15   :  { %v111_v26 = vsub.f32 %v87_v19, %v99_v20  ;;  %678 = vrsqrt.f32 %v203_v22  ;;  %v206_v30 = vadd.f32 1e-05, %v122_v23  ;;  %v541_v63 = vunpack.c.l.bf16 %v643_v57  ;;  %v649_v22 = vld [vmem:[%s890_s3 + $0x10] sm:$0xff]  }
  0x16   :  { %v205_v27 = vadd.f32 1e-05, %v121_v24  ;;  %680 = vrsqrt.f32 %v204_v21  ;;  %v124_v31 = vmax.f32 %v112_v25, 0.0  ;;  %v561_v2 = vunpack.c.l.bf16 %v560_v61 }
  0x17   :  { %v123_v28 = vmax.f32 %v111_v26, 0.0  ;;  %v542_v3 = vunpack.c.h.bf16 %v643_v57  ;;  %v562_v5 = vunpack.c.h.bf16 %v560_v61  ;;  %v812_v6 = vand.u32 127, %v406_v62 }
  0x18   :  { %182 = vperm.xlu1 %665, %v76_v11   ;;  %177 = vperm.xlu0 %664, %v75_v15   ;;  %682 = vrsqrt.f32 %v205_v27  ;;  %v208_v35 = vadd.f32 1e-05, %v124_v31  ;;  %v546_v11 = vunpack.c.h.bf16 %v644_v1  ;;  %v545_v14 = vunpack.c.l.bf16 %v644_v1  ;;  %v645_v15 = vld [vmem:[%s889_s0 + $0x18] sm:$0xff]   ;;  %v646_v31 = vld [vmem:[%s889_s0 + $0x20] sm:$0xff]  }
  0x19   :  { %v667_v29 = vpop.eup %666  ;;  %v207_v34 = vadd.f32 1e-05, %v123_v28  ;;  %684 = vrsqrt.f32 %v206_v30  ;;  %v565_v17 = vunpack.c.l.bf16 %v648_v8  ;;  %vm410_vm0 = vcmp.lt.s32.totalorder %v812_v6, 8 }
  0x1a   :  { %v669_v32 = vpop.eup %668  ;;  %v566_v20 = vunpack.c.h.bf16 %v648_v8  ;;  %v550_v26 = vunpack.c.h.bf16 %v645_v15  ;;  %v549_v27 = vunpack.c.l.bf16 %v645_v15 }
  0x1b   :  { %v671_v33 = vpop.eup %670  ;;  %686 = vrsqrt.f32 %v207_v34  ;;  %v569_v34 = vunpack.c.l.bf16 %v649_v22 }
  0x1c   :  { %223 = vperm.xlu0 %664, %v669_v32   ;;  %228 = vperm.xlu1 %665, %v671_v33   ;;  %688 = vrsqrt.f32 %v208_v35 }
  0x1d   :  { %v673_v36 = vpop.eup %672 }
  0x1e   :  { %v675_v37 = vpop.eup %674 }
  0x1f   :  { %v677_v38 = vpop.eup %676 }
  0x20   :  { %233 = vperm.xlu0 %664, %v667_v29   ;;  %238 = vperm.xlu1 %665, %v673_v36  }
  0x22   :  { %v679_v39 = vpop.eup %678 }
  0x23   :  { %v681_v40 = vpop.eup %680 }
  0x24   :  { %243 = vperm.xlu0 %664, %v677_v38   ;;  %248 = vperm.xlu1 %665, %v675_v37   ;;  %v570_v38 = vunpack.c.h.bf16 %v649_v22 }
  0x25   :  { %v683_v41 = vpop.eup %682 }
  0x26   :  { %v685_v42 = vpop.eup %684 }
  0x28   :  { %253 = vperm.xlu0 %664, %v679_v39   ;;  %258 = vperm.xlu1 %665, %v681_v40   ;;  %v687_v43 = vpop.eup %686  ;;  %v650_v40 = vld [vmem:[%s890_s3 + $0x18] sm:$0xff]  }
  0x29   :  { %v689_v44 = vpop.eup %688  ;;  %v573_v57 = vunpack.c.l.bf16 %v650_v40 }
  0x2c   :  { %263 = vperm.xlu0 %664, %v683_v41   ;;  %268 = vperm.xlu1 %665, %v685_v42  }
  0x30   :  { %273 = vperm.xlu0 %664, %v687_v43   ;;  %278 = vperm.xlu1 %665, %v689_v44  }
  0x7f   :  { %v138_v45 = vpop.permute.xlu1 %137  ;;  %v128_v46 = vpop.permute.xlu0 %127 }
  0x80   :  { %v185_v0 = vsub.f32 %v537_v56, %v128_v46  ;;  %v187_v13 = vsub.f32 %v541_v63, %v138_v45  ;;  %v554_v45 = vunpack.c.h.bf16 %v646_v31  ;;  %v553_v46 = vunpack.c.l.bf16 %v646_v31 }
  0x83   :  { %v143_v47 = vpop.permute.xlu1 %142  ;;  %v133_v48 = vpop.permute.xlu0 %132 }
  0x84   :  { %v186_v4 = vsub.f32 %v538_v58, %v133_v48  ;;  %v188_v18 = vsub.f32 %v542_v3, %v143_v47 }
  0x87   :  { %v153_v49 = vpop.permute.xlu1 %152  ;;  %v148_v50 = vpop.permute.xlu0 %147 }
  0x88   :  { %v189_v30 = vsub.f32 %v545_v14, %v148_v50  ;;  %v190_v35 = vsub.f32 %v546_v11, %v153_v49  ;;  %v647_v50 = vld [vmem:[%s889_s0 + $0x28] sm:$0xff]  }
  0x8b   :  { %v788_v51 = vpop.permute.xlu1 %162  ;;  %v790_v52 = vpop.permute.xlu0 %157 }
  0x8c   :  { %v191_v49 = vsub.f32 %v549_v27, %v790_v52  ;;  %v192_v58 = vsub.f32 %v550_v26, %v788_v51  ;;  %v574_v52 = vunpack.c.h.bf16 %v650_v40 }
  0x8f   :  { %v795_v54 = vpop.permute.xlu1 %172  ;;  %v797_v55 = vpop.permute.xlu0 %167 }
  0x90   :  { %v193_v51 = vsub.f32 %v553_v46, %v797_v55  ;;  %v652_v55 = vld [vmem:[%s890_s3 + $0x28] sm:$0xff]  }
  0x91   :  { %v581_v26 = vunpack.c.l.bf16 %v652_v55 }
  0x93   :  { %v802_v59 = vpop.permute.xlu1 %182  ;;  %v804_v60 = vpop.permute.xlu0 %177 }
  0x97   :  { %v224_v7 = vpop.permute.xlu0 %223  ;;  %v229_v9 = vpop.permute.xlu1 %228 }
  0x98   :  { %v281_v10 = vmul.f32 %v224_v7, %v185_v0  ;;  %v282_v12 = vmul.f32 %v229_v9, %v186_v4  ;;  %v651_v0 = vld [vmem:[%s890_s3 + $0x20] sm:$0xff]   ;;  %v557_v7 = vunpack.c.l.bf16 %v647_v50 }
  0x9a   :  { %v317_v16 = vadd.f32 %v561_v2, %v281_v10  ;;  %v318_v19 = vadd.f32 %v562_v5, %v282_v12  ;;  %v558_v5 = vunpack.c.h.bf16 %v647_v50  ;;  %v577_v12 = vunpack.c.l.bf16 %v651_v0 }
  0x9b   :  { %v234_v21 = vpop.permute.xlu0 %233  ;;  %v239_v24 = vpop.permute.xlu1 %238 }
  0x9c   :  { %v329_v23 = vmax.f32 %v317_v16, 0.0  ;;  %v283_v25 = vmul.f32 %v234_v21, %v187_v13  ;;  %v330_v28 = vmax.f32 %v318_v19, 0.0  ;;  %v284_v29 = vmul.f32 %v239_v24, %v188_v18 }
  0x9d   :  { %v194_v13 = vsub.f32 %v554_v45, %v795_v54  ;;  %v578_v16 = vunpack.c.h.bf16 %v651_v0  ;;  %v195_v24 = vsub.f32 %v557_v7, %v804_v60  ;;  %v196_v27 = vsub.f32 %v558_v5, %v802_v59 }
  0x9e   :  { %v411_v32 = vsel %vm410_vm0, %v329_v23, 0.0  ;;  %v319_v33 = vadd.f32 %v565_v17, %v283_v25  ;;  %v412_v36 = vsel %vm410_vm0, %v330_v28, 0.0  ;;  %v320_v37 = vadd.f32 %v566_v20, %v284_v29 }
  0x9f   :  { %v244_v39 = vpop.permute.xlu0 %243  ;;  %v616_v41 = vpack.c.bf16 %v412_v36, %v411_v32  ;;  %v249_v43 = vpop.permute.xlu1 %248 }
  0xa0   :  { %v331_v42 = vmax.f32 %v319_v33, 0.0  ;;  %v285_v44 = vmul.f32 %v244_v39, %v189_v30  ;;  %v332_v47 = vmax.f32 %v320_v37, 0.0  ;;  %v286_v48 = vmul.f32 %v249_v43, %v190_v35 }
  0xa1   :  { %617 = vst [vmem:[%s891_s4] sm:$0xff] %v616_v41   ;;  %v582_v30 = vunpack.c.h.bf16 %v652_v55 }
  0xa2   :  { %v413_v53 = vsel %vm410_vm0, %v331_v42, 0.0  ;;  %v321_v56 = vadd.f32 %v569_v34, %v285_v44  ;;  %v414_v61 = vsel %vm410_vm0, %v332_v47, 0.0  ;;  %v322_v62 = vadd.f32 %v570_v38, %v286_v48 }
  0xa3   :  { %v254_v63 = vpop.permute.xlu0 %253  ;;  %v621_v1 = vpack.c.bf16 %v414_v61, %v413_v53  ;;  %v259_v3 = vpop.permute.xlu1 %258 }
  0xa4   :  { %v333_v2 = vmax.f32 %v321_v56, 0.0  ;;  %v287_v4 = vmul.f32 %v254_v63, %v191_v49  ;;  %v334_v8 = vmax.f32 %v322_v62, 0.0  ;;  %v288_v9 = vmul.f32 %v259_v3, %v192_v58 }
  0xa5   :  { %658 = vst [vmem:[%s891_s4 + $0x8] sm:$0xff] %v621_v1  }
  0xa6   :  { %v415_v10 = vsel %vm410_vm0, %v333_v2, 0.0  ;;  %v323_v11 = vadd.f32 %v573_v57, %v287_v4  ;;  %v416_v14 = vsel %vm410_vm0, %v334_v8, 0.0  ;;  %v324_v15 = vadd.f32 %v574_v52, %v288_v9 }
  0xa7   :  { %v264_v17 = vpop.permute.xlu0 %263  ;;  %v626_v18 = vpack.c.bf16 %v416_v14, %v415_v10  ;;  %v269_v20 = vpop.permute.xlu1 %268 }
  0xa8   :  { %v335_v19 = vmax.f32 %v323_v11, 0.0  ;;  %v289_v21 = vmul.f32 %v264_v17, %v193_v51  ;;  %v336_v22 = vmax.f32 %v324_v15, 0.0  ;;  %v290_v23 = vmul.f32 %v269_v20, %v194_v13 }
  0xa9   :  { %659 = vst [vmem:[%s891_s4 + $0x10] sm:$0xff] %v626_v18  }
  0xaa   :  { %v417_v54 = vsel %vm410_vm0, %v335_v19, 0.0  ;;  %v325_v25 = vadd.f32 %v577_v12, %v289_v21  ;;  %v418_v28 = vsel %vm410_vm0, %v336_v22, 0.0  ;;  %v326_v29 = vadd.f32 %v578_v16, %v290_v23 }
  0xab   :  { %v274_v31 = vpop.permute.xlu0 %273  ;;  %v631_v32 = vpack.c.bf16 %v418_v28, %v417_v54  ;;  %v279_v60 = vpop.permute.xlu1 %278 }
  0xac   :  { %v337_v33 = vmax.f32 %v325_v25, 0.0  ;;  %v291_v34 = vmul.f32 %v274_v31, %v195_v24  ;;  %v338_v35 = vmax.f32 %v326_v29, 0.0  ;;  %v292_v36 = vmul.f32 %v279_v60, %v196_v27 }
  0xad   :  { %660 = vst [vmem:[%s891_s4 + $0x18] sm:$0xff] %v631_v32  }
  0xae   :  { %v419_v37 = vsel %vm410_vm0, %v337_v33, 0.0  ;;  %v327_v59 = vadd.f32 %v581_v26, %v291_v34  ;;  %v420_v38 = vsel %vm410_vm0, %v338_v35, 0.0  ;;  %v328_v39 = vadd.f32 %v582_v30, %v292_v36 }
  0xaf   :  { %v636_v40 = vpack.c.bf16 %v420_v38, %v419_v37 }
  0xb0   :  { %v339_v41 = vmax.f32 %v327_v59, 0.0  ;;  %v340_v42 = vmax.f32 %v328_v39, 0.0 }
  0xb1   :  { %661 = vst [vmem:[%s891_s4 + $0x20] sm:$0xff] %v636_v40  }
  0xb2   :  { %v421_v43 = vsel %vm410_vm0, %v339_v41, 0.0  ;;  %v422_v44 = vsel %vm410_vm0, %v340_v42, 0.0 }
  0xb3   :  { %v641_v45 = vpack.c.bf16 %v422_v44, %v421_v43 }
  0xb5   :  { %662 = vst [vmem:[%s891_s4 + $0x28] sm:$0xff] %v641_v45  }

// kernel: _lambda_.69
= control target key start
LH: loop header
LB: loop body
LE: loop exit
PB: predicated region body
PF: predicated region fallthrough
CT: control target
= control target key end

     0   :  { %v450_v1 = vmov 0   ;;  %vm215_vm0 = vcmask 785408   ;;  %s617_s1 = inlined_call_operand.vmem [shape: bf16[96,128], index: 1, kind: input, shape index: {}]   ;;  %s618_s0 = inlined_call_operand.vmem [shape: bf16[128,96], index: 0, kind: input, shape index: {}]   ;;  %s619_s2 = inlined_call_operand.vmem [shape: f32[128,1], index: 2, kind: input, shape index: {}]   ;;  %s620_s3 = inlined_call_operand.vmem [shape: f32[128,128], index: 3, kind: output, shape index: {}]  }
   0x1   :  { %v436_v0 = vld [vmem:[%s617_s1 + $0x28] sm:$0xff]   ;;  %435 = vset.pattern.permute.xlu1 %v450_v1  ;;  %434 = vset.pattern.permute.xlu0 %v450_v1  ;;  %v437_v2 = vld [vmem:[%s617_s1 + $0x20] sm:$0xff]   ;;  %v438_v3 = vld [vmem:[%s617_s1 + $0x18] sm:$0xff]  }
   0x2   :  { %393 = vmatprep.subr.bf16.mxu0 %v436_v0  ;;  %421 = vmatprep.subr.bf16.mxu1 %v436_v0  ;;  %v442_v4 = vld [vmem:[%s618_s0] sm:$0xff]   ;;  %v439_v6 = vld [vmem:[%s617_s1 + $0x10] sm:$0xff]   ;;  %v440_v7 = vld [vmem:[%s617_s1 + $0x8] sm:$0xff]  }
   0x3   :  { %394 = vmatpush3.bf16.msra.mxu0 %v436_v0  ;;  %427 = vmatpush3.bf16.msra.mxu1 %v436_v0  ;;  %v443_v5 = vld [vmem:[%s618_s0 + $0x20] sm:$0xff]   ;;  %v45_v8 = vld [vmem:[%s619_s2 + $0x10] sm:$0xff]  ;;  %v46_v11 = vld [vmem:[%s619_s2 + $0x18] sm:$0xff] }
   0x4   :  { %395 = vmatprep.subr.bf16.mxu0 %v437_v2  ;;  %422 = vmatprep.subr.bf16.mxu1 %v437_v2  ;;  %v43_v9 = vld [vmem:[%s619_s2] sm:$0xff]  ;;  %v44_v12 = vld [vmem:[%s619_s2 + $0x8] sm:$0xff]  ;;  %v446_v17 = vld [vmem:[%s618_s0 + $0x10] sm:$0xff]  }
   0x5   :  { %405 = vmatprep.mubr.msk.bf16.mxu0 %vm215_vm0, %v442_v4  ;;  %413 = vmatprep.mubr.msk.bf16.mxu1 %vm215_vm0, %v443_v5  ;;  %v441_v10 = vld [vmem:[%s617_s1] sm:$0xff]   ;;  %v444_v13 = vld [vmem:[%s618_s0 + $0x8] sm:$0xff]   ;;  %v447_v18 = vld [vmem:[%s618_s0 + $0x30] sm:$0xff]  }
   0x6   :  { %71 = vperm.xlu1 %435, %v45_v8   ;;  %61 = vperm.xlu0 %434, %v43_v9   ;;  %v445_v14 = vld [vmem:[%s618_s0 + $0x28] sm:$0xff]   ;;  %v47_v16 = vld [vmem:[%s619_s2 + $0x20] sm:$0xff]  ;;  %v50_v19 = vld [vmem:[%s619_s2 + $0x38] sm:$0xff] }
   0x7   :  { %396 = vmatpush3.bf16.msra.mxu0 %v437_v2  ;;  %428 = vmatpush3.bf16.msra.mxu1 %v437_v2  ;;  %v48_v15 = vld [vmem:[%s619_s2 + $0x28] sm:$0xff]  ;;  %v49_v20 = vld [vmem:[%s619_s2 + $0x30] sm:$0xff]  ;;  %v448_v21 = vld [vmem:[%s618_s0 + $0x18] sm:$0xff]  }
   0x8   :  { %397 = vmatprep.subr.bf16.mxu0 %v438_v3  ;;  %423 = vmatprep.subr.bf16.mxu1 %v438_v3  ;;  %v449_v22 = vld [vmem:[%s618_s0 + $0x38] sm:$0xff]   ;;  %v52_v23 = vld [vmem:[%s619_s2 + $0x48] sm:$0xff]  ;;  %v51_v24 = vld [vmem:[%s619_s2 + $0x40] sm:$0xff] }
   0x9   :  { %v54_v25 = vld [vmem:[%s619_s2 + $0x58] sm:$0xff]  ;;  %v53_v26 = vld [vmem:[%s619_s2 + $0x50] sm:$0xff]  ;;  %v56_v27 = vld [vmem:[%s619_s2 + $0x68] sm:$0xff] }
   0xa   :  { %76 = vperm.xlu1 %435, %v46_v11   ;;  %66 = vperm.xlu0 %434, %v44_v12   ;;  %v55_v28 = vld [vmem:[%s619_s2 + $0x60] sm:$0xff]  ;;  %v58_v29 = vld [vmem:[%s619_s2 + $0x78] sm:$0xff]  ;;  %v57_v30 = vld [vmem:[%s619_s2 + $0x70] sm:$0xff] }
   0xb   :  { %398 = vmatpush3.bf16.msra.mxu0 %v438_v3  ;;  %429 = vmatpush3.bf16.msra.mxu1 %v438_v3 }
   0xc   :  { %399 = vmatprep.subr.bf16.mxu0 %v439_v6  ;;  %424 = vmatprep.subr.bf16.mxu1 %v439_v6 }
   0xe   :  { %86 = vperm.xlu1 %435, %v48_v15   ;;  %81 = vperm.xlu0 %434, %v47_v16  }
   0xf   :  { %400 = vmatpush3.bf16.msra.mxu0 %v439_v6  ;;  %430 = vmatpush3.bf16.msra.mxu1 %v439_v6 }
  0x10   :  { %401 = vmatprep.subr.bf16.mxu0 %v440_v7  ;;  %425 = vmatprep.subr.bf16.mxu1 %v440_v7 }
  0x12   :  { %96 = vperm.xlu1 %435, %v50_v19   ;;  %91 = vperm.xlu0 %434, %v49_v20  }
  0x13   :  { %402 = vmatpush3.bf16.msra.mxu0 %v440_v7  ;;  %431 = vmatpush3.bf16.msra.mxu1 %v440_v7 }
  0x14   :  { %403 = vmatprep.subr.bf16.mxu0 %v441_v10  ;;  %426 = vmatprep.subr.bf16.mxu1 %v441_v10 }
  0x16   :  { %106 = vperm.xlu1 %435, %v52_v23   ;;  %101 = vperm.xlu0 %434, %v51_v24  }
  0x17   :  { %404 = vmatpush3.bf16.msra.mxu0 %v441_v10  ;;  %432 = vmatpush3.bf16.msra.mxu1 %v441_v10 }
  0x1a   :  { %406 = vmatmul.mubr.msk.bf16.vlgmr.msra.gmra.mxu0 %vm215_vm0, %v444_v13  ;;  %414 = vmatmul.mubr.msk.bf16.vlgmr.msra.gmra.mxu1 %vm215_vm0, %v445_v14 }
  0x1b   :  { %409 = vmatprep.mubr.msk.bf16.mxu0 %vm215_vm0, %v446_v17  ;;  %417 = vmatprep.mubr.msk.bf16.mxu1 %vm215_vm0, %v447_v18 }
  0x1c   :  { %116 = vperm.xlu1 %435, %v54_v25   ;;  %111 = vperm.xlu0 %434, %v53_v26  }
  0x20   :  { %126 = vperm.xlu1 %435, %v56_v27   ;;  %121 = vperm.xlu0 %434, %v55_v28  }
  0x22   :  { %410 = vmatmul.mubr.msk.bf16.gmra.mxu0 %vm215_vm0, %v448_v21  ;;  %418 = vmatmul.mubr.msk.bf16.gmra.mxu1 %vm215_vm0, %v449_v22 }
  0x24   :  { %136 = vperm.xlu1 %435, %v58_v29   ;;  %131 = vperm.xlu0 %434, %v57_v30  }
  0x81   :  { %v62_v31 = vpop.permute.xlu0 %61  ;;  %v72_v32 = vpop.permute.xlu1 %71 }
  0x85   :  { %v67_v33 = vpop.permute.xlu0 %66  ;;  %v77_v34 = vpop.permute.xlu1 %76 }
  0x89   :  { %v82_v35 = vpop.permute.xlu0 %81  ;;  %v87_v36 = vpop.permute.xlu1 %86 }
  0x8d   :  { %v92_v37 = vpop.permute.xlu0 %91  ;;  %v97_v38 = vpop.permute.xlu1 %96 }
  0x91   :  { %v102_v39 = vpop.permute.xlu0 %101  ;;  %v107_v40 = vpop.permute.xlu1 %106 }
  0x97   :  { %v112_v41 = vpop.permute.xlu0 %111  ;;  %v117_v42 = vpop.permute.xlu1 %116 }
  0x9b   :  { %v122_v45 = vpop.permute.xlu0 %121  ;;  %v127_v54 = vpop.permute.xlu1 %126 }
  0x9f   :  { %v132_v59 = vpop.permute.xlu0 %131  ;;  %v137_v4 = vpop.permute.xlu1 %136 }
  0xda   :  { %v407_v43 = vpop.f32.mrf.mxu0  ;;  %v415_v44 = vpop.f32.mrf.mxu1 }
  0xdb   :  { %v283_v46 = vadd.f32 %v407_v43, %v72_v32  ;;  %v315_v47 = vadd.f32 %v415_v44, %v112_v41 }
  0xdc   :  { %v274_v48 = vpop.f32.mrf.mxu0  ;;  %v306_v49 = vpop.f32.mrf.mxu1 }
  0xdd   :  { %339 = vst [vmem:[%s620_s3 + $0x10] sm:$0xff] %v283_v46  ;;  %347 = vst [vmem:[%s620_s3 + $0x50] sm:$0xff] %v315_v47  ;;  %v275_v50 = vadd.f32 %v274_v48, %v62_v31  ;;  %v307_v51 = vadd.f32 %v306_v49, %v102_v39 }
  0xde   :  { %v408_v52 = vpop.f32.mrf.mxu0  ;;  %v416_v53 = vpop.f32.mrf.mxu1 }
  0xdf   :  { %337 = vst [vmem:[%s620_s3] sm:$0xff] %v275_v50  ;;  %345 = vst [vmem:[%s620_s3 + $0x40] sm:$0xff] %v307_v51  ;;  %v286_v55 = vadd.f32 %v408_v52, %v77_v34  ;;  %v318_v56 = vadd.f32 %v416_v53, %v117_v42 }
  0xe0   :  { %v277_v57 = vpop.f32.mrf.mxu0  ;;  %v309_v58 = vpop.f32.mrf.mxu1 }
  0xe1   :  { %340 = vst [vmem:[%s620_s3 + $0x18] sm:$0xff] %v286_v55  ;;  %348 = vst [vmem:[%s620_s3 + $0x58] sm:$0xff] %v318_v56  ;;  %v278_v60 = vadd.f32 %v277_v57, %v67_v33  ;;  %v310_v61 = vadd.f32 %v309_v58, %v107_v40 }
  0xe2   :  { %v411_v62 = vpop.f32.mrf.mxu0  ;;  %v419_v63 = vpop.f32.mrf.mxu1 }
  0xe3   :  { %338 = vst [vmem:[%s620_s3 + $0x8] sm:$0xff] %v278_v60  ;;  %346 = vst [vmem:[%s620_s3 + $0x48] sm:$0xff] %v310_v61  ;;  %v299_v0 = vadd.f32 %v411_v62, %v92_v37  ;;  %v331_v1 = vadd.f32 %v419_v63, %v132_v59 }
  0xe4   :  { %v290_v2 = vpop.f32.mrf.mxu0  ;;  %v322_v3 = vpop.f32.mrf.mxu1 }
  0xe5   :  { %343 = vst [vmem:[%s620_s3 + $0x30] sm:$0xff] %v299_v0  ;;  %351 = vst [vmem:[%s620_s3 + $0x70] sm:$0xff] %v331_v1  ;;  %v291_v5 = vadd.f32 %v290_v2, %v82_v35  ;;  %v323_v6 = vadd.f32 %v322_v3, %v122_v45 }
  0xe6   :  { %v412_v7 = vpop.f32.mrf.mxu0  ;;  %v420_v8 = vpop.f32.mrf.mxu1 }
  0xe7   :  { %341 = vst [vmem:[%s620_s3 + $0x20] sm:$0xff] %v291_v5  ;;  %349 = vst [vmem:[%s620_s3 + $0x60] sm:$0xff] %v323_v6  ;;  %v302_v9 = vadd.f32 %v412_v7, %v97_v38  ;;  %v334_v10 = vadd.f32 %v420_v8, %v137_v4 }
  0xe8   :  { %v293_v11 = vpop.f32.mrf.mxu0  ;;  %v325_v12 = vpop.f32.mrf.mxu1 }
  0xe9   :  { %344 = vst [vmem:[%s620_s3 + $0x38] sm:$0xff] %v302_v9  ;;  %352 = vst [vmem:[%s620_s3 + $0x78] sm:$0xff] %v334_v10  ;;  %v294_v13 = vadd.f32 %v293_v11, %v87_v36  ;;  %v326_v14 = vadd.f32 %v325_v12, %v127_v54 }
  0xeb   :  { %342 = vst [vmem:[%s620_s3 + $0x28] sm:$0xff] %v294_v13  ;;  %350 = vst [vmem:[%s620_s3 + $0x68] sm:$0xff] %v326_v14 }

</bundles_post_ra>
